<compile_context>
chip_gen: v5e
topology: v5e:2x2
jax: 0.10.0
libtpu: 0.0.40
codegen_flags: <defaults>
</compile_context>

<pallas_src>
import functools

import numpy as np
import jax
import jax.numpy as jnp
from jax.experimental import pallas as pl
from jax.experimental.pallas import tpu as pltpu


# PyTorch Sequential (input_nc=3):
#   Conv(3->64,k4,s2,p1) LReLU | Conv(64->128,k4,s2,p1) IN LReLU |
#   Conv(128->256,k4,s2,p1) IN LReLU | Conv(256->512,k4,s1,p1) IN LReLU |
#   Conv(512->1,k4,s1,p1) ; global avg pool.
# cin_pad/cout_pad: zero-padded channel counts used on device (exact padding:
# padded in-channels meet zero weights, padded out-channels stay zero).
_LAYER_CFG = [
    dict(cin=3,   cout=64,  cin_pad=32,  cout_pad=128, stride=2, norm=False, lrelu=True,  pool=False),
    dict(cin=64,  cout=128, cin_pad=128, cout_pad=128, stride=2, norm=True,  lrelu=True,  pool=False),
    dict(cin=128, cout=256, cin_pad=128, cout_pad=256, stride=2, norm=True,  lrelu=True,  pool=False),
    dict(cin=256, cout=512, cin_pad=256, cout_pad=512, stride=1, norm=True,  lrelu=True,  pool=False),
    dict(cin=512, cout=1,   cin_pad=512, cout_pad=1,   stride=1, norm=False, lrelu=False, pool=True),
]


def _device_kind():
    try:
        return jax.devices()[0].device_kind.lower()
    except Exception:  # pragma: no cover
        return ""


def _max_ct():
    # 256-wide Cout tiles fill the 2x256x256 MXU on v6e/v7x; 128 elsewhere.
    kind = _device_kind()
    return 256 if ("v6" in kind or "v7" in kind) else 128


def _vmem_cap_bytes():
    # v7x has 64 MiB physical VMEM per TensorCore; leave headroom there.
    return (56 if "v7" in _device_kind() else 100) * (1 << 20)


# ----------------------------------------------------------------------------
# Pallas kernel: one fused conv layer step = one MXU matmul + f32 epilogue.
# Grid = (batch, Cout-tile); the im2col scratch is built only at cout-tile 0
# and reused for the remaining tiles of the same batch element.
# ----------------------------------------------------------------------------
def _conv_kernel(x_ref, w_ref, b_ref, m_ref, o_ref, col_ref, *,
                 offs, M, rows_out, n_valid, do_norm, do_lrelu):
    cin = x_ref.shape[-1]
    ct = o_ref.shape[-1]

    @pl.when(pl.program_id(1) == 0)
    def _build_im2col():
        for s, off in enumerate(offs):
            # Reshape-free shifted row-slice copy of the flattened padded
            # image; destination lane slab starts at a multiple of 128.
            col_ref[:, s * cin:(s + 1) * cin] = x_ref[0, off:off + M, :]

    # Single bf16 x bf16 -> f32 matmul, contraction dim = K*K*Cin
    # (accumulation happens on the MXU, not on the VPU).
    y = jnp.dot(col_ref[...], w_ref[...], preferred_element_type=jnp.float32)
    y = y + b_ref[...]                                      # (M, ct) f32

    if do_norm:
        # InstanceNorm2d: per-sample/per-channel, biased var, eps=1e-5, no
        # affine.  Rows whose flat index wraps past the valid output width
        # are conv "wrap" garbage -> masked out of the two-pass statistics.
        vb = m_ref[...] > 0.0                               # (M, 1)
        inv_p = 1.0 / float(n_valid)
        mean = jnp.sum(jnp.where(vb, y, 0.0), axis=0, keepdims=True) * inv_p
        d = jnp.where(vb, y - mean, 0.0)
        var = jnp.sum(d * d, axis=0, keepdims=True) * inv_p
        y = (y - mean) * jax.lax.rsqrt(var + 1e-5)

    if do_lrelu:
        y = jnp.where(y >= 0.0, y, 0.2 * y)                 # LeakyReLU(0.2)

    o_ref[0, 0:M, :] = y.astype(o_ref.dtype)
    tail = rows_out - M                                     # ksize-1 dead rows
    if tail > 0:
        o_ref[0, M:rows_out, :] = jnp.zeros((tail, ct), o_ref.dtype)


def _conv_layer(xf, w_flat, bias, *, ksize, Hp, Wp, do_norm, do_lrelu):
    B, HWp, Cin = xf.shape
    Kc, Cout = w_flat.shape
    nshift = ksize * ksize
    assert HWp == Hp * Wp and Kc == nshift * Cin and Cout % 128 == 0
    Ho, Wo = Hp - ksize + 1, Wp - ksize + 1
    M = (Ho - 1) * Wp + Wo            # rows of the flat (padded-width) output
    rows_out = Ho * Wp
    ct = min(Cout, _max_ct())
    n_co = Cout // ct
    offs = tuple(kh * Wp + kw for kh in range(ksize) for kw in range(ksize))

    # rows with (flat index mod Wp) >= Wo are wrap garbage -> mask value 0.
    mask = jnp.asarray(
        ((np.arange(M).reshape(M, 1) % Wp) < Wo).astype(np.float32))

    kernel = functools.partial(
        _conv_kernel, offs=offs, M=M, rows_out=rows_out, n_valid=Ho * Wo,
        do_norm=do_norm, do_lrelu=do_lrelu)

    # Layer-aware VMEM budget: double-buffered blocks + scratch + f32 temps.
    est = (2 * Hp * Wp * Cin * 2 + 2 * Kc * ct * 2 + 2 * rows_out * ct * 2
           + M * Kc * 2 + 4 * M * ct * 4)
    vmem_limit = int(min(max(2 * est, 32 << 20), _vmem_cap_bytes()))

    return pl.pallas_call(
        kernel,
        out_shape=jax.ShapeDtypeStruct((B, rows_out, Cout), jnp.bfloat16),
        grid=(B, n_co),
        in_specs=[
            # flattened padded image of one sample; resident across Cout tiles
            pl.BlockSpec((1, HWp, Cin), lambda b, c: (b, 0, 0)),
            # packed weights (K*K*Cin, CT) for this Cout tile
            pl.BlockSpec((Kc, ct), lambda b, c: (0, c)),
            # bias tile
            pl.BlockSpec((1, ct), lambda b, c: (0, c)),
            # valid-row mask (tiny, constant)
            pl.BlockSpec((M, 1), lambda b, c: (0, 0)),
        ],
        out_specs=pl.BlockSpec((1, rows_out, ct), lambda b, c: (b, 0, c)),
        scratch_shapes=[pltpu.VMEM((M, Kc), jnp.bfloat16)],
        compiler_params=pltpu.CompilerParams(
            dimension_semantics=("parallel", "arbitrary"),
            vmem_limit_bytes=vmem_limit,
        ),
    )(xf, w_flat, bias, mask)


# ----------------------------------------------------------------------------
# Wrapper-side layout prep (pure reshuffles / zero padding; no heavy compute).
# ----------------------------------------------------------------------------
def _prep_input(x, stride):
    # x: (B, H, W, C) bf16 -> conv padding of 1; stride-2 layers additionally
    # get space-to-depth so the conv becomes a stride-1 2x2 conv.
    x = jnp.pad(x, ((0, 0), (1, 1), (1, 1), (0, 0)))
    if stride == 2:
        B, Hp, Wp, C = x.shape
        x = x.reshape(B, Hp // 2, 2, Wp // 2, 2, C)
        x = x.transpose(0, 1, 3, 2, 4, 5).reshape(B, Hp // 2, Wp // 2, 4 * C)
    return x


def pack_params(params):
    """One-time weight repack: channel pad, stride-2 s2d repack, bf16, flatten."""
    packed = []
    for cfg, (w, b) in zip(_LAYER_CFG[:4], params[:4]):
        cin_pad, cout_pad, stride = cfg["cin_pad"], cfg["cout_pad"], cfg["stride"]
        _, _, cin, cout = w.shape
        w = jnp.pad(w, ((0, 0), (0, 0), (0, cin_pad - cin), (0, cout_pad - cout)))
        b = jnp.pad(b, (0, cout_pad - cout)).reshape(1, cout_pad).astype(jnp.float32)
        if stride == 2:
            # stride-1 2x2 kernel over the space-to-depth input:
            # w2[(a*2+b'), (p*2+q)*cin + c, co] = w[2a+p, 2b'+q, c, co]
            w = w.reshape(2, 2, 2, 2, cin_pad, cout_pad)   # (a, p, b', q, ci, co)
            w = w.transpose(0, 2, 1, 3, 4, 5)              # (a, b', p, q, ci, co)
            w = w.reshape(4 * 4 * cin_pad, cout_pad)       # (Kc, Cout)
        else:
            w = w.reshape(16 * cin_pad, cout_pad)          # shift s = kh*4 + kw
        packed.append((w.astype(jnp.bfloat16), b))
    w5, b5 = params[4]
    packed.append((jnp.asarray(w5, jnp.float32), jnp.asarray(b5, jnp.float32)))
    return packed


def init_params(key, input_nc=3):
    assert input_nc == _LAYER_CFG[0]["cin"]
    params = []
    for idx, cfg in enumerate(_LAYER_CFG):
        kw_, kb_ = jax.random.split(jax.random.fold_in(key, idx))
        w = jax.random.normal(kw_, (4, 4, cfg["cin"], cfg["cout"]),
                              jnp.float32) * 0.05
        b = jax.random.normal(kb_, (cfg["cout"],), jnp.float32) * 0.01
        params.append((w, b))
    return params


def _final_layer(x, w5, b5):
    # Conv(512->1, k4, s1, p1) + global average pool.  The mean over output
    # positions commutes with the (linear) conv, so this collapses to 16
    # shifted spatial means and one (B, 16*512) @ (16*512, 1) dot -> (B, 1).
    B, H, W, C = x.shape
    xp = jnp.pad(x.astype(jnp.float32), ((0, 0), (1, 1), (1, 1), (0, 0)))
    Ho, Wo = H - 1, W - 1
    means = []
    for kh in range(4):
        for kw in range(4):
            means.append(jnp.mean(xp[:, kh:kh + Ho, kw:kw + Wo, :], axis=(1, 2)))
    ms = jnp.concatenate(means, axis=-1)                     # (B, 16*C)
    wf = w5.astype(jnp.float32).reshape(16 * C, 1)
    return ms @ wf + b5.reshape(1, 1)                        # (B, 1)


def discriminator_forward(x_nchw, packed):
    x = jnp.transpose(x_nchw, (0, 2, 3, 1))                  # NCHW -> NHWC
    B, H, W, C = x.shape
    assert H % 8 == 0 and W % 8 == 0 and H >= 24 and W >= 24
    # pad input channels (3 -> 32) so the layer-1 s2d contraction is 128-wide
    x = jnp.pad(x, ((0, 0), (0, 0), (0, 0), (0, _LAYER_CFG[0]["cin_pad"] - C)))
    x = x.astype(jnp.bfloat16)
    for cfg, (w_flat, bias) in zip(_LAYER_CFG[:4], packed[:4]):
        xp = _prep_input(x, cfg["stride"])
        _, Hp, Wp, Cin = xp.shape
        ksize = 2 if cfg["stride"] == 2 else 4
        Ho, Wo = Hp - ksize + 1, Wp - ksize + 1
        yf = _conv_layer(xp.reshape(B, Hp * Wp, Cin), w_flat, bias,
                         ksize=ksize, Hp=Hp, Wp=Wp,
                         do_norm=cfg["norm"], do_lrelu=cfg["lrelu"])
        # drop the Wp-Wo conv "wrap" columns; the next layer re-pads anyway
        x = yf.reshape(B, Ho, Wp, cfg["cout_pad"])[:, :, :Wo, :]
    w5, b5 = packed[4]
    return _final_layer(x[..., :_LAYER_CFG[4]["cin"]], w5, b5)


# ----------------------------------------------------------------------------
# Pure-JAX reference with identical bf16 quantization points (for checking).
# ----------------------------------------------------------------------------
def reference_forward(x_nchw, params):
    x = jnp.transpose(x_nchw, (0, 2, 3, 1)).astype(jnp.bfloat16)
    for cfg, (w, b) in zip(_LAYER_CFG, params):
        y = jax.lax.conv_general_dilated(
            x, w.astype(jnp.bfloat16),
            window_strides=(cfg["stride"], cfg["stride"]),
            padding=((1, 1), (1, 1)),
            dimension_numbers=("NHWC", "HWIO", "NHWC"),
            preferred_element_type=jnp.float32)
        y = y + b.reshape(1, 1, 1, -1)
        if cfg["norm"]:
            m = jnp.mean(y, axis=(1, 2), keepdims=True)
            v = jnp.mean(jnp.square(y - m), axis=(1, 2), keepdims=True)
            y = (y - m) * jax.lax.rsqrt(v + 1e-5)
        if cfg["lrelu"]:
            y = jnp.where(y >= 0.0, y, 0.2 * y)
        if cfg["pool"]:
            return jnp.mean(y, axis=(1, 2))                  # (B, 1)
        x = y.astype(jnp.bfloat16)
    raise AssertionError("unreachable")


if __name__ == "__main__":
    key = jax.random.PRNGKey(0)
    params = init_params(key, input_nc=3)
    packed = pack_params(params)          # one-time weight repack (hoisted)

    # Input (PyTorch NCHW). 32x32 keeps shapes small; final conv map is 2x2.
    x = jax.random.normal(jax.random.fold_in(key, 100), (2, 3, 32, 32),
                          jnp.float32)

    fwd = jax.jit(discriminator_forward)
    out = jax.block_until_ready(fwd(x, packed))
    ref = jax.block_until_ready(jax.jit(reference_forward)(x, params))

    assert out.shape == (2, 1), out.shape
    rel_err = float(jnp.max(jnp.abs(out - ref)) /
                    (jnp.max(jnp.abs(ref)) + 1e-6))
    assert rel_err < 2e-2, f"mismatch vs reference: rel err = {rel_err}"
    print("KERNEL_OK")
</pallas_src>

<mosaic_0001>
module attributes {stable_mosaic.version = 11 : i64} {
  func.func @_conv_kernel(%arg0: i32, %arg1: i32, %arg2: memref<1x289x128xbf16, #tpu.memory_space<vmem>>, %arg3: memref<512x128xbf16, #tpu.memory_space<vmem>>, %arg4: memref<1x128xf32, #tpu.memory_space<vmem>>, %arg5: memref<271x1xf32, #tpu.memory_space<vmem>>, %arg6: memref<1x272x128xbf16, #tpu.memory_space<vmem>>, %arg7: memref<271x512xbf16, #tpu.memory_space<vmem>>) attributes {dimension_semantics = [#tpu.dimension_semantics<parallel>, #tpu.dimension_semantics<arbitrary>], iteration_bounds = array<i64: 2, 1>, scalar_prefetch = 0 : i64, scratch_operands = 1 : i64, tpu.core_type = #tpu.core_type<tc>, window_params = [{transform_indices = @transform_0, window_bounds = array<i64: 1, 289, 128>}, {transform_indices = @transform_1, window_bounds = array<i64: 512, 128>}, {transform_indices = @transform_2, window_bounds = array<i64: 1, 128>}, {pipeline_mode = #tpu.pipeline_mode<synchronous>, transform_indices = @transform_3, window_bounds = array<i64: 271, 1>}, {transform_indices = @transform_4, window_bounds = array<i64: 1, 272, 128>}]} {
    %c0_i32 = arith.constant 0 : i32
    %0 = arith.cmpi eq, %arg1, %c0_i32 : i32
    %1 = arith.extui %0 : i1 to i32
    %c0_i32_0 = arith.constant 0 : i32
    %2 = arith.cmpi ne, %1, %c0_i32_0 : i32
    scf.if %2 {
      %c0_14 = arith.constant 0 : index
      %c0_15 = arith.constant 0 : index
      %c0_16 = arith.constant 0 : index
      %22 = vector.load %arg2[%c0_14, %c0_15, %c0_16] : memref<1x289x128xbf16, #tpu.memory_space<vmem>>, vector<1x271x128xbf16>
      %23 = vector.shape_cast %22 : vector<1x271x128xbf16> to vector<271x128xbf16>
      %c0_17 = arith.constant 0 : index
      %c0_18 = arith.constant 0 : index
      %24 = vector.load %arg7[%c0_17, %c0_18] : memref<271x512xbf16, #tpu.memory_space<vmem>>, vector<271x128xbf16>
      tpu.vector_store %arg7[%c0_17, %c0_18], %23 {strides = array<i32>} : memref<271x512xbf16, #tpu.memory_space<vmem>>, vector<271x128xbf16>,
      %c0_19 = arith.constant 0 : index
      %c1 = arith.constant 1 : index
      %c0_20 = arith.constant 0 : index
      %25 = vector.load %arg2[%c0_19, %c1, %c0_20] : memref<1x289x128xbf16, #tpu.memory_space<vmem>>, vector<1x271x128xbf16>
      %26 = vector.shape_cast %25 : vector<1x271x128xbf16> to vector<271x128xbf16>
      %c0_21 = arith.constant 0 : index
      %c128 = arith.constant 128 : index
      %27 = vector.load %arg7[%c0_21, %c128] : memref<271x512xbf16, #tpu.memory_space<vmem>>, vector<271x128xbf16>
      tpu.vector_store %arg7[%c0_21, %c128], %26 {strides = array<i32>} : memref<271x512xbf16, #tpu.memory_space<vmem>>, vector<271x128xbf16>,
      %c0_22 = arith.constant 0 : index
      %c17 = arith.constant 17 : index
      %c0_23 = arith.constant 0 : index
      %28 = vector.load %arg2[%c0_22, %c17, %c0_23] : memref<1x289x128xbf16, #tpu.memory_space<vmem>>, vector<1x271x128xbf16>
      %29 = vector.shape_cast %28 : vector<1x271x128xbf16> to vector<271x128xbf16>
      %c0_24 = arith.constant 0 : index
      %c256 = arith.constant 256 : index
      %30 = vector.load %arg7[%c0_24, %c256] : memref<271x512xbf16, #tpu.memory_space<vmem>>, vector<271x128xbf16>
      tpu.vector_store %arg7[%c0_24, %c256], %29 {strides = array<i32>} : memref<271x512xbf16, #tpu.memory_space<vmem>>, vector<271x128xbf16>,
      %c0_25 = arith.constant 0 : index
      %c18 = arith.constant 18 : index
      %c0_26 = arith.constant 0 : index
      %31 = vector.load %arg2[%c0_25, %c18, %c0_26] : memref<1x289x128xbf16, #tpu.memory_space<vmem>>, vector<1x271x128xbf16>
      %32 = vector.shape_cast %31 : vector<1x271x128xbf16> to vector<271x128xbf16>
      %c0_27 = arith.constant 0 : index
      %c384 = arith.constant 384 : index
      %33 = vector.load %arg7[%c0_27, %c384] : memref<271x512xbf16, #tpu.memory_space<vmem>>, vector<271x128xbf16>
      tpu.vector_store %arg7[%c0_27, %c384], %32 {strides = array<i32>} : memref<271x512xbf16, #tpu.memory_space<vmem>>, vector<271x128xbf16>,
    } else {
    }
    %c0 = arith.constant 0 : index
    %c0_1 = arith.constant 0 : index
    %3 = vector.load %arg7[%c0, %c0_1] : memref<271x512xbf16, #tpu.memory_space<vmem>>, vector<271x512xbf16>
    %c0_2 = arith.constant 0 : index
    %c0_3 = arith.constant 0 : index
    %4 = vector.load %arg3[%c0_2, %c0_3] : memref<512x128xbf16, #tpu.memory_space<vmem>>, vector<512x128xbf16>
    %cst = arith.constant dense<0.000000e+00> : vector<271x128xf32>
    %5 = tpu.matmul %3, %4, %cst {dimension_numbers = #tpu.dot_dimension_numbers<[1], [0], [0], [1], [0, 0, 1, 1], [], []>} : vector<271x512xbf16>, vector<512x128xbf16>, vector<271x128xf32> -> vector<271x128xf32>
    %c0_4 = arith.constant 0 : index
    %c0_5 = arith.constant 0 : index
    %6 = vector.load %arg4[%c0_4, %c0_5] : memref<1x128xf32, #tpu.memory_space<vmem>>, vector<1x128xf32>
    %7 = vector.broadcast %6 : vector<1x128xf32> to vector<271x128xf32>
    %8 = arith.addf %5, %7 : vector<271x128xf32>
    %cst_6 = arith.constant 0.000000e+00 : f32
    %9 = vector.broadcast %cst_6 : f32 to vector<271x128xf32>
    %10 = arith.cmpf oge, %8, %9 : vector<271x128xf32>
    %cst_7 = arith.constant 2.000000e-01 : f32
    %11 = vector.broadcast %cst_7 : f32 to vector<271x128xf32>
    %12 = arith.mulf %11, %8 : vector<271x128xf32>
    %13 = arith.select %10, %8, %12 : vector<271x128xi1>, vector<271x128xf32>
    %14 = arith.truncf %13 : vector<271x128xf32> to vector<271x128xbf16>
    %c0_8 = arith.constant 0 : index
    %c0_9 = arith.constant 0 : index
    %c0_10 = arith.constant 0 : index
    %15 = vector.load %arg6[%c0_8, %c0_9, %c0_10] : memref<1x272x128xbf16, #tpu.memory_space<vmem>>, vector<1x271x128xbf16>
    %16 = vector.shape_cast %15 : vector<1x271x128xbf16> to vector<271x128xbf16>
    %17 = vector.shape_cast %14 : vector<271x128xbf16> to vector<1x271x128xbf16>
    tpu.vector_store %arg6[%c0_8, %c0_9, %c0_10], %17 {strides = array<i32>} : memref<1x272x128xbf16, #tpu.memory_space<vmem>>, vector<1x271x128xbf16>,
    %cst_11 = arith.constant 0.000000e+00 : bf16
    %18 = vector.broadcast %cst_11 : bf16 to vector<1x128xbf16>
    %c0_12 = arith.constant 0 : index
    %c271 = arith.constant 271 : index
    %c0_13 = arith.constant 0 : index
    %19 = vector.load %arg6[%c0_12, %c271, %c0_13] : memref<1x272x128xbf16, #tpu.memory_space<vmem>>, vector<1x1x128xbf16>
    %20 = vector.shape_cast %19 : vector<1x1x128xbf16> to vector<1x128xbf16>
    %21 = vector.shape_cast %18 : vector<1x128xbf16> to vector<1x1x128xbf16>
    tpu.vector_store %arg6[%c0_12, %c271, %c0_13], %21 {strides = array<i32>} : memref<1x272x128xbf16, #tpu.memory_space<vmem>>, vector<1x1x128xbf16>,
    return
  }
  func.func @transform_0(%arg0: i32, %arg1: i32) -> (i32, i32, i32) {
    %c0_i32 = arith.constant 0 : i32
    %c0_i32_0 = arith.constant 0 : i32
    %c0_i32_1 = arith.constant 0 : i32
    return %arg0, %c0_i32, %c0_i32_0 : i32, i32, i32
  }
  func.func @transform_1(%arg0: i32, %arg1: i32) -> (i32, i32) {
    %c0_i32 = arith.constant 0 : i32
    %c0_i32_0 = arith.constant 0 : i32
    return %c0_i32, %arg1 : i32, i32
  }
  func.func @transform_2(%arg0: i32, %arg1: i32) -> (i32, i32) {
    %c0_i32 = arith.constant 0 : i32
    %c0_i32_0 = arith.constant 0 : i32
    return %c0_i32, %arg1 : i32, i32
  }
  func.func @transform_3(%arg0: i32, %arg1: i32) -> (i32, i32) {
    %c0_i32 = arith.constant 0 : i32
    %c0_i32_0 = arith.constant 0 : i32
    %c0_i32_1 = arith.constant 0 : i32
    return %c0_i32, %c0_i32_0 : i32, i32
  }
  func.func @transform_4(%arg0: i32, %arg1: i32) -> (i32, i32, i32) {
    %c0_i32 = arith.constant 0 : i32
    %c0_i32_0 = arith.constant 0 : i32
    return %arg0, %c0_i32, %arg1 : i32, i32, i32
  }
}

module attributes {stable_mosaic.version = 11 : i64} {
  func.func @_conv_kernel(%arg0: i32, %arg1: i32, %arg2: memref<1x81x512xbf16, #tpu.memory_space<vmem>>, %arg3: memref<2048x128xbf16, #tpu.memory_space<vmem>>, %arg4: memref<1x128xf32, #tpu.memory_space<vmem>>, %arg5: memref<71x1xf32, #tpu.memory_space<vmem>>, %arg6: memref<1x72x128xbf16, #tpu.memory_space<vmem>>, %arg7: memref<71x2048xbf16, #tpu.memory_space<vmem>>) attributes {dimension_semantics = [#tpu.dimension_semantics<parallel>, #tpu.dimension_semantics<arbitrary>], iteration_bounds = array<i64: 2, 1>, scalar_prefetch = 0 : i64, scratch_operands = 1 : i64, tpu.core_type = #tpu.core_type<tc>, window_params = [{transform_indices = @transform_0, window_bounds = array<i64: 1, 81, 512>}, {transform_indices = @transform_1, window_bounds = array<i64: 2048, 128>}, {transform_indices = @transform_2, window_bounds = array<i64: 1, 128>}, {pipeline_mode = #tpu.pipeline_mode<synchronous>, transform_indices = @transform_3, window_bounds = array<i64: 71, 1>}, {transform_indices = @transform_4, window_bounds = array<i64: 1, 72, 128>}]} {
    %c0_i32 = arith.constant 0 : i32
    %0 = arith.cmpi eq, %arg1, %c0_i32 : i32
    %1 = arith.extui %0 : i1 to i32
    %c0_i32_0 = arith.constant 0 : i32
    %2 = arith.cmpi ne, %1, %c0_i32_0 : i32
    scf.if %2 {
      %c0_24 = arith.constant 0 : index
      %c0_25 = arith.constant 0 : index
      %c0_26 = arith.constant 0 : index
      %51 = vector.load %arg2[%c0_24, %c0_25, %c0_26] : memref<1x81x512xbf16, #tpu.memory_space<vmem>>, vector<1x71x512xbf16>
      %52 = vector.shape_cast %51 : vector<1x71x512xbf16> to vector<71x512xbf16>
      %c0_27 = arith.constant 0 : index
      %c0_28 = arith.constant 0 : index
      %53 = vector.load %arg7[%c0_27, %c0_28] : memref<71x2048xbf16, #tpu.memory_space<vmem>>, vector<71x512xbf16>
      tpu.vector_store %arg7[%c0_27, %c0_28], %52 {strides = array<i32>} : memref<71x2048xbf16, #tpu.memory_space<vmem>>, vector<71x512xbf16>,
      %c0_29 = arith.constant 0 : index
      %c1 = arith.constant 1 : index
      %c0_30 = arith.constant 0 : index
      %54 = vector.load %arg2[%c0_29, %c1, %c0_30] : memref<1x81x512xbf16, #tpu.memory_space<vmem>>, vector<1x71x512xbf16>
      %55 = vector.shape_cast %54 : vector<1x71x512xbf16> to vector<71x512xbf16>
      %c0_31 = arith.constant 0 : index
      %c512 = arith.constant 512 : index
      %56 = vector.load %arg7[%c0_31, %c512] : memref<71x2048xbf16, #tpu.memory_space<vmem>>, vector<71x512xbf16>
      tpu.vector_store %arg7[%c0_31, %c512], %55 {strides = array<i32>} : memref<71x2048xbf16, #tpu.memory_space<vmem>>, vector<71x512xbf16>,
      %c0_32 = arith.constant 0 : index
      %c9 = arith.constant 9 : index
      %c0_33 = arith.constant 0 : index
      %57 = vector.load %arg2[%c0_32, %c9, %c0_33] : memref<1x81x512xbf16, #tpu.memory_space<vmem>>, vector<1x71x512xbf16>
      %58 = vector.shape_cast %57 : vector<1x71x512xbf16> to vector<71x512xbf16>
      %c0_34 = arith.constant 0 : index
      %c1024 = arith.constant 1024 : index
      %59 = vector.load %arg7[%c0_34, %c1024] : memref<71x2048xbf16, #tpu.memory_space<vmem>>, vector<71x512xbf16>
      tpu.vector_store %arg7[%c0_34, %c1024], %58 {strides = array<i32>} : memref<71x2048xbf16, #tpu.memory_space<vmem>>, vector<71x512xbf16>,
      %c0_35 = arith.constant 0 : index
      %c10 = arith.constant 10 : index
      %c0_36 = arith.constant 0 : index
      %60 = vector.load %arg2[%c0_35, %c10, %c0_36] : memref<1x81x512xbf16, #tpu.memory_space<vmem>>, vector<1x71x512xbf16>
      %61 = vector.shape_cast %60 : vector<1x71x512xbf16> to vector<71x512xbf16>
      %c0_37 = arith.constant 0 : index
      %c1536 = arith.constant 1536 : index
      %62 = vector.load %arg7[%c0_37, %c1536] : memref<71x2048xbf16, #tpu.memory_space<vmem>>, vector<71x512xbf16>
      tpu.vector_store %arg7[%c0_37, %c1536], %61 {strides = array<i32>} : memref<71x2048xbf16, #tpu.memory_space<vmem>>, vector<71x512xbf16>,
    } else {
    }
    %c0 = arith.constant 0 : index
    %c0_1 = arith.constant 0 : index
    %3 = vector.load %arg7[%c0, %c0_1] : memref<71x2048xbf16, #tpu.memory_space<vmem>>, vector<71x2048xbf16>
    %c0_2 = arith.constant 0 : index
    %c0_3 = arith.constant 0 : index
    %4 = vector.load %arg3[%c0_2, %c0_3] : memref<2048x128xbf16, #tpu.memory_space<vmem>>, vector<2048x128xbf16>
    %cst = arith.constant dense<0.000000e+00> : vector<71x128xf32>
    %5 = tpu.matmul %3, %4, %cst {dimension_numbers = #tpu.dot_dimension_numbers<[1], [0], [0], [1], [0, 0, 1, 1], [], []>} : vector<71x2048xbf16>, vector<2048x128xbf16>, vector<71x128xf32> -> vector<71x128xf32>
    %c0_4 = arith.constant 0 : index
    %c0_5 = arith.constant 0 : index
    %6 = vector.load %arg4[%c0_4, %c0_5] : memref<1x128xf32, #tpu.memory_space<vmem>>, vector<1x128xf32>
    %7 = vector.broadcast %6 : vector<1x128xf32> to vector<71x128xf32>
    %8 = arith.addf %5, %7 : vector<71x128xf32>
    %c0_6 = arith.constant 0 : index
    %c0_7 = arith.constant 0 : index
    %9 = vector.load %arg5[%c0_6, %c0_7] : memref<71x1xf32, #tpu.memory_space<vmem>>, vector<71x1xf32>
    %cst_8 = arith.constant 0.000000e+00 : f32
    %10 = vector.broadcast %cst_8 : f32 to vector<71x1xf32>
    %11 = arith.cmpf ogt, %9, %10 : vector<71x1xf32>
    %cst_9 = arith.constant 0.000000e+00 : f32
    %12 = vector.shape_cast %11 : vector<71x1xi1> to vector<71x1xi1>
    %13 = vector.broadcast %12 : vector<71x1xi1> to vector<71x128xi1>
    %14 = vector.broadcast %cst_9 : f32 to vector<71x128xf32>
    %15 = arith.select %13, %8, %14 : vector<71x128xi1>, vector<71x128xf32>
    %cst_10 = arith.constant dense<0.000000e+00> : vector<128xf32>
    %16 = vector.multi_reduction <add>, %15, %cst_10 [0] : vector<71x128xf32> to vector<128xf32>
    %17 = vector.shape_cast %16 : vector<128xf32> to vector<1x128xf32>
    %cst_11 = arith.constant 1.562500e-02 : f32
    %18 = vector.broadcast %cst_11 : f32 to vector<1x128xf32>
    %19 = arith.mulf %17, %18 : vector<1x128xf32>
    %20 = vector.broadcast %19 : vector<1x128xf32> to vector<71x128xf32>
    %21 = arith.subf %8, %20 : vector<71x128xf32>
    %cst_12 = arith.constant 0.000000e+00 : f32
    %22 = vector.shape_cast %11 : vector<71x1xi1> to vector<71x1xi1>
    %23 = vector.broadcast %22 : vector<71x1xi1> to vector<71x128xi1>
    %24 = vector.broadcast %cst_12 : f32 to vector<71x128xf32>
    %25 = arith.select %23, %21, %24 : vector<71x128xi1>, vector<71x128xf32>
    %26 = arith.mulf %25, %25 : vector<71x128xf32>
    %cst_13 = arith.constant dense<0.000000e+00> : vector<128xf32>
    %27 = vector.multi_reduction <add>, %26, %cst_13 [0] : vector<71x128xf32> to vector<128xf32>
    %28 = vector.shape_cast %27 : vector<128xf32> to vector<1x128xf32>
    %cst_14 = arith.constant 1.562500e-02 : f32
    %29 = vector.broadcast %cst_14 : f32 to vector<1x128xf32>
    %30 = arith.mulf %28, %29 : vector<1x128xf32>
    %31 = vector.broadcast %19 : vector<1x128xf32> to vector<71x128xf32>
    %32 = arith.subf %8, %31 : vector<71x128xf32>
    %cst_15 = arith.constant 9.99999974E-6 : f32
    %33 = vector.broadcast %cst_15 : f32 to vector<1x128xf32>
    %34 = arith.addf %30, %33 : vector<1x128xf32>
    %35 = math.rsqrt %34 : vector<1x128xf32>
    %36 = vector.broadcast %35 : vector<1x128xf32> to vector<71x128xf32>
    %37 = arith.mulf %32, %36 : vector<71x128xf32>
    %cst_16 = arith.constant 0.000000e+00 : f32
    %38 = vector.broadcast %cst_16 : f32 to vector<71x128xf32>
    %39 = arith.cmpf oge, %37, %38 : vector<71x128xf32>
    %cst_17 = arith.constant 2.000000e-01 : f32
    %40 = vector.broadcast %cst_17 : f32 to vector<71x128xf32>
    %41 = arith.mulf %40, %37 : vector<71x128xf32>
    %42 = arith.select %39, %37, %41 : vector<71x128xi1>, vector<71x128xf32>
    %43 = arith.truncf %42 : vector<71x128xf32> to vector<71x128xbf16>
    %c0_18 = arith.constant 0 : index
    %c0_19 = arith.constant 0 : index
    %c0_20 = arith.constant 0 : index
    %44 = vector.load %arg6[%c0_18, %c0_19, %c0_20] : memref<1x72x128xbf16, #tpu.memory_space<vmem>>, vector<1x71x128xbf16>
    %45 = vector.shape_cast %44 : vector<1x71x128xbf16> to vector<71x128xbf16>
    %46 = vector.shape_cast %43 : vector<71x128xbf16> to vector<1x71x128xbf16>
    tpu.vector_store %arg6[%c0_18, %c0_19, %c0_20], %46 {strides = array<i32>} : memref<1x72x128xbf16, #tpu.memory_space<vmem>>, vector<1x71x128xbf16>,
    %cst_21 = arith.constant 0.000000e+00 : bf16
    %47 = vector.broadcast %cst_21 : bf16 to vector<1x128xbf16>
    %c0_22 = arith.constant 0 : index
    %c71 = arith.constant 71 : index
    %c0_23 = arith.constant 0 : index
    %48 = vector.load %arg6[%c0_22, %c71, %c0_23] : memref<1x72x128xbf16, #tpu.memory_space<vmem>>, vector<1x1x128xbf16>
    %49 = vector.shape_cast %48 : vector<1x1x128xbf16> to vector<1x128xbf16>
    %50 = vector.shape_cast %47 : vector<1x128xbf16> to vector<1x1x128xbf16>
    tpu.vector_store %arg6[%c0_22, %c71, %c0_23], %50 {strides = array<i32>} : memref<1x72x128xbf16, #tpu.memory_space<vmem>>, vector<1x1x128xbf16>,
    return
  }
  func.func @transform_0(%arg0: i32, %arg1: i32) -> (i32, i32, i32) {
    %c0_i32 = arith.constant 0 : i32
    %c0_i32_0 = arith.constant 0 : i32
    %c0_i32_1 = arith.constant 0 : i32
    return %arg0, %c0_i32, %c0_i32_0 : i32, i32, i32
  }
  func.func @transform_1(%arg0: i32, %arg1: i32) -> (i32, i32) {
    %c0_i32 = arith.constant 0 : i32
    %c0_i32_0 = arith.constant 0 : i32
    return %c0_i32, %arg1 : i32, i32
  }
  func.func @transform_2(%arg0: i32, %arg1: i32) -> (i32, i32) {
    %c0_i32 = arith.constant 0 : i32
    %c0_i32_0 = arith.constant 0 : i32
    return %c0_i32, %arg1 : i32, i32
  }
  func.func @transform_3(%arg0: i32, %arg1: i32) -> (i32, i32) {
    %c0_i32 = arith.constant 0 : i32
    %c0_i32_0 = arith.constant 0 : i32
    %c0_i32_1 = arith.constant 0 : i32
    return %c0_i32, %c0_i32_0 : i32, i32
  }
  func.func @transform_4(%arg0: i32, %arg1: i32) -> (i32, i32, i32) {
    %c0_i32 = arith.constant 0 : i32
    %c0_i32_0 = arith.constant 0 : i32
    return %arg0, %c0_i32, %arg1 : i32, i32, i32
  }
}

module attributes {stable_mosaic.version = 11 : i64} {
  func.func @_conv_kernel(%arg0: i32, %arg1: i32, %arg2: memref<1x25x512xbf16, #tpu.memory_space<vmem>>, %arg3: memref<2048x128xbf16, #tpu.memory_space<vmem>>, %arg4: memref<1x128xf32, #tpu.memory_space<vmem>>, %arg5: memref<19x1xf32, #tpu.memory_space<vmem>>, %arg6: memref<1x20x128xbf16, #tpu.memory_space<vmem>>, %arg7: memref<19x2048xbf16, #tpu.memory_space<vmem>>) attributes {dimension_semantics = [#tpu.dimension_semantics<parallel>, #tpu.dimension_semantics<arbitrary>], iteration_bounds = array<i64: 2, 2>, scalar_prefetch = 0 : i64, scratch_operands = 1 : i64, tpu.core_type = #tpu.core_type<tc>, window_params = [{transform_indices = @transform_0, window_bounds = array<i64: 1, 25, 512>}, {transform_indices = @transform_1, window_bounds = array<i64: 2048, 128>}, {transform_indices = @transform_2, window_bounds = array<i64: 1, 128>}, {pipeline_mode = #tpu.pipeline_mode<synchronous>, transform_indices = @transform_3, window_bounds = array<i64: 19, 1>}, {transform_indices = @transform_4, window_bounds = array<i64: 1, 20, 128>}]} {
    %c0_i32 = arith.constant 0 : i32
    %0 = arith.cmpi eq, %arg1, %c0_i32 : i32
    %1 = arith.extui %0 : i1 to i32
    %c0_i32_0 = arith.constant 0 : i32
    %2 = arith.cmpi ne, %1, %c0_i32_0 : i32
    scf.if %2 {
      %c0_24 = arith.constant 0 : index
      %c0_25 = arith.constant 0 : index
      %c0_26 = arith.constant 0 : index
      %51 = vector.load %arg2[%c0_24, %c0_25, %c0_26] : memref<1x25x512xbf16, #tpu.memory_space<vmem>>, vector<1x19x512xbf16>
      %52 = vector.shape_cast %51 : vector<1x19x512xbf16> to vector<19x512xbf16>
      %c0_27 = arith.constant 0 : index
      %c0_28 = arith.constant 0 : index
      %53 = vector.load %arg7[%c0_27, %c0_28] : memref<19x2048xbf16, #tpu.memory_space<vmem>>, vector<19x512xbf16>
      tpu.vector_store %arg7[%c0_27, %c0_28], %52 {strides = array<i32>} : memref<19x2048xbf16, #tpu.memory_space<vmem>>, vector<19x512xbf16>,
      %c0_29 = arith.constant 0 : index
      %c1 = arith.constant 1 : index
      %c0_30 = arith.constant 0 : index
      %54 = vector.load %arg2[%c0_29, %c1, %c0_30] : memref<1x25x512xbf16, #tpu.memory_space<vmem>>, vector<1x19x512xbf16>
      %55 = vector.shape_cast %54 : vector<1x19x512xbf16> to vector<19x512xbf16>
      %c0_31 = arith.constant 0 : index
      %c512 = arith.constant 512 : index
      %56 = vector.load %arg7[%c0_31, %c512] : memref<19x2048xbf16, #tpu.memory_space<vmem>>, vector<19x512xbf16>
      tpu.vector_store %arg7[%c0_31, %c512], %55 {strides = array<i32>} : memref<19x2048xbf16, #tpu.memory_space<vmem>>, vector<19x512xbf16>,
      %c0_32 = arith.constant 0 : index
      %c5 = arith.constant 5 : index
      %c0_33 = arith.constant 0 : index
      %57 = vector.load %arg2[%c0_32, %c5, %c0_33] : memref<1x25x512xbf16, #tpu.memory_space<vmem>>, vector<1x19x512xbf16>
      %58 = vector.shape_cast %57 : vector<1x19x512xbf16> to vector<19x512xbf16>
      %c0_34 = arith.constant 0 : index
      %c1024 = arith.constant 1024 : index
      %59 = vector.load %arg7[%c0_34, %c1024] : memref<19x2048xbf16, #tpu.memory_space<vmem>>, vector<19x512xbf16>
      tpu.vector_store %arg7[%c0_34, %c1024], %58 {strides = array<i32>} : memref<19x2048xbf16, #tpu.memory_space<vmem>>, vector<19x512xbf16>,
      %c0_35 = arith.constant 0 : index
      %c6 = arith.constant 6 : index
      %c0_36 = arith.constant 0 : index
      %60 = vector.load %arg2[%c0_35, %c6, %c0_36] : memref<1x25x512xbf16, #tpu.memory_space<vmem>>, vector<1x19x512xbf16>
      %61 = vector.shape_cast %60 : vector<1x19x512xbf16> to vector<19x512xbf16>
      %c0_37 = arith.constant 0 : index
      %c1536 = arith.constant 1536 : index
      %62 = vector.load %arg7[%c0_37, %c1536] : memref<19x2048xbf16, #tpu.memory_space<vmem>>, vector<19x512xbf16>
      tpu.vector_store %arg7[%c0_37, %c1536], %61 {strides = array<i32>} : memref<19x2048xbf16, #tpu.memory_space<vmem>>, vector<19x512xbf16>,
    } else {
    }
    %c0 = arith.constant 0 : index
    %c0_1 = arith.constant 0 : index
    %3 = vector.load %arg7[%c0, %c0_1] : memref<19x2048xbf16, #tpu.memory_space<vmem>>, vector<19x2048xbf16>
    %c0_2 = arith.constant 0 : index
    %c0_3 = arith.constant 0 : index
    %4 = vector.load %arg3[%c0_2, %c0_3] : memref<2048x128xbf16, #tpu.memory_space<vmem>>, vector<2048x128xbf16>
    %cst = arith.constant dense<0.000000e+00> : vector<19x128xf32>
    %5 = tpu.matmul %3, %4, %cst {dimension_numbers = #tpu.dot_dimension_numbers<[1], [0], [0], [1], [0, 0, 1, 1], [], []>} : vector<19x2048xbf16>, vector<2048x128xbf16>, vector<19x128xf32> -> vector<19x128xf32>
    %c0_4 = arith.constant 0 : index
    %c0_5 = arith.constant 0 : index
    %6 = vector.load %arg4[%c0_4, %c0_5] : memref<1x128xf32, #tpu.memory_space<vmem>>, vector<1x128xf32>
    %7 = vector.broadcast %6 : vector<1x128xf32> to vector<19x128xf32>
    %8 = arith.addf %5, %7 : vector<19x128xf32>
    %c0_6 = arith.constant 0 : index
    %c0_7 = arith.constant 0 : index
    %9 = vector.load %arg5[%c0_6, %c0_7] : memref<19x1xf32, #tpu.memory_space<vmem>>, vector<19x1xf32>
    %cst_8 = arith.constant 0.000000e+00 : f32
    %10 = vector.broadcast %cst_8 : f32 to vector<19x1xf32>
    %11 = arith.cmpf ogt, %9, %10 : vector<19x1xf32>
    %cst_9 = arith.constant 0.000000e+00 : f32
    %12 = vector.shape_cast %11 : vector<19x1xi1> to vector<19x1xi1>
    %13 = vector.broadcast %12 : vector<19x1xi1> to vector<19x128xi1>
    %14 = vector.broadcast %cst_9 : f32 to vector<19x128xf32>
    %15 = arith.select %13, %8, %14 : vector<19x128xi1>, vector<19x128xf32>
    %cst_10 = arith.constant dense<0.000000e+00> : vector<128xf32>
    %16 = vector.multi_reduction <add>, %15, %cst_10 [0] : vector<19x128xf32> to vector<128xf32>
    %17 = vector.shape_cast %16 : vector<128xf32> to vector<1x128xf32>
    %cst_11 = arith.constant 6.250000e-02 : f32
    %18 = vector.broadcast %cst_11 : f32 to vector<1x128xf32>
    %19 = arith.mulf %17, %18 : vector<1x128xf32>
    %20 = vector.broadcast %19 : vector<1x128xf32> to vector<19x128xf32>
    %21 = arith.subf %8, %20 : vector<19x128xf32>
    %cst_12 = arith.constant 0.000000e+00 : f32
    %22 = vector.shape_cast %11 : vector<19x1xi1> to vector<19x1xi1>
    %23 = vector.broadcast %22 : vector<19x1xi1> to vector<19x128xi1>
    %24 = vector.broadcast %cst_12 : f32 to vector<19x128xf32>
    %25 = arith.select %23, %21, %24 : vector<19x128xi1>, vector<19x128xf32>
    %26 = arith.mulf %25, %25 : vector<19x128xf32>
    %cst_13 = arith.constant dense<0.000000e+00> : vector<128xf32>
    %27 = vector.multi_reduction <add>, %26, %cst_13 [0] : vector<19x128xf32> to vector<128xf32>
    %28 = vector.shape_cast %27 : vector<128xf32> to vector<1x128xf32>
    %cst_14 = arith.constant 6.250000e-02 : f32
    %29 = vector.broadcast %cst_14 : f32 to vector<1x128xf32>
    %30 = arith.mulf %28, %29 : vector<1x128xf32>
    %31 = vector.broadcast %19 : vector<1x128xf32> to vector<19x128xf32>
    %32 = arith.subf %8, %31 : vector<19x128xf32>
    %cst_15 = arith.constant 9.99999974E-6 : f32
    %33 = vector.broadcast %cst_15 : f32 to vector<1x128xf32>
    %34 = arith.addf %30, %33 : vector<1x128xf32>
    %35 = math.rsqrt %34 : vector<1x128xf32>
    %36 = vector.broadcast %35 : vector<1x128xf32> to vector<19x128xf32>
    %37 = arith.mulf %32, %36 : vector<19x128xf32>
    %cst_16 = arith.constant 0.000000e+00 : f32
    %38 = vector.broadcast %cst_16 : f32 to vector<19x128xf32>
    %39 = arith.cmpf oge, %37, %38 : vector<19x128xf32>
    %cst_17 = arith.constant 2.000000e-01 : f32
    %40 = vector.broadcast %cst_17 : f32 to vector<19x128xf32>
    %41 = arith.mulf %40, %37 : vector<19x128xf32>
    %42 = arith.select %39, %37, %41 : vector<19x128xi1>, vector<19x128xf32>
    %43 = arith.truncf %42 : vector<19x128xf32> to vector<19x128xbf16>
    %c0_18 = arith.constant 0 : index
    %c0_19 = arith.constant 0 : index
    %c0_20 = arith.constant 0 : index
    %44 = vector.load %arg6[%c0_18, %c0_19, %c0_20] : memref<1x20x128xbf16, #tpu.memory_space<vmem>>, vector<1x19x128xbf16>
    %45 = vector.shape_cast %44 : vector<1x19x128xbf16> to vector<19x128xbf16>
    %46 = vector.shape_cast %43 : vector<19x128xbf16> to vector<1x19x128xbf16>
    tpu.vector_store %arg6[%c0_18, %c0_19, %c0_20], %46 {strides = array<i32>} : memref<1x20x128xbf16, #tpu.memory_space<vmem>>, vector<1x19x128xbf16>,
    %cst_21 = arith.constant 0.000000e+00 : bf16
    %47 = vector.broadcast %cst_21 : bf16 to vector<1x128xbf16>
    %c0_22 = arith.constant 0 : index
    %c19 = arith.constant 19 : index
    %c0_23 = arith.constant 0 : index
    %48 = vector.load %arg6[%c0_22, %c19, %c0_23] : memref<1x20x128xbf16, #tpu.memory_space<vmem>>, vector<1x1x128xbf16>
    %49 = vector.shape_cast %48 : vector<1x1x128xbf16> to vector<1x128xbf16>
    %50 = vector.shape_cast %47 : vector<1x128xbf16> to vector<1x1x128xbf16>
    tpu.vector_store %arg6[%c0_22, %c19, %c0_23], %50 {strides = array<i32>} : memref<1x20x128xbf16, #tpu.memory_space<vmem>>, vector<1x1x128xbf16>,
    return
  }
  func.func @transform_0(%arg0: i32, %arg1: i32) -> (i32, i32, i32) {
    %c0_i32 = arith.constant 0 : i32
    %c0_i32_0 = arith.constant 0 : i32
    %c0_i32_1 = arith.constant 0 : i32
    return %arg0, %c0_i32, %c0_i32_0 : i32, i32, i32
  }
  func.func @transform_1(%arg0: i32, %arg1: i32) -> (i32, i32) {
    %c0_i32 = arith.constant 0 : i32
    %c0_i32_0 = arith.constant 0 : i32
    return %c0_i32, %arg1 : i32, i32
  }
  func.func @transform_2(%arg0: i32, %arg1: i32) -> (i32, i32) {
    %c0_i32 = arith.constant 0 : i32
    %c0_i32_0 = arith.constant 0 : i32
    return %c0_i32, %arg1 : i32, i32
  }
  func.func @transform_3(%arg0: i32, %arg1: i32) -> (i32, i32) {
    %c0_i32 = arith.constant 0 : i32
    %c0_i32_0 = arith.constant 0 : i32
    %c0_i32_1 = arith.constant 0 : i32
    return %c0_i32, %c0_i32_0 : i32, i32
  }
  func.func @transform_4(%arg0: i32, %arg1: i32) -> (i32, i32, i32) {
    %c0_i32 = arith.constant 0 : i32
    %c0_i32_0 = arith.constant 0 : i32
    return %arg0, %c0_i32, %arg1 : i32, i32, i32
  }
}

module attributes {stable_mosaic.version = 11 : i64} {
  func.func @_conv_kernel(%arg0: i32, %arg1: i32, %arg2: memref<1x36x256xbf16, #tpu.memory_space<vmem>>, %arg3: memref<4096x128xbf16, #tpu.memory_space<vmem>>, %arg4: memref<1x128xf32, #tpu.memory_space<vmem>>, %arg5: memref<15x1xf32, #tpu.memory_space<vmem>>, %arg6: memref<1x18x128xbf16, #tpu.memory_space<vmem>>, %arg7: memref<15x4096xbf16, #tpu.memory_space<vmem>>) attributes {dimension_semantics = [#tpu.dimension_semantics<parallel>, #tpu.dimension_semantics<arbitrary>], iteration_bounds = array<i64: 2, 4>, scalar_prefetch = 0 : i64, scratch_operands = 1 : i64, tpu.core_type = #tpu.core_type<tc>, window_params = [{transform_indices = @transform_0, window_bounds = array<i64: 1, 36, 256>}, {transform_indices = @transform_1, window_bounds = array<i64: 4096, 128>}, {transform_indices = @transform_2, window_bounds = array<i64: 1, 128>}, {pipeline_mode = #tpu.pipeline_mode<synchronous>, transform_indices = @transform_3, window_bounds = array<i64: 15, 1>}, {transform_indices = @transform_4, window_bounds = array<i64: 1, 18, 128>}]} {
    %c0_i32 = arith.constant 0 : i32
    %0 = arith.cmpi eq, %arg1, %c0_i32 : i32
    %1 = arith.extui %0 : i1 to i32
    %c0_i32_0 = arith.constant 0 : i32
    %2 = arith.cmpi ne, %1, %c0_i32_0 : i32
    scf.if %2 {
      %c0_24 = arith.constant 0 : index
      %c0_25 = arith.constant 0 : index
      %c0_26 = arith.constant 0 : index
      %51 = vector.load %arg2[%c0_24, %c0_25, %c0_26] : memref<1x36x256xbf16, #tpu.memory_space<vmem>>, vector<1x15x256xbf16>
      %52 = vector.shape_cast %51 : vector<1x15x256xbf16> to vector<15x256xbf16>
      %c0_27 = arith.constant 0 : index
      %c0_28 = arith.constant 0 : index
      %53 = vector.load %arg7[%c0_27, %c0_28] : memref<15x4096xbf16, #tpu.memory_space<vmem>>, vector<15x256xbf16>
      tpu.vector_store %arg7[%c0_27, %c0_28], %52 {strides = array<i32>} : memref<15x4096xbf16, #tpu.memory_space<vmem>>, vector<15x256xbf16>,
      %c0_29 = arith.constant 0 : index
      %c1 = arith.constant 1 : index
      %c0_30 = arith.constant 0 : index
      %54 = vector.load %arg2[%c0_29, %c1, %c0_30] : memref<1x36x256xbf16, #tpu.memory_space<vmem>>, vector<1x15x256xbf16>
      %55 = vector.shape_cast %54 : vector<1x15x256xbf16> to vector<15x256xbf16>
      %c0_31 = arith.constant 0 : index
      %c256 = arith.constant 256 : index
      %56 = vector.load %arg7[%c0_31, %c256] : memref<15x4096xbf16, #tpu.memory_space<vmem>>, vector<15x256xbf16>
      tpu.vector_store %arg7[%c0_31, %c256], %55 {strides = array<i32>} : memref<15x4096xbf16, #tpu.memory_space<vmem>>, vector<15x256xbf16>,
      %c0_32 = arith.constant 0 : index
      %c2 = arith.constant 2 : index
      %c0_33 = arith.constant 0 : index
      %57 = vector.load %arg2[%c0_32, %c2, %c0_33] : memref<1x36x256xbf16, #tpu.memory_space<vmem>>, vector<1x15x256xbf16>
      %58 = vector.shape_cast %57 : vector<1x15x256xbf16> to vector<15x256xbf16>
      %c0_34 = arith.constant 0 : index
      %c512 = arith.constant 512 : index
      %59 = vector.load %arg7[%c0_34, %c512] : memref<15x4096xbf16, #tpu.memory_space<vmem>>, vector<15x256xbf16>
      tpu.vector_store %arg7[%c0_34, %c512], %58 {strides = array<i32>} : memref<15x4096xbf16, #tpu.memory_space<vmem>>, vector<15x256xbf16>,
      %c0_35 = arith.constant 0 : index
      %c3 = arith.constant 3 : index
      %c0_36 = arith.constant 0 : index
      %60 = vector.load %arg2[%c0_35, %c3, %c0_36] : memref<1x36x256xbf16, #tpu.memory_space<vmem>>, vector<1x15x256xbf16>
      %61 = vector.shape_cast %60 : vector<1x15x256xbf16> to vector<15x256xbf16>
      %c0_37 = arith.constant 0 : index
      %c768 = arith.constant 768 : index
      %62 = vector.load %arg7[%c0_37, %c768] : memref<15x4096xbf16, #tpu.memory_space<vmem>>, vector<15x256xbf16>
      tpu.vector_store %arg7[%c0_37, %c768], %61 {strides = array<i32>} : memref<15x4096xbf16, #tpu.memory_space<vmem>>, vector<15x256xbf16>,
      %c0_38 = arith.constant 0 : index
      %c6 = arith.constant 6 : index
      %c0_39 = arith.constant 0 : index
      %63 = vector.load %arg2[%c0_38, %c6, %c0_39] : memref<1x36x256xbf16, #tpu.memory_space<vmem>>, vector<1x15x256xbf16>
      %64 = vector.shape_cast %63 : vector<1x15x256xbf16> to vector<15x256xbf16>
      %c0_40 = arith.constant 0 : index
      %c1024 = arith.constant 1024 : index
      %65 = vector.load %arg7[%c0_40, %c1024] : memref<15x4096xbf16, #tpu.memory_space<vmem>>, vector<15x256xbf16>
      tpu.vector_store %arg7[%c0_40, %c1024], %64 {strides = array<i32>} : memref<15x4096xbf16, #tpu.memory_space<vmem>>, vector<15x256xbf16>,
      %c0_41 = arith.constant 0 : index
      %c7 = arith.constant 7 : index
      %c0_42 = arith.constant 0 : index
      %66 = vector.load %arg2[%c0_41, %c7, %c0_42] : memref<1x36x256xbf16, #tpu.memory_space<vmem>>, vector<1x15x256xbf16>
      %67 = vector.shape_cast %66 : vector<1x15x256xbf16> to vector<15x256xbf16>
      %c0_43 = arith.constant 0 : index
      %c1280 = arith.constant 1280 : index
      %68 = vector.load %arg7[%c0_43, %c1280] : memref<15x4096xbf16, #tpu.memory_space<vmem>>, vector<15x256xbf16>
      tpu.vector_store %arg7[%c0_43, %c1280], %67 {strides = array<i32>} : memref<15x4096xbf16, #tpu.memory_space<vmem>>, vector<15x256xbf16>,
      %c0_44 = arith.constant 0 : index
      %c8 = arith.constant 8 : index
      %c0_45 = arith.constant 0 : index
      %69 = vector.load %arg2[%c0_44, %c8, %c0_45] : memref<1x36x256xbf16, #tpu.memory_space<vmem>>, vector<1x15x256xbf16>
      %70 = vector.shape_cast %69 : vector<1x15x256xbf16> to vector<15x256xbf16>
      %c0_46 = arith.constant 0 : index
      %c1536 = arith.constant 1536 : index
      %71 = vector.load %arg7[%c0_46, %c1536] : memref<15x4096xbf16, #tpu.memory_space<vmem>>, vector<15x256xbf16>
      tpu.vector_store %arg7[%c0_46, %c1536], %70 {strides = array<i32>} : memref<15x4096xbf16, #tpu.memory_space<vmem>>, vector<15x256xbf16>,
      %c0_47 = arith.constant 0 : index
      %c9 = arith.constant 9 : index
      %c0_48 = arith.constant 0 : index
      %72 = vector.load %arg2[%c0_47, %c9, %c0_48] : memref<1x36x256xbf16, #tpu.memory_space<vmem>>, vector<1x15x256xbf16>
      %73 = vector.shape_cast %72 : vector<1x15x256xbf16> to vector<15x256xbf16>
      %c0_49 = arith.constant 0 : index
      %c1792 = arith.constant 1792 : index
      %74 = vector.load %arg7[%c0_49, %c1792] : memref<15x4096xbf16, #tpu.memory_space<vmem>>, vector<15x256xbf16>
      tpu.vector_store %arg7[%c0_49, %c1792], %73 {strides = array<i32>} : memref<15x4096xbf16, #tpu.memory_space<vmem>>, vector<15x256xbf16>,
      %c0_50 = arith.constant 0 : index
      %c12 = arith.constant 12 : index
      %c0_51 = arith.constant 0 : index
      %75 = vector.load %arg2[%c0_50, %c12, %c0_51] : memref<1x36x256xbf16, #tpu.memory_space<vmem>>, vector<1x15x256xbf16>
      %76 = vector.shape_cast %75 : vector<1x15x256xbf16> to vector<15x256xbf16>
      %c0_52 = arith.constant 0 : index
      %c2048 = arith.constant 2048 : index
      %77 = vector.load %arg7[%c0_52, %c2048] : memref<15x4096xbf16, #tpu.memory_space<vmem>>, vector<15x256xbf16>
      tpu.vector_store %arg7[%c0_52, %c2048], %76 {strides = array<i32>} : memref<15x4096xbf16, #tpu.memory_space<vmem>>, vector<15x256xbf16>,
      %c0_53 = arith.constant 0 : index
      %c13 = arith.constant 13 : index
      %c0_54 = arith.constant 0 : index
      %78 = vector.load %arg2[%c0_53, %c13, %c0_54] : memref<1x36x256xbf16, #tpu.memory_space<vmem>>, vector<1x15x256xbf16>
      %79 = vector.shape_cast %78 : vector<1x15x256xbf16> to vector<15x256xbf16>
      %c0_55 = arith.constant 0 : index
      %c2304 = arith.constant 2304 : index
      %80 = vector.load %arg7[%c0_55, %c2304] : memref<15x4096xbf16, #tpu.memory_space<vmem>>, vector<15x256xbf16>
      tpu.vector_store %arg7[%c0_55, %c2304], %79 {strides = array<i32>} : memref<15x4096xbf16, #tpu.memory_space<vmem>>, vector<15x256xbf16>,
      %c0_56 = arith.constant 0 : index
      %c14 = arith.constant 14 : index
      %c0_57 = arith.constant 0 : index
      %81 = vector.load %arg2[%c0_56, %c14, %c0_57] : memref<1x36x256xbf16, #tpu.memory_space<vmem>>, vector<1x15x256xbf16>
      %82 = vector.shape_cast %81 : vector<1x15x256xbf16> to vector<15x256xbf16>
      %c0_58 = arith.constant 0 : index
      %c2560 = arith.constant 2560 : index
      %83 = vector.load %arg7[%c0_58, %c2560] : memref<15x4096xbf16, #tpu.memory_space<vmem>>, vector<15x256xbf16>
      tpu.vector_store %arg7[%c0_58, %c2560], %82 {strides = array<i32>} : memref<15x4096xbf16, #tpu.memory_space<vmem>>, vector<15x256xbf16>,
      %c0_59 = arith.constant 0 : index
      %c15_60 = arith.constant 15 : index
      %c0_61 = arith.constant 0 : index
      %84 = vector.load %arg2[%c0_59, %c15_60, %c0_61] : memref<1x36x256xbf16, #tpu.memory_space<vmem>>, vector<1x15x256xbf16>
      %85 = vector.shape_cast %84 : vector<1x15x256xbf16> to vector<15x256xbf16>
      %c0_62 = arith.constant 0 : index
      %c2816 = arith.constant 2816 : index
      %86 = vector.load %arg7[%c0_62, %c2816] : memref<15x4096xbf16, #tpu.memory_space<vmem>>, vector<15x256xbf16>
      tpu.vector_store %arg7[%c0_62, %c2816], %85 {strides = array<i32>} : memref<15x4096xbf16, #tpu.memory_space<vmem>>, vector<15x256xbf16>,
      %c0_63 = arith.constant 0 : index
      %c18 = arith.constant 18 : index
      %c0_64 = arith.constant 0 : index
      %87 = vector.load %arg2[%c0_63, %c18, %c0_64] : memref<1x36x256xbf16, #tpu.memory_space<vmem>>, vector<1x15x256xbf16>
      %88 = vector.shape_cast %87 : vector<1x15x256xbf16> to vector<15x256xbf16>
      %c0_65 = arith.constant 0 : index
      %c3072 = arith.constant 3072 : index
      %89 = vector.load %arg7[%c0_65, %c3072] : memref<15x4096xbf16, #tpu.memory_space<vmem>>, vector<15x256xbf16>
      tpu.vector_store %arg7[%c0_65, %c3072], %88 {strides = array<i32>} : memref<15x4096xbf16, #tpu.memory_space<vmem>>, vector<15x256xbf16>,
      %c0_66 = arith.constant 0 : index
      %c19 = arith.constant 19 : index
      %c0_67 = arith.constant 0 : index
      %90 = vector.load %arg2[%c0_66, %c19, %c0_67] : memref<1x36x256xbf16, #tpu.memory_space<vmem>>, vector<1x15x256xbf16>
      %91 = vector.shape_cast %90 : vector<1x15x256xbf16> to vector<15x256xbf16>
      %c0_68 = arith.constant 0 : index
      %c3328 = arith.constant 3328 : index
      %92 = vector.load %arg7[%c0_68, %c3328] : memref<15x4096xbf16, #tpu.memory_space<vmem>>, vector<15x256xbf16>
      tpu.vector_store %arg7[%c0_68, %c3328], %91 {strides = array<i32>} : memref<15x4096xbf16, #tpu.memory_space<vmem>>, vector<15x256xbf16>,
      %c0_69 = arith.constant 0 : index
      %c20 = arith.constant 20 : index
      %c0_70 = arith.constant 0 : index
      %93 = vector.load %arg2[%c0_69, %c20, %c0_70] : memref<1x36x256xbf16, #tpu.memory_space<vmem>>, vector<1x15x256xbf16>
      %94 = vector.shape_cast %93 : vector<1x15x256xbf16> to vector<15x256xbf16>
      %c0_71 = arith.constant 0 : index
      %c3584 = arith.constant 3584 : index
      %95 = vector.load %arg7[%c0_71, %c3584] : memref<15x4096xbf16, #tpu.memory_space<vmem>>, vector<15x256xbf16>
      tpu.vector_store %arg7[%c0_71, %c3584], %94 {strides = array<i32>} : memref<15x4096xbf16, #tpu.memory_space<vmem>>, vector<15x256xbf16>,
      %c0_72 = arith.constant 0 : index
      %c21 = arith.constant 21 : index
      %c0_73 = arith.constant 0 : index
      %96 = vector.load %arg2[%c0_72, %c21, %c0_73] : memref<1x36x256xbf16, #tpu.memory_space<vmem>>, vector<1x15x256xbf16>
      %97 = vector.shape_cast %96 : vector<1x15x256xbf16> to vector<15x256xbf16>
      %c0_74 = arith.constant 0 : index
      %c3840 = arith.constant 3840 : index
      %98 = vector.load %arg7[%c0_74, %c3840] : memref<15x4096xbf16, #tpu.memory_space<vmem>>, vector<15x256xbf16>
      tpu.vector_store %arg7[%c0_74, %c3840], %97 {strides = array<i32>} : memref<15x4096xbf16, #tpu.memory_space<vmem>>, vector<15x256xbf16>,
    } else {
    }
    %c0 = arith.constant 0 : index
    %c0_1 = arith.constant 0 : index
    %3 = vector.load %arg7[%c0, %c0_1] : memref<15x4096xbf16, #tpu.memory_space<vmem>>, vector<15x4096xbf16>
    %c0_2 = arith.constant 0 : index
    %c0_3 = arith.constant 0 : index
    %4 = vector.load %arg3[%c0_2, %c0_3] : memref<4096x128xbf16, #tpu.memory_space<vmem>>, vector<4096x128xbf16>
    %cst = arith.constant dense<0.000000e+00> : vector<15x128xf32>
    %5 = tpu.matmul %3, %4, %cst {dimension_numbers = #tpu.dot_dimension_numbers<[1], [0], [0], [1], [0, 0, 1, 1], [], []>} : vector<15x4096xbf16>, vector<4096x128xbf16>, vector<15x128xf32> -> vector<15x128xf32>
    %c0_4 = arith.constant 0 : index
    %c0_5 = arith.constant 0 : index
    %6 = vector.load %arg4[%c0_4, %c0_5] : memref<1x128xf32, #tpu.memory_space<vmem>>, vector<1x128xf32>
    %7 = vector.broadcast %6 : vector<1x128xf32> to vector<15x128xf32>
    %8 = arith.addf %5, %7 : vector<15x128xf32>
    %c0_6 = arith.constant 0 : index
    %c0_7 = arith.constant 0 : index
    %9 = vector.load %arg5[%c0_6, %c0_7] : memref<15x1xf32, #tpu.memory_space<vmem>>, vector<15x1xf32>
    %cst_8 = arith.constant 0.000000e+00 : f32
    %10 = vector.broadcast %cst_8 : f32 to vector<15x1xf32>
    %11 = arith.cmpf ogt, %9, %10 : vector<15x1xf32>
    %cst_9 = arith.constant 0.000000e+00 : f32
    %12 = vector.shape_cast %11 : vector<15x1xi1> to vector<15x1xi1>
    %13 = vector.broadcast %12 : vector<15x1xi1> to vector<15x128xi1>
    %14 = vector.broadcast %cst_9 : f32 to vector<15x128xf32>
    %15 = arith.select %13, %8, %14 : vector<15x128xi1>, vector<15x128xf32>
    %cst_10 = arith.constant dense<0.000000e+00> : vector<128xf32>
    %16 = vector.multi_reduction <add>, %15, %cst_10 [0] : vector<15x128xf32> to vector<128xf32>
    %17 = vector.shape_cast %16 : vector<128xf32> to vector<1x128xf32>
    %cst_11 = arith.constant 0.111111112 : f32
    %18 = vector.broadcast %cst_11 : f32 to vector<1x128xf32>
    %19 = arith.mulf %17, %18 : vector<1x128xf32>
    %20 = vector.broadcast %19 : vector<1x128xf32> to vector<15x128xf32>
    %21 = arith.subf %8, %20 : vector<15x128xf32>
    %cst_12 = arith.constant 0.000000e+00 : f32
    %22 = vector.shape_cast %11 : vector<15x1xi1> to vector<15x1xi1>
    %23 = vector.broadcast %22 : vector<15x1xi1> to vector<15x128xi1>
    %24 = vector.broadcast %cst_12 : f32 to vector<15x128xf32>
    %25 = arith.select %23, %21, %24 : vector<15x128xi1>, vector<15x128xf32>
    %26 = arith.mulf %25, %25 : vector<15x128xf32>
    %cst_13 = arith.constant dense<0.000000e+00> : vector<128xf32>
    %27 = vector.multi_reduction <add>, %26, %cst_13 [0] : vector<15x128xf32> to vector<128xf32>
    %28 = vector.shape_cast %27 : vector<128xf32> to vector<1x128xf32>
    %cst_14 = arith.constant 0.111111112 : f32
    %29 = vector.broadcast %cst_14 : f32 to vector<1x128xf32>
    %30 = arith.mulf %28, %29 : vector<1x128xf32>
    %31 = vector.broadcast %19 : vector<1x128xf32> to vector<15x128xf32>
    %32 = arith.subf %8, %31 : vector<15x128xf32>
    %cst_15 = arith.constant 9.99999974E-6 : f32
    %33 = vector.broadcast %cst_15 : f32 to vector<1x128xf32>
    %34 = arith.addf %30, %33 : vector<1x128xf32>
    %35 = math.rsqrt %34 : vector<1x128xf32>
    %36 = vector.broadcast %35 : vector<1x128xf32> to vector<15x128xf32>
    %37 = arith.mulf %32, %36 : vector<15x128xf32>
    %cst_16 = arith.constant 0.000000e+00 : f32
    %38 = vector.broadcast %cst_16 : f32 to vector<15x128xf32>
    %39 = arith.cmpf oge, %37, %38 : vector<15x128xf32>
    %cst_17 = arith.constant 2.000000e-01 : f32
    %40 = vector.broadcast %cst_17 : f32 to vector<15x128xf32>
    %41 = arith.mulf %40, %37 : vector<15x128xf32>
    %42 = arith.select %39, %37, %41 : vector<15x128xi1>, vector<15x128xf32>
    %43 = arith.truncf %42 : vector<15x128xf32> to vector<15x128xbf16>
    %c0_18 = arith.constant 0 : index
    %c0_19 = arith.constant 0 : index
    %c0_20 = arith.constant 0 : index
    %44 = vector.load %arg6[%c0_18, %c0_19, %c0_20] : memref<1x18x128xbf16, #tpu.memory_space<vmem>>, vector<1x15x128xbf16>
    %45 = vector.shape_cast %44 : vector<1x15x128xbf16> to vector<15x128xbf16>
    %46 = vector.shape_cast %43 : vector<15x128xbf16> to vector<1x15x128xbf16>
    tpu.vector_store %arg6[%c0_18, %c0_19, %c0_20], %46 {strides = array<i32>} : memref<1x18x128xbf16, #tpu.memory_space<vmem>>, vector<1x15x128xbf16>,
    %cst_21 = arith.constant 0.000000e+00 : bf16
    %47 = vector.broadcast %cst_21 : bf16 to vector<3x128xbf16>
    %c0_22 = arith.constant 0 : index
    %c15 = arith.constant 15 : index
    %c0_23 = arith.constant 0 : index
    %48 = vector.load %arg6[%c0_22, %c15, %c0_23] : memref<1x18x128xbf16, #tpu.memory_space<vmem>>, vector<1x3x128xbf16>
    %49 = vector.shape_cast %48 : vector<1x3x128xbf16> to vector<3x128xbf16>
    %50 = vector.shape_cast %47 : vector<3x128xbf16> to vector<1x3x128xbf16>
    tpu.vector_store %arg6[%c0_22, %c15, %c0_23], %50 {strides = array<i32>} : memref<1x18x128xbf16, #tpu.memory_space<vmem>>, vector<1x3x128xbf16>,
    return
  }
  func.func @transform_0(%arg0: i32, %arg1: i32) -> (i32, i32, i32) {
    %c0_i32 = arith.constant 0 : i32
    %c0_i32_0 = arith.constant 0 : i32
    %c0_i32_1 = arith.constant 0 : i32
    return %arg0, %c0_i32, %c0_i32_0 : i32, i32, i32
  }
  func.func @transform_1(%arg0: i32, %arg1: i32) -> (i32, i32) {
    %c0_i32 = arith.constant 0 : i32
    %c0_i32_0 = arith.constant 0 : i32
    return %c0_i32, %arg1 : i32, i32
  }
  func.func @transform_2(%arg0: i32, %arg1: i32) -> (i32, i32) {
    %c0_i32 = arith.constant 0 : i32
    %c0_i32_0 = arith.constant 0 : i32
    return %c0_i32, %arg1 : i32, i32
  }
  func.func @transform_3(%arg0: i32, %arg1: i32) -> (i32, i32) {
    %c0_i32 = arith.constant 0 : i32
    %c0_i32_0 = arith.constant 0 : i32
    %c0_i32_1 = arith.constant 0 : i32
    return %c0_i32, %c0_i32_0 : i32, i32
  }
  func.func @transform_4(%arg0: i32, %arg1: i32) -> (i32, i32, i32) {
    %c0_i32 = arith.constant 0 : i32
    %c0_i32_0 = arith.constant 0 : i32
    return %arg0, %c0_i32, %arg1 : i32, i32, i32
  }
}

</mosaic_0001>

<bundles_post_ra>
// kernel: discriminator_forward.4
= control target key start
LH: loop header
LB: loop body
LE: loop exit
PB: predicated region body
PF: predicated region fallthrough
CT: control target
= control target key end

     0   :  { %9 = vsyncpa [#allocation4], 0  ;;  %s4391_s0 = inlined_call_operand.vmem [shape: bf16[2,289,128], index: 0, kind: input, shape index: {}]   ;;  %s4392_s1 = inlined_call_operand.hbm [shape: bf16[512,128], index: 1, kind: input, shape index: {}]   ;;  %s4393_s2 = inlined_call_operand.hbm [shape: f32[1,128], index: 2, kind: input, shape index: {}]   ;;  %s4394_s3 = inlined_call_operand.hbm [shape: f32[271,1], index: 3, kind: input, shape index: {}]   ;;  %s4395_s4 = inlined_call_operand.vmem [shape: bf16[2,272,128], index: 4, kind: output, shape index: {}]  }
   0x1   :  { %10 = vsyncpa [#allocation6], 0  ;;  %s3656_s15 = smov 0   ;;  %s3658_s16 = smov 0  }
   0x2   :  { %s3660_s17 = smov 0  }
   0x3 LB: > { %s189_s20 = sshll.u32 %s4393_s2, 4  ;;  %s2828_s21 = sadd.s32 4294967295, %s3622_s17   ;;  %s3622_s17 = sphi %s3660_s17, %s16_s17   ;;  %s3618_s16 = sphi %s3658_s16, %s4406_s16   ;;  %s3614_s15 = sphi %s3656_s15, %s4405_s15   ;;  %s190_s20 = int_to_ptr.hbm [resolvable:$true] %s189_s20 }
   0x4   : > { %p2830_p0 = scmp.ge.s32.totalorder %s3622_s17, 1  ;;  %p160_p1 = scmp.lt.s32.totalorder %s3622_s17, 3 }
   0x5   : > { %p3677_p2 = scmp.eq.s32.totalorder %s2828_s21, 0  ;;  %s3624_s24 = smov [#allocation5]  }
   0x6   : > { %p3681_p3 = pnand %p2830_p0, %p160_p1  ;;  %s191_s25 = sshll.u32 %s3624_s24, 4  ;;  %s192_s25 = int_to_ptr.vmem [resolvable:$true] %s191_s25 }
   0x7   : > { %s28_s27 = sadd.s32 1, %s3618_s16  ;;  %s173_s30 = sshll.u32 %s4392_s1, 4  ;;  %s174_s30 = int_to_ptr.hbm [resolvable:$true] %s173_s30 }
   0x8   : > { %p3453_p4 = pneg %p3681_p3  ;;  %p30_p6 = scmp.ge.s32.totalorder %s28_s27, 2 }
   0x9   : > { %s3625_s5 = smov [#allocation3]   ;;  %s200_s9 = sshll.u32 %s4394_s3, 4  ;;  %s201_s9 = int_to_ptr.hbm [resolvable:$true] %s200_s9 }
   0xa   : > { %p3689_p5 = pnand %p3677_p2, %p3453_p4  ;;  %s4408_s27 = smov (%p30_p6, %s28_s27), 0 }
   0xb   : > { %s175_s6 = sshll.u32 %s3625_s5, 4  ;;  %s3626_s10 = smov 64   ;;  %s176_s6 = int_to_ptr.vmem [resolvable:$true] %s175_s6 }
   0xc   : > { %3459 = dma.hbm_to_vmem [thread:$0]  (!%p3689_p5), %s190_s20, 16, %s192_s25, [#allocation6]  }
   0xd   : > { %s3627_s11 = smov 4   ;;  %s3628_s12 = smov [#allocation7]  }
   0xe   : > { %3456 = dma.hbm_to_vmem [thread:$0]  (!%p3689_p5), %s174_s30, 4096, %s176_s6, [#allocation4], %s3626_s10, %s3626_s10, %s3627_s11  }
   0xf   : > { %s202_s13 = sshll.u32 %s3628_s12, 4  ;;  %s3629_s14 = smov 128   ;;  %s203_s13 = int_to_ptr.vmem [resolvable:$true] %s202_s13 }
  0x10   : > { %s3630_s18 = smov 8   ;;  %226 = sbr.rel (%p3681_p3) target bundleno = 474 (0x1da), region = 36 }
  0x11   : > { %3462 = dma.hbm_to_vmem [thread:$0]  (!%p3689_p5), %s201_s9, 4352, %s203_s13, [#allocation6], %s3629_s14, %s3629_s14, %s3630_s18  }
  0x15   : > { %3605 = dma.done.wait (%p3677_p2), [#allocation4], 4096  }
  0x16   : > { %3607 = vsyncadd (%p3677_p2), [#allocation4], 4294963200 }
  0x17   : > { %3609 = dma.done.wait (%p3677_p2), [#allocation6], 4368  }
  0x18   : > { %3611 = vsyncadd (%p3677_p2), [#allocation6], 4294962928  ;;  %p266_p7 = scmp.lt.s32.totalorder %s3614_s15, 1  ;;  %v3319_v0 = vld [vmem:[#allocation3 + $0x38] sm:$0xff]  ;;  %v3318_v4 = vld [vmem:[#allocation3 + $0x30] sm:$0xff]  ;;  %vm1315_vm2 = vcmask 1042432  }
  0x19   : > { %v3327_v1 = vld [vmem:[#allocation3 + $0x78] sm:$0xff]  ;;  %2159 = vmatpush.bf16.msra.mxu0 %v3319_v0  ;;  %v3326_v5 = vld [vmem:[#allocation3 + $0x70] sm:$0xff]  ;;  %v3317_v8 = vld [vmem:[#allocation3 + $0x28] sm:$0xff]  ;;  %vm352_vm0 = vsmask.f32 3328  ;;  %vm1316_vm3 = vcmask 1046532  }
  0x1a   : > { %v3335_v2 = vld [vmem:[#allocation3 + $0xb8] sm:$0xff]  ;;  %s4410_s15 = smov (!%p266_p7, %s3614_s15), 1  ;;  %2253 = vmatpush.bf16.msra.mxu1 %v3327_v1  ;;  %v3334_v6 = vld [vmem:[#allocation3 + $0xb0] sm:$0xff]  ;;  %v3325_v9 = vld [vmem:[#allocation3 + $0x68] sm:$0xff]  ;;  %vm391_vm1 = vsmask.f32 7440 }
  0x1b   : > { %v3343_v3 = vld [vmem:[#allocation3 + $0xf8] sm:$0xff]  ;;  %2347 = vmatpush.bf16.msra.mxu2 %v3335_v2  ;;  %v3342_v7 = vld [vmem:[#allocation3 + $0xf0] sm:$0xff]  ;;  %s3439_s19 = smul.u32 148, %s4410_s15  ;;  %v3333_v10 = vld [vmem:[#allocation3 + $0xa8] sm:$0xff] }
  0x1c   : > { %2441 = vmatpush.bf16.msra.mxu3 %v3343_v3  ;;  %v3341_v11 = vld [vmem:[#allocation3 + $0xe8] sm:$0xff]  ;;  %v3316_v12 = vld [vmem:[#allocation3 + $0x20] sm:$0xff]  ;;  %v3315_v19 = vld [vmem:[#allocation3 + $0x18] sm:$0xff]  ;;  %s3440_s23 = smul.u32 136, %s4410_s15 }
  0x1d   : > { %2160 = vmatpush.bf16.msra.mxu0 %v3318_v4  ;;  %s3726_s22 = scalar_lea.vmem %s4391_s0, %s3439_s19  ;;  %v3324_v13 = vld [vmem:[#allocation3 + $0x60] sm:$0xff]  ;;  %v3323_v20 = vld [vmem:[#allocation3 + $0x58] sm:$0xff]  ;;  %v3314_v38 = vld [vmem:[#allocation3 + $0x10] sm:$0xff] }
  0x1e   : > { %2254 = vmatpush.bf16.msra.mxu1 %v3326_v5  ;;  %v3332_v14 = vld [vmem:[#allocation3 + $0xa0] sm:$0xff]  ;;  %v3733_v22 = vld [vmem:[%s3726_s22 + $0x8] sm:$0xf]  ;;  %v803_v30 = vld [vmem:[%s3726_s22 + $0xc] sm:$0xf]  ;;  %s4122_s25 = scalar_lea.vmem %s4395_s4, %s3440_s23 }
  0x1f   : > { %2348 = vmatpush.bf16.msra.mxu2 %v3334_v6  ;;  %v3340_v15 = vld [vmem:[#allocation3 + $0xe0] sm:$0xff]  ;;  %v802_v27 = vld [vmem:[%s3726_s22 + $0x8] sm:$0xf]  ;;  %v413_v28 = vshll.u32 %v3733_v22, 16  ;;  %v417_v29 = vshrl.u32 %v3733_v22, 16  ;;  %v3331_v32 = vld [vmem:[#allocation3 + $0x98] sm:$0xff] }
  0x20   : > { %2442 = vmatpush.bf16.msra.mxu3 %v3342_v7  ;;  %v284_v16 = vld [vmem:[%s3726_s22] sm:$0xf]  ;;  %v285_v17 = vld [vmem:[%s3726_s22 + $0x4] sm:$0xf]  ;;  %v3740_v31 = vld [vmem:[%s3726_s22 + $0x10] sm:$0xf] }
  0x21   : > { %2161 = vmatpush.bf16.msra.mxu0 %v3317_v8  ;;  %318 = vst [vmem:[#allocation2] sm:$0xf] %v284_v16  ;;  %v357_v18 = vld [vmem:[%s3726_s22] sm:$0xf]  ;;  %v358_v21 = vld [vmem:[%s3726_s22 + $0x4] sm:$0xf]  ;;  %vm3750_vm4 = vmor %vm352_vm0, %vm391_vm1 }
  0x22   : > { %2255 = vmatpush.bf16.msra.mxu1 %v3325_v9  ;;  %319 = vst [vmem:[#allocation2 + $0x10] sm:$0xf] %v285_v17  ;;  %v394_v23 = vshrl.u32 %v357_v18, 16  ;;  %v397_v24 = vshll.u32 %v357_v18, 16  ;;  %v403_v25 = vshll.u32 %v358_v21, 16  ;;  %v407_v26 = vshrl.u32 %v358_v21, 16  ;;  %vm3762_vm5 = vmor %vm1315_vm2, %vm1316_vm3 }
  0x23   : > { %2349 = vmatpush.bf16.msra.mxu2 %v3333_v10  ;;  %v3339_v33 = vld [vmem:[#allocation3 + $0xd8] sm:$0xff]  ;;  %v3322_v39 = vld [vmem:[#allocation3 + $0x50] sm:$0xff]  ;;  %v3742_v40 = vrot.slane %v413_v28, 5  ;;  %v837_v41 = vshrl.u32 %v802_v27, 16  ;;  %v840_v42 = vshll.u32 %v802_v27, 16  ;;  %v846_v43 = vshll.u32 %v803_v30, 16 }
  0x24   : > { %2443 = vmatpush.bf16.msra.mxu3 %v3341_v11  ;;  %v396_v34 = vrot.slane %v394_v23, 4  ;;  %v399_v35 = vrot.slane %v397_v24, 5  ;;  %v405_v36 = vrot.slane %v403_v25, 5  ;;  %v409_v37 = vrot.slane %v407_v26, 4  ;;  %v1245_v44 = vld [vmem:[%s3726_s22 + $0x8] sm:$0xe] }
  0x25   : > { %2162 = vmatpush.bf16.msra.mxu0 %v3316_v12  ;;  %v850_v47 = vshrl.u32 %v803_v30, 16  ;;  %v856_v48 = vshll.u32 %v3740_v31, 16  ;;  %v1246_v49 = vld [vmem:[%s3726_s22 + $0xc] sm:$0xf]  ;;  %v286_v50 = vld [vmem:[%s3726_s22 + $0x8] sm:$0xf] }
  0x26   : > { %2256 = vmatpush.bf16.msra.mxu1 %v3324_v13  ;;  %v400_v45 = vor.u32 %v399_v35, %v396_v34  ;;  %v410_v46 = vor.u32 %v409_v37, %v405_v36  ;;  %v839_v52 = vrot.slane %v837_v41, 4  ;;  %v842_v53 = vrot.slane %v840_v42, 5  ;;  %v3756_v56 = vld [vmem:[%s3726_s22 + $0x10] sm:$0xf]  ;;  %v3313_v0 = vld [vmem:[#allocation3 + $0x8] sm:$0xff]  ;;  %v3312_v21 = vld [vmem:[#allocation3] sm:$0xff] }
  0x27   : > { %2350 = vmatpush.bf16.msra.mxu2 %v3332_v14  ;;  %v848_v54 = vrot.slane %v846_v43, 5  ;;  %v860_v55 = vshrl.u32 %v3740_v31, 16  ;;  %v3330_v57 = vld [vmem:[#allocation3 + $0x90] sm:$0xff]  ;;  %v852_v61 = vrot.slane %v850_v47, 4  ;;  %v3758_v62 = vrot.slane %v856_v48, 5  ;;  %v3321_v1 = vld [vmem:[#allocation3 + $0x48] sm:$0xff] }
  0x28   : > { %2444 = vmatpush.bf16.msra.mxu3 %v3340_v15  ;;  %v3338_v58 = vld [vmem:[#allocation3 + $0xd0] sm:$0xff]  ;;  %v401_v59 = vrot.slane %v400_v45, 4  ;;  %v411_v60 = vrot.slane %v410_v46, 4  ;;  %v843_v2 = vor.u32 %v842_v53, %v839_v52  ;;  %v2841_v3 = vrot.slane %v1245_v44, 9  ;;  %v287_v5 = vld [vmem:[%s3726_s22 + $0xc] sm:$0xf] }
  0x29   : > { %2163 = vmatpush.bf16.msra.mxu0 %v3315_v19  ;;  %v1320_v4 = vrot.slane %v1246_v49, 5  ;;  %320 = vst [vmem:[#allocation2 + $0x20] sm:$0xf] %v286_v50  ;;  %v3329_v6 = vld [vmem:[#allocation3 + $0x88] sm:$0xff]  ;;  %v853_v10 = vor.u32 %v852_v61, %v848_v54  ;;  %v1323_v11 = vrot.slane %v3756_v56, 5  ;;  %v419_v18 = vrot.slane %v417_v29, 4 }
  0x2a   : > { %2257 = vmatpush.bf16.msra.mxu1 %v3323_v20  ;;  %v3337_v7 = vld [vmem:[#allocation3 + $0xc8] sm:$0xff]  ;;  %v406_v8 = vsel %vm3750_vm4, %v401_v59, %v405_v36  ;;  %v416_v9 = vsel %vm3750_vm4, %v411_v60, %v3742_v40  ;;  %321 = vst [vmem:[#allocation2 + $0x30] sm:$0xf] %v287_v5  ;;  %v844_v13 = vrot.slane %v843_v2, 4  ;;  %v3777_v16 = vld [vmem:[%s3726_s22 + $0x10] sm:$0xf] }
  0x2b   : > { %2351 = vmatpush.bf16.msra.mxu2 %v3331_v32  ;;  %v360_v12 = vld [vmem:[%s3726_s22 + $0xc] sm:$0xf]  ;;  %766 = vst [vmem:[#allocation2 + $0x4] sm:$0xf] %v406_v8  ;;  %v1321_v14 = vsel %vm3762_vm5, %v2841_v3, %v1320_v4  ;;  %v1322_v15 = vrot.slane %v1320_v4, 4  ;;  %v854_v17 = vrot.slane %v853_v10, 4  ;;  %v420_v31 = vor.u32 %v419_v18, %v3742_v40 }
  0x2c   : > { %2445 = vmatpush.bf16.msra.mxu3 %v3339_v33  ;;  %767 = vst [vmem:[#allocation2 + $0x14] sm:$0xf] %v416_v9  ;;  %v423_v19 = vshll.u32 %v360_v12, 16  ;;  %v427_v20 = vshrl.u32 %v360_v12, 16  ;;  %v3320_v23 = vld [vmem:[#allocation3 + $0x40] sm:$0xff]  ;;  %v849_v26 = vsel %vm3750_vm4, %v844_v13, %v848_v54  ;;  %v433_v28 = vshll.u32 %v3777_v16, 16 }
  0x2d   : > { %2164 = vmatpush.bf16.msra.mxu0 %v3314_v38  ;;  %v2844_v24 = vld [vmem:[#allocation2] sm:$0xf]  ;;  %v3246_v25 = vld [vmem:[#allocation2 + $0xc] sm:$0xf0]  ;;  %v1324_v27 = vsel %vm3762_vm5, %v1322_v15, %v1323_v11  ;;  %1455 = vst [vmem:[#allocation2 + $0xc] sm:$0xf] %v1321_v14  ;;  %v859_v30 = vsel %vm3750_vm4, %v854_v17, %v3758_v62 }
  0x2e   : > { %2258 = vmatpush.bf16.msra.mxu1 %v3322_v39  ;;  %v805_v22 = vld [vmem:[%s3726_s22 + $0x14] sm:$0xf]  ;;  %v3328_v29 = vld [vmem:[#allocation3 + $0x80] sm:$0xff]  ;;  %1209 = vst [vmem:[#allocation2 + $0x8] sm:$0xf] %v849_v26  ;;  %v425_v32 = vrot.slane %v423_v19, 5  ;;  %v2845_v48 = vor.u32 %v3246_v25, %v2844_v24 }
  0x2f   : > { %2352 = vmatpush.bf16.msra.mxu2 %v3330_v57  ;;  %v429_v33 = vrot.slane %v427_v20, 4  ;;  %v806_v34 = vld [vmem:[%s3726_s22 + $0x18] sm:$0xf]  ;;  %1210 = vst [vmem:[#allocation2 + $0x18] sm:$0xf] %v859_v30  ;;  %v437_v35 = vshrl.u32 %v3777_v16, 16 }
  0x30   : > { %2446 = vmatpush.bf16.msra.mxu3 %v3338_v58  ;;  %v862_v36 = vrot.slane %v860_v55, 4  ;;  %v866_v37 = vshll.u32 %v805_v22, 16  ;;  %v870_v38 = vshrl.u32 %v805_v22, 16  ;;  %v3336_v39 = vld [vmem:[#allocation3 + $0xc0] sm:$0xff]  ;;  %1456 = vst [vmem:[#allocation2 + $0x1c] sm:$0xf] %v1324_v27 }
  0x31   : > { %2165 = vmatpush.bf16.msra.mxu0 %v3313_v0  ;;  %v421_v41 = vrot.slane %v420_v31, 4  ;;  %v430_v42 = vor.u32 %v429_v33, %v425_v32  ;;  %v435_v43 = vrot.slane %v433_v28, 5  ;;  %v876_v40 = vshll.u32 %v806_v34, 16  ;;  %v1248_v54 = vld [vmem:[%s3726_s22 + $0x14] sm:$0xf] }
  0x32   : > { %2259 = vmatpush.bf16.msra.mxu1 %v3321_v1  ;;  %v863_v44 = vor.u32 %v862_v36, %v3758_v62  ;;  %v868_v45 = vrot.slane %v866_v37, 5  ;;  %v872_v46 = vrot.slane %v870_v38, 4  ;;  %v880_v47 = vshrl.u32 %v806_v34, 16  ;;  %v3244_v49 = vld [vmem:[#allocation2 + $0x4] sm:$0xf] }
  0x33   : > { %2353 = vmatpush.bf16.msra.mxu2 %v3329_v6  ;;  %v426_v50 = vsel %vm3750_vm4, %v421_v41, %v425_v32  ;;  %v431_v52 = vrot.slane %v430_v42, 4  ;;  %v878_v53 = vrot.slane %v876_v40, 5  ;;  %v2846_v55 = vld [vmem:[#allocation2 + $0x10] sm:$0xf0]  ;;  %v1325_v59 = vrot.slane %v1323_v11, 4 }
  0x34   : > { %2447 = vmatpush.bf16.msra.mxu3 %v3337_v7  ;;  %768 = vst [vmem:[#allocation2 + $0x24] sm:$0xf] %v426_v50  ;;  %v864_v57 = vrot.slane %v863_v44, 4  ;;  %v873_v58 = vor.u32 %v872_v46, %v868_v45  ;;  %v2849_v60 = vor.u32 %v3244_v49, %v2846_v55  ;;  %v3245_v61 = vld [vmem:[#allocation2 + $0xc] sm:$0xf]  ;;  %v1326_v1 = vrot.slane %v1248_v54, 5 }
  0x35   : > { %2166 = vmatpush.bf16.msra.mxu0 %v3312_v21  ;;  %v436_v62 = vsel %vm3750_vm4, %v431_v52, %v435_v43  ;;  %v3804_v0 = vld [vmem:[%s3726_s22 + $0x18] sm:$0xf]  ;;  %v439_v2 = vrot.slane %v437_v35, 4  ;;  %v2852_v3 = vld [vmem:[#allocation2 + $0x8] sm:$0xf]  ;;  %v882_v10 = vrot.slane %v880_v47, 4 }
  0x36   : > { %2260 = vmatpush.bf16.msra.mxu1 %v3320_v23  ;;  %769 = vst [vmem:[#allocation2 + $0x34] sm:$0xf] %v436_v62  ;;  %v869_v4 = vsel %vm3750_vm4, %v864_v57, %v868_v45  ;;  %v874_v5 = vrot.slane %v873_v58, 4  ;;  %v1329_v56 = vrot.slane %v3804_v0, 5  ;;  %v3247_v6 = vld [vmem:[#allocation2 + $0x14] sm:$0xf0]  ;;  %v1327_v7 = vsel %vm3762_vm5, %v1325_v59, %v1326_v1 }
  0x37   : > { %2354 = vmatpush.bf16.msra.mxu2 %v3328_v29  ;;  %1211 = vst [vmem:[#allocation2 + $0x28] sm:$0xf] %v869_v4  ;;  %v1328_v8 = vrot.slane %v1326_v1, 4  ;;  %v440_v9 = vor.u32 %v439_v2, %v435_v43  ;;  %v2853_v11 = vor.u32 %v3247_v6, %v2852_v3  ;;  %v2854_v12 = vld [vmem:[#allocation2 + $0x18] sm:$0xf0]  ;;  %v883_v23 = vor.u32 %v882_v10, %v878_v53 }
  0x38   : > { %2448 = vmatpush.bf16.msra.mxu3 %v3336_v39  ;;  %2167 = vmatmul.bf16.vlgmr.msra.gmra.mxu0 %v2845_v48  ;;  %v879_v13 = vsel %vm3750_vm4, %v874_v5, %v878_v53  ;;  %1457 = vst [vmem:[#allocation2 + $0x2c] sm:$0xf] %v1327_v7  ;;  %v288_v14 = vld [vmem:[%s3726_s22 + $0x10] sm:$0xf]  ;;  %v2857_v15 = vor.u32 %v3245_v61, %v2854_v12  ;;  %v289_v17 = vld [vmem:[%s3726_s22 + $0x14] sm:$0xf] }
  0x39   : > { %2261 = vmatmul.bf16.vlgmr.msra.gmra.mxu1 %v2849_v60  ;;  %1212 = vst [vmem:[#allocation2 + $0x38] sm:$0xf] %v879_v13  ;;  %v1330_v16 = vsel %vm3762_vm5, %v1328_v8, %v1329_v56  ;;  %v362_v18 = vld [vmem:[%s3726_s22 + $0x14] sm:$0xf]  ;;  %v363_v19 = vld [vmem:[%s3726_s22 + $0x18] sm:$0xf] }
  0x3a   : > { %2355 = vmatmul.bf16.vlgmr.msra.gmra.mxu2 %v2853_v11  ;;  %1458 = vst [vmem:[#allocation2 + $0x3c] sm:$0xf] %v1330_v16  ;;  %v441_v20 = vrot.slane %v440_v9, 4  ;;  %v443_v21 = vshll.u32 %v362_v18, 16  ;;  %v447_v24 = vshrl.u32 %v362_v18, 16  ;;  %v453_v25 = vshll.u32 %v363_v19, 16 }
  0x3b   : > { %2449 = vmatmul.bf16.vlgmr.msra.gmra.mxu3 %v2857_v15  ;;  %322 = vst [vmem:[#allocation2 + $0x40] sm:$0xf] %v288_v14  ;;  %v2860_v26 = vld [vmem:[#allocation2 + $0x20] sm:$0xf]  ;;  %v3250_v27 = vld [vmem:[#allocation2 + $0x2c] sm:$0xf0] }
  0x3c   : > { %323 = vst [vmem:[#allocation2 + $0x50] sm:$0xf] %v289_v17  ;;  %v445_v28 = vrot.slane %v443_v21, 5  ;;  %v807_v22 = vld [vmem:[%s3726_s22 + $0x1c] sm:$0xf]  ;;  %v449_v30 = vrot.slane %v447_v24, 4  ;;  %v2861_v45 = vor.u32 %v3250_v27, %v2860_v26 }
  0x3d   : > { %v3248_v29 = vld [vmem:[#allocation2 + $0x24] sm:$0xf]  ;;  %v457_v31 = vshrl.u32 %v363_v19, 16  ;;  %v808_v32 = vld [vmem:[%s3726_s22 + $0x20] sm:$0xf]  ;;  %v455_v35 = vrot.slane %v453_v25, 5 }
  0x3e   : > { %v2862_v33 = vld [vmem:[#allocation2 + $0x30] sm:$0xf0]  ;;  %v446_v34 = vsel %vm3750_vm4, %v441_v20, %v445_v28  ;;  %v884_v36 = vrot.slane %v883_v23, 4  ;;  %v886_v37 = vshll.u32 %v807_v22, 16  ;;  %v450_v38 = vor.u32 %v449_v30, %v445_v28  ;;  %v1250_v42 = vld [vmem:[%s3726_s22 + $0x1c] sm:$0xf] }
  0x3f   : > { %770 = vst [vmem:[#allocation2 + $0x44] sm:$0xf] %v446_v34  ;;  %v890_v39 = vshrl.u32 %v807_v22, 16  ;;  %v896_v41 = vshll.u32 %v808_v32, 16  ;;  %v900_v40 = vshrl.u32 %v808_v32, 16  ;;  %v2865_v46 = vor.u32 %v3248_v29, %v2862_v33 }
  0x40   : > { %v888_v43 = vrot.slane %v886_v37, 5  ;;  %v1251_v44 = vld [vmem:[%s3726_s22 + $0x20] sm:$0xf]  ;;  %v2868_v47 = vld [vmem:[#allocation2 + $0x28] sm:$0xf]  ;;  %v451_v50 = vrot.slane %v450_v38, 4 }
  0x41   : > { %v3251_v48 = vld [vmem:[#allocation2 + $0x34] sm:$0xf0]  ;;  %v3249_v49 = vld [vmem:[#allocation2 + $0x2c] sm:$0xf]  ;;  %v892_v52 = vrot.slane %v890_v39, 4  ;;  %v898_v55 = vrot.slane %v896_v41, 5 }
  0x42   : > { %v2870_v53 = vld [vmem:[#allocation2 + $0x38] sm:$0xf0]  ;;  %v889_v54 = vsel %vm3750_vm4, %v884_v36, %v888_v43  ;;  %v1331_v57 = vrot.slane %v1329_v56, 4  ;;  %v1332_v58 = vrot.slane %v1250_v42, 5  ;;  %v456_v59 = vsel %vm3750_vm4, %v451_v50, %v455_v35  ;;  %v290_v62 = vld [vmem:[%s3726_s22 + $0x18] sm:$0xf] }
  0x43   : > { %v893_v60 = vor.u32 %v892_v52, %v888_v43  ;;  %1213 = vst [vmem:[#allocation2 + $0x48] sm:$0xf] %v889_v54  ;;  %v1335_v61 = vrot.slane %v1251_v44, 5  ;;  %v459_v0 = vrot.slane %v457_v31, 4  ;;  %v902_v3 = vrot.slane %v900_v40, 4 }
  0x44   : > { %771 = vst [vmem:[#allocation2 + $0x54] sm:$0xf] %v456_v59  ;;  %v1333_v1 = vsel %vm3762_vm5, %v1331_v57, %v1332_v58  ;;  %v1334_v2 = vrot.slane %v1332_v58, 4  ;;  %v364_v5 = vld [vmem:[%s3726_s22 + $0x1c] sm:$0xf]  ;;  %v2869_v6 = vor.u32 %v3251_v48, %v2868_v47  ;;  %v2873_v7 = vor.u32 %v3249_v49, %v2870_v53 }
  0x45   : > { %v894_v4 = vrot.slane %v893_v60, 4  ;;  %1459 = vst [vmem:[#allocation2 + $0x4c] sm:$0xf] %v1333_v1  ;;  %v460_v56 = vor.u32 %v459_v0, %v455_v35  ;;  %v291_v9 = vld [vmem:[%s3726_s22 + $0x1c] sm:$0xf]  ;;  %v903_v11 = vor.u32 %v902_v3, %v898_v55  ;;  %v463_v14 = vshll.u32 %v364_v5, 16 }
  0x46   : > { %v1336_v8 = vsel %vm3762_vm5, %v1334_v2, %v1335_v61  ;;  %324 = vst [vmem:[#allocation2 + $0x60] sm:$0xf] %v290_v62  ;;  %v365_v10 = vld [vmem:[%s3726_s22 + $0x20] sm:$0xf]  ;;  %v467_v15 = vshrl.u32 %v364_v5, 16  ;;  %v1337_v31 = vrot.slane %v1335_v61, 4 }
  0x47   : > { %v899_v12 = vsel %vm3750_vm4, %v894_v4, %v898_v55  ;;  %1460 = vst [vmem:[#allocation2 + $0x5c] sm:$0xf] %v1336_v8  ;;  %v461_v13 = vrot.slane %v460_v56, 4  ;;  %v473_v16 = vshll.u32 %v365_v10, 16  ;;  %v809_v17 = vld [vmem:[%s3726_s22 + $0x24] sm:$0xf] }
  0x48   : > { %2172 = vmatmul.bf16.gmra.mxu0 %v2861_v45  ;;  %1214 = vst [vmem:[#allocation2 + $0x58] sm:$0xf] %v899_v12  ;;  %v465_v18 = vrot.slane %v463_v14, 5  ;;  %v469_v19 = vrot.slane %v467_v15, 4  ;;  %v810_v20 = vld [vmem:[%s3726_s22 + $0x28] sm:$0xf] }
  0x49   : > { %2266 = vmatmul.bf16.gmra.mxu1 %v2865_v46  ;;  %325 = vst [vmem:[#allocation2 + $0x70] sm:$0xf] %v291_v9  ;;  %v904_v21 = vrot.slane %v903_v11, 4  ;;  %v906_v23 = vshll.u32 %v809_v17, 16  ;;  %v910_v24 = vshrl.u32 %v809_v17, 16  ;;  %v475_v27 = vrot.slane %v473_v16, 5 }
  0x4a   : > { %2360 = vmatmul.bf16.gmra.mxu2 %v2869_v6  ;;  %v466_v25 = vsel %vm3750_vm4, %v461_v13, %v465_v18  ;;  %v470_v26 = vor.u32 %v469_v19, %v465_v18  ;;  %v916_v28 = vshll.u32 %v810_v20, 16  ;;  %v1252_v22 = vld [vmem:[%s3726_s22 + $0x24] sm:$0xf]  ;;  %v477_v33 = vshrl.u32 %v365_v10, 16  ;;  %v3845_v36 = vld [vmem:[%s3726_s22 + $0x28] sm:$0xf] }
  0x4b   : > { %2454 = vmatmul.bf16.gmra.mxu3 %v2873_v7  ;;  %772 = vst [vmem:[#allocation2 + $0x64] sm:$0xf] %v466_v25  ;;  %v908_v29 = vrot.slane %v906_v23, 5  ;;  %v912_v30 = vrot.slane %v910_v24, 4  ;;  %v920_v35 = vshrl.u32 %v810_v20, 16  ;;  %v1338_v40 = vrot.slane %v1252_v22, 5 }
  0x4c   : > { %v471_v32 = vrot.slane %v470_v26, 4  ;;  %v918_v34 = vrot.slane %v916_v28, 5  ;;  %v2876_v37 = vld [vmem:[#allocation2 + $0x40] sm:$0xf]  ;;  %v3254_v38 = vld [vmem:[#allocation2 + $0x4c] sm:$0xf0] }
  0x4d   : > { %v3252_v39 = vld [vmem:[#allocation2 + $0x44] sm:$0xf]  ;;  %v2878_v41 = vld [vmem:[#allocation2 + $0x50] sm:$0xf0]  ;;  %v909_v42 = vsel %vm3750_vm4, %v904_v21, %v908_v29  ;;  %v913_v43 = vor.u32 %v912_v30, %v908_v29  ;;  %v1341_v44 = vrot.slane %v3845_v36, 5  ;;  %v1339_v53 = vsel %vm3762_vm5, %v1337_v31, %v1338_v40 }
  0x4e   : > { %v3253_v45 = vld [vmem:[#allocation2 + $0x4c] sm:$0xf]  ;;  %v2886_v46 = vld [vmem:[#allocation2 + $0x58] sm:$0xf0]  ;;  %v476_v47 = vsel %vm3750_vm4, %v471_v32, %v475_v27  ;;  %1215 = vst [vmem:[#allocation2 + $0x68] sm:$0xf] %v909_v42  ;;  %v2877_v1 = vor.u32 %v3254_v38, %v2876_v37  ;;  %v2881_v2 = vor.u32 %v3252_v39, %v2878_v41 }
  0x4f   : > { %v292_v48 = vld [vmem:[%s3726_s22 + $0x20] sm:$0xf]  ;;  %v2884_v49 = vld [vmem:[#allocation2 + $0x48] sm:$0xf]  ;;  %v3255_v50 = vld [vmem:[#allocation2 + $0x54] sm:$0xf0]  ;;  %v2889_v5 = vor.u32 %v3253_v45, %v2886_v46 }
  0x50   : > { %773 = vst [vmem:[#allocation2 + $0x74] sm:$0xf] %v476_v47  ;;  %v914_v52 = vrot.slane %v913_v43, 4  ;;  %v1340_v54 = vrot.slane %v1338_v40, 4  ;;  %v293_v55 = vld [vmem:[%s3726_s22 + $0x24] sm:$0xf]  ;;  %v2885_v9 = vor.u32 %v3255_v50, %v2884_v49 }
  0x51   : > { %1461 = vst [vmem:[#allocation2 + $0x6c] sm:$0xf] %v1339_v53  ;;  %v366_v57 = vld [vmem:[%s3726_s22 + $0x24] sm:$0xf]  ;;  %v367_v58 = vld [vmem:[%s3726_s22 + $0x28] sm:$0xf] }
  0x52   : > { %v919_v59 = vsel %vm3750_vm4, %v914_v52, %v918_v34  ;;  %v1342_v60 = vsel %vm3762_vm5, %v1340_v54, %v1341_v44  ;;  %326 = vst [vmem:[#allocation2 + $0x80] sm:$0xf] %v292_v48  ;;  %v479_v61 = vrot.slane %v477_v33, 4  ;;  %v483_v62 = vshll.u32 %v366_v57, 16  ;;  %v811_v0 = vld [vmem:[%s3726_s22 + $0x2c] sm:$0xf] }
  0x53   : > { %1216 = vst [vmem:[#allocation2 + $0x78] sm:$0xf] %v919_v59  ;;  %v487_v3 = vshrl.u32 %v366_v57, 16  ;;  %v493_v4 = vshll.u32 %v367_v58, 16  ;;  %v812_v7 = vld [vmem:[%s3726_s22 + $0x30] sm:$0xf] }
  0x54   : > { %1462 = vst [vmem:[#allocation2 + $0x7c] sm:$0xf] %v1342_v60  ;;  %v480_v56 = vor.u32 %v479_v61, %v475_v27  ;;  %v485_v6 = vrot.slane %v483_v62, 5  ;;  %v922_v8 = vrot.slane %v920_v35, 4  ;;  %v926_v11 = vshll.u32 %v811_v0, 16 }
  0x55   : > { %327 = vst [vmem:[#allocation2 + $0x90] sm:$0xf] %v293_v55  ;;  %v489_v10 = vrot.slane %v487_v3, 4  ;;  %v930_v12 = vshrl.u32 %v811_v0, 16  ;;  %v495_v14 = vrot.slane %v493_v4, 5  ;;  %v936_v16 = vshll.u32 %v812_v7, 16 }
  0x56   : > { %v481_v13 = vrot.slane %v480_v56, 4  ;;  %v923_v15 = vor.u32 %v922_v8, %v918_v34  ;;  %v497_v18 = vshrl.u32 %v367_v58, 16  ;;  %v928_v19 = vrot.slane %v926_v11, 5  ;;  %v1254_v21 = vld [vmem:[%s3726_s22 + $0x2c] sm:$0xf] }
  0x57   : > { %v490_v17 = vor.u32 %v489_v10, %v485_v6  ;;  %v932_v20 = vrot.slane %v930_v12, 4  ;;  %v1255_v25 = vld [vmem:[%s3726_s22 + $0x30] sm:$0xf]  ;;  %v938_v28 = vrot.slane %v936_v16, 5  ;;  %v940_v22 = vshrl.u32 %v812_v7, 16 }
  0x58   : > { %2177 = vmatmul.bf16.gmra.mxu0 %v2877_v1  ;;  %v486_v23 = vsel %vm3750_vm4, %v481_v13, %v485_v6  ;;  %v924_v24 = vrot.slane %v923_v15, 4  ;;  %v1343_v30 = vrot.slane %v1341_v44, 4  ;;  %v1344_v31 = vrot.slane %v1254_v21, 5  ;;  %v2892_v36 = vld [vmem:[#allocation2 + $0x60] sm:$0xf] }
  0x59   : > { %2271 = vmatmul.bf16.gmra.mxu1 %v2881_v2  ;;  %v491_v26 = vrot.slane %v490_v17, 4  ;;  %774 = vst [vmem:[#allocation2 + $0x84] sm:$0xf] %v486_v23  ;;  %v933_v27 = vor.u32 %v932_v20, %v928_v19  ;;  %v1347_v32 = vrot.slane %v1255_v25, 5  ;;  %v499_v35 = vrot.slane %v497_v18, 4 }
  0x5a   : > { %2365 = vmatmul.bf16.gmra.mxu2 %v2885_v9  ;;  %v929_v29 = vsel %vm3750_vm4, %v924_v24, %v928_v19  ;;  %v3258_v37 = vld [vmem:[#allocation2 + $0x6c] sm:$0xf0]  ;;  %v1345_v38 = vsel %vm3762_vm5, %v1343_v30, %v1344_v31  ;;  %v1346_v39 = vrot.slane %v1344_v31, 4  ;;  %v942_v41 = vrot.slane %v940_v22, 4  ;;  %v3256_v42 = vld [vmem:[#allocation2 + $0x64] sm:$0xf] }
  0x5b   : > { %2459 = vmatmul.bf16.gmra.mxu3 %v2889_v5  ;;  %v496_v33 = vsel %vm3750_vm4, %v491_v26, %v495_v14  ;;  %v934_v34 = vrot.slane %v933_v27, 4  ;;  %1217 = vst [vmem:[#allocation2 + $0x88] sm:$0xf] %v929_v29  ;;  %v2894_v43 = vld [vmem:[#allocation2 + $0x70] sm:$0xf0]  ;;  %v500_v46 = vor.u32 %v499_v35, %v495_v14  ;;  %v2893_v59 = vor.u32 %v3258_v37, %v2892_v36 }
  0x5c   : > { %775 = vst [vmem:[#allocation2 + $0x94] sm:$0xf] %v496_v33  ;;  %v294_v44 = vld [vmem:[%s3726_s22 + $0x28] sm:$0xf]  ;;  %v295_v45 = vld [vmem:[%s3726_s22 + $0x2c] sm:$0xf]  ;;  %v1348_v47 = vsel %vm3762_vm5, %v1346_v39, %v1347_v32  ;;  %v943_v50 = vor.u32 %v942_v41, %v938_v28  ;;  %v2897_v0 = vor.u32 %v3256_v42, %v2894_v43 }
  0x5d   : > { %v939_v40 = vsel %vm3750_vm4, %v934_v34, %v938_v28  ;;  %1463 = vst [vmem:[#allocation2 + $0x8c] sm:$0xf] %v1345_v38  ;;  %v368_v48 = vld [vmem:[%s3726_s22 + $0x2c] sm:$0xf]  ;;  %v369_v49 = vld [vmem:[%s3726_s22 + $0x30] sm:$0xf] }
  0x5e   : > { %1218 = vst [vmem:[#allocation2 + $0x98] sm:$0xf] %v939_v40  ;;  %v501_v52 = vrot.slane %v500_v46, 4  ;;  %v503_v53 = vshll.u32 %v368_v48, 16  ;;  %v507_v54 = vshrl.u32 %v368_v48, 16  ;;  %v513_v55 = vshll.u32 %v369_v49, 16 }
  0x5f   : > { %1464 = vst [vmem:[#allocation2 + $0x9c] sm:$0xf] %v1348_v47  ;;  %v2900_v57 = vld [vmem:[#allocation2 + $0x68] sm:$0xf]  ;;  %v813_v58 = vld [vmem:[%s3726_s22 + $0x34] sm:$0xf] }
  0x60   : > { %328 = vst [vmem:[#allocation2 + $0xa0] sm:$0xf] %v294_v44  ;;  %v3259_v60 = vld [vmem:[#allocation2 + $0x74] sm:$0xf0]  ;;  %v505_v61 = vrot.slane %v503_v53, 5  ;;  %v509_v62 = vrot.slane %v507_v54, 4 }
  0x61   : > { %329 = vst [vmem:[#allocation2 + $0xb0] sm:$0xf] %v295_v45  ;;  %v3257_v1 = vld [vmem:[#allocation2 + $0x6c] sm:$0xf]  ;;  %v814_v2 = vld [vmem:[%s3726_s22 + $0x38] sm:$0xf]  ;;  %v2901_v14 = vor.u32 %v3259_v60, %v2900_v57 }
  0x62   : > { %v944_v3 = vrot.slane %v943_v50, 4  ;;  %v946_v4 = vshll.u32 %v813_v58, 16  ;;  %v950_v5 = vshrl.u32 %v813_v58, 16  ;;  %v2902_v56 = vld [vmem:[#allocation2 + $0x78] sm:$0xf0]  ;;  %v506_v6 = vsel %vm3750_vm4, %v501_v52, %v505_v61 }
  0x63   : > { %v510_v7 = vor.u32 %v509_v62, %v505_v61  ;;  %v515_v8 = vrot.slane %v513_v55, 5  ;;  %v956_v9 = vshll.u32 %v814_v2, 16  ;;  %v1256_v10 = vld [vmem:[%s3726_s22 + $0x34] sm:$0xf]  ;;  %776 = vst [vmem:[#allocation2 + $0xa4] sm:$0xf] %v506_v6  ;;  %v2905_v21 = vor.u32 %v3257_v1, %v2902_v56 }
  0x64   : > { %v948_v11 = vrot.slane %v946_v4, 5  ;;  %v952_v12 = vrot.slane %v950_v5, 4  ;;  %v1349_v13 = vrot.slane %v1347_v32, 4  ;;  %v1257_v19 = vld [vmem:[%s3726_s22 + $0x38] sm:$0xf]  ;;  %v1350_v20 = vrot.slane %v1256_v10, 5 }
  0x65   : > { %v511_v15 = vrot.slane %v510_v7, 4  ;;  %v958_v18 = vrot.slane %v956_v9, 5  ;;  %v517_v24 = vshrl.u32 %v369_v49, 16  ;;  %v960_v28 = vshrl.u32 %v814_v2, 16  ;;  %v370_v29 = vld [vmem:[%s3726_s22 + $0x34] sm:$0xf] }
  0x66   : > { %v949_v16 = vsel %vm3750_vm4, %v944_v3, %v948_v11  ;;  %v953_v17 = vor.u32 %v952_v12, %v948_v11  ;;  %v1351_v26 = vsel %vm3762_vm5, %v1349_v13, %v1350_v20  ;;  %v1352_v27 = vrot.slane %v1350_v20, 4  ;;  %v296_v35 = vld [vmem:[%s3726_s22 + $0x30] sm:$0xf]  ;;  %v815_v36 = vld [vmem:[%s3726_s22 + $0x3c] sm:$0xf] }
  0x67   : > { %v516_v23 = vsel %vm3750_vm4, %v511_v15, %v515_v8  ;;  %1219 = vst [vmem:[#allocation2 + $0xa8] sm:$0xf] %v949_v16  ;;  %v1353_v22 = vrot.slane %v1257_v19, 5  ;;  %v519_v31 = vrot.slane %v517_v24, 4  ;;  %v523_v32 = vshll.u32 %v370_v29, 16 }
  0x68   : > { %2182 = vmatmul.bf16.gmra.mxu0 %v2893_v59  ;;  %777 = vst [vmem:[#allocation2 + $0xb4] sm:$0xf] %v516_v23  ;;  %v954_v25 = vrot.slane %v953_v17, 4  ;;  %v527_v33 = vshrl.u32 %v370_v29, 16  ;;  %v297_v37 = vld [vmem:[%s3726_s22 + $0x34] sm:$0xf] }
  0x69   : > { %2276 = vmatmul.bf16.gmra.mxu1 %v2897_v0  ;;  %1465 = vst [vmem:[#allocation2 + $0xac] sm:$0xf] %v1351_v26  ;;  %v1354_v34 = vsel %vm3762_vm5, %v1352_v27, %v1353_v22  ;;  %v371_v38 = vld [vmem:[%s3726_s22 + $0x38] sm:$0xf]  ;;  %v520_v39 = vor.u32 %v519_v31, %v515_v8  ;;  %v2908_v41 = vld [vmem:[#allocation2 + $0x80] sm:$0xf] }
  0x6a   : > { %2370 = vmatmul.bf16.gmra.mxu2 %v2901_v14  ;;  %v959_v30 = vsel %vm3750_vm4, %v954_v25, %v958_v18  ;;  %1466 = vst [vmem:[#allocation2 + $0xbc] sm:$0xf] %v1354_v34  ;;  %v3262_v42 = vld [vmem:[#allocation2 + $0x8c] sm:$0xf0]  ;;  %v525_v43 = vrot.slane %v523_v32, 5  ;;  %v529_v40 = vrot.slane %v527_v33, 4 }
  0x6b   : > { %2464 = vmatmul.bf16.gmra.mxu3 %v2905_v21  ;;  %1220 = vst [vmem:[#allocation2 + $0xb8] sm:$0xf] %v959_v30  ;;  %v533_v44 = vshll.u32 %v371_v38, 16  ;;  %v962_v45 = vrot.slane %v960_v28, 4  ;;  %v3260_v46 = vld [vmem:[#allocation2 + $0x84] sm:$0xf]  ;;  %v2909_v2 = vor.u32 %v3262_v42, %v2908_v41 }
  0x6c   : > { %330 = vst [vmem:[#allocation2 + $0xc0] sm:$0xf] %v296_v35  ;;  %v521_v47 = vrot.slane %v520_v39, 4  ;;  %v966_v48 = vshll.u32 %v815_v36, 16  ;;  %v2910_v49 = vld [vmem:[#allocation2 + $0x90] sm:$0xf0]  ;;  %v530_v50 = vor.u32 %v529_v40, %v525_v43 }
  0x6d   : > { %331 = vst [vmem:[#allocation2 + $0xd0] sm:$0xf] %v297_v37  ;;  %v3903_v52 = vrot.slane %v533_v44, 5  ;;  %v816_v53 = vld [vmem:[%s3726_s22 + $0x40] sm:$0xf]  ;;  %v963_v54 = vor.u32 %v962_v45, %v958_v18  ;;  %v970_v55 = vshrl.u32 %v815_v36, 16  ;;  %v2913_v3 = vor.u32 %v3260_v46, %v2910_v49 }
  0x6e   : > { %v526_v57 = vsel %vm3750_vm4, %v521_v47, %v525_v43  ;;  %v968_v58 = vrot.slane %v966_v48, 5  ;;  %v976_v59 = vshll.u32 %v816_v53, 16  ;;  %v1258_v60 = vld [vmem:[%s3726_s22 + $0x3c] sm:$0xf]  ;;  %v531_v61 = vrot.slane %v530_v50, 4 }
  0x6f   : > { %778 = vst [vmem:[#allocation2 + $0xc4] sm:$0xf] %v526_v57  ;;  %v964_v62 = vrot.slane %v963_v54, 4  ;;  %v972_v0 = vrot.slane %v970_v55, 4  ;;  %v1355_v1 = vrot.slane %v1353_v22, 4  ;;  %v1356_v56 = vrot.slane %v1258_v60, 5 }
  0x70   : > { %v2916_v4 = vld [vmem:[#allocation2 + $0x88] sm:$0xf]  ;;  %v3910_v5 = vld [vmem:[%s3726_s22 + $0x40] sm:$0xf]  ;;  %v3263_v6 = vld [vmem:[#allocation2 + $0x94] sm:$0xf0]  ;;  %v536_v8 = vsel %vm3750_vm4, %v531_v61, %v3903_v52 }
  0x71   : > { %v3261_v7 = vld [vmem:[#allocation2 + $0x8c] sm:$0xf]  ;;  %v969_v9 = vsel %vm3750_vm4, %v964_v62, %v968_v58  ;;  %v973_v10 = vor.u32 %v972_v0, %v968_v58  ;;  %v978_v11 = vrot.slane %v976_v59, 5  ;;  %v2918_v12 = vld [vmem:[#allocation2 + $0x98] sm:$0xf0]  ;;  %v1357_v13 = vsel %vm3762_vm5, %v1355_v1, %v1356_v56 }
  0x72   : > { %779 = vst [vmem:[#allocation2 + $0xd4] sm:$0xf] %v536_v8  ;;  %v1358_v14 = vrot.slane %v1356_v56, 4  ;;  %v1359_v15 = vrot.slane %v3910_v5, 5  ;;  %v2917_v17 = vor.u32 %v3263_v6, %v2916_v4  ;;  %v2921_v19 = vor.u32 %v3261_v7, %v2918_v12  ;;  %v372_v24 = vld [vmem:[%s3726_s22 + $0x3c] sm:$0xf] }
  0x73   : > { %v974_v16 = vrot.slane %v973_v10, 4  ;;  %1221 = vst [vmem:[#allocation2 + $0xc8] sm:$0xf] %v969_v9  ;;  %v537_v20 = vshrl.u32 %v371_v38, 16  ;;  %v980_v23 = vshrl.u32 %v816_v53, 16  ;;  %v543_v25 = vshll.u32 %v372_v24, 16 }
  0x74   : > { %v1360_v18 = vsel %vm3762_vm5, %v1358_v14, %v1359_v15  ;;  %1467 = vst [vmem:[#allocation2 + $0xcc] sm:$0xf] %v1357_v13  ;;  %v547_v26 = vshrl.u32 %v372_v24, 16  ;;  %v817_v29 = vld [vmem:[%s3726_s22 + $0x44] sm:$0xf]  ;;  %v1361_v59 = vrot.slane %v1359_v15, 4 }
  0x75   : > { %v979_v21 = vsel %vm3750_vm4, %v974_v16, %v978_v11  ;;  %1468 = vst [vmem:[#allocation2 + $0xdc] sm:$0xf] %v1360_v18  ;;  %v539_v27 = vrot.slane %v537_v20, 4  ;;  %v545_v28 = vrot.slane %v543_v25, 5  ;;  %v982_v30 = vrot.slane %v980_v23, 4 }
  0x76   : > { %1222 = vst [vmem:[#allocation2 + $0xd8] sm:$0xf] %v979_v21  ;;  %v549_v22 = vrot.slane %v547_v26, 4  ;;  %v298_v31 = vld [vmem:[%s3726_s22 + $0x38] sm:$0xf]  ;;  %v986_v38 = vshll.u32 %v817_v29, 16 }
  0x77   : > { %v299_v32 = vld [vmem:[%s3726_s22 + $0x3c] sm:$0xf]  ;;  %332 = vst [vmem:[#allocation2 + $0xe0] sm:$0xf] %v298_v31  ;;  %v373_v33 = vld [vmem:[%s3726_s22 + $0x40] sm:$0xf]  ;;  %v540_v34 = vor.u32 %v539_v27, %v3903_v52  ;;  %v983_v36 = vor.u32 %v982_v30, %v978_v11 }
  0x78   : > { %2187 = vmatmul.bf16.gmra.mxu0 %v2909_v2  ;;  %v550_v35 = vor.u32 %v549_v22, %v545_v28  ;;  %333 = vst [vmem:[#allocation2 + $0xf0] sm:$0xf] %v299_v32  ;;  %v553_v37 = vshll.u32 %v373_v33, 16  ;;  %v2924_v39 = vld [vmem:[#allocation2 + $0xa0] sm:$0xf]  ;;  %v988_v48 = vrot.slane %v986_v38, 5 }
  0x79   : > { %2281 = vmatmul.bf16.gmra.mxu1 %v2913_v3  ;;  %v3266_v41 = vld [vmem:[#allocation2 + $0xac] sm:$0xf0]  ;;  %v3264_v42 = vld [vmem:[#allocation2 + $0xa4] sm:$0xf]  ;;  %v541_v43 = vrot.slane %v540_v34, 4  ;;  %v984_v47 = vrot.slane %v983_v36, 4 }
  0x7a   : > { %2375 = vmatmul.bf16.gmra.mxu2 %v2917_v17  ;;  %v551_v40 = vrot.slane %v550_v35, 4  ;;  %v818_v44 = vld [vmem:[%s3726_s22 + $0x48] sm:$0xf]  ;;  %v2926_v45 = vld [vmem:[#allocation2 + $0xb0] sm:$0xf0]  ;;  %v3931_v46 = vrot.slane %v553_v37, 5  ;;  %v2925_v1 = vor.u32 %v3266_v41, %v2924_v39 }
  0x7b   : > { %2469 = vmatmul.bf16.gmra.mxu3 %v2921_v19  ;;  %v546_v49 = vsel %vm3750_vm4, %v541_v43, %v545_v28  ;;  %v990_v50 = vshrl.u32 %v817_v29, 16  ;;  %v996_v52 = vshll.u32 %v818_v44, 16  ;;  %v1260_v53 = vld [vmem:[%s3726_s22 + $0x44] sm:$0xf]  ;;  %v3937_v54 = vld [vmem:[%s3726_s22 + $0x48] sm:$0xf]  ;;  %v989_v58 = vsel %vm3750_vm4, %v984_v47, %v988_v48 }
  0x7c   : > { %v2932_v55 = vld [vmem:[#allocation2 + $0xa8] sm:$0xf]  ;;  %v556_v57 = vsel %vm3750_vm4, %v551_v40, %v3931_v46  ;;  %780 = vst [vmem:[#allocation2 + $0xe4] sm:$0xf] %v546_v49  ;;  %v1362_v60 = vrot.slane %v1260_v53, 5  ;;  %v1365_v0 = vrot.slane %v3937_v54, 5  ;;  %v2929_v2 = vor.u32 %v3264_v42, %v2926_v45 }
  0x7d   : > { %v3265_v61 = vld [vmem:[#allocation2 + $0xac] sm:$0xf]  ;;  %781 = vst [vmem:[#allocation2 + $0xf4] sm:$0xf] %v556_v57  ;;  %v992_v62 = vrot.slane %v990_v50, 4  ;;  %v998_v7 = vrot.slane %v996_v52, 5 }
  0x7e   : > { %v3267_v3 = vld [vmem:[#allocation2 + $0xb4] sm:$0xf0]  ;;  %1223 = vst [vmem:[#allocation2 + $0xe8] sm:$0xf] %v989_v58  ;;  %v1363_v4 = vsel %vm3762_vm5, %v1361_v59, %v1362_v60  ;;  %v1364_v5 = vrot.slane %v1362_v60, 4  ;;  %v557_v12 = vshrl.u32 %v373_v33, 16 }
  0x7f   : > { %v2934_v56 = vld [vmem:[#allocation2 + $0xb8] sm:$0xf0]  ;;  %v993_v6 = vor.u32 %v992_v62, %v988_v48  ;;  %1469 = vst [vmem:[#allocation2 + $0xec] sm:$0xf] %v1363_v4  ;;  %v2933_v9 = vor.u32 %v3267_v3, %v2932_v55  ;;  %v374_v13 = vld [vmem:[%s3726_s22 + $0x44] sm:$0xf] }
  0x80   : > { %v1366_v8 = vsel %vm3762_vm5, %v1364_v5, %v1365_v0  ;;  %v2937_v11 = vor.u32 %v3265_v61, %v2934_v56  ;;  %v819_v14 = vld [vmem:[%s3726_s22 + $0x4c] sm:$0xf]  ;;  %v1000_v16 = vshrl.u32 %v818_v44, 16  ;;  %v563_v17 = vshll.u32 %v374_v13, 16  ;;  %v375_v25 = vld [vmem:[%s3726_s22 + $0x48] sm:$0xf] }
  0x81   : > { %v994_v10 = vrot.slane %v993_v6, 4  ;;  %1470 = vst [vmem:[#allocation2 + $0xfc] sm:$0xf] %v1366_v8  ;;  %v567_v18 = vshrl.u32 %v374_v13, 16  ;;  %v1006_v19 = vshll.u32 %v819_v14, 16  ;;  %v1010_v20 = vshrl.u32 %v819_v14, 16 }
  0x82   : > { %v559_v21 = vrot.slane %v557_v12, 4  ;;  %v565_v23 = vrot.slane %v563_v17, 5  ;;  %v573_v28 = vshll.u32 %v375_v25, 16  ;;  %v3956_v22 = vld [vmem:[%s3726_s22 + $0x50] sm:$0xf]  ;;  %v1002_v29 = vrot.slane %v1000_v16, 4 }
  0x83   : > { %v999_v15 = vsel %vm3750_vm4, %v994_v10, %v998_v7  ;;  %v569_v24 = vrot.slane %v567_v18, 4  ;;  %v1262_v30 = vld [vmem:[%s3726_s22 + $0x4c] sm:$0xf]  ;;  %v1008_v31 = vrot.slane %v1006_v19, 5  ;;  %v1012_v32 = vrot.slane %v1010_v20, 4 }
  0x84   : > { %1224 = vst [vmem:[#allocation2 + $0xf8] sm:$0xf] %v999_v15  ;;  %v560_v26 = vor.u32 %v559_v21, %v3931_v46  ;;  %v1016_v33 = vshll.u32 %v3956_v22, 16  ;;  %v2940_v34 = vld [vmem:[#allocation2 + $0xc0] sm:$0xf]  ;;  %v575_v39 = vrot.slane %v573_v28, 5  ;;  %v1003_v43 = vor.u32 %v1002_v29, %v998_v7 }
  0x85   : > { %v570_v27 = vor.u32 %v569_v24, %v565_v23  ;;  %v3270_v35 = vld [vmem:[#allocation2 + $0xcc] sm:$0xf0]  ;;  %v3268_v36 = vld [vmem:[#allocation2 + $0xc4] sm:$0xf]  ;;  %v1368_v41 = vrot.slane %v1262_v30, 5  ;;  %v1013_v40 = vor.u32 %v1012_v32, %v1008_v31  ;;  %v1367_v49 = vrot.slane %v1365_v0, 4 }
  0x86   : > { %v561_v37 = vrot.slane %v560_v26, 4  ;;  %v2942_v42 = vld [vmem:[#allocation2 + $0xd0] sm:$0xf0]  ;;  %v3960_v44 = vrot.slane %v1016_v33, 5  ;;  %v3963_v45 = vld [vmem:[%s3726_s22 + $0x50] sm:$0xf]  ;;  %v2941_v57 = vor.u32 %v3270_v35, %v2940_v34 }
  0x87   : > { %v571_v38 = vrot.slane %v570_v27, 4  ;;  %v300_v46 = vld [vmem:[%s3726_s22 + $0x40] sm:$0xf]  ;;  %v301_v47 = vld [vmem:[%s3726_s22 + $0x44] sm:$0xf]  ;;  %v1004_v52 = vrot.slane %v1003_v43, 4  ;;  %v2945_v58 = vor.u32 %v3268_v36, %v2942_v42 }
  0x88   : > { %2192 = vmatmul.bf16.gmra.mxu0 %v2925_v1  ;;  %v566_v48 = vsel %vm3750_vm4, %v561_v37, %v565_v23  ;;  %334 = vst [vmem:[#allocation2 + $0x100] sm:$0xf] %v300_v46  ;;  %v1014_v53 = vrot.slane %v1013_v40, 4  ;;  %v1370_v54 = vrot.slane %v1368_v41, 4  ;;  %v1371_v55 = vrot.slane %v3963_v45, 5 }
  0x89   : > { %2286 = vmatmul.bf16.gmra.mxu1 %v2929_v2  ;;  %v576_v50 = vsel %vm3750_vm4, %v571_v38, %v575_v39  ;;  %335 = vst [vmem:[#allocation2 + $0x110] sm:$0xf] %v301_v47  ;;  %v2948_v59 = vld [vmem:[#allocation2 + $0xc8] sm:$0xf]  ;;  %v3271_v60 = vld [vmem:[#allocation2 + $0xd4] sm:$0xf0]  ;;  %v1009_v61 = vsel %vm3750_vm4, %v1004_v52, %v1008_v31  ;;  %v1369_v2 = vsel %vm3762_vm5, %v1367_v49, %v1368_v41 }
  0x8a   : > { %2380 = vmatmul.bf16.gmra.mxu2 %v2933_v9  ;;  %782 = vst [vmem:[#allocation2 + $0x104] sm:$0xf] %v566_v48  ;;  %v1019_v62 = vsel %vm3750_vm4, %v1014_v53, %v3960_v44  ;;  %v3269_v0 = vld [vmem:[#allocation2 + $0xcc] sm:$0xf]  ;;  %v2950_v1 = vld [vmem:[#allocation2 + $0xd8] sm:$0xf0]  ;;  %v1372_v3 = vsel %vm3762_vm5, %v1370_v54, %v1371_v55  ;;  %v2949_v4 = vor.u32 %v3271_v60, %v2948_v59 }
  0x8b   : > { %2474 = vmatmul.bf16.gmra.mxu3 %v2937_v11  ;;  %783 = vst [vmem:[#allocation2 + $0x114] sm:$0xf] %v576_v50  ;;  %v2953_v5 = vor.u32 %v3269_v0, %v2950_v1  ;;  %v577_v56 = vshrl.u32 %v375_v25, 16  ;;  %v376_v6 = vld [vmem:[%s3726_s22 + $0x4c] sm:$0xf]  ;;  %v1020_v9 = vshrl.u32 %v3956_v22, 16 }
  0x8c   : > { %1225 = vst [vmem:[#allocation2 + $0x108] sm:$0xf] %v1009_v61  ;;  %v583_v7 = vshll.u32 %v376_v6, 16  ;;  %v587_v8 = vshrl.u32 %v376_v6, 16  ;;  %v821_v13 = vld [vmem:[%s3726_s22 + $0x54] sm:$0xf] }
  0x8d   : > { %1226 = vst [vmem:[#allocation2 + $0x118] sm:$0xf] %v1019_v62  ;;  %v579_v10 = vrot.slane %v577_v56, 4  ;;  %v3985_v14 = vld [vmem:[%s3726_s22 + $0x50] sm:$0xf]  ;;  %v1022_v21 = vrot.slane %v1020_v9, 4 }
  0x8e   : > { %1471 = vst [vmem:[#allocation2 + $0x10c] sm:$0xf] %v1369_v2  ;;  %v585_v11 = vrot.slane %v583_v7, 5  ;;  %v589_v12 = vrot.slane %v587_v8, 4  ;;  %v3988_v15 = vld [vmem:[%s3726_s22 + $0x58] sm:$0xf] }
  0x8f   : > { %1472 = vst [vmem:[#allocation2 + $0x11c] sm:$0xf] %v1372_v3  ;;  %v580_v16 = vor.u32 %v579_v10, %v575_v39  ;;  %v593_v18 = vshll.u32 %v3985_v14, 16  ;;  %v2956_v19 = vld [vmem:[#allocation2 + $0xe0] sm:$0xf]  ;;  %v1026_v23 = vshll.u32 %v821_v13, 16  ;;  %v1023_v31 = vor.u32 %v1022_v21, %v3960_v44 }
  0x90   : > { %v590_v17 = vor.u32 %v589_v12, %v585_v11  ;;  %v3274_v20 = vld [vmem:[#allocation2 + $0xec] sm:$0xf0]  ;;  %v1030_v24 = vshrl.u32 %v821_v13, 16  ;;  %v1036_v25 = vshll.u32 %v3988_v15, 16  ;;  %v3272_v26 = vld [vmem:[#allocation2 + $0xe4] sm:$0xf] }
  0x91   : > { %v581_v27 = vrot.slane %v580_v16, 4  ;;  %v3992_v22 = vrot.slane %v593_v18, 5  ;;  %v1264_v29 = vld [vmem:[%s3726_s22 + $0x54] sm:$0xf]  ;;  %v1028_v32 = vrot.slane %v1026_v23, 5  ;;  %v1024_v41 = vrot.slane %v1023_v31, 4 }
  0x92   : > { %v591_v28 = vrot.slane %v590_v17, 4  ;;  %v2958_v30 = vld [vmem:[#allocation2 + $0xf0] sm:$0xf0]  ;;  %v1032_v33 = vrot.slane %v1030_v24, 4  ;;  %v3996_v34 = vrot.slane %v1036_v25, 5  ;;  %v1373_v43 = vrot.slane %v1371_v55, 4 }
  0x93   : > { %v302_v35 = vld [vmem:[%s3726_s22 + $0x48] sm:$0xf]  ;;  %v303_v36 = vld [vmem:[%s3726_s22 + $0x4c] sm:$0xf]  ;;  %v586_v37 = vsel %vm3750_vm4, %v581_v27, %v585_v11  ;;  %v4006_v39 = vld [vmem:[%s3726_s22 + $0x58] sm:$0xf]  ;;  %v2957_v44 = vor.u32 %v3274_v20, %v2956_v19  ;;  %v2961_v47 = vor.u32 %v3272_v26, %v2958_v30  ;;  %v1029_v49 = vsel %vm3750_vm4, %v1024_v41, %v1028_v32 }
  0x94   : > { %v596_v38 = vsel %vm3750_vm4, %v591_v28, %v3992_v22  ;;  %336 = vst [vmem:[#allocation2 + $0x120] sm:$0xf] %v302_v35  ;;  %v1033_v42 = vor.u32 %v1032_v33, %v1028_v32  ;;  %v1374_v40 = vrot.slane %v1264_v29, 5  ;;  %v2964_v45 = vld [vmem:[#allocation2 + $0xe8] sm:$0xf]  ;;  %v1377_v46 = vrot.slane %v4006_v39, 5 }
  0x95   : > { %337 = vst [vmem:[#allocation2 + $0x130] sm:$0xf] %v303_v36  ;;  %v3275_v48 = vld [vmem:[#allocation2 + $0xf4] sm:$0xf0]  ;;  %v3273_v53 = vld [vmem:[#allocation2 + $0xec] sm:$0xf] }
  0x96   : > { %784 = vst [vmem:[#allocation2 + $0x124] sm:$0xf] %v586_v37  ;;  %v1034_v50 = vrot.slane %v1033_v42, 4  ;;  %v1376_v52 = vrot.slane %v1374_v40, 4  ;;  %v2966_v54 = vld [vmem:[#allocation2 + $0xf8] sm:$0xf0]  ;;  %v1375_v55 = vsel %vm3762_vm5, %v1373_v43, %v1374_v40  ;;  %v2965_v59 = vor.u32 %v3275_v48, %v2964_v45 }
  0x97   : > { %785 = vst [vmem:[#allocation2 + $0x134] sm:$0xf] %v596_v38  ;;  %v2969_v60 = vor.u32 %v3273_v53, %v2966_v54  ;;  %v378_v61 = vld [vmem:[%s3726_s22 + $0x54] sm:$0xf]  ;;  %v823_v62 = vld [vmem:[%s3726_s22 + $0x5c] sm:$0xf] }
  0x98   : > { %2197 = vmatmul.bf16.gmra.mxu0 %v2941_v57  ;;  %v1039_v57 = vsel %vm3750_vm4, %v1034_v50, %v3996_v34  ;;  %1227 = vst [vmem:[#allocation2 + $0x128] sm:$0xf] %v1029_v49  ;;  %v597_v0 = vshrl.u32 %v3985_v14, 16  ;;  %v1040_v1 = vshrl.u32 %v3988_v15, 16  ;;  %v603_v2 = vshll.u32 %v378_v61, 16 }
  0x99   : > { %2291 = vmatmul.bf16.gmra.mxu1 %v2945_v58  ;;  %v1378_v58 = vsel %vm3762_vm5, %v1376_v52, %v1377_v46  ;;  %1228 = vst [vmem:[#allocation2 + $0x138] sm:$0xf] %v1039_v57  ;;  %v607_v3 = vshrl.u32 %v378_v61, 16  ;;  %v4025_v7 = vld [vmem:[%s3726_s22 + $0x58] sm:$0xf]  ;;  %v1379_v36 = vrot.slane %v1377_v46, 4 }
  0x9a   : > { %2385 = vmatmul.bf16.gmra.mxu2 %v2949_v4  ;;  %1473 = vst [vmem:[#allocation2 + $0x12c] sm:$0xf] %v1375_v55  ;;  %v1046_v4 = vshll.u32 %v823_v62, 16  ;;  %v599_v56 = vrot.slane %v597_v0, 4  ;;  %v1042_v6 = vrot.slane %v1040_v1, 4  ;;  %v605_v8 = vrot.slane %v603_v2, 5 }
  0x9b   : > { %2479 = vmatmul.bf16.gmra.mxu3 %v2953_v5  ;;  %1474 = vst [vmem:[#allocation2 + $0x13c] sm:$0xf] %v1378_v58  ;;  %v1050_v5 = vshrl.u32 %v823_v62, 16  ;;  %v609_v9 = vrot.slane %v607_v3, 4  ;;  %v613_v11 = vshll.u32 %v4025_v7, 16  ;;  %vm351_vm1 = vcmask 1043456  }
  0x9c   : > { %v600_v10 = vor.u32 %v599_v56, %v3992_v22  ;;  %v4030_v12 = vld [vmem:[%s3726_s22 + $0x60] sm:$0xf]  ;;  %v1043_v13 = vor.u32 %v1042_v6, %v3996_v34  ;;  %v1048_v15 = vrot.slane %v1046_v4, 5  ;;  %v3278_v19 = vld [vmem:[#allocation2 + $0x10c] sm:$0xf0]  ;;  %vm4315_vm2 = vmand %vm351_vm1, %vm352_vm0 }
  0x9d   : > { %v610_v14 = vor.u32 %v609_v9, %v605_v8  ;;  %v1052_v16 = vrot.slane %v1050_v5, 4  ;;  %v1056_v17 = vshll.u32 %v4030_v12, 16  ;;  %v2972_v18 = vld [vmem:[#allocation2 + $0x100] sm:$0xf]  ;;  %v3276_v20 = vld [vmem:[#allocation2 + $0x104] sm:$0xf] }
  0x9e   : > { %v601_v21 = vrot.slane %v600_v10, 4  ;;  %v4034_v23 = vrot.slane %v613_v11, 5  ;;  %v1044_v24 = vrot.slane %v1043_v13, 4  ;;  %v2974_v25 = vld [vmem:[#allocation2 + $0x110] sm:$0xf0]  ;;  %v2973_v43 = vor.u32 %v3278_v19, %v2972_v18 }
  0x9f   : > { %v611_v26 = vrot.slane %v610_v14, 4  ;;  %v1053_v27 = vor.u32 %v1052_v16, %v1048_v15  ;;  %v4036_v28 = vrot.slane %v1056_v17, 5  ;;  %v1266_v22 = vld [vmem:[%s3726_s22 + $0x5c] sm:$0xf]  ;;  %v304_v29 = vld [vmem:[%s3726_s22 + $0x50] sm:$0xf]  ;;  %v2977_v40 = vor.u32 %v3276_v20, %v2974_v25 }
  0xa0   : > { %v305_v30 = vld [vmem:[%s3726_s22 + $0x54] sm:$0xf]  ;;  %v606_v31 = vsel %vm3750_vm4, %v601_v21, %v605_v8  ;;  %v4044_v32 = vld [vmem:[%s3726_s22 + $0x60] sm:$0xf]  ;;  %338 = vst [vmem:[#allocation2 + $0x140] sm:$0xf] %v304_v29  ;;  %v1049_v41 = vsel %vm3750_vm4, %v1044_v24, %v1048_v15 }
  0xa1   : > { %v4046_v33 = vld [vmem:[#allocation5] ss:$0 sm:$0xff]  ;;  %v616_v34 = vsel %vm3750_vm4, %v611_v26, %v4034_v23  ;;  %v1054_v35 = vrot.slane %v1053_v27, 4  ;;  %v1380_v37 = vrot.slane %v1266_v22, 5  ;;  %v2980_v38 = vld [vmem:[#allocation2 + $0x108] sm:$0xf] }
  0xa2   : > { %339 = vst [vmem:[#allocation2 + $0x150] sm:$0xf] %v305_v30  ;;  %v1383_v42 = vrot.slane %v4044_v32, 5  ;;  %v3277_v48 = vld [vmem:[#allocation2 + $0x10c] sm:$0xf] }
  0xa3   : > { %786 = vst [vmem:[#allocation2 + $0x144] sm:$0xf] %v606_v31  ;;  %v1059_v45 = vsel %vm3750_vm4, %v1054_v35, %v4036_v28  ;;  %v2982_v49 = vld [vmem:[#allocation2 + $0x118] sm:$0xf0]  ;;  %v1381_v50 = vsel %vm3762_vm5, %v1379_v36, %v1380_v37  ;;  %v825_v58 = vld [vmem:[%s3726_s22 + $0x64] sm:$0xf] }
  0xa4   : > { %787 = vst [vmem:[#allocation2 + $0x154] sm:$0xf] %v616_v34  ;;  %v2985_v55 = vor.u32 %v3277_v48, %v2982_v49  ;;  %v380_v57 = vld [vmem:[%s3726_s22 + $0x5c] sm:$0xf]  ;;  %v1066_v0 = vshll.u32 %v825_v58, 16  ;;  %v1070_v1 = vshrl.u32 %v825_v58, 16 }
  0xa5   : > { %1229 = vst [vmem:[#allocation2 + $0x148] sm:$0xf] %v1049_v41  ;;  %v623_v61 = vshll.u32 %v380_v57, 16  ;;  %v627_v62 = vshrl.u32 %v380_v57, 16  ;;  %v4071_v5 = vld [vmem:[%s3726_s22 + $0x60] sm:$0xf] }
  0xa6   : > { %1230 = vst [vmem:[#allocation2 + $0x158] sm:$0xf] %v1059_v45  ;;  %v633_v10 = vshll.u32 %v4071_v5, 16  ;;  %v2988_v13 = vld [vmem:[#allocation2 + $0x120] sm:$0xf]  ;;  %v1068_v17 = vrot.slane %v1066_v0, 5 }
  0xa7   : > { %1475 = vst [vmem:[#allocation2 + $0x14c] sm:$0xf] %v1381_v50  ;;  %v625_v56 = vrot.slane %v623_v61, 5  ;;  %v629_v6 = vrot.slane %v627_v62, 4  ;;  %v3282_v14 = vld [vmem:[#allocation2 + $0x12c] sm:$0xf0] }
  0xa8   : > { %2202 = vmatmul.bf16.gmra.mxu0 %v2957_v44  ;;  %v3279_v44 = vld [vmem:[#allocation2 + $0x114] sm:$0xf0]  ;;  %v4077_v16 = vld [vmem:[%s3726_s22 + $0x68] sm:$0xf]  ;;  %v1072_v18 = vrot.slane %v1070_v1, 4  ;;  %v4079_v24 = vrot.slane %v633_v10, 5 }
  0xa9   : > { %2296 = vmatmul.bf16.gmra.mxu1 %v2961_v47  ;;  %v1382_v47 = vrot.slane %v1380_v37, 4  ;;  %v2981_v53 = vor.u32 %v3279_v44, %v2980_v38  ;;  %v630_v15 = vor.u32 %v629_v6, %v625_v56  ;;  %v3280_v20 = vld [vmem:[#allocation2 + $0x124] sm:$0xf]  ;;  %v2990_v21 = vld [vmem:[#allocation2 + $0x130] sm:$0xf0]  ;;  %v1076_v36 = vshll.u32 %v4077_v16, 16 }
  0xaa   : > { %2390 = vmatmul.bf16.gmra.mxu2 %v2965_v59  ;;  %v617_v59 = vshrl.u32 %v4025_v7, 16  ;;  %v1268_v22 = vld [vmem:[%s3726_s22 + $0x64] sm:$0xf]  ;;  %v4083_v29 = vld [vmem:[%s3726_s22 + $0x68] sm:$0xf]  ;;  %v1385_v41 = vrot.slane %v1383_v42, 4 }
  0xab   : > { %2484 = vmatmul.bf16.gmra.mxu3 %v2969_v60  ;;  %v1384_v52 = vsel %vm3762_vm5, %v1382_v47, %v1383_v42  ;;  %v1060_v60 = vshrl.u32 %v4030_v12, 16  ;;  %v631_v26 = vrot.slane %v630_v15, 4  ;;  %v306_v31 = vld [vmem:[%s3726_s22 + $0x58] sm:$0xf]  ;;  %v307_v34 = vld [vmem:[%s3726_s22 + $0x5c] sm:$0xf] }
  0xac   : > { %1476 = vst [vmem:[#allocation2 + $0x15c] sm:$0xf] %v1384_v52  ;;  %v619_v2 = vrot.slane %v617_v59, 4  ;;  %v4098_v45 = vrot.slane %v1076_v36, 5  ;;  %v1386_v48 = vrot.slane %v1268_v22, 5  ;;  %v1389_v49 = vrot.slane %v4083_v29, 5 }
  0xad   : > { %v1062_v3 = vrot.slane %v1060_v60, 4  ;;  %340 = vst [vmem:[#allocation2 + $0x160] sm:$0xf] %v306_v31  ;;  %v636_v37 = vsel %vm3750_vm4, %v631_v26, %v4079_v24  ;;  %v3281_v32 = vld [vmem:[#allocation2 + $0x12c] sm:$0xf]  ;;  %v1080_v6 = vshrl.u32 %v4077_v16, 16 }
  0xae   : > { %v620_v7 = vor.u32 %v619_v2, %v4034_v23  ;;  %341 = vst [vmem:[#allocation2 + $0x170] sm:$0xf] %v307_v34  ;;  %v2998_v42 = vld [vmem:[#allocation2 + $0x138] sm:$0xf0]  ;;  %v1387_v57 = vsel %vm3762_vm5, %v1385_v41, %v1386_v48  ;;  %v1388_v58 = vrot.slane %v1386_v48, 4  ;;  %v1391_v41 = vrot.slane %v1389_v49, 4 }
  0xaf   : > { %v1063_v11 = vor.u32 %v1062_v3, %v4036_v28  ;;  %v1073_v28 = vor.u32 %v1072_v18, %v1068_v17  ;;  %789 = vst [vmem:[#allocation2 + $0x174] sm:$0xf] %v636_v37  ;;  %v3001_v1 = vor.u32 %v3281_v32, %v2998_v42  ;;  %v382_v3 = vld [vmem:[%s3726_s22 + $0x64] sm:$0xf]  ;;  %v4117_v15 = vld [vmem:[%s3726_s22 + $0x68] sm:$0xf] }
  0xb0   : > { %v621_v23 = vrot.slane %v620_v7, 4  ;;  %v1390_v2 = vsel %vm3762_vm5, %v1388_v58, %v1389_v49  ;;  %1477 = vst [vmem:[#allocation2 + $0x16c] sm:$0xf] %v1387_v57  ;;  %v827_v7 = vld [vmem:[%s3726_s22 + $0x6c] sm:$0xf]  ;;  %v653_v31 = vshll.u32 %v4117_v15, 16 }
  0xb1   : > { %v1064_v27 = vrot.slane %v1063_v11, 4  ;;  %v1074_v38 = vrot.slane %v1073_v28, 4  ;;  %1478 = vst [vmem:[#allocation2 + $0x17c] sm:$0xf] %v1390_v2  ;;  %v3284_v28 = vld [vmem:[#allocation2 + $0x144] sm:$0xf] }
  0xb2   : > { %v626_v35 = vsel %vm3750_vm4, %v621_v23, %v625_v56  ;;  %v637_v56 = vshrl.u32 %v4071_v5, 16  ;;  %v3006_v22 = vld [vmem:[#allocation2 + $0x150] sm:$0xf0]  ;;  %v1090_v34 = vshrl.u32 %v827_v7, 16  ;;  %v309_v48 = vld [vmem:[%s3726_s22 + $0x64] sm:$0xf] }
  0xb3   : > { %v1069_v44 = vsel %vm3750_vm4, %v1064_v27, %v1068_v17  ;;  %788 = vst [vmem:[#allocation2 + $0x164] sm:$0xf] %v626_v35  ;;  %v3287_v57 = vld [vmem:[#allocation2 + $0x154] sm:$0xf0]  ;;  %v1488_v51 = vld [vmem:[#allocation2 + $0x21c] sm:$0xf] }
  0xb4   : > { %1231 = vst [vmem:[#allocation2 + $0x168] sm:$0xf] %v1069_v44  ;;  %v1092_v49 = vrot.slane %v1090_v34, 4 }
  0xb5   : > { %v2168_v39 = vpop.f32.mrf.mxu0  ;;  %343 = vst [vmem:[#allocation2 + $0x190] sm:$0xf] %v309_v48 }
  0xb6   : > { %v2262_v46 = vpop.f32.mrf.mxu1  ;;  %v2169_v54 = vadd.f32 %v4046_v33, %v2168_v39  ;;  %v2993_v39 = vor.u32 %v3280_v20, %v2990_v21  ;;  %v3286_v20 = vld [vmem:[#allocation2 + $0x14c] sm:$0xf0] }
  0xb8   : > { %2207 = vmatmul.bf16.gmra.mxu0 %v2973_v43  ;;  %v2263_v4 = vadd.f32 %v2262_v46, %v2169_v54  ;;  %v2989_v43 = vor.u32 %v3282_v14, %v2988_v13  ;;  %v3283_v46 = vld [vmem:[#allocation2 + $0x134] sm:$0xf0]  ;;  %v1079_v54 = vsel %vm3750_vm4, %v1074_v38, %v4098_v45  ;;  %v1082_v14 = vrot.slane %v1080_v6, 4  ;;  %v4130_v38 = vld [vmem:[%s3726_s22 + $0x70] sm:$0xf] }
  0xb9   : > { %2301 = vmatmul.bf16.gmra.mxu1 %v2977_v40  ;;  %v2996_v40 = vld [vmem:[#allocation2 + $0x128] sm:$0xf]  ;;  %1232 = vst [vmem:[#allocation2 + $0x178] sm:$0xf] %v1079_v54  ;;  %v1096_v32 = vshll.u32 %v4130_v38, 16 }
  0xba   : > { %2395 = vmatmul.bf16.gmra.mxu2 %v2981_v53  ;;  %v2997_v62 = vor.u32 %v3283_v46, %v2996_v40  ;;  %v4136_v40 = vrot.slane %v653_v31, 5  ;;  %v308_v46 = vld [vmem:[%s3726_s22 + $0x60] sm:$0xf]  ;;  %v4171_v31 = vld [vmem:[%s3726_s22 + $0x70] sm:$0xf] }
  0xbb   : > { %2489 = vmatmul.bf16.gmra.mxu3 %v2985_v55  ;;  %342 = vst [vmem:[#allocation2 + $0x180] sm:$0xf] %v308_v46 }
  0xbd   : > { %v2170_v8 = vpop.f32.mrf.mxu0  ;;  %v2356_v12 = vpop.f32.mrf.mxu2 }
  0xbe   : > { %v2264_v9 = vpop.f32.mrf.mxu1  ;;  %v2450_v19 = vpop.f32.mrf.mxu3  ;;  %v2357_v25 = vadd.f32 %v2356_v12, %v2263_v4  ;;  %v2171_v30 = vadd.f32 %v4046_v33, %v2170_v8  ;;  %v643_v8 = vshll.u32 %v382_v3, 16  ;;  %v639_v12 = vrot.slane %v637_v56, 4  ;;  %v3014_v56 = vld [vmem:[#allocation2 + $0x158] sm:$0xf0] }
  0xc0   : > { %v2451_v47 = vadd.f32 %v2450_v19, %v2357_v25  ;;  %v2265_v50 = vadd.f32 %v2264_v9, %v2171_v30  ;;  %v647_v9 = vshrl.u32 %v382_v3, 16  ;;  %v645_v17 = vrot.slane %v643_v8, 5  ;;  %v4124_v19 = vld [vmem:[#allocation2 + $0x140] sm:$0xf] }
  0xc1   : > { %v640_v21 = vor.u32 %v639_v12, %v4079_v24  ;;  %v1086_v25 = vshll.u32 %v827_v7, 16  ;;  %v1083_v30 = vor.u32 %v1082_v14, %v4098_v45  ;;  %v1270_v24 = vld [vmem:[%s3726_s22 + $0x6c] sm:$0xf]  ;;  %v4139_v45 = vld [vmem:[%s3726_s22 + $0x70] sm:$0xf] }
  0xc2   : > { %v2569_v0 = vmul.f32 0.2, %v2451_v47  ;;  %vm2535_vm6 = vcmp.ge.f32.partialorder %v2451_v47, 0.0  ;;  %v649_v23 = vrot.slane %v647_v9, 4  ;;  %v1392_v42 = vrot.slane %v1270_v24, 5 }
  0xc3   : > { %v641_v37 = vrot.slane %v640_v21, 4  ;;  %v1084_v44 = vrot.slane %v1083_v30, 4 }
  0xc4   : > { %v2603_v13 = vsel %vm2535_vm6, %v2451_v47, %v2569_v0  ;;  %v4154_v0 = vrot.slane %v1096_v32, 5  ;;  %v1394_v6 = vrot.slane %v1392_v42, 4  ;;  %v4178_v32 = vld [vmem:[%s3726_s22 + $0x78] sm:$0xf] }
  0xc5   : > { %v2173_v52 = vpop.f32.mrf.mxu0  ;;  %v2358_v55 = vpop.f32.mrf.mxu2 }
  0xc6   : > { %v2267_v53 = vpop.f32.mrf.mxu1  ;;  %v2359_v59 = vadd.f32 %v2358_v55, %v2265_v50  ;;  %v2452_v60 = vpop.f32.mrf.mxu3  ;;  %v2174_v61 = vadd.f32 %v4046_v33, %v2173_v52  ;;  %v646_v50 = vsel %vm3750_vm4, %v641_v37, %v645_v17  ;;  %v1088_v52 = vrot.slane %v1086_v25, 5 }
  0xc7   : > { %v3009_v55 = vor.u32 %v3284_v28, %v3006_v22  ;;  %790 = vst [vmem:[#allocation2 + $0x184] sm:$0xf] %v646_v50 }
  0xc8   : > { %2212 = vmatmul.bf16.gmra.mxu0 %v2989_v43  ;;  %v2453_v4 = vadd.f32 %v2452_v60, %v2359_v59  ;;  %v2268_v11 = vadd.f32 %v2267_v53, %v2174_v61  ;;  %v650_v43 = vor.u32 %v649_v23, %v645_v17  ;;  %v3012_v53 = vld [vmem:[#allocation2 + $0x148] sm:$0xf]  ;;  %v1089_v58 = vsel %vm3750_vm4, %v1084_v44, %v1088_v52  ;;  %v3285_v60 = vld [vmem:[#allocation2 + $0x14c] sm:$0xf] }
  0xc9   : > { %2306 = vmatmul.bf16.gmra.mxu1 %v2993_v39  ;;  %v3005_v39 = vor.u32 %v3286_v20, %v4124_v19  ;;  %v1395_v59 = vrot.slane %v4139_v45, 5  ;;  %1233 = vst [vmem:[#allocation2 + $0x188] sm:$0xf] %v1089_v58  ;;  %v3017_v17 = vor.u32 %v3285_v60, %v3014_v56  ;;  %v657_v20 = vshrl.u32 %v4117_v15, 16  ;;  %v4184_v58 = vld [vmem:[%s3726_s22 + $0x78] sm:$0xf] }
  0xca   : > { %vm2536_vm7 = vcmp.ge.f32.partialorder %v2453_v4, 0.0  ;;  %v2570_v10 = vmul.f32 0.2, %v2453_v4  ;;  %2400 = vmatmul.bf16.gmra.mxu2 %v2997_v62  ;;  %v651_v29 = vrot.slane %v650_v43, 4  ;;  %v1093_v62 = vor.u32 %v1092_v49, %v1088_v52 }
  0xcb   : > { %2494 = vmatmul.bf16.gmra.mxu3 %v3001_v1  ;;  %v1393_v1 = vsel %vm3762_vm5, %v1391_v41, %v1392_v42  ;;  %v1396_v14 = vsel %vm3762_vm5, %v1394_v6, %v1395_v59  ;;  %v1100_v23 = vshrl.u32 %v4130_v38, 16  ;;  %v659_v28 = vrot.slane %v657_v20, 4 }
  0xcc   : > { %v2604_v5 = vsel %vm2536_vm7, %v2453_v4, %v2570_v10  ;;  %v656_v61 = vsel %vm3750_vm4, %v651_v29, %v4136_v40  ;;  %v1094_v7 = vrot.slane %v1093_v62, 4  ;;  %1479 = vst [vmem:[#allocation2 + $0x18c] sm:$0xf] %v1393_v1  ;;  %v673_v38 = vshll.u32 %v4171_v31, 16  ;;  %v3022_v29 = vld [vmem:[#allocation2 + $0x170] sm:$0xf0] }
  0xcd   : > { %v2175_v16 = vpop.f32.mrf.mxu0  ;;  %v3347_v26 = vpack.c.bf16 %v2604_v5, %v2603_v13  ;;  %v2361_v27 = vpop.f32.mrf.mxu2  ;;  %791 = vst [vmem:[#allocation2 + $0x194] sm:$0xf] %v656_v61  ;;  %v3013_v13 = vor.u32 %v3287_v57, %v3012_v53  ;;  %v660_v24 = vor.u32 %v659_v28, %v4136_v40  ;;  %v1102_v48 = vrot.slane %v1100_v23, 4  ;;  %v3288_v53 = vld [vmem:[#allocation2 + $0x164] sm:$0xf] }
  0xce   : > { %v2269_v18 = vpop.f32.mrf.mxu1  ;;  %v2362_v35 = vadd.f32 %v2361_v27, %v2268_v11  ;;  %v2455_v36 = vpop.f32.mrf.mxu3  ;;  %v2176_v47 = vadd.f32 %v4046_v33, %v2175_v16  ;;  %v1099_v5 = vsel %vm3750_vm4, %v1094_v7, %v4154_v0  ;;  %1480 = vst [vmem:[#allocation2 + $0x19c] sm:$0xf] %v1396_v14  ;;  %v384_v16 = vld [vmem:[%s3726_s22 + $0x6c] sm:$0xf]  ;;  %v4175_v40 = vrot.slane %v673_v38, 5 }
  0xcf   : > { %3348 = vst [vmem:[%s4122_s25] sm:$0xff] %v3347_v26   ;;  %v663_v25 = vshll.u32 %v384_v16, 16  ;;  %v667_v26 = vshrl.u32 %v384_v16, 16  ;;  %v661_v49 = vrot.slane %v660_v24, 4  ;;  %v1272_v57 = vld [vmem:[%s3726_s22 + $0x74] sm:$0xf]  ;;  %v1397_v6 = vrot.slane %v1395_v59, 4 }
  0xd0   : > { %v2456_v54 = vadd.f32 %v2455_v36, %v2362_v35  ;;  %v2270_v2 = vadd.f32 %v2269_v18, %v2176_v47  ;;  %v829_v18 = vld [vmem:[%s3726_s22 + $0x74] sm:$0xf]  ;;  %1234 = vst [vmem:[#allocation2 + $0x198] sm:$0xf] %v1099_v5  ;;  %v3020_v47 = vld [vmem:[#allocation2 + $0x160] sm:$0xf] }
  0xd1   : > { %v1106_v22 = vshll.u32 %v829_v18, 16  ;;  %v665_v34 = vrot.slane %v663_v25, 5  ;;  %v669_v35 = vrot.slane %v667_v26, 4  ;;  %v1110_v41 = vshrl.u32 %v829_v18, 16  ;;  %v3028_v61 = vld [vmem:[#allocation2 + $0x168] sm:$0xf] }
  0xd2   : > { %v2571_v10 = vmul.f32 0.2, %v2456_v54  ;;  %vm2537_vm8 = vcmp.ge.f32.partialorder %v2456_v54, 0.0  ;;  %v310_v62 = vld [vmem:[%s3726_s22 + $0x68] sm:$0xf]  ;;  %v1401_v5 = vrot.slane %v4184_v58, 5 }
  0xd3   : > { %v670_v46 = vor.u32 %v669_v35, %v665_v34  ;;  %v1108_v42 = vrot.slane %v1106_v22, 5  ;;  %v311_v1 = vld [vmem:[%s3726_s22 + $0x6c] sm:$0xf]  ;;  %344 = vst [vmem:[#allocation2 + $0x1a0] sm:$0xf] %v310_v62  ;;  %v677_v24 = vshrl.u32 %v4171_v31, 16 }
  0xd4   : > { %v2605_v30 = vsel %vm2537_vm8, %v2456_v54, %v2571_v10  ;;  %v3291_v7 = vld [vmem:[#allocation2 + $0x174] sm:$0xf0]  ;;  %345 = vst [vmem:[#allocation2 + $0x1b0] sm:$0xf] %v311_v1  ;;  %v3030_v59 = vld [vmem:[#allocation2 + $0x178] sm:$0xf0] }
  0xd5   : > { %v2178_v3 = vpop.f32.mrf.mxu0  ;;  %v2363_v8 = vpop.f32.mrf.mxu2  ;;  %v671_v54 = vrot.slane %v670_v46, 4  ;;  %v3029_v26 = vor.u32 %v3291_v7, %v3028_v61  ;;  %v3294_v61 = vld [vmem:[#allocation2 + $0x18c] sm:$0xf0] }
  0xd6   : > { %v2272_v4 = vpop.f32.mrf.mxu1  ;;  %v2179_v9 = vadd.f32 %v4046_v33, %v2178_v3  ;;  %v2364_v11 = vadd.f32 %v2363_v8, %v2270_v2  ;;  %v2457_v12 = vpop.f32.mrf.mxu3  ;;  %v666_v2 = vsel %vm3750_vm4, %v661_v49, %v665_v34  ;;  %v1112_v3 = vrot.slane %v1110_v41, 4 }
  0xd7   : > { %792 = vst [vmem:[#allocation2 + $0x1a4] sm:$0xf] %v666_v2  ;;  %v1120_v41 = vshrl.u32 %v4178_v32, 16 }
  0xd8   : > { %2217 = vmatmul.bf16.gmra.mxu0 %v3005_v39  ;;  %v2458_v19 = vadd.f32 %v2457_v12, %v2364_v11  ;;  %v2273_v21 = vadd.f32 %v2272_v4, %v2179_v9  ;;  %v3290_v39 = vld [vmem:[#allocation2 + $0x16c] sm:$0xf0]  ;;  %v676_v4 = vsel %vm3750_vm4, %v671_v54, %v4175_v40  ;;  %v1113_v10 = vor.u32 %v1112_v3, %v1108_v42 }
  0xd9   : > { %2311 = vmatmul.bf16.gmra.mxu1 %v3009_v55  ;;  %v1103_v55 = vor.u32 %v1102_v48, %v4154_v0  ;;  %v1116_v0 = vshll.u32 %v4178_v32, 16  ;;  %v3021_v9 = vor.u32 %v3290_v39, %v3020_v47  ;;  %v1398_v11 = vrot.slane %v1272_v57, 5  ;;  %793 = vst [vmem:[#allocation2 + $0x1b4] sm:$0xf] %v676_v4  ;;  %v3292_v4 = vld [vmem:[#allocation2 + $0x184] sm:$0xf] }
  0xda   : > { %vm2538_vm9 = vcmp.ge.f32.partialorder %v2458_v19, 0.0  ;;  %v2572_v27 = vmul.f32 0.2, %v2458_v19  ;;  %2405 = vmatmul.bf16.gmra.mxu2 %v3013_v13  ;;  %v3025_v12 = vor.u32 %v3288_v53, %v3022_v29  ;;  %v3289_v13 = vld [vmem:[#allocation2 + $0x16c] sm:$0xf]  ;;  %v679_v39 = vrot.slane %v677_v24, 4 }
  0xdb   : > { %2499 = vmatmul.bf16.gmra.mxu3 %v3017_v17  ;;  %v1104_v56 = vrot.slane %v1103_v55, 4  ;;  %v4199_v17 = vrot.slane %v1116_v0, 5  ;;  %v1399_v20 = vsel %vm3762_vm5, %v1397_v6, %v1398_v11  ;;  %v3033_v35 = vor.u32 %v3289_v13, %v3030_v59  ;;  %v4224_v6 = vld [vmem:[%s3726_s22 + $0x80] sm:$0xf]  ;;  %v3044_v13 = vld [vmem:[#allocation2 + $0x188] sm:$0xf] }
  0xdc   : > { %v2606_v36 = vsel %vm2538_vm9, %v2458_v19, %v2572_v27  ;;  %v1114_v19 = vrot.slane %v1113_v10, 4  ;;  %1481 = vst [vmem:[#allocation2 + $0x1ac] sm:$0xf] %v1399_v20  ;;  %v1122_v1 = vrot.slane %v1120_v41, 4  ;;  %v1274_v10 = vld [vmem:[%s3726_s22 + $0x7c] sm:$0xf] }
  0xdd   : > { %v2180_v37 = vpop.f32.mrf.mxu0  ;;  %v3352_v43 = vpack.c.bf16 %v2606_v36, %v2605_v30  ;;  %v2366_v44 = vpop.f32.mrf.mxu2  ;;  %v1109_v14 = vsel %vm3750_vm4, %v1104_v56, %v1108_v42  ;;  %v386_v36 = vld [vmem:[%s3726_s22 + $0x74] sm:$0xf]  ;;  %v680_v42 = vor.u32 %v679_v39, %v4175_v40  ;;  %v1403_v20 = vrot.slane %v1401_v5, 4 }
  0xde   : > { %v2274_v15 = vpop.f32.mrf.mxu1  ;;  %v2367_v50 = vadd.f32 %v2366_v44, %v2273_v21  ;;  %v2460_v52 = vpop.f32.mrf.mxu3  ;;  %v2181_v60 = vadd.f32 %v4046_v33, %v2180_v37  ;;  %v1400_v21 = vrot.slane %v1398_v11, 4  ;;  %1235 = vst [vmem:[#allocation2 + $0x1a8] sm:$0xf] %v1109_v14  ;;  %v1119_v30 = vsel %vm3750_vm4, %v1114_v19, %v4199_v17  ;;  %v831_v37 = vld [vmem:[%s3726_s22 + $0x7c] sm:$0xf] }
  0xdf   : > { %3424 = vst [vmem:[%s4122_s25 + $0x8] sm:$0xff] %v3352_v43   ;;  %v683_v43 = vshll.u32 %v386_v36, 16  ;;  %v687_v44 = vshrl.u32 %v386_v36, 16  ;;  %v1126_v46 = vshll.u32 %v831_v37, 16  ;;  %v1130_v54 = vshrl.u32 %v831_v37, 16 }
  0xe0   : > { %v2461_v8 = vadd.f32 %v2460_v52, %v2367_v50  ;;  %v2275_v16 = vadd.f32 %v2274_v15, %v2181_v60  ;;  %v1402_v34 = vsel %vm3762_vm5, %v1400_v21, %v1401_v5  ;;  %1236 = vst [vmem:[#allocation2 + $0x1b8] sm:$0xf] %v1119_v30  ;;  %v4217_v50 = vld [vmem:[%s3726_s22 + $0x78] sm:$0xf]  ;;  %v3036_v60 = vld [vmem:[#allocation2 + $0x180] sm:$0xf]  ;;  %v1123_v7 = vor.u32 %v1122_v1, %v4199_v17 }
  0xe1   : > { %1482 = vst [vmem:[#allocation2 + $0x1bc] sm:$0xf] %v1402_v34  ;;  %v685_v52 = vrot.slane %v683_v43, 5  ;;  %v689_v53 = vrot.slane %v687_v44, 4  ;;  %v693_v32 = vshll.u32 %v4217_v50, 16  ;;  %v681_v0 = vrot.slane %v680_v42, 4 }
  0xe2   : > { %v2573_v27 = vmul.f32 0.2, %v2461_v8  ;;  %vm2539_vm10 = vcmp.ge.f32.partialorder %v2461_v8, 0.0  ;;  %v3038_v56 = vld [vmem:[#allocation2 + $0x190] sm:$0xf0]  ;;  %v1124_v19 = vrot.slane %v1123_v7, 4 }
  0xe3   : > { %v690_v62 = vor.u32 %v689_v53, %v685_v52  ;;  %v4221_v40 = vrot.slane %v693_v32, 5  ;;  %v4230_v11 = vld [vmem:[%s3726_s22 + $0x80] sm:$0xf]  ;;  %v312_v14 = vld [vmem:[%s3726_s22 + $0x70] sm:$0xf]  ;;  %v1136_v17 = vshll.u32 %v4224_v6, 16 }
  0xe4   : > { %v2607_v48 = vsel %vm2539_vm10, %v2461_v8, %v2573_v27  ;;  %v1128_v8 = vrot.slane %v1126_v46, 5  ;;  %346 = vst [vmem:[#allocation2 + $0x1c0] sm:$0xf] %v312_v14  ;;  %v1404_v27 = vrot.slane %v1274_v10, 5  ;;  %v3046_v5 = vld [vmem:[#allocation2 + $0x198] sm:$0xf0] }
  0xe5   : > { %v2183_v18 = vpop.f32.mrf.mxu0  ;;  %v2368_v23 = vpop.f32.mrf.mxu2  ;;  %v4245_v34 = vrot.slane %v1136_v17, 5  ;;  %v697_v42 = vshrl.u32 %v4217_v50, 16 }
  0xe6   : > { %v2277_v45 = vpop.f32.mrf.mxu1  ;;  %v2184_v25 = vadd.f32 %v4046_v33, %v2183_v18  ;;  %v2369_v28 = vadd.f32 %v2368_v23, %v2275_v16  ;;  %v2462_v22 = vpop.f32.mrf.mxu3  ;;  %v313_v16 = vld [vmem:[%s3726_s22 + $0x74] sm:$0xf]  ;;  %v686_v18 = vsel %vm3750_vm4, %v681_v0, %v685_v52  ;;  %v3037_v23 = vor.u32 %v3294_v61, %v3036_v60 }
  0xe7   : > { %347 = vst [vmem:[#allocation2 + $0x1d0] sm:$0xf] %v313_v16  ;;  %v1129_v30 = vsel %vm3750_vm4, %v1124_v19, %v1128_v8  ;;  %v1405_v24 = vsel %vm3762_vm5, %v1403_v20, %v1404_v27  ;;  %v699_v61 = vrot.slane %v697_v42, 4  ;;  %v3054_v19 = vld [vmem:[#allocation2 + $0x1b0] sm:$0xf0] }
  0xe8   : > { %2222 = vmatmul.bf16.gmra.mxu0 %v3021_v9  ;;  %v2463_v15 = vadd.f32 %v2462_v22, %v2369_v28  ;;  %v2278_v38 = vadd.f32 %v2277_v45, %v2184_v25  ;;  %v691_v9 = vrot.slane %v690_v62, 4  ;;  %v1132_v45 = vrot.slane %v1130_v54, 4  ;;  %v3295_v25 = vld [vmem:[#allocation2 + $0x194] sm:$0xf0]  ;;  %v3293_v22 = vld [vmem:[#allocation2 + $0x18c] sm:$0xf] }
  0xe9   : > { %2316 = vmatmul.bf16.gmra.mxu1 %v3025_v12  ;;  %v3041_v28 = vor.u32 %v3292_v4, %v3038_v56  ;;  %794 = vst [vmem:[#allocation2 + $0x1c4] sm:$0xf] %v686_v18  ;;  %v3045_v44 = vor.u32 %v3295_v25, %v3044_v13  ;;  %v3049_v53 = vor.u32 %v3293_v22, %v3046_v5  ;;  %v1140_v54 = vshrl.u32 %v4224_v6, 16  ;;  %v3298_v13 = vld [vmem:[#allocation2 + $0x1ac] sm:$0xf0] }
  0xea   : > { %vm2540_vm11 = vcmp.ge.f32.partialorder %v2463_v15, 0.0  ;;  %v2574_v47 = vmul.f32 0.2, %v2463_v15  ;;  %2410 = vmatmul.bf16.gmra.mxu2 %v3029_v26  ;;  %v696_v59 = vsel %vm3750_vm4, %v691_v9, %v4221_v40  ;;  %v1133_v26 = vor.u32 %v1132_v45, %v1128_v8  ;;  %1237 = vst [vmem:[#allocation2 + $0x1c8] sm:$0xf] %v1129_v30 }
  0xeb   : > { %2504 = vmatmul.bf16.gmra.mxu3 %v3033_v35  ;;  %v1407_v35 = vrot.slane %v4230_v11, 5  ;;  %795 = vst [vmem:[#allocation2 + $0x1d4] sm:$0xf] %v696_v59  ;;  %v700_v8 = vor.u32 %v699_v61, %v4221_v40  ;;  %v1142_v16 = vrot.slane %v1140_v54, 4  ;;  %v3296_v59 = vld [vmem:[#allocation2 + $0x1a4] sm:$0xf] }
  0xec   : > { %v2608_v29 = vsel %vm2540_vm11, %v2463_v15, %v2574_v47  ;;  %v1134_v15 = vrot.slane %v1133_v26, 4  ;;  %1483 = vst [vmem:[#allocation2 + $0x1cc] sm:$0xf] %v1405_v24  ;;  %v4270_v20 = vld [vmem:[%s3726_s22 + $0x88] sm:$0xf] }
  0xed   : > { %v2185_v49 = vpop.f32.mrf.mxu0  ;;  %v3357_v55 = vpack.c.bf16 %v2608_v29, %v2607_v48  ;;  %v2371_v57 = vpop.f32.mrf.mxu2  ;;  %v388_v29 = vld [vmem:[%s3726_s22 + $0x7c] sm:$0xf]  ;;  %v701_v17 = vrot.slane %v700_v8, 4  ;;  %v1143_v25 = vor.u32 %v1142_v16, %v4245_v34  ;;  %v1276_v26 = vld [vmem:[%s3726_s22 + $0x84] sm:$0xf] }
  0xee   : > { %v2279_v31 = vpop.f32.mrf.mxu1  ;;  %v2372_v2 = vadd.f32 %v2371_v57, %v2278_v38  ;;  %v2465_v3 = vpop.f32.mrf.mxu3  ;;  %v2186_v12 = vadd.f32 %v4046_v33, %v2185_v49  ;;  %v1406_v38 = vrot.slane %v1404_v27, 4  ;;  %v1139_v48 = vsel %vm3750_vm4, %v1134_v15, %v4245_v34  ;;  %v833_v49 = vld [vmem:[%s3726_s22 + $0x84] sm:$0xf]  ;;  %v4276_v27 = vld [vmem:[%s3726_s22 + $0x88] sm:$0xf] }
  0xef   : > { %3425 = vst [vmem:[%s4122_s25 + $0x10] sm:$0xff] %v3357_v55   ;;  %v703_v55 = vshll.u32 %v388_v29, 16  ;;  %v707_v57 = vshrl.u32 %v388_v29, 16  ;;  %v1146_v62 = vshll.u32 %v833_v49, 16  ;;  %v1150_v9 = vshrl.u32 %v833_v49, 16 }
  0xf0   : > { %v2466_v21 = vadd.f32 %v2465_v3, %v2372_v2  ;;  %v2280_v36 = vadd.f32 %v2279_v31, %v2186_v12  ;;  %v1408_v52 = vsel %vm3762_vm5, %v1406_v38, %v1407_v35  ;;  %1238 = vst [vmem:[#allocation2 + $0x1d8] sm:$0xf] %v1139_v48  ;;  %v4263_v2 = vld [vmem:[%s3726_s22 + $0x80] sm:$0xf]  ;;  %v3060_v30 = vld [vmem:[#allocation2 + $0x1a8] sm:$0xf] }
  0xf1   : > { %1484 = vst [vmem:[#allocation2 + $0x1dc] sm:$0xf] %v1408_v52  ;;  %v705_v3 = vrot.slane %v703_v55, 5  ;;  %v709_v4 = vrot.slane %v707_v57, 4  ;;  %v713_v6 = vshll.u32 %v4263_v2, 16  ;;  %v1152_v5 = vrot.slane %v1150_v9, 4 }
  0xf2   : > { %v2575_v47 = vmul.f32 0.2, %v2466_v21  ;;  %vm2541_vm12 = vcmp.ge.f32.partialorder %v2466_v21, 0.0  ;;  %v3052_v12 = vld [vmem:[#allocation2 + $0x1a0] sm:$0xf]  ;;  %v1144_v24 = vrot.slane %v1143_v25, 4 }
  0xf3   : > { %v710_v14 = vor.u32 %v709_v4, %v705_v3  ;;  %v4267_v40 = vrot.slane %v713_v6, 5  ;;  %v1156_v34 = vshll.u32 %v4270_v20, 16  ;;  %v1409_v38 = vrot.slane %v1407_v35, 4  ;;  %v3062_v11 = vld [vmem:[#allocation2 + $0x1b8] sm:$0xf0] }
  0xf4   : > { %v2609_v1 = vsel %vm2541_vm12, %v2466_v21, %v2575_v47  ;;  %v1148_v21 = vrot.slane %v1146_v62, 5  ;;  %v1410_v47 = vrot.slane %v1276_v26, 5  ;;  %v390_v4 = vld [vmem:[%s3726_s22 + $0x84] sm:$0xf]  ;;  %v717_v8 = vshrl.u32 %v4263_v2, 16 }
  0xf5   : > { %v2188_v37 = vpop.f32.mrf.mxu0  ;;  %v2373_v41 = vpop.f32.mrf.mxu2  ;;  %v4291_v52 = vrot.slane %v1156_v34, 5  ;;  %v1160_v6 = vshrl.u32 %v4270_v20, 16  ;;  %v723_v9 = vshll.u32 %v390_v4, 16  ;;  %v1278_v34 = vld [vmem:[%s3726_s22 + $0x8c] sm:$0xf] }
  0xf6   : > { %v2282_v58 = vpop.f32.mrf.mxu1  ;;  %v2189_v43 = vadd.f32 %v4046_v33, %v2188_v37  ;;  %v2374_v39 = vadd.f32 %v2373_v41, %v2280_v36  ;;  %v2467_v46 = vpop.f32.mrf.mxu3  ;;  %v314_v36 = vld [vmem:[%s3726_s22 + $0x78] sm:$0xf]  ;;  %v315_v37 = vld [vmem:[%s3726_s22 + $0x7c] sm:$0xf]  ;;  %v3053_v41 = vor.u32 %v3298_v13, %v3052_v12  ;;  %v1149_v48 = vsel %vm3750_vm4, %v1144_v24, %v1148_v21 }
  0xf7   : > { %348 = vst [vmem:[#allocation2 + $0x1e0] sm:$0xf] %v314_v36  ;;  %v1411_v42 = vsel %vm3762_vm5, %v1409_v38, %v1410_v47  ;;  %v719_v16 = vrot.slane %v717_v8, 4  ;;  %v3301_v8 = vld [vmem:[#allocation2 + $0x1cc] sm:$0xf] }
  0xf8   : > { %2227 = vmatmul.bf16.gmra.mxu0 %v3037_v23  ;;  %v2468_v31 = vadd.f32 %v2467_v46, %v2374_v39  ;;  %v2283_v32 = vadd.f32 %v2282_v58, %v2189_v43  ;;  %v711_v23 = vrot.slane %v710_v14, 4  ;;  %v706_v58 = vsel %vm3750_vm4, %v701_v17, %v705_v3  ;;  %v3299_v43 = vld [vmem:[#allocation2 + $0x1b4] sm:$0xf0]  ;;  %349 = vst [vmem:[#allocation2 + $0x1f0] sm:$0xf] %v315_v37 }
  0xf9   : > { %2321 = vmatmul.bf16.gmra.mxu1 %v3041_v28  ;;  %v3057_v39 = vor.u32 %v3296_v59, %v3054_v19  ;;  %v3297_v46 = vld [vmem:[#allocation2 + $0x1ac] sm:$0xf]  ;;  %796 = vst [vmem:[#allocation2 + $0x1e4] sm:$0xf] %v706_v58  ;;  %v3061_v55 = vor.u32 %v3299_v43, %v3060_v30  ;;  %v1162_v59 = vrot.slane %v1160_v6, 4 }
  0xfa   : > { %vm2542_vm13 = vcmp.ge.f32.partialorder %v2468_v31, 0.0  ;;  %v2576_v60 = vmul.f32 0.2, %v2468_v31  ;;  %2415 = vmatmul.bf16.gmra.mxu2 %v3045_v44  ;;  %v716_v15 = vsel %vm3750_vm4, %v711_v23, %v4267_v40  ;;  %v1153_v44 = vor.u32 %v1152_v5, %v1148_v21  ;;  %1239 = vst [vmem:[#allocation2 + $0x1e8] sm:$0xf] %v1149_v48 }
  0xfb   : > { %2509 = vmatmul.bf16.gmra.mxu3 %v3049_v53  ;;  %v1413_v53 = vrot.slane %v4276_v27, 5  ;;  %797 = vst [vmem:[#allocation2 + $0x1f4] sm:$0xf] %v716_v15  ;;  %v3065_v3 = vor.u32 %v3297_v46, %v3062_v11  ;;  %v720_v21 = vor.u32 %v719_v16, %v4267_v40  ;;  %v3300_v30 = vld [vmem:[#allocation2 + $0x1c4] sm:$0xf]  ;;  %v1163_v37 = vor.u32 %v1162_v59, %v4291_v52 }
  0xfc   : > { %v2610_v56 = vsel %vm2542_vm13, %v2468_v31, %v2576_v60  ;;  %v1154_v35 = vrot.slane %v1153_v44, 4  ;;  %1485 = vst [vmem:[#allocation2 + $0x1ec] sm:$0xf] %v1411_v42  ;;  %v3070_v5 = vld [vmem:[#allocation2 + $0x1d0] sm:$0xf0] }
  0xfd   : > { %v2190_v0 = vpop.f32.mrf.mxu0  ;;  %v3362_v7 = vpack.c.bf16 %v2610_v56, %v2609_v1  ;;  %v2376_v10 = vpop.f32.mrf.mxu2  ;;  %v835_v56 = vld [vmem:[%s3726_s22 + $0x8c] sm:$0xf]  ;;  %v721_v15 = vrot.slane %v720_v21, 4  ;;  %v317_v40 = vld [vmem:[%s3726_s22 + $0x84] sm:$0xf]  ;;  %v1164_v11 = vrot.slane %v1163_v37, 4 }
  0xfe   : > { %v2284_v50 = vpop.f32.mrf.mxu1  ;;  %v2377_v18 = vadd.f32 %v2376_v10, %v2283_v32  ;;  %v2470_v45 = vpop.f32.mrf.mxu3  ;;  %v2191_v22 = vadd.f32 %v4046_v33, %v2190_v0  ;;  %v1412_v32 = vrot.slane %v1410_v47, 4  ;;  %v1159_v62 = vsel %vm3750_vm4, %v1154_v35, %v4291_v52  ;;  %v1279_v43 = vld [vmem:[%s3726_s22 + $0x90] sm:$0x1]  ;;  %v4320_v47 = vld [vmem:[#allocation5] ss:$0 sm:$0xff] }
  0xff   : > { %3426 = vst [vmem:[%s4122_s25 + $0x18] sm:$0xff] %v3362_v7   ;;  %v727_v7 = vshrl.u32 %v390_v4, 16  ;;  %v1166_v10 = vshll.u32 %v835_v56, 16  ;;  %v1170_v12 = vshrl.u32 %v835_v56, 16  ;;  %v316_v46 = vld [vmem:[%s3726_s22 + $0x80] sm:$0xf] }
 0x100   : > { %v2471_v28 = vadd.f32 %v2470_v45, %v2377_v18  ;;  %v2285_v29 = vadd.f32 %v2284_v50, %v2191_v22  ;;  %v1414_v1 = vsel %vm3762_vm5, %v1412_v32, %v1413_v53  ;;  %1240 = vst [vmem:[#allocation2 + $0x1f8] sm:$0xf] %v1159_v62  ;;  %v725_v18 = vrot.slane %v723_v9, 5  ;;  %v3302_v22 = vld [vmem:[#allocation2 + $0x1cc] sm:$0xf0] }
 0x101   : > { %1486 = vst [vmem:[#allocation2 + $0x1fc] sm:$0xf] %v1414_v1  ;;  %v729_v45 = vrot.slane %v727_v7, 4  ;;  %v1172_v23 = vrot.slane %v1170_v12, 4  ;;  %v354_v48 = vld [vmem:[#allocation2 + $0x210] sm:$0xf] }
 0x102   : > { %vm2543_vm14 = vcmp.ge.f32.partialorder %v2471_v28, 0.0  ;;  %v2577_v57 = vmul.f32 0.2, %v2471_v28  ;;  %v726_v52 = vsel %vm3750_vm4, %v721_v15, %v725_v18  ;;  %350 = vst [vmem:[#allocation2 + $0x200] sm:$0xf] %v316_v46  ;;  %v1416_v1 = vrot.slane %v1278_v34, 5 }
 0x103   : > { %v730_v36 = vor.u32 %v729_v45, %v725_v18  ;;  %v1242_v42 = vld [vmem:[#allocation2 + $0x218] sm:$0xf]  ;;  %798 = vst [vmem:[#allocation2 + $0x204] sm:$0xf] %v726_v52  ;;  %v3078_v6 = vld [vmem:[#allocation2 + $0x1d8] sm:$0xf0] }
 0x104   : > { %v2611_v13 = vsel %vm2543_vm14, %v2471_v28, %v2577_v57  ;;  %v3068_v28 = vld [vmem:[#allocation2 + $0x1c0] sm:$0xf]  ;;  %v1415_v57 = vrot.slane %v1413_v53, 4  ;;  %v1418_v53 = vrot.slane %v1416_v1, 4  ;;  %v3086_v37 = vld [vmem:[#allocation2 + $0x1f0] sm:$0xf0] }
 0x105   : > { %v2193_v49 = vpop.f32.mrf.mxu0  ;;  %v2378_v54 = vpop.f32.mrf.mxu2  ;;  %v3069_v32 = vor.u32 %v3302_v22, %v3068_v28  ;;  %v3092_v15 = vld [vmem:[#allocation2 + $0x1e8] sm:$0xf] }
 0x106   : > { %v2287_v31 = vpop.f32.mrf.mxu1  ;;  %v2379_v60 = vadd.f32 %v2378_v54, %v2285_v29  ;;  %v2472_v61 = vpop.f32.mrf.mxu3  ;;  %v2194_v50 = vadd.f32 %v4046_v33, %v2193_v49  ;;  %v1168_v33 = vrot.slane %v1166_v10, 5  ;;  %v799_v29 = vld [vmem:[#allocation2 + $0x214] sm:$0xf]  ;;  %v355_v49 = vsel %vm4315_vm2, %v317_v40, %v354_v48 }
 0x107   : > { %v3073_v54 = vor.u32 %v3300_v30, %v3070_v5  ;;  %356 = vst [vmem:[#allocation2 + $0x210] sm:$0xf] %v355_v49  ;;  %v1417_v27 = vsel %vm3762_vm5, %v1415_v57, %v1416_v1  ;;  %v3306_v30 = vld [vmem:[#allocation2 + $0x1ec] sm:$0xf0] }
 0x108   : > { %2232 = vmatmul.bf16.gmra.mxu0 %v3053_v41  ;;  %v2473_v0 = vadd.f32 %v2472_v61, %v2379_v60  ;;  %v2288_v2 = vadd.f32 %v2287_v31, %v2194_v50  ;;  %v1173_v24 = vor.u32 %v1172_v23, %v1168_v33  ;;  %v731_v41 = vrot.slane %v730_v36, 4  ;;  %v3303_v60 = vld [vmem:[#allocation2 + $0x1d4] sm:$0xf0]  ;;  %1487 = vst [vmem:[#allocation2 + $0x20c] sm:$0xf] %v1417_v27 }
 0x109   : > { %2326 = vmatmul.bf16.gmra.mxu1 %v3057_v39  ;;  %v1169_v61 = vsel %vm3750_vm4, %v1164_v11, %v1168_v33  ;;  %v3304_v36 = vld [vmem:[#allocation2 + $0x1e4] sm:$0xf] }
 0x10a   : > { %vm2544_vm15 = vcmp.ge.f32.partialorder %v2473_v0, 0.0  ;;  %v2578_v14 = vmul.f32 0.2, %v2473_v0  ;;  %2420 = vmatmul.bf16.gmra.mxu2 %v3061_v55  ;;  %v800_v31 = vsel %vm4315_vm2, %v731_v41, %v799_v29  ;;  %v1174_v35 = vrot.slane %v1173_v24, 4  ;;  %v3076_v55 = vld [vmem:[#allocation2 + $0x1c8] sm:$0xf] }
 0x10b   : > { %2514 = vmatmul.bf16.gmra.mxu3 %v3065_v3  ;;  %v1419_v3 = vrot.slane %v1279_v43, 5  ;;  %801 = vst [vmem:[#allocation2 + $0x214] sm:$0xf] %v800_v31  ;;  %v3077_v12 = vor.u32 %v3303_v60, %v3076_v55  ;;  %v3089_v5 = vor.u32 %v3304_v36, %v3086_v37  ;;  %v3307_v24 = vld [vmem:[#allocation2 + $0x1f4] sm:$0xf0] }
 0x10c   : > { %v2612_v19 = vsel %vm2544_vm15, %v2473_v0, %v2578_v14  ;;  %v1243_v62 = vsel %vm4315_vm2, %v1174_v35, %v1242_v42  ;;  %1241 = vst [vmem:[#allocation2 + $0x208] sm:$0xf] %v1169_v61  ;;  %v3093_v29 = vor.u32 %v3307_v24, %v3092_v15 }
 0x10d   : > { %v2195_v17 = vpop.f32.mrf.mxu0  ;;  %v3367_v25 = vpack.c.bf16 %v2612_v19, %v2611_v13  ;;  %v2381_v26 = vpop.f32.mrf.mxu2  ;;  %1244 = vst [vmem:[#allocation2 + $0x218] sm:$0xf] %v1243_v62  ;;  %v3081_v13 = vor.u32 %v3301_v8, %v3078_v6  ;;  %v1420_v14 = vsel %vm3762_vm5, %v1418_v53, %v1419_v3  ;;  %v3100_v3 = vld [vmem:[#allocation2 + $0x200] sm:$0xf] }
 0x10e   : > { %v2289_v20 = vpop.f32.mrf.mxu1  ;;  %v2475_v58 = vpop.f32.mrf.mxu3  ;;  %v2382_v44 = vadd.f32 %v2381_v26, %v2288_v2  ;;  %v2196_v39 = vadd.f32 %v4320_v47, %v2195_v17  ;;  %v1489_v59 = vsel %vm4315_vm2, %v1420_v14, %v1488_v51  ;;  %v3084_v26 = vld [vmem:[#allocation2 + $0x1e0] sm:$0xf] }
 0x10f   : > { %3427 = vst [vmem:[%s4122_s25 + $0x20] sm:$0xff] %v3367_v25  }
 0x110   : > { %v2476_v4 = vadd.f32 %v2475_v58, %v2382_v44  ;;  %v2290_v56 = vadd.f32 %v2289_v20, %v2196_v39  ;;  %1490 = vst [vmem:[#allocation2 + $0x21c] sm:$0xf] %v1489_v59  ;;  %v3085_v58 = vor.u32 %v3306_v30, %v3084_v26  ;;  %v3305_v44 = vld [vmem:[#allocation2 + $0x1ec] sm:$0xf]  ;;  %v3094_v39 = vld [vmem:[#allocation2 + $0x1f8] sm:$0xf0] }
 0x111   : > { %v3097_v49 = vor.u32 %v3305_v44, %v3094_v39 }
 0x112   : > { %v2579_v16 = vmul.f32 0.2, %v2476_v4  ;;  %vm2545_vm0 = vcmp.ge.f32.partialorder %v2476_v4, 0.0  ;;  %v3102_v8 = vld [vmem:[#allocation2 + $0x210] sm:$0xf0] }
 0x113   : > { %v3108_v27 = vld [vmem:[#allocation2 + $0x208] sm:$0xf] }
 0x114   : > { %v2613_v19 = vsel %vm2545_vm0, %v2476_v4, %v2579_v16  ;;  %v3311_v53 = vld [vmem:[#allocation2 + $0x214] sm:$0xf0] }
 0x115   : > { %v2198_v0 = vpop.f32.mrf.mxu0  ;;  %v2383_v9 = vpop.f32.mrf.mxu2  ;;  %v3109_v59 = vor.u32 %v3311_v53, %v3108_v27 }
 0x116   : > { %v2292_v50 = vpop.f32.mrf.mxu1  ;;  %v2384_v7 = vadd.f32 %v2383_v9, %v2290_v56  ;;  %v2477_v10 = vpop.f32.mrf.mxu3  ;;  %v2199_v45 = vadd.f32 %v4320_v47, %v2198_v0  ;;  %v3310_v0 = vld [vmem:[#allocation2 + $0x20c] sm:$0xf0] }
 0x117   : > { %v3101_v6 = vor.u32 %v3310_v0, %v3100_v3  ;;  %v3110_v14 = vld [vmem:[#allocation2 + $0x218] sm:$0xf0] }
 0x118   : > { %2237 = vmatmul.bf16.gmra.mxu0 %v3069_v32  ;;  %v2478_v18 = vadd.f32 %v2477_v10, %v2384_v7  ;;  %v2293_v17 = vadd.f32 %v2292_v50, %v2199_v45  ;;  %v3308_v50 = vld [vmem:[#allocation2 + $0x204] sm:$0xf] }
 0x119   : > { %2331 = vmatmul.bf16.gmra.mxu1 %v3073_v54  ;;  %v3105_v9 = vor.u32 %v3308_v50, %v3102_v8 }
 0x11a   : > { %vm2546_vm3 = vcmp.ge.f32.partialorder %v2478_v18, 0.0  ;;  %v2580_v33 = vmul.f32 0.2, %v2478_v18  ;;  %2425 = vmatmul.bf16.gmra.mxu2 %v3077_v12 }
 0x11b   : > { %2519 = vmatmul.bf16.gmra.mxu3 %v3081_v13  ;;  %v3309_v13 = vld [vmem:[#allocation2 + $0x20c] sm:$0xf] }
 0x11c   : > { %v2614_v2 = vsel %vm2546_vm3, %v2478_v18, %v2580_v33  ;;  %v3113_v33 = vor.u32 %v3309_v13, %v3110_v14 }
 0x11d   : > { %v2200_v63 = vpop.f32.mrf.mxu0  ;;  %v3372_v21 = vpack.c.bf16 %v2614_v2, %v2613_v19  ;;  %v2386_v23 = vpop.f32.mrf.mxu2 }
 0x11e   : > { %v2294_v20 = vpop.f32.mrf.mxu1  ;;  %v2480_v25 = vpop.f32.mrf.mxu3  ;;  %v2387_v28 = vadd.f32 %v2386_v23, %v2293_v17  ;;  %v2201_v22 = vadd.f32 %v4320_v47, %v2200_v63 }
 0x11f   : > { %3428 = vst [vmem:[%s4122_s25 + $0x28] sm:$0xff] %v3372_v21  }
 0x120   : > { %v2481_v34 = vadd.f32 %v2480_v25, %v2387_v28  ;;  %v2295_v40 = vadd.f32 %v2294_v20, %v2201_v22 }
 0x122   : > { %v2581_v31 = vmul.f32 0.2, %v2481_v34  ;;  %vm2547_vm4 = vcmp.ge.f32.partialorder %v2481_v34, 0.0 }
 0x124   : > { %v2615_v32 = vsel %vm2547_vm4, %v2481_v34, %v2581_v31 }
 0x125   : > { %v2203_v41 = vpop.f32.mrf.mxu0  ;;  %v2388_v46 = vpop.f32.mrf.mxu2 }
 0x126   : > { %v2297_v43 = vpop.f32.mrf.mxu1  ;;  %v2389_v48 = vadd.f32 %v2388_v46, %v2295_v40  ;;  %v2482_v52 = vpop.f32.mrf.mxu3  ;;  %v2204_v35 = vadd.f32 %v4320_v47, %v2203_v41 }
 0x128   : > { %2242 = vmatmul.bf16.gmra.mxu0 %v3085_v58  ;;  %v2483_v11 = vadd.f32 %v2482_v52, %v2389_v48  ;;  %v2298_v55 = vadd.f32 %v2297_v43, %v2204_v35 }
 0x129   : > { %2336 = vmatmul.bf16.gmra.mxu1 %v3089_v5 }
 0x12a   : > { %vm2548_vm5 = vcmp.ge.f32.partialorder %v2483_v11, 0.0  ;;  %v2582_v42 = vmul.f32 0.2, %v2483_v11  ;;  %2430 = vmatmul.bf16.gmra.mxu2 %v3093_v29 }
 0x12b   : > { %2524 = vmatmul.bf16.gmra.mxu3 %v3097_v49 }
 0x12c   : > { %v2616_v54 = vsel %vm2548_vm5, %v2483_v11, %v2582_v42 }
 0x12d   : > { %v2205_v57 = vpop.f32.mrf.mxu0  ;;  %v3377_v61 = vpack.c.bf16 %v2616_v54, %v2615_v32  ;;  %v2391_v62 = vpop.f32.mrf.mxu2 }
 0x12e   : > { %v2299_v60 = vpop.f32.mrf.mxu1  ;;  %v2485_v1 = vpop.f32.mrf.mxu3  ;;  %v2392_v4 = vadd.f32 %v2391_v62, %v2298_v55  ;;  %v2206_v56 = vadd.f32 %v4320_v47, %v2205_v57 }
 0x12f   : > { %3429 = vst [vmem:[%s4122_s25 + $0x30] sm:$0xff] %v3377_v61  }
 0x130   : > { %v2486_v51 = vadd.f32 %v2485_v1, %v2392_v4  ;;  %v2300_v7 = vadd.f32 %v2299_v60, %v2206_v56 }
 0x132   : > { %v2583_v19 = vmul.f32 0.2, %v2486_v51  ;;  %vm2549_vm6 = vcmp.ge.f32.partialorder %v2486_v51, 0.0 }
 0x134   : > { %v2617_v20 = vsel %vm2549_vm6, %v2486_v51, %v2583_v19 }
 0x135   : > { %v2208_v10 = vpop.f32.mrf.mxu0  ;;  %v2393_v16 = vpop.f32.mrf.mxu2 }
 0x136   : > { %v2302_v12 = vpop.f32.mrf.mxu1  ;;  %v2394_v18 = vadd.f32 %v2393_v16, %v2300_v7  ;;  %v2487_v45 = vpop.f32.mrf.mxu3  ;;  %v2209_v17 = vadd.f32 %v4320_v47, %v2208_v10 }
 0x138   : > { %2247 = vmatmul.bf16.gmra.mxu0 %v3101_v6  ;;  %v2488_v2 = vadd.f32 %v2487_v45, %v2394_v18  ;;  %v2303_v23 = vadd.f32 %v2302_v12, %v2209_v17 }
 0x139   : > { %2341 = vmatmul.bf16.gmra.mxu1 %v3105_v9 }
 0x13a   : > { %vm2550_vm7 = vcmp.ge.f32.partialorder %v2488_v2, 0.0  ;;  %v2584_v63 = vmul.f32 0.2, %v2488_v2  ;;  %2435 = vmatmul.bf16.gmra.mxu2 %v3109_v59 }
 0x13b   : > { %2529 = vmatmul.bf16.gmra.mxu3 %v3113_v33 }
 0x13c   : > { %v2618_v21 = vsel %vm2550_vm7, %v2488_v2, %v2584_v63 }
 0x13d   : > { %v2210_v25 = vpop.f32.mrf.mxu0  ;;  %v3382_v28 = vpack.c.bf16 %v2618_v21, %v2617_v20  ;;  %v2396_v22 = vpop.f32.mrf.mxu2 }
 0x13e   : > { %v2304_v26 = vpop.f32.mrf.mxu1  ;;  %v2490_v30 = vpop.f32.mrf.mxu3  ;;  %v2397_v36 = vadd.f32 %v2396_v22, %v2303_v23  ;;  %v2211_v37 = vadd.f32 %v4320_v47, %v2210_v25 }
 0x13f   : > { %3430 = vst [vmem:[%s4122_s25 + $0x38] sm:$0xff] %v3382_v28  }
 0x140   : > { %v2491_v58 = vadd.f32 %v2490_v30, %v2397_v36  ;;  %v2305_v5 = vadd.f32 %v2304_v26, %v2211_v37 }
 0x142   : > { %v2585_v43 = vmul.f32 0.2, %v2491_v58  ;;  %vm2551_vm8 = vcmp.ge.f32.partialorder %v2491_v58, 0.0 }
 0x144   : > { %v2619_v48 = vsel %vm2551_vm8, %v2491_v58, %v2585_v43 }
 0x145   : > { %v2213_v15 = vpop.f32.mrf.mxu0  ;;  %v2398_v34 = vpop.f32.mrf.mxu2 }
 0x146   : > { %v2307_v24 = vpop.f32.mrf.mxu1  ;;  %v2399_v40 = vadd.f32 %v2398_v34, %v2305_v5  ;;  %v2492_v41 = vpop.f32.mrf.mxu3  ;;  %v2214_v39 = vadd.f32 %v4320_v47, %v2213_v15 }
 0x148   : > { %v2493_v44 = vadd.f32 %v2492_v41, %v2399_v40  ;;  %v2308_v29 = vadd.f32 %v2307_v24, %v2214_v39 }
 0x14a   : > { %vm2552_vm9 = vcmp.ge.f32.partialorder %v2493_v44, 0.0  ;;  %v2586_v46 = vmul.f32 0.2, %v2493_v44 }
 0x14c   : > { %v2620_v52 = vsel %vm2552_vm9, %v2493_v44, %v2586_v46 }
 0x14d   : > { %v2215_v49 = vpop.f32.mrf.mxu0  ;;  %v3387_v11 = vpack.c.bf16 %v2620_v52, %v2619_v48  ;;  %v2401_v35 = vpop.f32.mrf.mxu2 }
 0x14e   : > { %v2309_v31 = vpop.f32.mrf.mxu1  ;;  %v2495_v42 = vpop.f32.mrf.mxu3  ;;  %v2402_v32 = vadd.f32 %v2401_v35, %v2308_v29  ;;  %v2216_v54 = vadd.f32 %v4320_v47, %v2215_v49 }
 0x14f   : > { %3431 = vst [vmem:[%s4122_s25 + $0x40] sm:$0xff] %v3387_v11  }
 0x150   : > { %v2496_v55 = vadd.f32 %v2495_v42, %v2402_v32  ;;  %v2310_v57 = vadd.f32 %v2309_v31, %v2216_v54 }
 0x152   : > { %v2587_v4 = vmul.f32 0.2, %v2496_v55  ;;  %vm2553_vm10 = vcmp.ge.f32.partialorder %v2496_v55, 0.0 }
 0x154   : > { %v2621_v8 = vsel %vm2553_vm10, %v2496_v55, %v2587_v4 }
 0x155   : > { %v2218_v60 = vpop.f32.mrf.mxu0  ;;  %v2403_v62 = vpop.f32.mrf.mxu2 }
 0x156   : > { %v2312_v61 = vpop.f32.mrf.mxu1  ;;  %v2404_v1 = vadd.f32 %v2403_v62, %v2310_v57  ;;  %v2497_v3 = vpop.f32.mrf.mxu3  ;;  %v2219_v0 = vadd.f32 %v4320_v47, %v2218_v60 }
 0x158   : > { %v2498_v56 = vadd.f32 %v2497_v3, %v2404_v1  ;;  %v2313_v9 = vadd.f32 %v2312_v61, %v2219_v0 }
 0x15a   : > { %vm2554_vm11 = vcmp.ge.f32.partialorder %v2498_v56, 0.0  ;;  %v2588_v50 = vmul.f32 0.2, %v2498_v56 }
 0x15c   : > { %v2622_v6 = vsel %vm2554_vm11, %v2498_v56, %v2588_v50  ;;  %vm2710_vm11 = vcmask 1043459  }
 0x15d   : > { %v2220_v27 = vpop.f32.mrf.mxu0  ;;  %v3392_v51 = vpack.c.bf16 %v2622_v6, %v2621_v8  ;;  %v2406_v7 = vpop.f32.mrf.mxu2 }
 0x15e   : > { %v2314_v53 = vpop.f32.mrf.mxu1  ;;  %v2500_v10 = vpop.f32.mrf.mxu3  ;;  %v2407_v12 = vadd.f32 %v2406_v7, %v2313_v9  ;;  %v2221_v13 = vadd.f32 %v4320_v47, %v2220_v27 }
 0x15f   : > { %3432 = vst [vmem:[%s4122_s25 + $0x48] sm:$0xff] %v3392_v51  }
 0x160   : > { %v2501_v14 = vadd.f32 %v2500_v10, %v2407_v12  ;;  %v2315_v16 = vadd.f32 %v2314_v53, %v2221_v13 }
 0x162   : > { %v2589_v2 = vmul.f32 0.2, %v2501_v14  ;;  %vm2555_vm12 = vcmp.ge.f32.partialorder %v2501_v14, 0.0 }
 0x164   : > { %v2623_v21 = vsel %vm2555_vm12, %v2501_v14, %v2589_v2  ;;  %vm2711_vm12 = vsmask.f32 7950 }
 0x165   : > { %v2223_v18 = vpop.f32.mrf.mxu0  ;;  %v2408_v59 = vpop.f32.mrf.mxu2 }
 0x166   : > { %v2317_v45 = vpop.f32.mrf.mxu1  ;;  %v2409_v33 = vadd.f32 %v2408_v59, %v2315_v16  ;;  %v2502_v19 = vpop.f32.mrf.mxu3  ;;  %v2224_v63 = vadd.f32 %v4320_v47, %v2223_v18 }
 0x168   : > { %v2503_v17 = vadd.f32 %v2502_v19, %v2409_v33  ;;  %v2318_v25 = vadd.f32 %v2317_v45, %v2224_v63 }
 0x16a   : > { %vm2556_vm13 = vcmp.ge.f32.partialorder %v2503_v17, 0.0  ;;  %v2590_v20 = vmul.f32 0.2, %v2503_v17 }
 0x16c   : > { %v2624_v23 = vsel %vm2556_vm13, %v2503_v17, %v2590_v20  ;;  %vm2712_vm13 = vmand %vm2710_vm11, %vm2711_vm12 }
 0x16d   : > { %v2225_v26 = vpop.f32.mrf.mxu0  ;;  %v3397_v22 = vpack.c.bf16 %v2624_v23, %v2623_v21  ;;  %v2411_v30 = vpop.f32.mrf.mxu2 }
 0x16e   : > { %v2319_v28 = vpop.f32.mrf.mxu1  ;;  %v2505_v36 = vpop.f32.mrf.mxu3  ;;  %v2412_v37 = vadd.f32 %v2411_v30, %v2318_v25  ;;  %v2226_v58 = vadd.f32 %v4320_v47, %v2225_v26 }
 0x16f   : > { %3433 = vst [vmem:[%s4122_s25 + $0x50] sm:$0xff] %v3397_v22  }
 0x170   : > { %v2506_v5 = vadd.f32 %v2505_v36, %v2412_v37  ;;  %v2320_v15 = vadd.f32 %v2319_v28, %v2226_v58 }
 0x172   : > { %v2591_v44 = vmul.f32 0.2, %v2506_v5  ;;  %vm2557_vm14 = vcmp.ge.f32.partialorder %v2506_v5, 0.0 }
 0x174   : > { %v2625_v52 = vsel %vm2557_vm14, %v2506_v5, %v2591_v44 }
 0x175   : > { %v2228_v24 = vpop.f32.mrf.mxu0  ;;  %v2413_v40 = vpop.f32.mrf.mxu2 }
 0x176   : > { %v2322_v34 = vpop.f32.mrf.mxu1  ;;  %v2414_v41 = vadd.f32 %v2413_v40, %v2320_v15  ;;  %v2507_v43 = vpop.f32.mrf.mxu3  ;;  %v2229_v46 = vadd.f32 %v4320_v47, %v2228_v24 }
 0x178   : > { %v2508_v39 = vadd.f32 %v2507_v43, %v2414_v41  ;;  %v2323_v49 = vadd.f32 %v2322_v34, %v2229_v46 }
 0x17a   : > { %vm2558_vm15 = vcmp.ge.f32.partialorder %v2508_v39, 0.0  ;;  %v2592_v48 = vmul.f32 0.2, %v2508_v39 }
 0x17c   : > { %v2626_v29 = vsel %vm2558_vm15, %v2508_v39, %v2592_v48 }
 0x17d   : > { %v2230_v31 = vpop.f32.mrf.mxu0  ;;  %v3402_v35 = vpack.c.bf16 %v2626_v29, %v2625_v52  ;;  %v2416_v42 = vpop.f32.mrf.mxu2 }
 0x17e   : > { %v2324_v11 = vpop.f32.mrf.mxu1  ;;  %v2510_v32 = vpop.f32.mrf.mxu3  ;;  %v2417_v54 = vadd.f32 %v2416_v42, %v2323_v49  ;;  %v2231_v55 = vadd.f32 %v4320_v47, %v2230_v31 }
 0x17f   : > { %3434 = vst [vmem:[%s4122_s25 + $0x58] sm:$0xff] %v3402_v35  }
 0x180   : > { %v2511_v57 = vadd.f32 %v2510_v32, %v2417_v54  ;;  %v2325_v60 = vadd.f32 %v2324_v11, %v2231_v55 }
 0x182   : > { %v2593_v56 = vmul.f32 0.2, %v2511_v57  ;;  %vm2559_vm1 = vcmp.ge.f32.partialorder %v2511_v57, 0.0 }
 0x184   : > { %v2627_v6 = vsel %vm2559_vm1, %v2511_v57, %v2593_v56 }
 0x185   : > { %v2233_v61 = vpop.f32.mrf.mxu0  ;;  %v2418_v1 = vpop.f32.mrf.mxu2 }
 0x186   : > { %v2327_v62 = vpop.f32.mrf.mxu1  ;;  %v2419_v3 = vadd.f32 %v2418_v1, %v2325_v60  ;;  %v2512_v4 = vpop.f32.mrf.mxu3  ;;  %v2234_v50 = vadd.f32 %v4320_v47, %v2233_v61 }
 0x188   : > { %v2513_v0 = vadd.f32 %v2512_v4, %v2419_v3  ;;  %v2328_v27 = vadd.f32 %v2327_v62, %v2234_v50 }
 0x18a   : > { %vm2560_vm0 = vcmp.ge.f32.partialorder %v2513_v0, 0.0  ;;  %v2594_v8 = vmul.f32 0.2, %v2513_v0 }
 0x18c   : > { %v2628_v9 = vsel %vm2560_vm0, %v2513_v0, %v2594_v8 }
 0x18d   : > { %v2235_v53 = vpop.f32.mrf.mxu0  ;;  %v3407_v7 = vpack.c.bf16 %v2628_v9, %v2627_v6  ;;  %v2421_v10 = vpop.f32.mrf.mxu2 }
 0x18e   : > { %v2329_v51 = vpop.f32.mrf.mxu1  ;;  %v2515_v12 = vpop.f32.mrf.mxu3  ;;  %v2422_v13 = vadd.f32 %v2421_v10, %v2328_v27  ;;  %v2236_v14 = vadd.f32 %v4320_v47, %v2235_v53 }
 0x18f   : > { %3435 = vst [vmem:[%s4122_s25 + $0x60] sm:$0xff] %v3407_v7  }
 0x190   : > { %v2516_v16 = vadd.f32 %v2515_v12, %v2422_v13  ;;  %v2330_v18 = vadd.f32 %v2329_v51, %v2236_v14 }
 0x192   : > { %v2595_v17 = vmul.f32 0.2, %v2516_v16  ;;  %vm2561_vm3 = vcmp.ge.f32.partialorder %v2516_v16, 0.0 }
 0x194   : > { %v2629_v23 = vsel %vm2561_vm3, %v2516_v16, %v2595_v17 }
 0x195   : > { %v2238_v45 = vpop.f32.mrf.mxu0  ;;  %v2423_v33 = vpop.f32.mrf.mxu2 }
 0x196   : > { %v2332_v59 = vpop.f32.mrf.mxu1  ;;  %v2424_v19 = vadd.f32 %v2423_v33, %v2330_v18  ;;  %v2517_v2 = vpop.f32.mrf.mxu3  ;;  %v2239_v20 = vadd.f32 %v4320_v47, %v2238_v45 }
 0x198   : > { %v2518_v63 = vadd.f32 %v2517_v2, %v2424_v19  ;;  %v2333_v26 = vadd.f32 %v2332_v59, %v2239_v20 }
 0x19a   : > { %vm2562_vm4 = vcmp.ge.f32.partialorder %v2518_v63, 0.0  ;;  %v2596_v21 = vmul.f32 0.2, %v2518_v63 }
 0x19c   : > { %v2630_v25 = vsel %vm2562_vm4, %v2518_v63, %v2596_v21 }
 0x19d   : > { %v2240_v28 = vpop.f32.mrf.mxu0  ;;  %v3412_v30 = vpack.c.bf16 %v2630_v25, %v2629_v23  ;;  %v2426_v36 = vpop.f32.mrf.mxu2  ;;  %v2707_v25 = vld [vmem:[%s4122_s25 + $0x84] sm:$0xf] }
 0x19e   : > { %v2334_v22 = vpop.f32.mrf.mxu1  ;;  %v2520_v37 = vpop.f32.mrf.mxu3  ;;  %v2427_v58 = vadd.f32 %v2426_v36, %v2333_v26  ;;  %v2241_v5 = vadd.f32 %v4320_v47, %v2240_v28 }
 0x19f   : > { %3436 = vst [vmem:[%s4122_s25 + $0x68] sm:$0xff] %v3412_v30  }
 0x1a0   : > { %v2521_v15 = vadd.f32 %v2520_v37, %v2427_v58  ;;  %v2335_v24 = vadd.f32 %v2334_v22, %v2241_v5 }
 0x1a2   : > { %v2597_v39 = vmul.f32 0.2, %v2521_v15  ;;  %vm2563_vm5 = vcmp.ge.f32.partialorder %v2521_v15, 0.0 }
 0x1a4   : > { %v2631_v29 = vsel %vm2563_vm5, %v2521_v15, %v2597_v39 }
 0x1a5   : > { %v2243_v34 = vpop.f32.mrf.mxu0  ;;  %v2428_v40 = vpop.f32.mrf.mxu2 }
 0x1a6   : > { %v2337_v41 = vpop.f32.mrf.mxu1  ;;  %v2429_v43 = vadd.f32 %v2428_v40, %v2335_v24  ;;  %v2522_v44 = vpop.f32.mrf.mxu3  ;;  %v2244_v48 = vadd.f32 %v4320_v47, %v2243_v34 }
 0x1a8   : > { %v2523_v46 = vadd.f32 %v2522_v44, %v2429_v43  ;;  %v2338_v31 = vadd.f32 %v2337_v41, %v2244_v48 }
 0x1aa   : > { %vm2564_vm6 = vcmp.ge.f32.partialorder %v2523_v46, 0.0  ;;  %v2598_v52 = vmul.f32 0.2, %v2523_v46 }
 0x1ac   : > { %v2632_v49 = vsel %vm2564_vm6, %v2523_v46, %v2598_v52 }
 0x1ad   : > { %v2245_v11 = vpop.f32.mrf.mxu0  ;;  %v3417_v35 = vpack.c.bf16 %v2632_v49, %v2631_v29  ;;  %v2431_v42 = vpop.f32.mrf.mxu2 }
 0x1ae   : > { %v2525_v32 = vpop.f32.mrf.mxu3  ;;  %v2339_v54 = vpop.f32.mrf.mxu1  ;;  %v2432_v55 = vadd.f32 %v2431_v42, %v2338_v31  ;;  %v2246_v57 = vadd.f32 %v4320_v47, %v2245_v11 }
 0x1af   : > { %3437 = vst [vmem:[%s4122_s25 + $0x70] sm:$0xff] %v3417_v35  }
 0x1b0   : > { %v2526_v60 = vadd.f32 %v2525_v32, %v2432_v55  ;;  %v2340_v61 = vadd.f32 %v2339_v54, %v2246_v57 }
 0x1b2   : > { %v2599_v0 = vmul.f32 0.2, %v2526_v60  ;;  %vm2565_vm7 = vcmp.ge.f32.partialorder %v2526_v60, 0.0 }
 0x1b4   : > { %v2633_v27 = vsel %vm2565_vm7, %v2526_v60, %v2599_v0 }
 0x1b5   : > { %v2248_v62 = vpop.f32.mrf.mxu0  ;;  %v2433_v1 = vpop.f32.mrf.mxu2 }
 0x1b6   : > { %v2434_v3 = vadd.f32 %v2433_v1, %v2340_v61  ;;  %v2527_v4 = vpop.f32.mrf.mxu3  ;;  %v2249_v56 = vadd.f32 %v4320_v47, %v2248_v62  ;;  %v2342_v8 = vpop.f32.mrf.mxu1 }
 0x1b8   : > { %v2528_v50 = vadd.f32 %v2527_v4, %v2434_v3  ;;  %v2343_v9 = vadd.f32 %v2342_v8, %v2249_v56 }
 0x1ba   : > { %vm2566_vm8 = vcmp.ge.f32.partialorder %v2528_v50, 0.0  ;;  %v2600_v6 = vmul.f32 0.2, %v2528_v50 }
 0x1bc   : > { %v2634_v53 = vsel %vm2566_vm8, %v2528_v50, %v2600_v6 }
 0x1bd   : > { %v3422_v51 = vpack.c.bf16 %v2634_v53, %v2633_v27  ;;  %v2436_v7 = vpop.f32.mrf.mxu2  ;;  %v2250_v10 = vpop.f32.mrf.mxu0 }
 0x1be   : > { %v2437_v12 = vadd.f32 %v2436_v7, %v2343_v9  ;;  %v2530_v13 = vpop.f32.mrf.mxu3  ;;  %v2251_v16 = vadd.f32 %v4320_v47, %v2250_v10  ;;  %v2344_v45 = vpop.f32.mrf.mxu1 }
 0x1bf   : > { %3438 = vst [vmem:[%s4122_s25 + $0x78] sm:$0xff] %v3422_v51  }
 0x1c0   : > { %v2531_v14 = vadd.f32 %v2530_v13, %v2437_v12  ;;  %v2345_v33 = vadd.f32 %v2344_v45, %v2251_v16 }
 0x1c2   : > { %vm2567_vm9 = vcmp.ge.f32.partialorder %v2531_v14, 0.0  ;;  %v2601_v18 = vmul.f32 0.2, %v2531_v14 }
 0x1c4   : > { %v2635_v59 = vsel %vm2567_vm9, %v2531_v14, %v2601_v18 }
 0x1c5   : > { %v2669_v19 = vpack.c.bf16 %v2635_v59, %v2635_v59  ;;  %v2438_v2 = vpop.f32.mrf.mxu2 }
 0x1c6   : > { %v2439_v17 = vadd.f32 %v2438_v2, %v2345_v33  ;;  %v2532_v63 = vpop.f32.mrf.mxu3 }
 0x1c7   : > { %2703 = vst [vmem:[%s4122_s25 + $0x80] sm:$0xf] %v2669_v19 }
 0x1c8   : > { %v2533_v20 = vadd.f32 %v2532_v63, %v2439_v17 }
 0x1ca   : > { %vm2568_vm10 = vcmp.ge.f32.partialorder %v2533_v20, 0.0  ;;  %v2602_v21 = vmul.f32 0.2, %v2533_v20 }
 0x1cc   : > { %v2636_v23 = vsel %vm2568_vm10, %v2533_v20, %v2602_v21 }
 0x1cd   : > { %v2670_v26 = vpack.c.bf16 %v2636_v23, %v2636_v23 }
 0x1cf   : > { %v2708_v47 = vsel %vm4315_vm2, %v2670_v26, %v2707_v25 }
 0x1d0   : > { %2709 = vst [vmem:[%s4122_s25 + $0x84] sm:$0xf] %v2708_v47 }
 0x1d7   : > { %v2713_v28 = vld [vmem:[%s4122_s25 + $0x84] sm:$0x8] }
 0x1d8   : > { %v2714_v22 = vsel %vm2712_vm13, 0, %v2713_v28 }
 0x1d9   : > { %2715 = vst [vmem:[%s4122_s25 + $0x84] sm:$0x8] %v2714_v22 }
 0x1da PF: > { %s16_s17 = sadd.s32 1, %s3622_s17   ;;  %s4405_s15 = smov %s3618_s16 }
 0x1db   : > { %p13_p8 = scmp.ge.s32.totalorder %s16_s17, 4   ;;  %s4406_s16 = smov %s4408_s27 }
 0x1dd   :  { %15 = sbr.rel (!%p13_p8) target bundleno = 3 (0x3), region = 85 }
 0x1e2   :  { %2743 = vsyncpa [#allocation4], 1 }
 0x1e3   :  { %2745 = vsyncpa [#allocation4 + $0x1], 1 }
 0x1e4   :  { %2746 = vsyncpa [#allocation6], 1 }

// kernel: discriminator_forward.5
= control target key start
LH: loop header
LB: loop body
LE: loop exit
PB: predicated region body
PF: predicated region fallthrough
CT: control target
= control target key end

     0   :  { %s4310_s15 = smov 0   ;;  %s4312_s16 = smov 0   ;;  %s5386_s0 = inlined_call_operand.vmem [shape: bf16[2,81,512], index: 0, kind: input, shape index: {}]   ;;  %s5387_s1 = inlined_call_operand.vmem [shape: bf16[2048,128], index: 1, kind: input, shape index: {}]   ;;  %s5388_s2 = inlined_call_operand.vmem [shape: f32[1,128], index: 2, kind: input, shape index: {}]   ;;  %s5389_s3 = inlined_call_operand.vmem [shape: f32[71,1], index: 3, kind: input, shape index: {}]   ;;  %s5390_s4 = inlined_call_operand.vmem [shape: bf16[2,72,128], index: 4, kind: output, shape index: {}]  }
   0x1   :  { %s4314_s17 = smov 0  }
   0x2 LB: > { %s26_s18 = sadd.s32 1, %s4278_s16  ;;  %p3237_p0 = scmp.ge.s32.totalorder %s4282_s17, 1  ;;  %s4282_s17 = sphi %s4314_s17, %s14_s17   ;;  %s4278_s16 = sphi %s4312_s16, %s5400_s16   ;;  %s4274_s15 = sphi %s4310_s15, %s5399_s15  }
   0x3   : > { %p28_p1 = scmp.ge.s32.totalorder %s26_s18, 2  ;;  %p193_p2 = scmp.lt.s32.totalorder %s4282_s17, 3 }
   0x5   : > { %s5402_s18 = smov (%p28_p1, %s26_s18), 0  ;;  %p194_p3 = pnand %p3237_p0, %p193_p2 }
   0x6   : > { %p229_p4 = scmp.lt.s32.totalorder (!%p194_p3), %s4274_s15, 1 }
   0x7   : > { %197 = sbr.rel (%p194_p3) target bundleno = 584 (0x248), region = 36 }
   0xc   : > { %v4083_v0 = vld [vmem:[%s5387_s1 + $0x38] sm:$0xff]  ;;  %v4082_v4 = vld [vmem:[%s5387_s1 + $0x30] sm:$0xff]  ;;  %s5404_s15 = smov (!%p229_p4, %s4274_s15), 1  ;;  %v4081_v8 = vld [vmem:[%s5387_s1 + $0x28] sm:$0xff]  ;;  %vm288_vm0 = vcmask 1043456   ;;  %vm291_vm2 = vcmask 1047556  }
   0xd   : > { %v4091_v1 = vld [vmem:[%s5387_s1 + $0x78] sm:$0xff]  ;;  %2390 = vmatpush.bf16.msra.mxu0 %v4083_v0  ;;  %v4090_v5 = vld [vmem:[%s5387_s1 + $0x70] sm:$0xff]  ;;  %s4227_s9 = smul.u32 176, %s5404_s15  ;;  %v4089_v9 = vld [vmem:[%s5387_s1 + $0x68] sm:$0xff]  ;;  %vm289_vm1 = vsmask.f32 3328 }
   0xe   : > { %v4099_v2 = vld [vmem:[%s5387_s1 + $0xb8] sm:$0xff]  ;;  %2423 = vmatpush.bf16.msra.mxu1 %v4091_v1  ;;  %v4098_v6 = vld [vmem:[%s5387_s1 + $0xb0] sm:$0xff]  ;;  %v4097_v10 = vld [vmem:[%s5387_s1 + $0xa8] sm:$0xff]  ;;  %vm292_vm3 = vsmask.f32 7424  ;;  %vm815_vm9 = vcmask 1042432  }
   0xf   : > { %v4107_v3 = vld [vmem:[%s5387_s1 + $0xf8] sm:$0xff]  ;;  %2456 = vmatpush.bf16.msra.mxu2 %v4099_v2  ;;  %v4106_v7 = vld [vmem:[%s5387_s1 + $0xf0] sm:$0xff]  ;;  %v4105_v11 = vld [vmem:[%s5387_s1 + $0xe8] sm:$0xff]  ;;  %s4370_s24 = scalar_lea.vmem %s5386_s0, %s4227_s9  ;;  %vm319_vm7 = vsmask.f32 7440  ;;  %vm816_vm10 = vcmask 1046532  }
  0x10   : > { %2489 = vmatpush.bf16.msra.mxu3 %v4107_v3  ;;  %v4080_v12 = vld [vmem:[%s5387_s1 + $0x20] sm:$0xff]  ;;  %v4388_v17 = vld [vmem:[%s4370_s24 + $0x10] sm:$0xff]  ;;  %v4392_v18 = vld [vmem:[%s4370_s24 + $0x8] sm:$0xff]  ;;  %s4228_s23 = smul.u32 36, %s5404_s15 }
  0x11   : > { %2391 = vmatpush.bf16.msra.mxu0 %v4082_v4  ;;  %v4088_v13 = vld [vmem:[%s5387_s1 + $0x60] sm:$0xff]  ;;  %v4395_v19 = vld [vmem:[%s4370_s24 + $0x18] sm:$0xff]  ;;  %274 = vst [vmem:[#allocation2 + $0x40] sm:$0xff] %v4388_v17  ;;  %v4416_v25 = vld [vmem:[%s4370_s24 + $0x30] sm:$0xff] }
  0x12   : > { %2424 = vmatpush.bf16.msra.mxu1 %v4090_v5  ;;  %v4096_v14 = vld [vmem:[%s5387_s1 + $0xa0] sm:$0xff]  ;;  %v4079_v20 = vld [vmem:[%s5387_s1 + $0x18] sm:$0xff]  ;;  %273 = vst [vmem:[#allocation2 + $0x8] sm:$0xff] %v4392_v18  ;;  %v4420_v26 = vld [vmem:[%s4370_s24 + $0x28] sm:$0xff]  ;;  %s5356_s27 = scalar_lea.vmem %s5390_s4, %s4228_s23 }
  0x13   : > { %2457 = vmatpush.bf16.msra.mxu2 %v4098_v6  ;;  %v4104_v15 = vld [vmem:[%s5387_s1 + $0xe0] sm:$0xff]  ;;  %v4087_v21 = vld [vmem:[%s5387_s1 + $0x58] sm:$0xff]  ;;  %275 = vst [vmem:[#allocation2 + $0x48] sm:$0xff] %v4395_v19  ;;  %v4078_v28 = vld [vmem:[%s5387_s1 + $0x10] sm:$0xff] }
  0x14   : > { %2490 = vmatpush.bf16.msra.mxu3 %v4106_v7  ;;  %v4385_v16 = vld [vmem:[%s4370_s24] sm:$0xff]  ;;  %v4095_v22 = vld [vmem:[%s5387_s1 + $0x98] sm:$0xff]  ;;  %278 = vst [vmem:[#allocation2 + $0xc0] sm:$0xff] %v4416_v25  ;;  %v4086_v29 = vld [vmem:[%s5387_s1 + $0x50] sm:$0xff] }
  0x15   : > { %2392 = vmatpush.bf16.msra.mxu0 %v4081_v8  ;;  %272 = vst [vmem:[#allocation2] sm:$0xff] %v4385_v16  ;;  %v4103_v23 = vld [vmem:[%s5387_s1 + $0xd8] sm:$0xff]  ;;  %v4413_v24 = vld [vmem:[%s4370_s24 + $0x20] sm:$0xff]  ;;  %v4094_v30 = vld [vmem:[%s5387_s1 + $0x90] sm:$0xff] }
  0x16   : > { %2425 = vmatpush.bf16.msra.mxu1 %v4089_v9  ;;  %276 = vst [vmem:[#allocation2 + $0x80] sm:$0xff] %v4413_v24  ;;  %v4423_v27 = vld [vmem:[%s4370_s24 + $0x38] sm:$0xff]  ;;  %v4102_v31 = vld [vmem:[%s5387_s1 + $0xd0] sm:$0xff]  ;;  %v4077_v32 = vld [vmem:[%s5387_s1 + $0x8] sm:$0xff] }
  0x17   : > { %2458 = vmatpush.bf16.msra.mxu2 %v4097_v10  ;;  %277 = vst [vmem:[#allocation2 + $0x88] sm:$0xff] %v4420_v26  ;;  %v4085_v33 = vld [vmem:[%s5387_s1 + $0x48] sm:$0xff]  ;;  %v4453_v36 = vld [vmem:[%s4370_s24 + $0x40] sm:$0xff]  ;;  %v4462_v41 = vld [vmem:[%s4370_s24 + $0x50] sm:$0xff] }
  0x18   : > { %2491 = vmatpush.bf16.msra.mxu3 %v4105_v11  ;;  %279 = vst [vmem:[#allocation2 + $0xc8] sm:$0xff] %v4423_v27  ;;  %v4093_v34 = vld [vmem:[%s5387_s1 + $0x88] sm:$0xff]  ;;  %v4076_v37 = vld [vmem:[%s5387_s1] sm:$0xff]  ;;  %v4473_v48 = vld [vmem:[%s4370_s24 + $0x58] sm:$0xff] }
  0x19   : > { %2393 = vmatpush.bf16.msra.mxu0 %v4080_v12  ;;  %v4101_v35 = vld [vmem:[%s5387_s1 + $0xc8] sm:$0xff]  ;;  %v4084_v38 = vld [vmem:[%s5387_s1 + $0x40] sm:$0xff]  ;;  %280 = vst [vmem:[#allocation2 + $0x100] sm:$0xff] %v4453_v36  ;;  %v4131_v52 = vld [vmem:[%s5387_s1 + $0x1b8] sm:$0xff] }
  0x1a   : > { %2426 = vmatpush.bf16.msra.mxu1 %v4088_v13  ;;  %v4092_v42 = vld [vmem:[%s5387_s1 + $0x80] sm:$0xff]  ;;  %282 = vst [vmem:[#allocation2 + $0x140] sm:$0xff] %v4462_v41  ;;  %v4470_v45 = vld [vmem:[%s4370_s24 + $0x48] sm:$0xff]  ;;  %v4115_v53 = vld [vmem:[%s5387_s1 + $0x138] sm:$0xff] }
  0x1b   : > { %2459 = vmatpush.bf16.msra.mxu2 %v4096_v14  ;;  %v4020_v43 = vld [vmem:[#allocation2 + $0x3c] sm:$0xf0]  ;;  %v3246_v44 = vld [vmem:[#allocation2 + $0x40] sm:$0xf0]  ;;  %v3252_v46 = vld [vmem:[#allocation2 + $0x8] sm:$0xf] }
  0x1c   : > { %2492 = vmatpush.bf16.msra.mxu3 %v4104_v15  ;;  %v3244_v39 = vld [vmem:[#allocation2] sm:$0xf]  ;;  %v4012_v40 = vld [vmem:[#allocation2 + $0x4] sm:$0xf]  ;;  %v4013_v47 = vld [vmem:[#allocation2 + $0xc] sm:$0xf] }
  0x1d   : > { %2394 = vmatpush.bf16.msra.mxu0 %v4079_v20  ;;  %281 = vst [vmem:[#allocation2 + $0x108] sm:$0xff] %v4470_v45  ;;  %v4100_v49 = vld [vmem:[%s5387_s1 + $0xc0] sm:$0xff]  ;;  %v4021_v50 = vld [vmem:[#allocation2 + $0x44] sm:$0xf0]  ;;  %v3254_v51 = vld [vmem:[#allocation2 + $0x48] sm:$0xf0]  ;;  %v3245_v54 = vor.u32 %v4020_v43, %v3244_v39  ;;  %v3249_v55 = vor.u32 %v4012_v40, %v3246_v44 }
  0x1e   : > { %2427 = vmatpush.bf16.msra.mxu1 %v4087_v21  ;;  %283 = vst [vmem:[#allocation2 + $0x148] sm:$0xff] %v4473_v48  ;;  %v3253_v56 = vor.u32 %v4021_v50, %v3252_v46  ;;  %v3257_v57 = vor.u32 %v4013_v47, %v3254_v51  ;;  %v4139_v58 = vld [vmem:[%s5387_s1 + $0x1f8] sm:$0xff]  ;;  %v4130_v60 = vld [vmem:[%s5387_s1 + $0x1b0] sm:$0xff]  ;;  %v4129_v0 = vld [vmem:[%s5387_s1 + $0x1a8] sm:$0xff] }
  0x1f   : > { %2460 = vmatpush.bf16.msra.mxu2 %v4095_v22  ;;  %v4123_v59 = vld [vmem:[%s5387_s1 + $0x178] sm:$0xff]  ;;  %v4114_v61 = vld [vmem:[%s5387_s1 + $0x130] sm:$0xff]  ;;  %v4113_v1 = vld [vmem:[%s5387_s1 + $0x128] sm:$0xff] }
  0x20   : > { %2493 = vmatpush.bf16.msra.mxu3 %v4103_v23  ;;  %v4138_v62 = vld [vmem:[%s5387_s1 + $0x1f0] sm:$0xff]  ;;  %v4511_v2 = vld [vmem:[%s4370_s24 + $0x60] sm:$0xff]  ;;  %v4137_v4 = vld [vmem:[%s5387_s1 + $0x1e8] sm:$0xff] }
  0x21   : > { %2395 = vmatpush.bf16.msra.mxu0 %v4078_v28  ;;  %v4122_v63 = vld [vmem:[%s5387_s1 + $0x170] sm:$0xff]  ;;  %284 = vst [vmem:[#allocation2 + $0x180] sm:$0xff] %v4511_v2  ;;  %v4121_v5 = vld [vmem:[%s5387_s1 + $0x168] sm:$0xff]  ;;  %v4528_v7 = vld [vmem:[%s4370_s24 + $0x78] sm:$0xff] }
  0x22   : > { %2428 = vmatpush.bf16.msra.mxu1 %v4086_v29  ;;  %v4514_v3 = vld [vmem:[%s4370_s24 + $0x70] sm:$0xff]  ;;  %v4525_v6 = vld [vmem:[%s4370_s24 + $0x68] sm:$0xff]  ;;  %v3308_v8 = vld [vmem:[#allocation2 + $0x80] sm:$0xf]  ;;  %287 = vst [vmem:[#allocation2 + $0x1c8] sm:$0xff] %v4528_v7 }
  0x23   : > { %2461 = vmatpush.bf16.msra.mxu2 %v4094_v30  ;;  %286 = vst [vmem:[#allocation2 + $0x1c0] sm:$0xff] %v4514_v3  ;;  %v4028_v9 = vld [vmem:[#allocation2 + $0x84] sm:$0xf]  ;;  %v4036_v12 = vld [vmem:[#allocation2 + $0xbc] sm:$0xf0]  ;;  %v4127_v28 = vld [vmem:[%s5387_s1 + $0x198] sm:$0xff] }
  0x24   : > { %2494 = vmatpush.bf16.msra.mxu3 %v4102_v31  ;;  %v4128_v10 = vld [vmem:[%s5387_s1 + $0x1a0] sm:$0xff]  ;;  %285 = vst [vmem:[#allocation2 + $0x188] sm:$0xff] %v4525_v6  ;;  %v3316_v14 = vld [vmem:[#allocation2 + $0x88] sm:$0xf]  ;;  %v4029_v20 = vld [vmem:[#allocation2 + $0x8c] sm:$0xf]  ;;  %v3309_v30 = vor.u32 %v4036_v12, %v3308_v8 }
  0x25   : > { %2396 = vmatpush.bf16.msra.mxu0 %v4077_v32  ;;  %v4112_v11 = vld [vmem:[%s5387_s1 + $0x120] sm:$0xff]  ;;  %v4037_v15 = vld [vmem:[#allocation2 + $0xc4] sm:$0xf0]  ;;  %v3318_v21 = vld [vmem:[#allocation2 + $0xc8] sm:$0xf0]  ;;  %v325_v8 = vshll.u32 %v4385_v16, 16 }
  0x26   : > { %2429 = vmatpush.bf16.msra.mxu1 %v4085_v33  ;;  %v3310_v13 = vld [vmem:[#allocation2 + $0xc0] sm:$0xf0]  ;;  %v4111_v29 = vld [vmem:[%s5387_s1 + $0x118] sm:$0xff]  ;;  %v3317_v32 = vor.u32 %v4037_v15, %v3316_v14  ;;  %v3321_v33 = vor.u32 %v4029_v20, %v3318_v21  ;;  %v4134_v39 = vld [vmem:[%s5387_s1 + $0x1d0] sm:$0xff]  ;;  %v355_v21 = vshll.u32 %v4413_v24, 16 }
  0x27   : > { %2462 = vmatpush.bf16.msra.mxu2 %v4093_v34  ;;  %v4136_v22 = vld [vmem:[%s5387_s1 + $0x1e0] sm:$0xff]  ;;  %v3313_v31 = vor.u32 %v4028_v9, %v3310_v13  ;;  %v4135_v34 = vld [vmem:[%s5387_s1 + $0x1d8] sm:$0xff]  ;;  %v4118_v40 = vld [vmem:[%s5387_s1 + $0x150] sm:$0xff]  ;;  %v331_v9 = vshll.u32 %v4388_v17, 16  ;;  %v327_v13 = vrot.slane %v325_v8, 5 }
  0x28   : > { %2495 = vmatpush.bf16.msra.mxu3 %v4101_v35  ;;  %v4120_v23 = vld [vmem:[%s5387_s1 + $0x160] sm:$0xff]  ;;  %v4119_v35 = vld [vmem:[%s5387_s1 + $0x158] sm:$0xff]  ;;  %v4109_v43 = vld [vmem:[%s5387_s1 + $0x108] sm:$0xff] }
  0x29   : > { %2397 = vmatpush.bf16.msra.mxu0 %v4076_v37  ;;  %v4126_v37 = vld [vmem:[%s5387_s1 + $0x190] sm:$0xff]  ;;  %v4575_v44 = vld [vmem:[%s4370_s24 + $0x80] sm:$0xff]  ;;  %vm4578_vm4 = vmand %vm288_vm0, %vm289_vm1  ;;  %v333_v14 = vrot.slane %v331_v9, 5 }
  0x2a   : > { %2430 = vmatpush.bf16.msra.mxu1 %v4084_v38  ;;  %v4110_v38 = vld [vmem:[%s5387_s1 + $0x110] sm:$0xff]  ;;  %vm293_vm5 = vmand %vm291_vm2, %vm292_vm3  ;;  %v295_v47 = vld [vmem:[#allocation2 + $0x200] sm:$0xff] }
  0x2b   : > { %2463 = vmatpush.bf16.msra.mxu2 %v4092_v42  ;;  %v4125_v42 = vld [vmem:[%s5387_s1 + $0x188] sm:$0xff]  ;;  %vm4584_vm6 = vmor %vm293_vm5, %vm4578_vm4 }
  0x2c   : > { %2496 = vmatpush.bf16.msra.mxu3 %v4100_v49  ;;  %2398 = vmatmul.bf16.vlgmr.msra.gmra.mxu0 %v3245_v54  ;;  %v4133_v50 = vld [vmem:[%s5387_s1 + $0x1c8] sm:$0xff]  ;;  %v4594_v51 = vsel %vm4584_vm6, %v4575_v44, %v295_v47  ;;  %v4052_v54 = vld [vmem:[#allocation2 + $0x13c] sm:$0xf0]  ;;  %vm4629_vm8 = vmor %vm289_vm1, %vm319_vm7 }
  0x2d   : > { %2522 = vmatpush.bf16.msrb.mxu0 %v4115_v53  ;;  %2431 = vmatmul.bf16.vlgmr.msra.gmra.mxu1 %v3249_v55  ;;  %297 = vst [vmem:[#allocation2 + $0x200] sm:$0xff] %v4594_v51  ;;  %v4044_v53 = vld [vmem:[#allocation2 + $0x104] sm:$0xf]  ;;  %v4117_v20 = vld [vmem:[%s5387_s1 + $0x148] sm:$0xff]  ;;  %vm5087_vm11 = vmor %vm815_vm9, %vm816_vm10 }
  0x2e   : > { %2464 = vmatmul.bf16.vlgmr.msra.gmra.mxu2 %v3253_v56  ;;  %2555 = vmatpush.bf16.msrb.mxu1 %v4123_v59  ;;  %v3374_v55 = vld [vmem:[#allocation2 + $0x140] sm:$0xf0]  ;;  %v3380_v56 = vld [vmem:[#allocation2 + $0x108] sm:$0xf]  ;;  %v3382_v59 = vld [vmem:[#allocation2 + $0x148] sm:$0xf0] }
  0x2f   : > { %2588 = vmatpush.bf16.msrb.mxu2 %v4131_v52  ;;  %2497 = vmatmul.bf16.vlgmr.msra.gmra.mxu3 %v3257_v57  ;;  %v3372_v52 = vld [vmem:[#allocation2 + $0x100] sm:$0xf]  ;;  %v4053_v57 = vld [vmem:[#allocation2 + $0x144] sm:$0xf0]  ;;  %v2925_v49 = vld [vmem:[%s5389_s3 + $0x38] sm:$0xff] }
  0x30   : > { %2621 = vmatpush.bf16.msrb.mxu3 %v4139_v58  ;;  %v4045_v58 = vld [vmem:[#allocation2 + $0x10c] sm:$0xf]  ;;  %vm2934_vm1 = vcmp.gt.f32.partialorder %v2925_v49, 0.0 }
  0x31   : > { %2523 = vmatpush.bf16.msrb.mxu0 %v4114_v61  ;;  %v298_v61 = vld [vmem:[#allocation2 + $0x208] sm:$0xff] }
  0x32   : > { %2556 = vmatpush.bf16.msrb.mxu1 %v4122_v63  ;;  %v3377_v63 = vor.u32 %v4044_v53, %v3374_v55  ;;  %v3436_v53 = vld [vmem:[#allocation2 + $0x180] sm:$0xf] }
  0x33   : > { %2589 = vmatpush.bf16.msrb.mxu2 %v4130_v60  ;;  %v4598_v60 = vld [vmem:[%s4370_s24 + $0x88] sm:$0xff]  ;;  %v4068_v55 = vld [vmem:[#allocation2 + $0x1bc] sm:$0xf0] }
  0x34   : > { %2622 = vmatpush.bf16.msrb.mxu3 %v4138_v62  ;;  %v3373_v62 = vor.u32 %v4052_v54, %v3372_v52 }
  0x35   : > { %2524 = vmatpush.bf16.msrb.mxu0 %v4113_v1  ;;  %v3381_v1 = vor.u32 %v4053_v57, %v3380_v56  ;;  %v4060_v56 = vld [vmem:[#allocation2 + $0x184] sm:$0xf] }
  0x36   : > { %2557 = vmatpush.bf16.msrb.mxu1 %v4121_v5  ;;  %v322_v5 = vshrl.u32 %v4385_v16, 16  ;;  %v4124_v16 = vld [vmem:[%s5387_s1 + $0x180] sm:$0xff] }
  0x37   : > { %2590 = vmatpush.bf16.msrb.mxu2 %v4129_v0  ;;  %v4603_v0 = vsel %vm4584_vm6, %v4598_v60, %v298_v61  ;;  %v4069_v61 = vld [vmem:[#allocation2 + $0x1c4] sm:$0xf0] }
  0x38   : > { %2623 = vmatpush.bf16.msrb.mxu3 %v4137_v4  ;;  %v3385_v4 = vor.u32 %v4045_v58, %v3382_v59  ;;  %300 = vst [vmem:[#allocation2 + $0x208] sm:$0xff] %v4603_v0  ;;  %v324_v12 = vrot.slane %v322_v5, 4  ;;  %v3438_v58 = vld [vmem:[#allocation2 + $0x1c0] sm:$0xf0]  ;;  %v3444_v59 = vld [vmem:[#allocation2 + $0x188] sm:$0xf]  ;;  %v3437_v5 = vor.u32 %v4068_v55, %v3436_v53  ;;  %v1447_v53 = vunpack.c.h.b16 %v4594_v51 }
  0x39   : > { %2525 = vmatpush.bf16.msrb.mxu0 %v4112_v11  ;;  %v336_v11 = vshrl.u32 %v4392_v18, 16  ;;  %v3441_v8 = vor.u32 %v4060_v56, %v3438_v58  ;;  %v3445_v9 = vor.u32 %v4069_v61, %v3444_v59  ;;  %v1449_v55 = vunpack.c.h.b16 %v4603_v0 }
  0x3a   : > { %2558 = vmatpush.bf16.msrb.mxu1 %v4120_v23  ;;  %v339_v23 = vshll.u32 %v4392_v18, 16  ;;  %v4116_v18 = vld [vmem:[%s5387_s1 + $0x140] sm:$0xff]  ;;  %v1527_v61 = vpack.c.b16 %v1447_v53, %v1447_v53  ;;  %v449_v53 = vshrl.u32 %v4511_v2, 16 }
  0x3b   : > { %2591 = vmatpush.bf16.msrb.mxu2 %v4128_v10  ;;  %v349_v10 = vshrl.u32 %v4388_v17, 16  ;;  %v4108_v17 = vld [vmem:[%s5387_s1 + $0x100] sm:$0xff] }
  0x3c   : > { %2624 = vmatpush.bf16.msrb.mxu3 %v4136_v22  ;;  %2403 = vmatmul.bf16.gmra.mxu0 %v3309_v30  ;;  %v338_v22 = vrot.slane %v336_v11, 4  ;;  %v369_v11 = vshrl.u32 %v4413_v24, 16  ;;  %v4147_v24 = vld [vmem:[%s5387_s1 + $0x238] sm:$0xff] }
  0x3d   : > { %2526 = vmatpush.bf16.msrb.mxu0 %v4111_v29  ;;  %2436 = vmatmul.bf16.gmra.mxu1 %v3313_v31  ;;  %v351_v15 = vrot.slane %v349_v10, 4  ;;  %v328_v29 = vor.u32 %v327_v13, %v324_v12  ;;  %v345_v31 = vshll.u32 %v4395_v19, 16  ;;  %v375_v12 = vshll.u32 %v4416_v25, 16 }
  0x3e   : > { %2469 = vmatmul.bf16.gmra.mxu2 %v3317_v32  ;;  %2559 = vmatpush.bf16.msrb.mxu1 %v4119_v35  ;;  %v359_v32 = vshrl.u32 %v4395_v19, 16  ;;  %v341_v35 = vrot.slane %v339_v23, 5  ;;  %v389_v13 = vshrl.u32 %v4416_v25, 16  ;;  %v395_v25 = vshll.u32 %v4453_v36, 16  ;;  %v4162_v23 = vld [vmem:[%s5387_s1 + $0x2b0] sm:$0xff] }
  0x3f   : > { %2592 = vmatpush.bf16.msrb.mxu2 %v4127_v28  ;;  %2502 = vmatmul.bf16.gmra.mxu3 %v3321_v33  ;;  %v4132_v28 = vld [vmem:[%s5387_s1 + $0x1c0] sm:$0xff]  ;;  %v352_v30 = vor.u32 %v351_v15, %v333_v14  ;;  %v377_v15 = vrot.slane %v375_v12, 5  ;;  %v435_v12 = vshll.u32 %v4511_v2, 16  ;;  %v4190_v33 = vld [vmem:[%s5387_s1 + $0x390] sm:$0xff] }
  0x40   : > { %2625 = vmatpush.bf16.msrb.mxu3 %v4135_v34  ;;  %v357_v34 = vrot.slane %v355_v21, 5  ;;  %v4144_v2 = vld [vmem:[%s5387_s1 + $0x220] sm:$0xff] }
  0x41   : > { %2527 = vmatpush.bf16.msrb.mxu0 %v4110_v38  ;;  %v329_v38 = vrot.slane %v328_v29, 4  ;;  %v353_v19 = vrot.slane %v352_v30, 4  ;;  %v4146_v29 = vld [vmem:[%s5387_s1 + $0x230] sm:$0xff] }
  0x42   : > { %2560 = vmatpush.bf16.msrb.mxu1 %v4118_v40  ;;  %v361_v40 = vrot.slane %v359_v32, 4 }
  0x43   : > { %2593 = vmatpush.bf16.msrb.mxu2 %v4126_v37  ;;  %v365_v37 = vshll.u32 %v4420_v26, 16  ;;  %v358_v47 = vsel %vm4629_vm8, %v353_v19, %v357_v34  ;;  %v405_v19 = vshll.u32 %v4470_v45, 16 }
  0x44   : > { %2626 = vmatpush.bf16.msrb.mxu3 %v4134_v39  ;;  %v347_v39 = vrot.slane %v345_v31, 5  ;;  %519 = vst [vmem:[#allocation2 + $0x50] sm:$0xff] %v358_v47  ;;  %v4671_v31 = vrot.slane %v395_v25, 5 }
  0x45   : > { %2528 = vmatpush.bf16.msrb.mxu0 %v4109_v43  ;;  %v334_v43 = vsel %vm4629_vm8, %v329_v38, %v333_v14  ;;  %v4641_v52 = vrot.slane %v365_v37, 5  ;;  %v371_v14 = vrot.slane %v369_v11, 4  ;;  %v385_v37 = vshll.u32 %v4423_v27, 16 }
  0x46   : > { %2561 = vmatpush.bf16.msrb.mxu1 %v4117_v20  ;;  %517 = vst [vmem:[#allocation2 + $0x10] sm:$0xff] %v334_v43  ;;  %v379_v20 = vshrl.u32 %v4420_v26, 16  ;;  %v4155_v26 = vld [vmem:[%s5387_s1 + $0x278] sm:$0xff]  ;;  %v399_v38 = vshrl.u32 %v4423_v27, 16  ;;  %v407_v56 = vrot.slane %v405_v19, 5 }
  0x47   : > { %2594 = vmatpush.bf16.msrb.mxu2 %v4125_v42  ;;  %v342_v42 = vor.u32 %v341_v35, %v338_v22  ;;  %v372_v21 = vor.u32 %v371_v14, %v357_v34  ;;  %v4171_v22 = vld [vmem:[%s5387_s1 + $0x2f8] sm:$0xff]  ;;  %v4154_v34 = vld [vmem:[%s5387_s1 + $0x270] sm:$0xff]  ;;  %v387_v43 = vrot.slane %v385_v37, 5 }
  0x48   : > { %2627 = vmatpush.bf16.msrb.mxu3 %v4133_v50  ;;  %v362_v50 = vor.u32 %v361_v40, %v347_v39  ;;  %v381_v32 = vrot.slane %v379_v20, 4  ;;  %v401_v47 = vrot.slane %v399_v38, 4  ;;  %v4160_v20 = vld [vmem:[%s5387_s1 + $0x2a0] sm:$0xff] }
  0x49   : > { %2529 = vmatpush.bf16.msrb.mxu0 %v4108_v17  ;;  %v343_v54 = vrot.slane %v342_v42, 4  ;;  %v391_v17 = vrot.slane %v389_v13, 4  ;;  %v373_v30 = vrot.slane %v372_v21, 4  ;;  %v4153_v13 = vld [vmem:[%s5387_s1 + $0x268] sm:$0xff]  ;;  %v439_v21 = vshrl.u32 %v4473_v48, 16 }
  0x4a   : > { %2562 = vmatpush.bf16.msrb.mxu1 %v4116_v18  ;;  %v363_v57 = vrot.slane %v362_v50, 4  ;;  %v4170_v18 = vld [vmem:[%s5387_s1 + $0x2f0] sm:$0xff]  ;;  %v382_v40 = vor.u32 %v381_v32, %v4641_v52  ;;  %v1446_v50 = vunpack.c.l.b16 %v4594_v51  ;;  %v409_v51 = vshrl.u32 %v4453_v36, 16  ;;  %v4161_v36 = vld [vmem:[%s5387_s1 + $0x2a8] sm:$0xff] }
  0x4b   : > { %2595 = vmatpush.bf16.msrb.mxu2 %v4124_v16  ;;  %v4163_v16 = vld [vmem:[%s5387_s1 + $0x2b8] sm:$0xff] }
  0x4c   : > { %2408 = vmatmul.bf16.gmra.mxu0 %v3373_v62  ;;  %2628 = vmatpush.bf16.msrb.mxu3 %v4132_v28  ;;  %v348_v62 = vsel %vm4629_vm8, %v343_v54, %v347_v39  ;;  %v392_v28 = vor.u32 %v391_v17, %v377_v15  ;;  %v378_v39 = vsel %vm4629_vm8, %v373_v30, %v377_v15  ;;  %v383_v27 = vrot.slane %v382_v40, 4 }
  0x4d   : > { %2441 = vmatmul.bf16.gmra.mxu1 %v3377_v63  ;;  %v4061_v63 = vld [vmem:[#allocation2 + $0x18c] sm:$0xf]  ;;  %518 = vst [vmem:[#allocation2 + $0x18] sm:$0xff] %v348_v62  ;;  %2654 = vmatpush.bf16.msra.mxu0 %v4147_v24  ;;  %v1448_v54 = vunpack.c.l.b16 %v4603_v0  ;;  %v1526_v59 = vpack.c.b16 %v1446_v50, %v1446_v50  ;;  %v419_v0 = vshrl.u32 %v4470_v45, 16  ;;  %v4717_v17 = vrot.slane %v435_v12, 5 }
  0x4e   : > { %2474 = vmatmul.bf16.gmra.mxu2 %v3381_v1  ;;  %v3446_v1 = vld [vmem:[#allocation2 + $0x1c8] sm:$0xf0]  ;;  %2687 = vmatpush.bf16.msra.mxu1 %v4155_v26  ;;  %v393_v35 = vrot.slane %v392_v28, 4  ;;  %521 = vst [vmem:[#allocation2 + $0x90] sm:$0xff] %v378_v39  ;;  %v425_v24 = vshll.u32 %v4473_v48, 16  ;;  %v445_v26 = vshll.u32 %v4525_v6, 16 }
  0x4f   : > { %2507 = vmatmul.bf16.gmra.mxu3 %v3385_v4  ;;  %v368_v4 = vsel %vm4629_vm8, %v363_v57, %v4641_v52  ;;  %v3449_v10 = vor.u32 %v4061_v63, %v3446_v1  ;;  %2720 = vmatpush.bf16.msra.mxu2 %v4163_v16  ;;  %v402_v52 = vor.u32 %v401_v47, %v387_v43  ;;  %v4169_v45 = vld [vmem:[%s5387_s1 + $0x2e8] sm:$0xff]  ;;  %v441_v30 = vrot.slane %v439_v21, 4  ;;  %v4014_v32 = vld [vmem:[#allocation2 + $0x14] sm:$0xf] }
  0x50   : > { %520 = vst [vmem:[#allocation2 + $0x58] sm:$0xff] %v368_v4  ;;  %2753 = vmatpush.bf16.msra.mxu3 %v4171_v22  ;;  %v398_v42 = vsel %vm4629_vm8, %v393_v35, %v4671_v31  ;;  %v388_v57 = vsel %vm4629_vm8, %v383_v27, %v387_v43  ;;  %v1528_v62 = vpack.c.b16 %v1448_v54, %v1448_v54  ;;  %v415_v4 = vshll.u32 %v4462_v41, 16  ;;  %v3262_v35 = vld [vmem:[#allocation2 + $0x50] sm:$0xf0] }
  0x51   : > { %2655 = vmatpush.bf16.msra.mxu0 %v4146_v29  ;;  %523 = vst [vmem:[#allocation2 + $0xd0] sm:$0xff] %v398_v42  ;;  %v403_v58 = vrot.slane %v402_v52, 4  ;;  %v1529_v63 = vpack.c.b16 %v1449_v55, %v1449_v55  ;;  %v427_v28 = vrot.slane %v425_v24, 5  ;;  %v447_v38 = vrot.slane %v445_v26, 5 }
  0x52   : > { %2688 = vmatpush.bf16.msra.mxu1 %v4154_v34  ;;  %522 = vst [vmem:[#allocation2 + $0x98] sm:$0xff] %v388_v57  ;;  %v417_v11 = vrot.slane %v415_v4, 5  ;;  %v4022_v34 = vld [vmem:[#allocation2 + $0x4c] sm:$0xf0]  ;;  %v3265_v50 = vor.u32 %v4014_v32, %v3262_v35  ;;  %v459_v52 = vshrl.u32 %v4525_v6, 16  ;;  %v469_v57 = vshrl.u32 %v4514_v3, 16 }
  0x53   : > { %2721 = vmatpush.bf16.msra.mxu2 %v4162_v23  ;;  %v408_v1 = vsel %vm4629_vm8, %v403_v58, %v407_v56  ;;  %v442_v37 = vor.u32 %v441_v30, %v427_v28  ;;  %v451_v58 = vrot.slane %v449_v53, 4  ;;  %v4168_v6 = vld [vmem:[%s5387_s1 + $0x2e0] sm:$0xff]  ;;  %v479_v4 = vshrl.u32 %v4528_v7, 16 }
  0x54   : > { %2754 = vmatpush.bf16.msra.mxu3 %v4170_v18  ;;  %524 = vst [vmem:[#allocation2 + $0xd8] sm:$0xff] %v408_v1  ;;  %v3268_v19 = vld [vmem:[#allocation2 + $0x18] sm:$0xf]  ;;  %v4015_v39 = vld [vmem:[#allocation2 + $0x1c] sm:$0xf] }
  0x55   : > { %v443_v43 = vrot.slane %v442_v37, 4  ;;  %v452_v1 = vor.u32 %v451_v58, %v4717_v17  ;;  %v489_v37 = vshrl.u32 %v4575_v44, 16 }
  0x56   : > { %2689 = vmatpush.bf16.msra.mxu1 %v4153_v13 }
  0x57   : > { %2722 = vmatpush.bf16.msra.mxu2 %v4161_v36  ;;  %v4023_v40 = vld [vmem:[#allocation2 + $0x54] sm:$0xf0]  ;;  %v3270_v42 = vld [vmem:[#allocation2 + $0x58] sm:$0xf0]  ;;  %v448_v27 = vsel %vm4629_vm8, %v443_v43, %v447_v38  ;;  %v4142_v43 = vld [vmem:[%s5387_s1 + $0x210] sm:$0xff] }
  0x58   : > { %2755 = vmatpush.bf16.msra.mxu3 %v4169_v45  ;;  %v3269_v54 = vor.u32 %v4023_v40, %v3268_v19  ;;  %v3273_v55 = vor.u32 %v4015_v39, %v3270_v42  ;;  %528 = vst [vmem:[#allocation2 + $0x158] sm:$0xff] %v448_v27  ;;  %v453_v45 = vrot.slane %v452_v1, 4  ;;  %v4038_v21 = vld [vmem:[#allocation2 + $0xcc] sm:$0xf0]  ;;  %v491_v39 = vrot.slane %v489_v37, 4 }
  0x59   : > { %v4158_v19 = vld [vmem:[%s5387_s1 + $0x290] sm:$0xff] }
  0x5b   : > { %2723 = vmatpush.bf16.msra.mxu2 %v4160_v20  ;;  %v3324_v20 = vld [vmem:[#allocation2 + $0x90] sm:$0xf]  ;;  %v3334_v30 = vld [vmem:[#allocation2 + $0xd8] sm:$0xf0] }
  0x5c   : > { %2413 = vmatmul.bf16.gmra.mxu0 %v3437_v5  ;;  %v429_v5 = vshrl.u32 %v4462_v41, 16  ;;  %2756 = vmatpush.bf16.msra.mxu3 %v4168_v6  ;;  %v3325_v32 = vor.u32 %v4038_v21, %v3324_v20  ;;  %v4149_v20 = vld [vmem:[%s5387_s1 + $0x248] sm:$0xff] }
  0x5d   : > { %2446 = vmatmul.bf16.gmra.mxu1 %v3441_v8  ;;  %v411_v8 = vrot.slane %v409_v51, 4  ;;  %v471_v51 = vrot.slane %v469_v57, 4 }
  0x5e   : > { %2479 = vmatmul.bf16.gmra.mxu2 %v3445_v9  ;;  %v421_v9 = vrot.slane %v419_v0, 4  ;;  %v431_v41 = vrot.slane %v429_v5, 4  ;;  %v475_v0 = vshll.u32 %v4575_v44, 16  ;;  %v4143_v5 = vld [vmem:[%s5387_s1 + $0x218] sm:$0xff]  ;;  %v4166_v44 = vld [vmem:[%s5387_s1 + $0x2d0] sm:$0xff] }
  0x5f   : > { %2512 = vmatmul.bf16.gmra.mxu3 %v3449_v10  ;;  %v4145_v10 = vld [vmem:[%s5387_s1 + $0x228] sm:$0xff]  ;;  %v412_v14 = vor.u32 %v411_v8, %v4671_v31  ;;  %v3260_v31 = vld [vmem:[#allocation2 + $0x10] sm:$0xf]  ;;  %v4167_v8 = vld [vmem:[%s5387_s1 + $0x2d8] sm:$0xff] }
  0x60   : > { %v422_v15 = vor.u32 %v421_v9, %v407_v56  ;;  %2656 = vmatpush.bf16.msra.mxu0 %v4145_v10  ;;  %v432_v16 = vor.u32 %v431_v41, %v417_v11  ;;  %v3261_v47 = vor.u32 %v4022_v34, %v3260_v31  ;;  %v455_v56 = vshll.u32 %v4514_v3, 16  ;;  %v4152_v3 = vld [vmem:[%s5387_s1 + $0x260] sm:$0xff]  ;;  %v4151_v10 = vld [vmem:[%s5387_s1 + $0x258] sm:$0xff]  ;;  %2757 = vmatpush.bf16.msra.mxu3 %v4167_v8 }
  0x61   : > { %v413_v25 = vrot.slane %v412_v14, 4  ;;  %2690 = vmatpush.bf16.msra.mxu1 %v4152_v3  ;;  %v485_v41 = vshll.u32 %v4598_v60, 16  ;;  %v3398_v57 = vld [vmem:[#allocation2 + $0x158] sm:$0xf0] }
  0x62   : > { %v423_v22 = vrot.slane %v422_v15, 4  ;;  %v433_v23 = vrot.slane %v432_v16, 4  ;;  %v481_v15 = vrot.slane %v479_v4, 4  ;;  %v4030_v16 = vld [vmem:[#allocation2 + $0x94] sm:$0xf]  ;;  %v4794_v4 = vld [vmem:[%s4370_s24 + $0x20] sm:$0xff] }
  0x63   : > { %v418_v29 = vsel %vm4629_vm8, %v413_v25, %v417_v11  ;;  %v3326_v25 = vld [vmem:[#allocation2 + $0xd0] sm:$0xf0]  ;;  %v487_v26 = vrot.slane %v485_v41, 5  ;;  %v4165_v41 = vld [vmem:[%s5387_s1 + $0x2c8] sm:$0xff] }
  0x64   : > { %v438_v18 = vsel %vm4629_vm8, %v433_v23, %v4717_v17  ;;  %525 = vst [vmem:[#allocation2 + $0x110] sm:$0xff] %v418_v29  ;;  %v428_v48 = vsel %vm4629_vm8, %v423_v22, %v427_v28  ;;  %2657 = vmatpush.bf16.msra.mxu0 %v4144_v2  ;;  %v3332_v23 = vld [vmem:[#allocation2 + $0x98] sm:$0xf]  ;;  %v4031_v28 = vld [vmem:[#allocation2 + $0x9c] sm:$0xf]  ;;  %2758 = vmatpush.bf16.msra.mxu3 %v4166_v44 }
  0x65   : > { %527 = vst [vmem:[#allocation2 + $0x150] sm:$0xff] %v438_v18  ;;  %2691 = vmatpush.bf16.msra.mxu1 %v4151_v10  ;;  %v4039_v29 = vld [vmem:[#allocation2 + $0xd4] sm:$0xf0]  ;;  %v3329_v18 = vor.u32 %v4030_v16, %v3326_v25  ;;  %v3337_v35 = vor.u32 %v4031_v28, %v3334_v30  ;;  %v585_v10 = vshrl.u32 %v4794_v4, 16  ;;  %v4816_v16 = vld [vmem:[%s4370_s24 + $0x30] sm:$0xff] }
  0x66   : > { %526 = vst [vmem:[#allocation2 + $0x118] sm:$0xff] %v428_v48  ;;  %v3333_v34 = vor.u32 %v4039_v29, %v3332_v23  ;;  %v536_v2 = vld [vmem:[#allocation2 + $0x218] sm:$0xff]  ;;  %v591_v23 = vshll.u32 %v4816_v16, 16 }
  0x68   : > { %2658 = vmatpush.bf16.msra.mxu0 %v4143_v5  ;;  %v540_v5 = vld [vmem:[%s4370_s24 + $0x18] sm:$0xff]  ;;  %2759 = vmatpush.bf16.msra.mxu3 %v4165_v41 }
  0x69   : > { %v575_v21 = vshll.u32 %v540_v5, 16 }
  0x6b   : > { %v3388_v42 = vld [vmem:[#allocation2 + $0x110] sm:$0xf]  ;;  %v577_v30 = vrot.slane %v575_v21, 5 }
  0x6c   : > { %2418 = vmatmul.bf16.gmra.mxu0 %v1526_v59  ;;  %v457_v59 = vrot.slane %v455_v56, 5  ;;  %v4055_v56 = vld [vmem:[#allocation2 + $0x154] sm:$0xf0] }
  0x6d   : > { %2451 = vmatmul.bf16.gmra.mxu1 %v1527_v61  ;;  %v465_v61 = vshll.u32 %v4528_v7, 16  ;;  %v477_v7 = vrot.slane %v475_v0, 5  ;;  %2659 = vmatpush.bf16.msra.mxu0 %v4142_v43  ;;  %v539_v0 = vld [vmem:[%s4370_s24 + $0x10] sm:$0xff] }
  0x6e   : > { %2484 = vmatmul.bf16.gmra.mxu2 %v1528_v62  ;;  %v461_v62 = vrot.slane %v459_v52, 4  ;;  %v472_v9 = vor.u32 %v471_v51, %v457_v59  ;;  %v458_v14 = vsel %vm4629_vm8, %v453_v45, %v457_v59  ;;  %v4047_v52 = vld [vmem:[#allocation2 + $0x11c] sm:$0xf]  ;;  %v558_v8 = vshrl.u32 %v539_v0, 16  ;;  %v4801_v45 = vld [vmem:[%s4370_s24 + $0x28] sm:$0xff] }
  0x6f   : > { %2517 = vmatmul.bf16.gmra.mxu3 %v1529_v63  ;;  %v4159_v63 = vld [vmem:[%s5387_s1 + $0x298] sm:$0xff]  ;;  %v467_v11 = vrot.slane %v465_v61, 5  ;;  %529 = vst [vmem:[#allocation2 + $0x190] sm:$0xff] %v458_v14  ;;  %v492_v53 = vor.u32 %v491_v39, %v477_v7  ;;  %v533_v61 = vld [vmem:[#allocation2 + $0x210] sm:$0xff]  ;;  %v581_v25 = vshll.u32 %v4801_v45, 16  ;;  %v595_v28 = vshrl.u32 %v4801_v45, 16 }
  0x70   : > { %v462_v36 = vor.u32 %v461_v62, %v447_v38  ;;  %2724 = vmatpush.bf16.msra.mxu2 %v4159_v63  ;;  %v473_v12 = vrot.slane %v472_v9, 4  ;;  %v494_v38 = vshrl.u32 %v4598_v60, 16  ;;  %v4046_v60 = vld [vmem:[#allocation2 + $0x114] sm:$0xf]  ;;  %v3401_v63 = vor.u32 %v4047_v52, %v3398_v57  ;;  %v4148_v57 = vld [vmem:[%s5387_s1 + $0x240] sm:$0xff] }
  0x71   : > { %v482_v22 = vor.u32 %v481_v15, %v467_v11  ;;  %v493_v58 = vrot.slane %v492_v53, 4  ;;  %v561_v9 = vshll.u32 %v539_v0, 16  ;;  %v587_v15 = vrot.slane %v585_v10, 4  ;;  %v4156_v53 = vld [vmem:[%s5387_s1 + $0x280] sm:$0xff] }
  0x72   : > { %v463_v13 = vrot.slane %v462_v36, 4  ;;  %v478_v17 = vsel %vm4629_vm8, %v473_v12, %v477_v7  ;;  %v496_v40 = vrot.slane %v494_v38, 4  ;;  %v567_v36 = vshll.u32 %v4794_v4, 16  ;;  %v4157_v7 = vld [vmem:[%s5387_s1 + $0x288] sm:$0xff] }
  0x73   : > { %531 = vst [vmem:[#allocation2 + $0x1d0] sm:$0xff] %v478_v17  ;;  %v483_v31 = vrot.slane %v482_v22, 4  ;;  %v4785_v51 = vsel %vm4584_vm6, %v493_v58, %v533_v61  ;;  %v560_v12 = vrot.slane %v558_v8, 4  ;;  %v4819_v17 = vld [vmem:[%s4370_s24 + $0x38] sm:$0xff]  ;;  %v4857_v8 = vld [vmem:[%s4370_s24 + $0x40] sm:$0xff] }
  0x74   : > { %v468_v24 = vsel %vm4629_vm8, %v463_v13, %v467_v11  ;;  %2725 = vmatpush.bf16.msra.mxu2 %v4158_v19  ;;  %v497_v27 = vor.u32 %v496_v40, %v487_v26  ;;  %535 = vst [vmem:[#allocation2 + $0x210] sm:$0xff] %v4785_v51  ;;  %v4141_v11 = vld [vmem:[%s5387_s1 + $0x208] sm:$0xff]  ;;  %v563_v13 = vrot.slane %v561_v9, 5  ;;  %v569_v14 = vrot.slane %v567_v36, 5 }
  0x75   : > { %530 = vst [vmem:[#allocation2 + $0x198] sm:$0xff] %v468_v24  ;;  %v488_v48 = vsel %vm4629_vm8, %v483_v31, %v487_v26  ;;  %v572_v24 = vshrl.u32 %v540_v5, 16  ;;  %2660 = vmatpush.bf16.msra.mxu0 %v4141_v11  ;;  %v583_v31 = vrot.slane %v581_v25, 5  ;;  %v605_v36 = vshrl.u32 %v4816_v16, 16  ;;  %v4203_v25 = vld [vmem:[%s5387_s1 + $0x3f8] sm:$0xff] }
  0x76   : > { %532 = vst [vmem:[#allocation2 + $0x1d8] sm:$0xff] %v488_v48  ;;  %v498_v59 = vrot.slane %v497_v27, 4  ;;  %v564_v22 = vor.u32 %v563_v13, %v560_v12  ;;  %v588_v26 = vor.u32 %v587_v15, %v569_v14  ;;  %v4062_v44 = vld [vmem:[#allocation2 + $0x194] sm:$0xf]  ;;  %v4140_v27 = vld [vmem:[%s5387_s1 + $0x200] sm:$0xff]  ;;  %v611_v10 = vshll.u32 %v4857_v8, 16 }
  0x77   : > { %v574_v29 = vrot.slane %v572_v24, 4  ;;  %v615_v11 = vshrl.u32 %v4819_v17, 16  ;;  %v607_v12 = vrot.slane %v605_v36, 4  ;;  %v4865_v13 = vld [vmem:[%s4370_s24 + $0x48] sm:$0xff] }
  0x78   : > { %v4790_v1 = vsel %vm4584_vm6, %v498_v59, %v536_v2  ;;  %2726 = vmatpush.bf16.msra.mxu2 %v4157_v7  ;;  %v589_v48 = vrot.slane %v588_v26, 4  ;;  %v625_v7 = vshrl.u32 %v4857_v8, 16  ;;  %v613_v15 = vrot.slane %v611_v10, 5  ;;  %v4881_v26 = vld [vmem:[%s4370_s24 + $0x58] sm:$0xff] }
  0x79   : > { %538 = vst [vmem:[#allocation2 + $0x218] sm:$0xff] %v4790_v1  ;;  %v578_v37 = vor.u32 %v577_v30, %v574_v29  ;;  %2661 = vmatpush.bf16.msra.mxu0 %v4140_v27  ;;  %v4187_v27 = vld [vmem:[%s5387_s1 + $0x378] sm:$0xff] }
  0x7a   : > { %v4070_v43 = vld [vmem:[#allocation2 + $0x1cc] sm:$0xf0]  ;;  %v627_v21 = vrot.slane %v625_v7, 4 }
  0x7c   : > { %2530 = vmatmul.bf16.vlgmr.msrb.gmra.mxu0 %v3261_v47  ;;  %v4054_v47 = vld [vmem:[#allocation2 + $0x14c] sm:$0xf0]  ;;  %v3460_v52 = vld [vmem:[#allocation2 + $0x198] sm:$0xf]  ;;  %2727 = vmatpush.bf16.msra.mxu2 %v4156_v53  ;;  %v1450_v53 = vunpack.c.l.b16 %v4785_v51 }
  0x7d   : > { %2563 = vmatmul.bf16.vlgmr.msrb.gmra.mxu1 %v3265_v50  ;;  %v4150_v50 = vld [vmem:[%s5387_s1 + $0x250] sm:$0xff]  ;;  %v3389_v6 = vor.u32 %v4054_v47, %v3388_v42  ;;  %v4071_v59 = vld [vmem:[#allocation2 + $0x1d4] sm:$0xf0]  ;;  %v3462_v61 = vld [vmem:[#allocation2 + $0x1d8] sm:$0xf0] }
  0x7e   : > { %2596 = vmatmul.bf16.vlgmr.msrb.gmra.mxu2 %v3269_v54  ;;  %v3390_v54 = vld [vmem:[#allocation2 + $0x150] sm:$0xf0]  ;;  %2692 = vmatpush.bf16.msra.mxu1 %v4150_v50  ;;  %v3452_v42 = vld [vmem:[#allocation2 + $0x190] sm:$0xf]  ;;  %v4837_v50 = vld [vmem:[%s5388_s2] ss:$0 sm:$0xff]  ;;  %v3461_v0 = vor.u32 %v4071_v59, %v3460_v52  ;;  %v1451_v52 = vunpack.c.h.b16 %v4785_v51  ;;  %v1453_v59 = vunpack.c.h.b16 %v4790_v1 }
  0x7f   : > { %2629 = vmatmul.bf16.vlgmr.msrb.gmra.mxu3 %v3273_v55  ;;  %v3396_v55 = vld [vmem:[#allocation2 + $0x118] sm:$0xf]  ;;  %v3393_v3 = vor.u32 %v4046_v60, %v3390_v54  ;;  %v3454_v47 = vld [vmem:[#allocation2 + $0x1d0] sm:$0xf0]  ;;  %v579_v60 = vrot.slane %v578_v37, 4  ;;  %v4164_v54 = vld [vmem:[%s5387_s1 + $0x2c0] sm:$0xff] }
  0x80   : > { %v3397_v62 = vor.u32 %v4055_v56, %v3396_v55  ;;  %v4063_v56 = vld [vmem:[#allocation2 + $0x19c] sm:$0xf]  ;;  %2760 = vmatpush.bf16.msra.mxu3 %v4164_v54  ;;  %v1533_v10 = vpack.c.b16 %v1453_v59, %v1453_v59 }
  0x81   : > { %v584_v58 = vsel %vm4629_vm8, %v579_v60, %v583_v31  ;;  %v3465_v5 = vor.u32 %v4063_v56, %v3462_v61  ;;  %v1452_v56 = vunpack.c.l.b16 %v4790_v1 }
  0x82   : > { %2693 = vmatpush.bf16.msra.mxu1 %v4149_v20  ;;  %754 = vst [vmem:[#allocation2 + $0x28] sm:$0xff] %v584_v58  ;;  %v4179_v20 = vld [vmem:[%s5387_s1 + $0x338] sm:$0xff] }
  0x83   : > { %2786 = vmatpush.bf16.msrb.mxu0 %v4179_v20  ;;  %v1532_v1 = vpack.c.b16 %v1452_v56, %v1452_v56 }
  0x84   : > { %2885 = vmatpush.bf16.msrb.mxu3 %v4203_v25 }
  0x86   : > { %2694 = vmatpush.bf16.msra.mxu1 %v4148_v57  ;;  %v4194_v57 = vld [vmem:[%s5387_s1 + $0x3b0] sm:$0xff] }
  0x8a   : > { %2819 = vmatpush.bf16.msrb.mxu1 %v4187_v27 }
  0x8c   : > { %2535 = vmatmul.bf16.gmra.mxu0 %v3325_v32  ;;  %v601_v32 = vshll.u32 %v4819_v17, 16 }
  0x8d   : > { %2568 = vmatmul.bf16.gmra.mxu1 %v3329_v18  ;;  %v565_v18 = vrot.slane %v564_v22, 4  ;;  %v4878_v22 = vld [vmem:[%s4370_s24 + $0x50] sm:$0xff] }
  0x8e   : > { %2601 = vmatmul.bf16.gmra.mxu2 %v3333_v34  ;;  %v4825_v34 = vrot.slane %v591_v23, 5  ;;  %v4832_v40 = vrot.slane %v601_v32, 5  ;;  %v617_v23 = vrot.slane %v615_v11, 4  ;;  %v628_v32 = vor.u32 %v627_v21, %v613_v15  ;;  %v4913_v11 = vld [vmem:[%s4370_s24 + $0x60] sm:$0xff]  ;;  %v4202_v21 = vld [vmem:[%s5387_s1 + $0x3f0] sm:$0xff] }
  0x8f   : > { %2634 = vmatmul.bf16.gmra.mxu3 %v3337_v35  ;;  %v597_v35 = vrot.slane %v595_v28, 4  ;;  %v570_v38 = vsel %vm4629_vm8, %v565_v18, %v569_v14  ;;  %v4195_v14 = vld [vmem:[%s5387_s1 + $0x3b8] sm:$0xff]  ;;  %v621_v28 = vshll.u32 %v4865_v13, 16  ;;  %v631_v18 = vshll.u32 %v4878_v22, 16 }
  0x90   : > { %v594_v19 = vsel %vm4629_vm8, %v589_v48, %v4825_v34  ;;  %753 = vst [vmem:[#allocation2 + $0x20] sm:$0xff] %v570_v38  ;;  %v608_v24 = vor.u32 %v607_v12, %v4825_v34  ;;  %2852 = vmatpush.bf16.msrb.mxu2 %v4195_v14  ;;  %v635_v48 = vshrl.u32 %v4865_v13, 16  ;;  %v618_v38 = vor.u32 %v617_v23, %v4832_v40 }
  0x91   : > { %v598_v39 = vor.u32 %v597_v35, %v583_v31  ;;  %755 = vst [vmem:[#allocation2 + $0x60] sm:$0xff] %v594_v19  ;;  %v623_v19 = vrot.slane %v621_v28, 5  ;;  %v645_v14 = vshrl.u32 %v4878_v22, 16  ;;  %v651_v25 = vshll.u32 %v4913_v11, 16  ;;  %2886 = vmatpush.bf16.msrb.mxu3 %v4202_v21 }
  0x92   : > { %v609_v31 = vrot.slane %v608_v24, 4  ;;  %v637_v54 = vrot.slane %v635_v48, 4  ;;  %v4178_v24 = vld [vmem:[%s5387_s1 + $0x330] sm:$0xff]  ;;  %v665_v23 = vshrl.u32 %v4913_v11, 16 }
  0x93   : > { %v599_v55 = vrot.slane %v598_v39, 4  ;;  %v641_v39 = vshll.u32 %v4881_v26, 16  ;;  %2787 = vmatpush.bf16.msrb.mxu0 %v4178_v24 }
  0x94   : > { %2853 = vmatpush.bf16.msrb.mxu2 %v4194_v57 }
  0x95   : > { %v604_v2 = vsel %vm4629_vm8, %v599_v55, %v4832_v40  ;;  %v619_v40 = vrot.slane %v618_v38, 4  ;;  %v643_v51 = vrot.slane %v641_v39, 5  ;;  %v4941_v38 = vld [vmem:[%s4370_s24 + $0x78] sm:$0xff] }
  0x96   : > { %756 = vst [vmem:[#allocation2 + $0x68] sm:$0xff] %v604_v2  ;;  %v638_v2 = vor.u32 %v637_v54, %v623_v19  ;;  %v681_v54 = vshll.u32 %v4941_v38, 16 }
  0x97   : > { %v624_v61 = vsel %vm4629_vm8, %v619_v40, %v623_v19 }
  0x98   : > { %758 = vst [vmem:[#allocation2 + $0xa8] sm:$0xff] %v624_v61 }
  0x9c   : > { %2540 = vmatmul.bf16.gmra.mxu0 %v3389_v6  ;;  %v3453_v6 = vor.u32 %v4070_v43, %v3452_v42  ;;  %v614_v43 = vsel %vm4629_vm8, %v609_v31, %v613_v15  ;;  %v655_v15 = vshrl.u32 %v4881_v26, 16  ;;  %v647_v31 = vrot.slane %v645_v14, 4  ;;  %v3284_v14 = vld [vmem:[#allocation2 + $0x28] sm:$0xf] }
  0x9d   : > { %2573 = vmatmul.bf16.gmra.mxu1 %v3393_v3  ;;  %v3457_v3 = vor.u32 %v4062_v44, %v3454_v47  ;;  %v629_v44 = vrot.slane %v628_v32, 4  ;;  %v4891_v47 = vrot.slane %v631_v18, 5  ;;  %757 = vst [vmem:[#allocation2 + $0xa0] sm:$0xff] %v614_v43  ;;  %v4936_v18 = vld [vmem:[%s4370_s24 + $0x70] sm:$0xff]  ;;  %v4025_v24 = vld [vmem:[#allocation2 + $0x64] sm:$0xf0] }
  0x9e   : > { %2606 = vmatmul.bf16.gmra.mxu2 %v3397_v62  ;;  %v657_v32 = vrot.slane %v655_v15, 4  ;;  %v4017_v15 = vld [vmem:[#allocation2 + $0x2c] sm:$0xf] }
  0x9f   : > { %2639 = vmatmul.bf16.gmra.mxu3 %v3401_v63  ;;  %v634_v58 = vsel %vm4629_vm8, %v629_v44, %v4891_v47  ;;  %v648_v48 = vor.u32 %v647_v31, %v4891_v47  ;;  %v3286_v21 = vld [vmem:[#allocation2 + $0x68] sm:$0xf0] }
  0xa0   : > { %759 = vst [vmem:[#allocation2 + $0xe0] sm:$0xff] %v634_v58  ;;  %v658_v19 = vor.u32 %v657_v32, %v643_v51 }
  0xa2   : > { %v659_v56 = vrot.slane %v658_v19, 4  ;;  %v4975_v19 = vld [vmem:[%s4370_s24 + $0x80] sm:$0xff] }
  0xa9   : > { %v2399_v62 = vpop.f32.mrf.mxu0 }
  0xaa   : > { %v2432_v63 = vpop.f32.mrf.mxu1  ;;  %v2400_v9 = vadd.f32 %v4837_v50, %v2399_v62 }
  0xac   : > { %v2433_v41 = vadd.f32 %v2432_v63, %v2400_v9  ;;  %2545 = vmatmul.bf16.gmra.mxu0 %v3453_v6  ;;  %v639_v6 = vrot.slane %v638_v2, 4  ;;  %v1530_v63 = vpack.c.b16 %v1450_v53, %v1450_v53  ;;  %v649_v53 = vrot.slane %v648_v48, 4 }
  0xad   : > { %2578 = vmatmul.bf16.gmra.mxu1 %v3457_v3 }
  0xae   : > { %2611 = vmatmul.bf16.gmra.mxu2 %v3461_v0  ;;  %v1531_v0 = vpack.c.b16 %v1451_v52, %v1451_v52  ;;  %v644_v7 = vsel %vm4629_vm8, %v639_v6, %v643_v51  ;;  %v3276_v51 = vld [vmem:[#allocation2 + $0x20] sm:$0xf] }
  0xaf   : > { %2644 = vmatmul.bf16.gmra.mxu3 %v3465_v5  ;;  %760 = vst [vmem:[#allocation2 + $0xe8] sm:$0xff] %v644_v7  ;;  %v4024_v6 = vld [vmem:[#allocation2 + $0x5c] sm:$0xf0] }
  0xb1   : > { %v2465_v29 = vpop.f32.mrf.mxu2  ;;  %v2401_v35 = vpop.f32.mrf.mxu0 }
  0xb2   : > { %v2498_v30 = vpop.f32.mrf.mxu3  ;;  %v2466_v34 = vadd.f32 %v2465_v29, %v2433_v41  ;;  %v2434_v37 = vpop.f32.mrf.mxu1  ;;  %v2402_v42 = vadd.f32 %v4837_v50, %v2401_v35  ;;  %v4916_v41 = vld [vmem:[%s4370_s24 + $0x68] sm:$0xff]  ;;  %v667_v35 = vrot.slane %v665_v23, 4 }
  0xb3   : > { %v661_v28 = vshll.u32 %v4916_v41, 16 }
  0xb4   : > { %v4893_v60 = vadd.f32 %v2498_v30, %v2466_v34  ;;  %v2435_v55 = vadd.f32 %v2434_v37, %v2402_v42  ;;  %v4186_v30 = vld [vmem:[%s5387_s1 + $0x370] sm:$0xff]  ;;  %v653_v34 = vrot.slane %v651_v25, 5  ;;  %v671_v37 = vshll.u32 %v4936_v18, 16 }
  0xb5   : > { %2820 = vmatpush.bf16.msrb.mxu1 %v4186_v30  ;;  %v663_v39 = vrot.slane %v661_v28, 5  ;;  %v675_v42 = vshrl.u32 %v4916_v41, 16 }
  0xb6   : > { %v668_v27 = vor.u32 %v667_v35, %v653_v34  ;;  %v4944_v40 = vrot.slane %v671_v37, 5  ;;  %v654_v59 = vsel %vm4629_vm8, %v649_v53, %v653_v34  ;;  %v3285_v35 = vor.u32 %v4025_v24, %v3284_v14 }
  0xb7   : > { %v677_v57 = vrot.slane %v675_v42, 4  ;;  %761 = vst [vmem:[#allocation2 + $0x120] sm:$0xff] %v654_v59  ;;  %v3289_v37 = vor.u32 %v4017_v15, %v3286_v21  ;;  %v685_v42 = vshrl.u32 %v4936_v18, 16  ;;  %v691_v53 = vshll.u32 %v4975_v19, 16 }
  0xb8   : > { %v669_v61 = vrot.slane %v668_v27, 4  ;;  %v705_v27 = vshrl.u32 %v4975_v19, 16 }
  0xb9   : > { %v2467_v3 = vpop.f32.mrf.mxu2  ;;  %v2404_v9 = vpop.f32.mrf.mxu0  ;;  %v678_v7 = vor.u32 %v677_v57, %v663_v39  ;;  %v4200_v57 = vld [vmem:[%s5387_s1 + $0x3e0] sm:$0xff]  ;;  %v693_v59 = vrot.slane %v691_v53, 5 }
  0xba   : > { %v2500_v62 = vpop.f32.mrf.mxu3  ;;  %v2468_v5 = vadd.f32 %v2467_v3, %v2435_v55  ;;  %v2437_v36 = vpop.f32.mrf.mxu1  ;;  %v2405_v12 = vadd.f32 %v4837_v50, %v2404_v9  ;;  %v4016_v3 = vld [vmem:[#allocation2 + $0x24] sm:$0xf]  ;;  %v4177_v9 = vld [vmem:[%s5387_s1 + $0x328] sm:$0xff] }
  0xbb   : > { %2788 = vmatpush.bf16.msrb.mxu0 %v4177_v9  ;;  %v679_v25 = vrot.slane %v678_v7, 4 }
  0xbc   : > { %v4921_v20 = vadd.f32 %v2500_v62, %v2468_v5  ;;  %v2438_v29 = vadd.f32 %v2437_v36, %v2405_v12  ;;  %2550 = vmatmul.bf16.gmra.mxu0 %v1530_v63  ;;  %v3278_v62 = vld [vmem:[#allocation2 + $0x60] sm:$0xf0]  ;;  %v4193_v63 = vld [vmem:[%s5387_s1 + $0x3a8] sm:$0xff]  ;;  %v4969_v12 = vrot.slane %v681_v54, 5 }
  0xbd   : > { %2583 = vmatmul.bf16.gmra.mxu1 %v1531_v0  ;;  %v664_v0 = vsel %vm4629_vm8, %v659_v56, %v663_v39  ;;  %v4201_v36 = vld [vmem:[%s5387_s1 + $0x3e8] sm:$0xff]  ;;  %2854 = vmatpush.bf16.msrb.mxu2 %v4193_v63  ;;  %v3281_v30 = vor.u32 %v4016_v3, %v3278_v62  ;;  %v4176_v56 = vld [vmem:[%s5387_s1 + $0x320] sm:$0xff]  ;;  %v5004_v3 = vld [vmem:[%s4370_s24 + $0x98] sm:$0xff] }
  0xbe   : > { %2616 = vmatmul.bf16.gmra.mxu2 %v1532_v1  ;;  %v4185_v1 = vld [vmem:[%s5387_s1 + $0x368] sm:$0xff]  ;;  %762 = vst [vmem:[#allocation2 + $0x128] sm:$0xff] %v664_v0  ;;  %2887 = vmatpush.bf16.msrb.mxu3 %v4201_v36  ;;  %v684_v31 = vsel %vm4629_vm8, %v679_v25, %v4969_v12  ;;  %v721_v25 = vshll.u32 %v5004_v3, 16 }
  0xbf   : > { %2649 = vmatmul.bf16.gmra.mxu3 %v1533_v10  ;;  %v674_v10 = vsel %vm4629_vm8, %v669_v61, %v4944_v40  ;;  %2821 = vmatpush.bf16.msrb.mxu1 %v4185_v1  ;;  %764 = vst [vmem:[#allocation2 + $0x168] sm:$0xff] %v684_v31  ;;  %v4985_v54 = vld [vmem:[%s4370_s24 + $0x88] sm:$0xff]  ;;  %v707_v61 = vrot.slane %v705_v27, 4 }
  0xc0   : > { %763 = vst [vmem:[#allocation2 + $0x160] sm:$0xff] %v674_v10  ;;  %v701_v63 = vshll.u32 %v4985_v54, 16  ;;  %2789 = vmatpush.bf16.msrb.mxu0 %v4176_v56  ;;  %v715_v9 = vshrl.u32 %v4985_v54, 16  ;;  %v723_v56 = vrot.slane %v721_v25, 5 }
  0xc1   : > { %v2470_v43 = vpop.f32.mrf.mxu2  ;;  %v2406_v55 = vpop.f32.mrf.mxu0  ;;  %v708_v0 = vor.u32 %v707_v61, %v693_v59 }
  0xc2   : > { %v2503_v44 = vpop.f32.mrf.mxu3  ;;  %v2471_v47 = vadd.f32 %v2470_v43, %v2438_v29  ;;  %v2439_v52 = vpop.f32.mrf.mxu1  ;;  %v2407_v58 = vadd.f32 %v4837_v50, %v2406_v55  ;;  %v3277_v29 = vor.u32 %v4024_v6, %v3276_v51  ;;  %v695_v43 = vshrl.u32 %v4941_v38, 16  ;;  %v4192_v55 = vld [vmem:[%s5387_s1 + $0x3a0] sm:$0xff]  ;;  %v5000_v51 = vld [vmem:[%s4370_s24 + $0x90] sm:$0xff]  ;;  %2888 = vmatpush.bf16.msrb.mxu3 %v4200_v57  ;;  %v4041_v57 = vld [vmem:[#allocation2 + $0xe4] sm:$0xf0] }
  0xc3   : > { %2855 = vmatpush.bf16.msrb.mxu2 %v4192_v55  ;;  %v709_v24 = vrot.slane %v708_v0, 4  ;;  %v703_v21 = vrot.slane %v701_v63, 5  ;;  %v4033_v55 = vld [vmem:[#allocation2 + $0xac] sm:$0xf]  ;;  %v4183_v0 = vld [vmem:[%s5387_s1 + $0x358] sm:$0xff] }
  0xc4   : > { %v4950_v2 = vadd.f32 %v2503_v44, %v2471_v47  ;;  %v2440_v5 = vadd.f32 %v2439_v52, %v2407_v58  ;;  %v687_v52 = vrot.slane %v685_v42, 4  ;;  %v4184_v58 = vld [vmem:[%s5387_s1 + $0x360] sm:$0xff]  ;;  %v697_v62 = vrot.slane %v695_v43, 4 }
  0xc5   : > { %2822 = vmatpush.bf16.msrb.mxu1 %v4184_v58  ;;  %v4032_v42 = vld [vmem:[#allocation2 + $0xa4] sm:$0xf]  ;;  %v3350_v58 = vld [vmem:[#allocation2 + $0xe8] sm:$0xf0] }
  0xc6   : > { %v688_v6 = vor.u32 %v687_v52, %v4944_v40  ;;  %v698_v7 = vor.u32 %v697_v62, %v4969_v12  ;;  %v4191_v12 = vld [vmem:[%s5387_s1 + $0x398] sm:$0xff]  ;;  %v3342_v43 = vld [vmem:[#allocation2 + $0xe0] sm:$0xf0] }
  0xc7   : > { %2856 = vmatpush.bf16.msrb.mxu2 %v4191_v12  ;;  %v3345_v63 = vor.u32 %v4032_v42, %v3342_v43  ;;  %v4198_v42 = vld [vmem:[%s5387_s1 + $0x3d0] sm:$0xff] }
  0xc8   : > { %v689_v10 = vrot.slane %v688_v6, 4 }
  0xc9   : > { %v2472_v23 = vpop.f32.mrf.mxu2  ;;  %v2409_v48 = vpop.f32.mrf.mxu0  ;;  %2823 = vmatpush.bf16.msrb.mxu1 %v4183_v0  ;;  %v769_v0 = vld [vmem:[#allocation2 + $0x220] sm:$0xff] }
  0xca   : > { %v2505_v28 = vpop.f32.mrf.mxu3  ;;  %v2473_v32 = vadd.f32 %v2472_v23, %v2440_v5  ;;  %v2442_v34 = vpop.f32.mrf.mxu1  ;;  %v2410_v39 = vadd.f32 %v4837_v50, %v2409_v48  ;;  %v711_v5 = vshll.u32 %v5000_v51, 16  ;;  %v4175_v48 = vld [vmem:[%s5387_s1 + $0x318] sm:$0xff] }
  0xcb   : > { %2790 = vmatpush.bf16.msrb.mxu0 %v4175_v48  ;;  %2857 = vmatpush.bf16.msrb.mxu2 %v4190_v33 }
  0xcc   : > { %v4980_v44 = vadd.f32 %v2505_v28, %v2473_v32  ;;  %v2443_v47 = vadd.f32 %v2442_v34, %v2410_v39  ;;  %2662 = vmatmul.bf16.vlgmr.msra.gmra.mxu0 %v3277_v29  ;;  %v694_v28 = vsel %vm4629_vm8, %v689_v10, %v693_v59  ;;  %v5014_v29 = vrot.slane %v711_v5, 5  ;;  %v3340_v32 = vld [vmem:[#allocation2 + $0xa0] sm:$0xf]  ;;  %v4199_v34 = vld [vmem:[%s5387_s1 + $0x3d8] sm:$0xff] }
  0xcd   : > { %2695 = vmatmul.bf16.vlgmr.msra.gmra.mxu1 %v3281_v30  ;;  %v699_v30 = vrot.slane %v698_v7, 4  ;;  %765 = vst [vmem:[#allocation2 + $0x1a0] sm:$0xff] %v694_v28  ;;  %v4040_v39 = vld [vmem:[#allocation2 + $0xdc] sm:$0xf0]  ;;  %2889 = vmatpush.bf16.msrb.mxu3 %v4199_v34  ;;  %v3353_v10 = vor.u32 %v4033_v55, %v3350_v58  ;;  %v3406_v58 = vld [vmem:[#allocation2 + $0x160] sm:$0xf0] }
  0xce   : > { %2728 = vmatmul.bf16.vlgmr.msra.gmra.mxu2 %v3285_v35  ;;  %v717_v35 = vrot.slane %v715_v9, 4  ;;  %v714_v53 = vsel %vm4629_vm8, %v709_v24, %v5014_v29  ;;  %v3341_v62 = vor.u32 %v4040_v39, %v3340_v32  ;;  %v725_v24 = vshrl.u32 %v5000_v51, 16  ;;  %v4174_v39 = vld [vmem:[%s5387_s1 + $0x310] sm:$0xff] }
  0xcf   : > { %2761 = vmatmul.bf16.vlgmr.msra.gmra.mxu3 %v3289_v37  ;;  %v704_v27 = vsel %vm4629_vm8, %v699_v30, %v703_v21  ;;  %767 = vst [vmem:[#allocation2 + $0x1e0] sm:$0xff] %v714_v53  ;;  %v4048_v53 = vld [vmem:[#allocation2 + $0x124] sm:$0xf]  ;;  %2791 = vmatpush.bf16.msrb.mxu0 %v4174_v39 }
  0xd0   : > { %v718_v52 = vor.u32 %v717_v35, %v703_v21  ;;  %766 = vst [vmem:[#allocation2 + $0x1a8] sm:$0xff] %v704_v27  ;;  %v730_v21 = vshrl.u32 %v5004_v3, 16  ;;  %v727_v28 = vrot.slane %v725_v24, 4  ;;  %v3412_v27 = vld [vmem:[#allocation2 + $0x128] sm:$0xf] }
  0xd1   : > { %v2475_v36 = vpop.f32.mrf.mxu2  ;;  %v2411_v40 = vpop.f32.mrf.mxu0  ;;  %2890 = vmatpush.bf16.msrb.mxu3 %v4198_v42 }
  0xd2   : > { %v2508_v1 = vpop.f32.mrf.mxu3  ;;  %v2476_v14 = vadd.f32 %v2475_v36, %v2443_v47  ;;  %v2444_v15 = vpop.f32.mrf.mxu1  ;;  %v2412_v23 = vadd.f32 %v4837_v50, %v2411_v40  ;;  %v3348_v47 = vld [vmem:[#allocation2 + $0xa8] sm:$0xf]  ;;  %v719_v59 = vrot.slane %v718_v52, 4  ;;  %v732_v30 = vrot.slane %v730_v21, 4 }
  0xd3   : > { %v728_v55 = vor.u32 %v727_v28, %v5014_v29 }
  0xd4   : > { %v5016_v31 = vadd.f32 %v2508_v1, %v2476_v14  ;;  %v2445_v37 = vadd.f32 %v2444_v15, %v2412_v23  ;;  %v3349_v1 = vor.u32 %v4041_v57, %v3348_v47  ;;  %v724_v7 = vsel %vm4629_vm8, %v719_v59, %v723_v56  ;;  %v4182_v47 = vld [vmem:[%s5387_s1 + $0x350] sm:$0xff]  ;;  %v4056_v57 = vld [vmem:[#allocation2 + $0x15c] sm:$0xf0]  ;;  %v4049_v59 = vld [vmem:[#allocation2 + $0x12c] sm:$0xf] }
  0xd5   : > { %768 = vst [vmem:[#allocation2 + $0x1e8] sm:$0xff] %v724_v7  ;;  %v733_v52 = vor.u32 %v732_v30, %v723_v56  ;;  %2824 = vmatpush.bf16.msrb.mxu1 %v4182_v47  ;;  %v4173_v30 = vld [vmem:[%s5387_s1 + $0x308] sm:$0xff] }
  0xd6   : > { %2792 = vmatpush.bf16.msrb.mxu0 %v4173_v30 }
  0xd9   : > { %v2477_v61 = vpop.f32.mrf.mxu2  ;;  %v2414_v9 = vpop.f32.mrf.mxu0 }
  0xda   : > { %v2510_v6 = vpop.f32.mrf.mxu3  ;;  %v2478_v5 = vadd.f32 %v2477_v61, %v2445_v37  ;;  %v2447_v36 = vpop.f32.mrf.mxu1  ;;  %v2415_v14 = vadd.f32 %v4837_v50, %v2414_v9  ;;  %v3404_v37 = vld [vmem:[#allocation2 + $0x120] sm:$0xf]  ;;  %v4057_v61 = vld [vmem:[#allocation2 + $0x164] sm:$0xf0] }
  0xdc   : > { %v5038_v40 = vadd.f32 %v2510_v6, %v2478_v5  ;;  %v2448_v15 = vadd.f32 %v2447_v36, %v2415_v14  ;;  %2667 = vmatmul.bf16.gmra.mxu0 %v3341_v62  ;;  %v3414_v6 = vld [vmem:[#allocation2 + $0x168] sm:$0xf0]  ;;  %v729_v62 = vrot.slane %v728_v55, 4 }
  0xdd   : > { %2700 = vmatmul.bf16.gmra.mxu1 %v3345_v63  ;;  %v734_v63 = vrot.slane %v733_v52, 4  ;;  %v772_v5 = vld [vmem:[#allocation2 + $0x228] sm:$0xff]  ;;  %v3417_v24 = vor.u32 %v4049_v59, %v3414_v6  ;;  %v830_v59 = vrot.slane %v4819_v17, 5  ;;  %v3468_v6 = vld [vmem:[#allocation2 + $0x1a0] sm:$0xf] }
  0xde   : > { %2733 = vmatmul.bf16.gmra.mxu2 %v3349_v1  ;;  %v3405_v1 = vor.u32 %v4056_v57, %v3404_v37  ;;  %v5060_v29 = vsel %vm4584_vm6, %v729_v62, %v769_v0  ;;  %v776_v37 = vld [vmem:[%s4370_s24 + $0x18] sm:$0xee]  ;;  %v4072_v62 = vld [vmem:[#allocation2 + $0x1dc] sm:$0xf0]  ;;  %v3470_v0 = vld [vmem:[#allocation2 + $0x1e0] sm:$0xf0] }
  0xdf   : > { %2766 = vmatmul.bf16.gmra.mxu3 %v3353_v10  ;;  %v3409_v10 = vor.u32 %v4048_v53, %v3406_v58  ;;  %771 = vst [vmem:[#allocation2 + $0x220] sm:$0xff] %v5060_v29  ;;  %v5065_v21 = vsel %vm4584_vm6, %v734_v63, %v772_v5  ;;  %v4064_v63 = vld [vmem:[#allocation2 + $0x1a4] sm:$0xf] }
  0xe0   : > { %774 = vst [vmem:[#allocation2 + $0x228] sm:$0xff] %v5065_v21  ;;  %v4172_v17 = vld [vmem:[%s5387_s1 + $0x300] sm:$0xff] }
  0xe1   : > { %v2480_v25 = vpop.f32.mrf.mxu2  ;;  %v2416_v12 = vpop.f32.mrf.mxu0  ;;  %2793 = vmatpush.bf16.msrb.mxu0 %v4172_v17 }
  0xe2   : > { %v2513_v23 = vpop.f32.mrf.mxu3  ;;  %v2481_v32 = vadd.f32 %v2480_v25, %v2448_v15  ;;  %v2449_v48 = vpop.f32.mrf.mxu1  ;;  %v2417_v34 = vadd.f32 %v4837_v50, %v2416_v12  ;;  %v3413_v15 = vor.u32 %v4057_v61, %v3412_v27  ;;  %v820_v12 = vrot.slane %v4794_v4, 5 }
  0xe3   : > { %v827_v4 = vrot.slane %v4816_v16, 5 }
  0xe4   : > { %v5046_v35 = vadd.f32 %v2513_v23, %v2481_v32  ;;  %v2450_v43 = vadd.f32 %v2449_v48, %v2417_v34  ;;  %v4189_v23 = vld [vmem:[%s5387_s1 + $0x388] sm:$0xff]  ;;  %v824_v48 = vrot.slane %v4801_v45, 5  ;;  %v775_v34 = vld [vmem:[%s4370_s24 + $0x10] sm:$0xee]  ;;  %v826_v53 = vrot.slane %v820_v12, 4 }
  0xe5   : > { %v4181_v32 = vld [vmem:[%s5387_s1 + $0x348] sm:$0xff]  ;;  %2858 = vmatpush.bf16.msrb.mxu2 %v4189_v23  ;;  %v3241_v45 = vrot.slane %v776_v37, 9  ;;  %v3469_v23 = vor.u32 %v4072_v62, %v3468_v6  ;;  %v833_v37 = vrot.slane %v4857_v8, 5  ;;  %v842_v6 = vrot.slane %v4881_v26, 5 }
  0xe6   : > { %2825 = vmatpush.bf16.msrb.mxu1 %v4181_v32  ;;  %v829_v57 = vrot.slane %v824_v48, 4  ;;  %v828_v5 = vsel %vm5087_vm11, %v826_v53, %v827_v4  ;;  %v832_v53 = vrot.slane %v827_v4, 4  ;;  %v1454_v26 = vunpack.c.l.b16 %v5060_v29 }
  0xe7   : > { %v825_v16 = vsel %vm5087_vm11, %v3241_v45, %v824_v48  ;;  %894 = vst [vmem:[#allocation2 + $0x70] sm:$0xff] %v828_v5  ;;  %v1457_v5 = vunpack.c.h.b16 %v5065_v21 }
  0xe8   : > { %893 = vst [vmem:[#allocation2 + $0x38] sm:$0xff] %v825_v16  ;;  %v834_v8 = vsel %vm5087_vm11, %v832_v53, %v833_v37  ;;  %v1534_v17 = vpack.c.b16 %v1454_v26, %v1454_v26 }
  0xe9   : > { %v2482_v9 = vpop.f32.mrf.mxu2  ;;  %v2419_v7 = vpop.f32.mrf.mxu0  ;;  %896 = vst [vmem:[#allocation2 + $0xb0] sm:$0xff] %v834_v8 }
  0xea   : > { %v2515_v36 = vpop.f32.mrf.mxu3  ;;  %v2483_v56 = vadd.f32 %v2482_v9, %v2450_v43  ;;  %v2452_v14 = vpop.f32.mrf.mxu1  ;;  %v2420_v33 = vadd.f32 %v4837_v50, %v2419_v7  ;;  %v4197_v50 = vld [vmem:[%s5387_s1 + $0x3c8] sm:$0xff]  ;;  %v3240_v43 = vrot.slane %v775_v34, 9  ;;  %v4188_v9 = vld [vmem:[%s5387_s1 + $0x380] sm:$0xff] }
  0xeb   : > { %2891 = vmatpush.bf16.msrb.mxu3 %v4197_v50  ;;  %v4180_v7 = vld [vmem:[%s5387_s1 + $0x340] sm:$0xff]  ;;  %2859 = vmatpush.bf16.msrb.mxu2 %v4188_v9 }
  0xec   : > { %v5069_v25 = vadd.f32 %v2515_v36, %v2483_v56  ;;  %v2453_v28 = vadd.f32 %v2452_v14, %v2420_v33  ;;  %2672 = vmatmul.bf16.gmra.mxu0 %v3405_v1  ;;  %v821_v58 = vsel %vm5087_vm11, %v3240_v43, %v820_v12  ;;  %v4196_v36 = vld [vmem:[%s5387_s1 + $0x3c0] sm:$0xff]  ;;  %v831_v1 = vsel %vm5087_vm11, %v829_v57, %v830_v59  ;;  %v4065_v56 = vld [vmem:[#allocation2 + $0x1ac] sm:$0xf]  ;;  %v4073_v14 = vld [vmem:[#allocation2 + $0x1e4] sm:$0xf0] }
  0xed   : > { %2705 = vmatmul.bf16.gmra.mxu1 %v3409_v10  ;;  %892 = vst [vmem:[#allocation2 + $0x30] sm:$0xff] %v821_v58  ;;  %v3476_v10 = vld [vmem:[#allocation2 + $0x1a8] sm:$0xf] }
  0xee   : > { %2738 = vmatmul.bf16.gmra.mxu2 %v3413_v15  ;;  %v3478_v15 = vld [vmem:[#allocation2 + $0x1e8] sm:$0xf0]  ;;  %895 = vst [vmem:[#allocation2 + $0x78] sm:$0xff] %v831_v1  ;;  %2826 = vmatpush.bf16.msrb.mxu1 %v4180_v7  ;;  %v3477_v32 = vor.u32 %v4073_v14, %v3476_v10  ;;  %v1537_v14 = vpack.c.b16 %v1457_v5, %v1457_v5 }
  0xef   : > { %2771 = vmatmul.bf16.gmra.mxu3 %v3417_v24  ;;  %v3481_v12 = vor.u32 %v4065_v56, %v3478_v15 }
  0xf0   : > { %2892 = vmatpush.bf16.msrb.mxu3 %v4196_v36 }
  0xf1   : > { %v2485_v39 = vpop.f32.mrf.mxu2  ;;  %v2421_v47 = vpop.f32.mrf.mxu0 }
  0xf2   : > { %v2518_v42 = vpop.f32.mrf.mxu3  ;;  %v2486_v27 = vadd.f32 %v2485_v39, %v2453_v28  ;;  %v2454_v55 = vpop.f32.mrf.mxu1  ;;  %v3473_v28 = vor.u32 %v4064_v63, %v3470_v0  ;;  %v836_v39 = vrot.slane %v4865_v13, 5  ;;  %v839_v47 = vrot.slane %v4878_v22, 5 }
  0xf3   : > { %v835_v55 = vrot.slane %v830_v59, 4  ;;  %v1456_v0 = vunpack.c.l.b16 %v5065_v21  ;;  %v4284_v21 = vmov 0  }
  0xf4   : > { %v5095_v61 = vadd.f32 %v2518_v42, %v2486_v27  ;;  %v838_v27 = vrot.slane %v833_v37, 4  ;;  %4254 = vset.pattern.permute.xlu0 %v4284_v21  ;;  %4255 = vset.pattern.permute.xlu1 %v4284_v21 }
  0xf5   : > { %v837_v4 = vsel %vm5087_vm11, %v835_v55, %v836_v39  ;;  %v1536_v7 = vpack.c.b16 %v1456_v0, %v1456_v0  ;;  %4256 = vset.pattern.permute.xlu2 %v4284_v21  ;;  %v3292_v55 = vld [vmem:[#allocation2 + $0x30] sm:$0xf]  ;;  %v3302_v8 = vld [vmem:[#allocation2 + $0x78] sm:$0xf0] }
  0xf6   : > { %v840_v13 = vsel %vm5087_vm11, %v838_v27, %v839_v47  ;;  %897 = vst [vmem:[#allocation2 + $0xb8] sm:$0xff] %v837_v4 }
  0xf7   : > { %898 = vst [vmem:[#allocation2 + $0xf0] sm:$0xff] %v840_v13  ;;  %v2919_v13 = vld [vmem:[%s5389_s3 + $0x8] sm:$0xff] }
  0xf8   : > { %vm2928_vm13 = vcmp.gt.f32.partialorder %v2919_v13, 0.0 }
  0xf9   : > { %v2487_v24 = vpop.f32.mrf.mxu2  ;;  %v2531_v30 = vpop.f32.mrf.mxu0 }
  0xfa   : > { %v2520_v33 = vpop.f32.mrf.mxu3  ;;  %v2564_v50 = vpop.f32.mrf.mxu1  ;;  %v2532_v48 = vadd.f32 %v2531_v30, %v4893_v60  ;;  %v841_v60 = vrot.slane %v836_v39, 4 }
  0xfb   : > { %v2918_v33 = vld [vmem:[%s5389_s3] sm:$0xff] }
  0xfc   : > { %v2565_v34 = vadd.f32 %v2564_v50, %v2532_v48  ;;  %2677 = vmatmul.bf16.gmra.mxu0 %v3469_v23  ;;  %v843_v22 = vsel %vm5087_vm11, %v841_v60, %v842_v6  ;;  %v845_v23 = vrot.slane %v4913_v11, 5  ;;  %vm2927_vm12 = vcmp.gt.f32.partialorder %v2918_v33, 0.0  ;;  %v3300_v60 = vld [vmem:[#allocation2 + $0x38] sm:$0xf] }
  0xfd   : > { %2710 = vmatmul.bf16.gmra.mxu1 %v3473_v28  ;;  %899 = vst [vmem:[#allocation2 + $0xf8] sm:$0xff] %v843_v22  ;;  %v848_v28 = vrot.slane %v4916_v41, 5  ;;  %v2936_v50 = vsel %vm2927_vm12, 1, %v4284_v21  ;;  %v851_v48 = vrot.slane %v4936_v18, 5  ;;  %v847_v11 = vrot.slane %v842_v6, 4 }
  0xfe   : > { %2743 = vmatmul.bf16.gmra.mxu2 %v3477_v32  ;;  %v844_v32 = vrot.slane %v839_v47, 4  ;;  %2946 = vperm.xlu0 %4254, %v2936_v50   ;;  %v854_v41 = vrot.slane %v4941_v38, 5  ;;  %v4018_v18 = vld [vmem:[#allocation2 + $0x34] sm:$0xf]  ;;  %v4019_v6 = vld [vmem:[#allocation2 + $0x3c] sm:$0xf] }
  0xff   : > { %2776 = vmatmul.bf16.gmra.mxu3 %v3481_v12  ;;  %v850_v12 = vrot.slane %v845_v23, 4  ;;  %v856_v33 = vrot.slane %v851_v48, 4 }
 0x100   : > { %v846_v53 = vsel %vm5087_vm11, %v844_v32, %v845_v23  ;;  %v859_v32 = vrot.slane %v854_v41, 4 }
 0x101   : > { %v2597_v42 = vpop.f32.mrf.mxu2  ;;  %v2533_v57 = vpop.f32.mrf.mxu0  ;;  %v852_v27 = vsel %vm5087_vm11, %v850_v12, %v851_v48  ;;  %900 = vst [vmem:[#allocation2 + $0x130] sm:$0xff] %v846_v53  ;;  %v4035_v53 = vld [vmem:[#allocation2 + $0xbc] sm:$0xf] }
 0x102   : > { %v2630_v43 = vpop.f32.mrf.mxu3  ;;  %v2598_v45 = vadd.f32 %v2597_v42, %v2565_v34  ;;  %v2566_v58 = vpop.f32.mrf.mxu1  ;;  %v2534_v62 = vadd.f32 %v2533_v57, %v4921_v20  ;;  %v1455_v20 = vunpack.c.h.b16 %v5060_v29  ;;  %v853_v42 = vrot.slane %v848_v28, 4  ;;  %902 = vst [vmem:[#allocation2 + $0x170] sm:$0xff] %v852_v27 }
 0x104   : > { %v5127_v63 = vadd.f32 %v2630_v43, %v2598_v45  ;;  %v2567_v59 = vadd.f32 %v2566_v58, %v2534_v62  ;;  %v1535_v36 = vpack.c.b16 %v1455_v20, %v1455_v20  ;;  %v849_v45 = vsel %vm5087_vm11, %v847_v11, %v848_v28  ;;  %v4026_v58 = vld [vmem:[#allocation2 + $0x6c] sm:$0xf0]  ;;  %v4027_v62 = vld [vmem:[#allocation2 + $0x74] sm:$0xf0] }
 0x105   : > { %v855_v57 = vsel %vm5087_vm11, %v853_v42, %v854_v41  ;;  %901 = vst [vmem:[#allocation2 + $0x138] sm:$0xff] %v849_v45  ;;  %v2937_v20 = vsel %vm2928_vm13, 1, %v4284_v21  ;;  %v863_v28 = vrot.slane %v5000_v51, 5  ;;  %v4034_v51 = vld [vmem:[#allocation2 + $0xb4] sm:$0xf] }
 0x106   : > { %903 = vst [vmem:[#allocation2 + $0x178] sm:$0xff] %v855_v57  ;;  %2949 = vperm.xlu0 %4254, %v2937_v20   ;;  %v4042_v41 = vld [vmem:[#allocation2 + $0xec] sm:$0xf0]  ;;  %v4043_v27 = vld [vmem:[#allocation2 + $0xf4] sm:$0xf0] }
 0x109   : > { %v2599_v16 = vpop.f32.mrf.mxu2  ;;  %v2536_v10 = vpop.f32.mrf.mxu0 }
 0x10a   : > { %v2632_v9 = vpop.f32.mrf.mxu3  ;;  %v2600_v1 = vadd.f32 %v2599_v16, %v2567_v59  ;;  %v2569_v56 = vpop.f32.mrf.mxu1  ;;  %v2537_v15 = vadd.f32 %v2536_v10, %v4950_v2  ;;  %v3293_v59 = vor.u32 %v4026_v58, %v3292_v55  ;;  %v3366_v55 = vld [vmem:[#allocation2 + $0xf8] sm:$0xf0] }
 0x10b   : > { %v3369_v13 = vor.u32 %v4035_v53, %v3366_v55 }
 0x10c   : > { %v5136_v24 = vadd.f32 %v2632_v9, %v2600_v1  ;;  %v2570_v29 = vadd.f32 %v2569_v56, %v2537_v15  ;;  %2682 = vmatmul.bf16.gmra.mxu0 %v1534_v17  ;;  %v3301_v9 = vor.u32 %v4027_v62, %v3300_v60  ;;  %v3305_v17 = vor.u32 %v4019_v6, %v3302_v8  ;;  %v2920_v56 = vld [vmem:[%s5389_s3 + $0x10] sm:$0xff] }
 0x10d   : > { %2715 = vmatmul.bf16.gmra.mxu1 %v1535_v36  ;;  %vm2929_vm14 = vcmp.gt.f32.partialorder %v2920_v56, 0.0 }
 0x10e   : > { %2748 = vmatmul.bf16.gmra.mxu2 %v1536_v7  ;;  %v857_v7 = vrot.slane %v4975_v19, 5 }
 0x10f   : > { %2781 = vmatmul.bf16.gmra.mxu3 %v1537_v14  ;;  %v860_v14 = vrot.slane %v4985_v54, 5 }
 0x110   : > { %v862_v23 = vrot.slane %v857_v7, 4  ;;  %v858_v54 = vsel %vm5087_vm11, %v856_v33, %v857_v7  ;;  %v3428_v33 = vld [vmem:[#allocation2 + $0x138] sm:$0xf] }
 0x111   : > { %v2602_v2 = vpop.f32.mrf.mxu2  ;;  %v2538_v37 = vpop.f32.mrf.mxu0  ;;  %v865_v12 = vrot.slane %v860_v14, 4  ;;  %904 = vst [vmem:[#allocation2 + $0x1b0] sm:$0xff] %v858_v54  ;;  %v861_v11 = vsel %vm5087_vm11, %v859_v32, %v860_v14  ;;  %v4058_v14 = vld [vmem:[#allocation2 + $0x16c] sm:$0xf0]  ;;  %v3430_v32 = vld [vmem:[#allocation2 + $0x178] sm:$0xf0] }
 0x112   : > { %v2635_v30 = vpop.f32.mrf.mxu3  ;;  %v2603_v34 = vadd.f32 %v2602_v2, %v2570_v29  ;;  %v2571_v39 = vpop.f32.mrf.mxu1  ;;  %v2539_v43 = vadd.f32 %v2538_v37, %v4980_v44  ;;  %v3294_v44 = vld [vmem:[#allocation2 + $0x70] sm:$0xf0]  ;;  %v864_v37 = vsel %vm5087_vm11, %v862_v23, %v863_v28  ;;  %905 = vst [vmem:[#allocation2 + $0x1b8] sm:$0xff] %v861_v11 }
 0x113   : > { %v3297_v26 = vor.u32 %v4018_v18, %v3294_v44  ;;  %906 = vst [vmem:[#allocation2 + $0x1f0] sm:$0xff] %v864_v37  ;;  %v2921_v18 = vld [vmem:[%s5389_s3 + $0x18] sm:$0xff] }
 0x114   : > { %v5154_v47 = vadd.f32 %v2635_v30, %v2603_v34  ;;  %v2572_v38 = vadd.f32 %v2571_v39, %v2539_v43  ;;  %v866_v34 = vrot.slane %v5004_v3, 5  ;;  %v3356_v39 = vld [vmem:[#allocation2 + $0xb0] sm:$0xf]  ;;  %v3364_v43 = vld [vmem:[#allocation2 + $0xb8] sm:$0xf]  ;;  %vm2930_vm15 = vcmp.gt.f32.partialorder %v2921_v18, 0.0 }
 0x115   : > { %v2939_v44 = vsel %vm2930_vm15, 1, %v4284_v21  ;;  %v3365_v8 = vor.u32 %v4043_v27, %v3364_v43  ;;  %v2924_v43 = vld [vmem:[%s5389_s3 + $0x30] sm:$0xff] }
 0x116   : > { %v867_v42 = vsel %vm5087_vm11, %v865_v12, %v866_v34  ;;  %v871_v56 = vrot.slane %v866_v34, 4  ;;  %v908_v12 = vld [vmem:[#allocation2 + $0x230] sm:$0xff]  ;;  %vm2933_vm0 = vcmp.gt.f32.partialorder %v2924_v43, 0.0 }
 0x117   : > { %907 = vst [vmem:[#allocation2 + $0x1f8] sm:$0xff] %v867_v42  ;;  %v2942_v55 = vsel %vm2933_vm0, 1, %v4284_v21 }
 0x118   : > { %2964 = vperm.xlu0 %4254, %v2942_v55  }
 0x119   : > { %v2604_v4 = vpop.f32.mrf.mxu2  ;;  %v2541_v5 = vpop.f32.mrf.mxu0 }
 0x11a   : > { %v2637_v22 = vpop.f32.mrf.mxu3  ;;  %v2605_v0 = vadd.f32 %v2604_v4, %v2572_v38  ;;  %v2574_v16 = vpop.f32.mrf.mxu1  ;;  %v2542_v36 = vadd.f32 %v2541_v5, %v5016_v31  ;;  %v2938_v31 = vsel %vm2929_vm14, 1, %v4284_v21  ;;  %v3357_v38 = vor.u32 %v4042_v41, %v3356_v39 }
 0x11b   : > { %2952 = vperm.xlu1 %4255, %v2938_v31   ;;  %v3422_v31 = vld [vmem:[#allocation2 + $0x170] sm:$0xf0]  ;;  %vm2997_vm14 = vcmask 1046528  }
 0x11c   : > { %v5165_v1 = vadd.f32 %v2637_v22, %v2605_v0  ;;  %v2575_v10 = vadd.f32 %v2574_v16, %v2542_v36  ;;  %2794 = vmatmul.bf16.vlgmr.msrb.gmra.mxu0 %v3293_v59  ;;  %v3420_v36 = vld [vmem:[#allocation2 + $0x130] sm:$0xf] }
 0x11d   : > { %2827 = vmatmul.bf16.vlgmr.msrb.gmra.mxu1 %v3297_v26  ;;  %v3421_v37 = vor.u32 %v4058_v14, %v3420_v36 }
 0x11e   : > { %2860 = vmatmul.bf16.vlgmr.msrb.gmra.mxu2 %v3301_v9 }
 0x11f   : > { %2893 = vmatmul.bf16.vlgmr.msrb.gmra.mxu3 %v3305_v17 }
 0x121   : > { %v2607_v15 = vpop.f32.mrf.mxu2  ;;  %v2543_v30 = vpop.f32.mrf.mxu0 }
 0x122   : > { %v2640_v29 = vpop.f32.mrf.mxu3  ;;  %v2608_v2 = vadd.f32 %v2607_v15, %v2575_v10  ;;  %v2576_v50 = vpop.f32.mrf.mxu1  ;;  %v2544_v19 = vadd.f32 %v2543_v30, %v5038_v40  ;;  %v3358_v40 = vld [vmem:[#allocation2 + $0xf0] sm:$0xf0]  ;;  %v868_v10 = vrot.slane %v863_v28, 4  ;;  %v793_v15 = vld [vmem:[%s4370_s24 + $0xa0] sm:$0x11]  ;;  %v911_v28 = vld [vmem:[#allocation2 + $0x238] sm:$0xff] }
 0x123   : > { %v3361_v58 = vor.u32 %v4034_v51, %v3358_v40  ;;  %2955 = vperm.xlu1 %4255, %v2939_v44   ;;  %v869_v23 = vrot.slane %v793_v15, 5  ;;  %v4059_v30 = vld [vmem:[#allocation2 + $0x174] sm:$0xf0] }
 0x124   : > { %v5180_v48 = vadd.f32 %v2640_v29, %v2608_v2  ;;  %v2577_v3 = vadd.f32 %v2576_v50, %v2544_v19  ;;  %v794_v29 = vld [vmem:[%s4370_s24 + $0xa8] sm:$0x11]  ;;  %v4051_v50 = vld [vmem:[#allocation2 + $0x13c] sm:$0xf]  ;;  %v3429_v41 = vor.u32 %v4059_v30, %v3428_v33 }
 0x125   : > { %v872_v2 = vrot.slane %v794_v29, 5  ;;  %v3433_v40 = vor.u32 %v4051_v50, %v3430_v32 }
 0x127   : > { %v873_v19 = vsel %vm5087_vm11, %v871_v56, %v872_v2 }
 0x128   : > { %v5212_v52 = vsel %vm4584_vm6, %v873_v19, %v911_v28 }
 0x129   : > { %v2609_v45 = vpop.f32.mrf.mxu2  ;;  %v2546_v6 = vpop.f32.mrf.mxu0  ;;  %913 = vst [vmem:[#allocation2 + $0x238] sm:$0xff] %v5212_v52 }
 0x12a   : > { %v2642_v57 = vpop.f32.mrf.mxu3  ;;  %v2610_v60 = vadd.f32 %v2609_v45, %v2577_v3  ;;  %v2579_v62 = vpop.f32.mrf.mxu1  ;;  %v2547_v4 = vadd.f32 %v2546_v6, %v5046_v35  ;;  %v4050_v35 = vld [vmem:[#allocation2 + $0x134] sm:$0xf]  ;;  %v3484_v6 = vld [vmem:[#allocation2 + $0x1b0] sm:$0xf] }
 0x12b   : > { %v3425_v39 = vor.u32 %v4050_v35, %v3422_v31  ;;  %v2923_v31 = vld [vmem:[%s5389_s3 + $0x28] sm:$0xff] }
 0x12c   : > { %v5191_v22 = vadd.f32 %v2642_v57, %v2610_v60  ;;  %v2580_v59 = vadd.f32 %v2579_v62, %v2547_v4  ;;  %2799 = vmatmul.bf16.gmra.mxu0 %v3357_v38  ;;  %v4074_v62 = vld [vmem:[#allocation2 + $0x1ec] sm:$0xf0]  ;;  %v3492_v4 = vld [vmem:[#allocation2 + $0x1b8] sm:$0xf]  ;;  %vm2932_vm3 = vcmp.gt.f32.partialorder %v2923_v31, 0.0 }
 0x12d   : > { %2832 = vmatmul.bf16.gmra.mxu1 %v3361_v58  ;;  %v2941_v2 = vsel %vm2932_vm3, 1, %v4284_v21 }
 0x12e   : > { %2865 = vmatmul.bf16.gmra.mxu2 %v3365_v8  ;;  %v4066_v8 = vld [vmem:[#allocation2 + $0x1b4] sm:$0xf] }
 0x12f   : > { %2898 = vmatmul.bf16.gmra.mxu3 %v3369_v13  ;;  %v3486_v13 = vld [vmem:[#allocation2 + $0x1f0] sm:$0xf0] }
 0x130   : > { %v3489_v36 = vor.u32 %v4066_v8, %v3486_v13 }
 0x131   : > { %v2612_v26 = vpop.f32.mrf.mxu2  ;;  %v2548_v5 = vpop.f32.mrf.mxu0 }
 0x132   : > { %v2645_v20 = vpop.f32.mrf.mxu3  ;;  %v2613_v0 = vadd.f32 %v2612_v26, %v2580_v59  ;;  %v2581_v16 = vpop.f32.mrf.mxu1  ;;  %v2549_v9 = vadd.f32 %v2548_v5, %v5069_v25  ;;  %v870_v25 = vsel %vm5087_vm11, %v868_v10, %v869_v23  ;;  %v4067_v59 = vld [vmem:[#allocation2 + $0x1bc] sm:$0xf]  ;;  %v4075_v26 = vld [vmem:[#allocation2 + $0x1f4] sm:$0xf0] }
 0x133   : > { %v5204_v51 = vsel %vm4584_vm6, %v870_v25, %v908_v12 }
 0x134   : > { %v5194_v17 = vadd.f32 %v2645_v20, %v2613_v0  ;;  %v2582_v7 = vadd.f32 %v2581_v16, %v2549_v9  ;;  %910 = vst [vmem:[#allocation2 + $0x230] sm:$0xff] %v5204_v51  ;;  %v3494_v20 = vld [vmem:[#allocation2 + $0x1f8] sm:$0xf0]  ;;  %v2922_v0 = vld [vmem:[%s5389_s3 + $0x20] sm:$0xff]  ;;  %v3485_v9 = vor.u32 %v4074_v62, %v3484_v6  ;;  %v1458_v19 = vunpack.c.l.b16 %v5204_v51 }
 0x135   : > { %vm2931_vm2 = vcmp.gt.f32.partialorder %v2922_v0, 0.0  ;;  %v3497_v14 = vor.u32 %v4067_v59, %v3494_v20  ;;  %v1459_v28 = vunpack.c.h.b16 %v5204_v51 }
 0x136   : > { %v2940_v35 = vsel %vm2931_vm2, 1, %v4284_v21 }
 0x137   : > { %2958 = vperm.xlu2 %4256, %v2940_v35  }
 0x139   : > { %v2614_v34 = vpop.f32.mrf.mxu2  ;;  %v2551_v42 = vpop.f32.mrf.mxu0 }
 0x13a   : > { %v2647_v54 = vpop.f32.mrf.mxu3  ;;  %v2615_v11 = vadd.f32 %v2614_v34, %v2582_v7  ;;  %v2584_v3 = vpop.f32.mrf.mxu1  ;;  %v2552_v53 = vadd.f32 %v2551_v42, %v5095_v61  ;;  %v2943_v61 = vsel %vm2934_vm1, 1, %v4284_v21  ;;  %v3493_v7 = vor.u32 %v4075_v26, %v3492_v4 }
 0x13b   : > { %2967 = vperm.xlu1 %4255, %v2943_v61   ;;  %v1460_v34 = vunpack.c.l.b16 %v5212_v52  ;;  %v1538_v42 = vpack.c.b16 %v1458_v19, %v1458_v19 }
 0x13c   : > { %v5216_v27 = vadd.f32 %v2647_v54, %v2615_v11  ;;  %v2585_v18 = vadd.f32 %v2584_v3, %v2552_v53  ;;  %2804 = vmatmul.bf16.gmra.mxu0 %v3421_v37  ;;  %v1461_v54 = vunpack.c.h.b16 %v5212_v52  ;;  %v2926_v37 = vld [vmem:[%s5389_s3 + $0x40] sm:$0x7f] }
 0x13d   : > { %2837 = vmatmul.bf16.gmra.mxu1 %v3425_v39  ;;  %vm2935_vm5 = vcmp.gt.f32.partialorder %v2926_v37, 0.0  ;;  %v1540_v53 = vpack.c.b16 %v1460_v34, %v1460_v34 }
 0x13e   : > { %2870 = vmatmul.bf16.gmra.mxu2 %v3429_v41  ;;  %v2944_v3 = vsel %vm2935_vm5, 1, %v4284_v21  ;;  %v1541_v51 = vpack.c.b16 %v1461_v54, %v1461_v54 }
 0x13f   : > { %2903 = vmatmul.bf16.gmra.mxu3 %v3433_v40  ;;  %2961 = vperm.xlu2 %4256, %v2941_v2  }
 0x141   : > { %v2617_v45 = vpop.f32.mrf.mxu2  ;;  %v2553_v58 = vpop.f32.mrf.mxu0 }
 0x142   : > { %v2650_v57 = vpop.f32.mrf.mxu3  ;;  %v2618_v38 = vadd.f32 %v2617_v45, %v2585_v18  ;;  %v2586_v44 = vpop.f32.mrf.mxu1 }
 0x144   : > { %v5223_v60 = vadd.f32 %v2650_v57, %v2618_v38 }
 0x147   : > { %2970 = vperm.xlu2 %4256, %v2944_v3  }
 0x149   : > { %v2619_v5 = vpop.f32.mrf.mxu2  ;;  %v2663_v10 = vpop.f32.mrf.mxu0 }
 0x14a   : > { %v2652_v16 = vpop.f32.mrf.mxu3  ;;  %v2696_v56 = vpop.f32.mrf.mxu1  ;;  %v2664_v15 = vadd.f32 %v2663_v10, %v5127_v63 }
 0x14c   : > { %v2697_v29 = vadd.f32 %v2696_v56, %v2664_v15  ;;  %2809 = vmatmul.bf16.gmra.mxu0 %v3485_v9 }
 0x14d   : > { %2842 = vmatmul.bf16.gmra.mxu1 %v3489_v36 }
 0x14e   : > { %2875 = vmatmul.bf16.gmra.mxu2 %v3493_v7 }
 0x14f   : > { %2908 = vmatmul.bf16.gmra.mxu3 %v3497_v14 }
 0x151   : > { %v2729_v33 = vpop.f32.mrf.mxu2  ;;  %v2665_v50 = vpop.f32.mrf.mxu0 }
 0x152   : > { %v2762_v23 = vpop.f32.mrf.mxu3  ;;  %v2730_v30 = vadd.f32 %v2729_v33, %v2697_v29  ;;  %v2698_v32 = vpop.f32.mrf.mxu1  ;;  %v2666_v63 = vadd.f32 %v2665_v50, %v5136_v24  ;;  %v1539_v24 = vpack.c.b16 %v1459_v28, %v1459_v28 }
 0x154   : > { %v5235_v25 = vadd.f32 %v2762_v23, %v2730_v30  ;;  %v2699_v12 = vadd.f32 %v2698_v32, %v2666_v63 }
 0x159   : > { %v2731_v39 = vpop.f32.mrf.mxu2  ;;  %v2668_v40 = vpop.f32.mrf.mxu0 }
 0x15a   : > { %v2764_v11 = vpop.f32.mrf.mxu3  ;;  %v2732_v41 = vadd.f32 %v2731_v39, %v2699_v12  ;;  %v2701_v43 = vpop.f32.mrf.mxu1  ;;  %v2669_v55 = vadd.f32 %v2668_v40, %v5154_v47 }
 0x15c   : > { %v5246_v52 = vadd.f32 %v2764_v11, %v2732_v41  ;;  %v2702_v18 = vadd.f32 %v2701_v43, %v2669_v55  ;;  %2814 = vmatmul.bf16.gmra.mxu0 %v1538_v42 }
 0x15d   : > { %2847 = vmatmul.bf16.gmra.mxu1 %v1539_v24 }
 0x15e   : > { %2880 = vmatmul.bf16.gmra.mxu2 %v1540_v53 }
 0x15f   : > { %2913 = vmatmul.bf16.gmra.mxu3 %v1541_v51 }
 0x161   : > { %v2734_v49 = vpop.f32.mrf.mxu2  ;;  %v2670_v57 = vpop.f32.mrf.mxu0 }
 0x162   : > { %v2767_v61 = vpop.f32.mrf.mxu3  ;;  %v2735_v45 = vadd.f32 %v2734_v49, %v2702_v18  ;;  %v2703_v21 = vpop.f32.mrf.mxu1  ;;  %v2671_v38 = vadd.f32 %v2670_v57, %v5165_v1 }
 0x164   : > { %v5249_v58 = vadd.f32 %v2767_v61, %v2735_v45  ;;  %v2704_v44 = vadd.f32 %v2703_v21, %v2671_v38 }
 0x169   : > { %v2736_v6 = vpop.f32.mrf.mxu2  ;;  %v2673_v8 = vpop.f32.mrf.mxu0 }
 0x16a   : > { %v2769_v62 = vpop.f32.mrf.mxu3  ;;  %v2737_v47 = vadd.f32 %v2736_v6, %v2704_v44  ;;  %v2706_v13 = vpop.f32.mrf.mxu1  ;;  %v2674_v4 = vadd.f32 %v2673_v8, %v5180_v48 }
 0x16c   : > { %v5252_v59 = vadd.f32 %v2769_v62, %v2737_v47  ;;  %v2707_v26 = vadd.f32 %v2706_v13, %v2674_v4 }
 0x170   : > { %v5268_v55 = vpop.permute.xlu0 %2946 }
 0x171   : > { %v2739_v20 = vpop.f32.mrf.mxu2  ;;  %v2675_v16 = vpop.f32.mrf.mxu0  ;;  %vm2972_vm6 = vcmp.eq.s32.totalorder %v5268_v55, 1 }
 0x172   : > { %v2772_v0 = vpop.f32.mrf.mxu3  ;;  %v2740_v5 = vadd.f32 %v2739_v20, %v2707_v26  ;;  %v2708_v9 = vpop.f32.mrf.mxu1  ;;  %v2676_v1 = vadd.f32 %v2675_v16, %v5191_v22 }
 0x174   : > { %v5255_v36 = vadd.f32 %v2772_v0, %v2740_v5  ;;  %v2709_v35 = vadd.f32 %v2708_v9, %v2676_v1 }
 0x178   : > { %v5272_v6 = vpop.permute.xlu0 %2949 }
 0x179   : > { %v2741_v10 = vpop.f32.mrf.mxu2  ;;  %v2678_v14 = vpop.f32.mrf.mxu0  ;;  %vm2973_vm7 = vcmp.eq.s32.totalorder %v5272_v6, 1 }
 0x17a   : > { %v2774_v56 = vpop.f32.mrf.mxu3  ;;  %v2742_v7 = vadd.f32 %v2741_v10, %v2709_v35  ;;  %v2711_v15 = vpop.f32.mrf.mxu1  ;;  %v2679_v48 = vadd.f32 %v2678_v14, %v5194_v17 }
 0x17c   : > { %v5258_v29 = vadd.f32 %v2774_v56, %v2742_v7  ;;  %v2712_v31 = vadd.f32 %v2711_v15, %v2679_v48 }
 0x181   : > { %v2744_v33 = vpop.f32.mrf.mxu2  ;;  %v2680_v30 = vpop.f32.mrf.mxu0 }
 0x182   : > { %v2777_v23 = vpop.f32.mrf.mxu3  ;;  %v2745_v2 = vadd.f32 %v2744_v33, %v2712_v31  ;;  %v2713_v50 = vpop.f32.mrf.mxu1  ;;  %v2681_v22 = vadd.f32 %v2680_v30, %v5216_v27 }
 0x184   : > { %v5261_v32 = vadd.f32 %v2777_v23, %v2745_v2  ;;  %v2714_v63 = vadd.f32 %v2713_v50, %v2681_v22 }
 0x189   : > { %v2746_v12 = vpop.f32.mrf.mxu2  ;;  %v2683_v34 = vpop.f32.mrf.mxu0 }
 0x18a   : > { %v2779_v19 = vpop.f32.mrf.mxu3  ;;  %v2747_v28 = vadd.f32 %v2746_v12, %v2714_v63  ;;  %v2716_v54 = vpop.f32.mrf.mxu1  ;;  %v2684_v17 = vadd.f32 %v2683_v34, %v5223_v60 }
 0x18c   : > { %v5264_v37 = vadd.f32 %v2779_v19, %v2747_v28  ;;  %v2717_v39 = vadd.f32 %v2716_v54, %v2684_v17 }
 0x18d   : > { %v5287_v5 = vpop.permute.xlu1 %2952 }
 0x18e   : > { %vm2974_vm8 = vcmp.eq.s32.totalorder %v5287_v5, 1 }
 0x191   : > { %v2749_v11 = vpop.f32.mrf.mxu2  ;;  %v2685_v3 = vpop.f32.mrf.mxu0 }
 0x192   : > { %v2782_v42 = vpop.f32.mrf.mxu3  ;;  %v2750_v24 = vadd.f32 %v2749_v11, %v2717_v39  ;;  %v2718_v41 = vpop.f32.mrf.mxu1 }
 0x193   : > { %v5305_v19 = vpop.permute.xlu2 %2958 }
 0x194   : > { %v5266_v40 = vadd.f32 %v2782_v42, %v2750_v24  ;;  %vm2976_vm10 = vcmp.eq.s32.totalorder %v5305_v19, 1 }
 0x195   : > { %v5296_v33 = vpop.permute.xlu1 %2955 }
 0x196   : > { %vm2975_vm9 = vcmp.eq.s32.totalorder %v5296_v33, 1 }
 0x199   : > { %v2751_v27 = vpop.f32.mrf.mxu2  ;;  %v2795_v53 = vpop.f32.mrf.mxu0 }
 0x19a   : > { %v2784_v43 = vpop.f32.mrf.mxu3  ;;  %v2828_v51 = vpop.f32.mrf.mxu1  ;;  %v2796_v18 = vadd.f32 %v2795_v53, %v5235_v25 }
 0x19b   : > { %v5314_v43 = vpop.permute.xlu2 %2961 }
 0x19c   : > { %v2829_v57 = vadd.f32 %v2828_v51, %v2796_v18  ;;  %vm2977_vm11 = vcmp.eq.s32.totalorder %v5314_v43, 1 }
 0x1a1   : > { %v2861_v49 = vpop.f32.mrf.mxu2  ;;  %v2797_v61 = vpop.f32.mrf.mxu0 }
 0x1a2   : > { %v2894_v60 = vpop.f32.mrf.mxu3  ;;  %v2830_v45 = vpop.f32.mrf.mxu1  ;;  %v2798_v21 = vadd.f32 %v2797_v61, %v5246_v52  ;;  %v2862_v38 = vadd.f32 %v2861_v49, %v2829_v57 }
 0x1a4   : > { %v2831_v44 = vadd.f32 %v2830_v45, %v2798_v21  ;;  %v5274_v8 = vadd.f32 %v2894_v60, %v2862_v38  ;;  %v5320_v38 = vpop.permute.xlu0 %2964 }
 0x1a5   : > { %vm2978_vm12 = vcmp.eq.s32.totalorder %v5320_v38, 1 }
 0x1a6   : > { %v2981_v52 = vsel %vm2972_vm6, %v5274_v8, 0.0 }
 0x1a9   : > { %v2863_v62 = vpop.f32.mrf.mxu2  ;;  %v2800_v4 = vpop.f32.mrf.mxu0 }
 0x1aa   : > { %v2896_v47 = vpop.f32.mrf.mxu3  ;;  %v2864_v13 = vadd.f32 %v2863_v62, %v2831_v44  ;;  %v2833_v26 = vpop.f32.mrf.mxu1  ;;  %v2801_v20 = vadd.f32 %v2800_v4, %v5249_v58 }
 0x1ac   : > { %v5278_v25 = vadd.f32 %v2896_v47, %v2864_v13  ;;  %v2834_v9 = vadd.f32 %v2833_v26, %v2801_v20 }
 0x1ae   : > { %v2982_v0 = vsel %vm2973_vm7, %v5278_v25, 0.0 }
 0x1af   : > { %v2990_v16 = vadd.f32 %v2982_v0, %v2981_v52  ;;  %v2968_v0 = vpop.permute.xlu1 %2967 }
 0x1b0   : > { %vm2979_vm13 = vcmp.eq.s32.totalorder %v2968_v0, 1 }
 0x1b1   : > { %v2866_v1 = vpop.f32.mrf.mxu2  ;;  %v2802_v56 = vpop.f32.mrf.mxu0 }
 0x1b2   : > { %v2899_v35 = vpop.f32.mrf.mxu3  ;;  %v2867_v10 = vadd.f32 %v2866_v1, %v2834_v9  ;;  %v2835_v7 = vpop.f32.mrf.mxu1  ;;  %v2803_v14 = vadd.f32 %v2802_v56, %v5252_v59 }
 0x1b4   : > { %v5290_v58 = vadd.f32 %v2899_v35, %v2867_v10  ;;  %v2836_v31 = vadd.f32 %v2835_v7, %v2803_v14 }
 0x1b6   : > { %v2983_v15 = vsel %vm2974_vm8, %v5290_v58, 0.0 }
 0x1b7   : > { %v2991_v48 = vadd.f32 %v2990_v16, %v2983_v15 }
 0x1b9   : > { %v2868_v23 = vpop.f32.mrf.mxu2  ;;  %v2805_v50 = vpop.f32.mrf.mxu0 }
 0x1ba   : > { %v2901_v2 = vpop.f32.mrf.mxu3  ;;  %v2869_v30 = vadd.f32 %v2868_v23, %v2836_v31  ;;  %v2838_v22 = vpop.f32.mrf.mxu1  ;;  %v2806_v12 = vadd.f32 %v2805_v50, %v5255_v36 }
 0x1bc   : > { %v5299_v63 = vadd.f32 %v2901_v2, %v2869_v30  ;;  %v2839_v34 = vadd.f32 %v2838_v22, %v2806_v12 }
 0x1be   : > { %v2984_v59 = vsel %vm2975_vm9, %v5299_v63, 0.0 }
 0x1bf   : > { %v2992_v28 = vadd.f32 %v2991_v48, %v2984_v59  ;;  %v2971_v48 = vpop.permute.xlu2 %2970 }
 0x1c0   : > { %vm2980_vm15 = vcmp.eq.s32.totalorder %v2971_v48, 1 }
 0x1c1   : > { %v2871_v54 = vpop.f32.mrf.mxu2  ;;  %v2807_v11 = vpop.f32.mrf.mxu0 }
 0x1c2   : > { %v2904_v17 = vpop.f32.mrf.mxu3  ;;  %v2872_v39 = vadd.f32 %v2871_v54, %v2839_v34  ;;  %v2840_v42 = vpop.f32.mrf.mxu1  ;;  %v2808_v3 = vadd.f32 %v2807_v11, %v5258_v29 }
 0x1c4   : > { %v5308_v24 = vadd.f32 %v2904_v17, %v2872_v39  ;;  %v2841_v27 = vadd.f32 %v2840_v42, %v2808_v3 }
 0x1c6   : > { %v2985_v36 = vsel %vm2976_vm10, %v5308_v24, 0.0 }
 0x1c7   : > { %v2993_v41 = vadd.f32 %v2992_v28, %v2985_v36 }
 0x1c9   : > { %v2873_v53 = vpop.f32.mrf.mxu2  ;;  %v2810_v49 = vpop.f32.mrf.mxu0 }
 0x1ca   : > { %v2906_v51 = vpop.f32.mrf.mxu3  ;;  %v2874_v18 = vadd.f32 %v2873_v53, %v2841_v27  ;;  %v2843_v60 = vpop.f32.mrf.mxu1  ;;  %v2811_v45 = vadd.f32 %v2810_v49, %v5261_v32 }
 0x1cc   : > { %v2907_v61 = vadd.f32 %v2906_v51, %v2874_v18  ;;  %v2844_v21 = vadd.f32 %v2843_v60, %v2811_v45 }
 0x1ce   : > { %v2986_v29 = vsel %vm2977_vm11, %v2907_v61, 0.0 }
 0x1cf   : > { %v2994_v57 = vadd.f32 %v2993_v41, %v2986_v29 }
 0x1d1   : > { %v2876_v44 = vpop.f32.mrf.mxu2  ;;  %v2812_v13 = vpop.f32.mrf.mxu0 }
 0x1d2   : > { %v2909_v62 = vpop.f32.mrf.mxu3  ;;  %v2877_v47 = vadd.f32 %v2876_v44, %v2844_v21  ;;  %v2845_v4 = vpop.f32.mrf.mxu1  ;;  %v2813_v20 = vadd.f32 %v2812_v13, %v5264_v37 }
 0x1d4   : > { %v2910_v26 = vadd.f32 %v2909_v62, %v2877_v47  ;;  %v2846_v16 = vadd.f32 %v2845_v4, %v2813_v20 }
 0x1d6   : > { %v2987_v32 = vsel %vm2978_vm12, %v2910_v26, 0.0 }
 0x1d7   : > { %v2995_v52 = vadd.f32 %v2994_v57, %v2987_v32 }
 0x1d9   : > { %v2878_v9 = vpop.f32.mrf.mxu2  ;;  %v2815_v10 = vpop.f32.mrf.mxu0 }
 0x1da   : > { %v2911_v1 = vpop.f32.mrf.mxu3  ;;  %v2879_v35 = vadd.f32 %v2878_v9, %v2846_v16  ;;  %v2848_v56 = vpop.f32.mrf.mxu1  ;;  %v2816_v14 = vadd.f32 %v2815_v10, %v5266_v40 }
 0x1dc   : > { %v2912_v7 = vadd.f32 %v2911_v1, %v2879_v35  ;;  %v2849_v31 = vadd.f32 %v2848_v56, %v2816_v14 }
 0x1de   : > { %v2988_v15 = vsel %vm2979_vm13, %v2912_v7, 0.0 }
 0x1df   : > { %v2996_v37 = vadd.f32 %v2995_v52, %v2988_v15 }
 0x1e1   : > { %v2881_v23 = vpop.f32.mrf.mxu2  ;;  %v2817_v50 = vpop.f32.mrf.mxu0 }
 0x1e2   : > { %v2914_v2 = vpop.f32.mrf.mxu3  ;;  %v2882_v30 = vadd.f32 %v2881_v23, %v2849_v31  ;;  %v2850_v22 = vpop.f32.mrf.mxu1 }
 0x1e4   : > { %v2915_v12 = vadd.f32 %v2914_v2, %v2882_v30 }
 0x1e6   : > { %v2989_v59 = vsel %vm2980_vm15, %v2915_v12, 0.0 }
 0x1e7   : > { %v2998_v28 = vsel %vm2997_vm14, %v2989_v59, 0.0 }
 0x1e8   : > { %v2999_v34 = vadd.f32 %v2998_v28, %v2996_v37 }
 0x1e9   : > { %v2883_v40 = vpop.f32.mrf.mxu2 }
 0x1ea   : > { %v2916_v54 = vpop.f32.mrf.mxu3  ;;  %v3000_v17 = vrot.slane %v2999_v34, 4 }
 0x1ec   : > { %v3001_v39 = vadd.f32 %v3000_v17, %v2999_v34 }
 0x1ee   : > { %v3002_v11 = vrot.slane %v3001_v39, 2 }
 0x1f0   : > { %v3003_v42 = vadd.f32 %v3002_v11, %v3001_v39 }
 0x1f2   : > { %v3004_v3 = vrot.slane %v3003_v42, 1 }
 0x1f4   : > { %v3005_v36 = vadd.f32 %v3004_v3, %v3003_v42 }
 0x1f6   : > { %v3006_v41 = vmul.f32 0.015625, %v3005_v36 }
 0x1f8   : > { %v3007_v27 = vsub.f32 %v5274_v8, %v3006_v41  ;;  %v3008_v53 = vsub.f32 %v5278_v25, %v3006_v41  ;;  %v3009_v51 = vsub.f32 %v5290_v58, %v3006_v41  ;;  %v3010_v18 = vsub.f32 %v5299_v63, %v3006_v41 }
 0x1f9   : > { %v3011_v49 = vsub.f32 %v5308_v24, %v3006_v41  ;;  %v3012_v60 = vsub.f32 %v2907_v61, %v3006_v41  ;;  %v3013_v45 = vsub.f32 %v2910_v26, %v3006_v41  ;;  %v3014_v29 = vsub.f32 %v2912_v7, %v3006_v41 }
 0x1fa   : > { %v3015_v57 = vsub.f32 %v2915_v12, %v3006_v41  ;;  %v3016_v21 = vsel %vm2972_vm6, %v3007_v27, 0.0  ;;  %v3017_v44 = vsel %vm2973_vm7, %v3008_v53, 0.0  ;;  %v3018_v8 = vsel %vm2974_vm8, %v3009_v51, 0.0 }
 0x1fb   : > { %v3025_v25 = vmul.f32 %v3016_v21, %v3016_v21  ;;  %v3026_v62 = vmul.f32 %v3017_v44, %v3017_v44  ;;  %v3019_v58 = vsel %vm2975_vm9, %v3010_v18, 0.0  ;;  %v3027_v63 = vmul.f32 %v3018_v8, %v3018_v8 }
 0x1fc   : > { %v3020_v61 = vsel %vm2976_vm10, %v3011_v49, 0.0  ;;  %v3028_v47 = vmul.f32 %v3019_v58, %v3019_v58  ;;  %v3021_v55 = vsel %vm2977_vm11, %v3012_v60, 0.0  ;;  %v3022_v5 = vsel %vm2978_vm12, %v3013_v45, 0.0 }
 0x1fd   : > { %v3034_v24 = vadd.f32 %v3026_v62, %v3025_v25  ;;  %v3029_v6 = vmul.f32 %v3020_v61, %v3020_v61  ;;  %v3024_v26 = vsel %vm2980_vm15, %v3015_v57, 0.0  ;;  %v3030_v20 = vmul.f32 %v3021_v55, %v3021_v55 }
 0x1fe   : > { %v3023_v32 = vsel %vm2979_vm13, %v3014_v29, 0.0  ;;  %v3031_v52 = vmul.f32 %v3022_v5, %v3022_v5  ;;  %v3033_v19 = vmul.f32 %v3024_v26, %v3024_v26  ;;  %vm3120_vm13 = vcmask 1043459  }
 0x1ff   : > { %v3035_v13 = vadd.f32 %v3034_v24, %v3027_v63  ;;  %v3032_v9 = vmul.f32 %v3023_v32, %v3023_v32 }
 0x200   : > { %v3041_v43 = vsel %vm2997_vm14, %v3033_v19, 0.0  ;;  %vm3121_vm14 = vsmask.f32 7950 }
 0x201   : > { %v3036_v4 = vadd.f32 %v3035_v13, %v3028_v47  ;;  %v3117_v47 = vld [vmem:[%s5356_s27 + $0x20] sm:$0xf]  ;;  %vm3122_vm15 = vmand %vm3120_vm13, %vm3121_vm14 }
 0x203   : > { %v3037_v33 = vadd.f32 %v3036_v4, %v3029_v6 }
 0x205   : > { %v3038_v16 = vadd.f32 %v3037_v33, %v3030_v20 }
 0x207   : > { %v3039_v1 = vadd.f32 %v3038_v16, %v3031_v52 }
 0x209   : > { %v3040_v35 = vadd.f32 %v3039_v1, %v3032_v9 }
 0x20b   : > { %v3042_v10 = vadd.f32 %v3041_v43, %v3040_v35 }
 0x20d   : > { %v3043_v56 = vrot.slane %v3042_v10, 4 }
 0x20f   : > { %v3044_v7 = vadd.f32 %v3043_v56, %v3042_v10 }
 0x211   : > { %v3045_v14 = vrot.slane %v3044_v7, 2 }
 0x213   : > { %v3046_v38 = vadd.f32 %v3045_v14, %v3044_v7 }
 0x215   : > { %v3047_v15 = vrot.slane %v3046_v38, 1 }
 0x217   : > { %v3048_v37 = vadd.f32 %v3047_v15, %v3046_v38 }
 0x219   : > { %v3049_v48 = vmul.f32 0.015625, %v3048_v37 }
 0x21b   : > { %v3050_v31 = vadd.f32 1e-05, %v3049_v48 }
 0x21d   : > { %4258 = vrsqrt.f32 %v3050_v31  ;;  %vm3057_vm1 = vweird.f32 %v3050_v31 }
 0x223   : > { %v4259_v0 = vpop.eup %4258 }
 0x224   : > { %v3052_v23 = vmul.f32 %v4259_v0, %v3050_v31  ;;  %vm3058_vm0 = vweird.f32 %v4259_v0 }
 0x225   : > { %vm3059_vm2 = vmor %vm3057_vm1, %vm3058_vm0 }
 0x226   : > { %v3053_v2 = vmul.f32 %v4259_v0, %v3052_v23 }
 0x228   : > { %v3054_v30 = vmul.f32 0.5, %v3053_v2 }
 0x22a   : > { %v3055_v50 = vsub.f32 1.5, %v3054_v30 }
 0x22c   : > { %v3056_v22 = vmul.f32 %v4259_v0, %v3055_v50 }
 0x22e   : > { %v3060_v12 = vsel %vm3059_vm2, %v4259_v0, %v3056_v22 }
 0x22f   : > { %v3061_v59 = vmul.f32 %v3060_v12, %v3007_v27  ;;  %v3062_v28 = vmul.f32 %v3060_v12, %v3008_v53  ;;  %v3063_v34 = vmul.f32 %v3060_v12, %v3009_v51  ;;  %v3064_v40 = vmul.f32 %v3060_v12, %v3010_v18 }
 0x230   : > { %v3065_v54 = vmul.f32 %v3060_v12, %v3011_v49  ;;  %v3066_v17 = vmul.f32 %v3060_v12, %v3012_v60  ;;  %v3067_v39 = vmul.f32 %v3060_v12, %v3013_v45  ;;  %v3068_v11 = vmul.f32 %v3060_v12, %v3014_v29 }
 0x231   : > { %v3069_v42 = vmul.f32 %v3060_v12, %v3015_v57  ;;  %vm3070_vm3 = vcmp.ge.f32.partialorder %v3061_v59, 0.0  ;;  %vm3071_vm5 = vcmp.ge.f32.partialorder %v3062_v28, 0.0  ;;  %vm3072_vm6 = vcmp.ge.f32.partialorder %v3063_v34, 0.0 }
 0x232   : > { %vm3073_vm7 = vcmp.ge.f32.partialorder %v3064_v40, 0.0  ;;  %vm3074_vm8 = vcmp.ge.f32.partialorder %v3065_v54, 0.0  ;;  %vm3075_vm9 = vcmp.ge.f32.partialorder %v3066_v17, 0.0  ;;  %vm3076_vm10 = vcmp.ge.f32.partialorder %v3067_v39, 0.0 }
 0x233   : > { %vm3077_vm11 = vcmp.ge.f32.partialorder %v3068_v11, 0.0  ;;  %vm3078_vm12 = vcmp.ge.f32.partialorder %v3069_v42, 0.0  ;;  %v3079_v3 = vmul.f32 0.2, %v3061_v59  ;;  %v3080_v36 = vmul.f32 0.2, %v3062_v28 }
 0x234   : > { %v3081_v41 = vmul.f32 0.2, %v3063_v34  ;;  %v3082_v27 = vmul.f32 0.2, %v3064_v40  ;;  %v3083_v53 = vmul.f32 0.2, %v3065_v54 }
 0x235   : > { %v3084_v51 = vmul.f32 0.2, %v3066_v17  ;;  %v3085_v18 = vmul.f32 0.2, %v3067_v39  ;;  %v3086_v49 = vmul.f32 0.2, %v3068_v11  ;;  %v3088_v60 = vsel %vm3070_vm3, %v3061_v59, %v3079_v3 }
 0x236   : > { %v3087_v45 = vmul.f32 0.2, %v3069_v42  ;;  %v3089_v29 = vsel %vm3071_vm5, %v3062_v28, %v3080_v36  ;;  %v3090_v57 = vsel %vm3072_vm6, %v3063_v34, %v3081_v41  ;;  %v3091_v21 = vsel %vm3073_vm7, %v3064_v40, %v3082_v27 }
 0x237   : > { %v3092_v44 = vsel %vm3074_vm8, %v3065_v54, %v3083_v53  ;;  %v3093_v8 = vsel %vm3075_vm9, %v3066_v17, %v3084_v51  ;;  %v3094_v25 = vsel %vm3076_vm10, %v3067_v39, %v3085_v18  ;;  %v3095_v62 = vsel %vm3077_vm11, %v3068_v11, %v3086_v49 }
 0x238   : > { %v3096_v58 = vsel %vm3078_vm12, %v3069_v42, %v3087_v45  ;;  %v4207_v63 = vpack.c.bf16 %v3089_v29, %v3088_v60  ;;  %v4212_v24 = vpack.c.bf16 %v3091_v21, %v3090_v57  ;;  %v4217_v61 = vpack.c.bf16 %v3093_v8, %v3092_v44 }
 0x239   : > { %v3105_v13 = vpack.c.bf16 %v3096_v58, %v3096_v58  ;;  %v4222_v55 = vpack.c.bf16 %v3095_v62, %v3094_v25 }
 0x23a   : > { %4208 = vst [vmem:[%s5356_s27] sm:$0xff] %v4207_v63  }
 0x23b   : > { %4224 = vst [vmem:[%s5356_s27 + $0x8] sm:$0xff] %v4212_v24   ;;  %v3118_v6 = vsel %vm4578_vm4, %v3105_v13, %v3117_v47 }
 0x23c   : > { %4225 = vst [vmem:[%s5356_s27 + $0x10] sm:$0xff] %v4217_v61  }
 0x23d   : > { %4226 = vst [vmem:[%s5356_s27 + $0x18] sm:$0xff] %v4222_v55  }
 0x23e   : > { %3119 = vst [vmem:[%s5356_s27 + $0x20] sm:$0xf] %v3118_v6 }
 0x245   : > { %v3123_v4 = vld [vmem:[%s5356_s27 + $0x20] sm:$0x8] }
 0x246   : > { %v3124_v5 = vsel %vm3122_vm15, 0, %v3123_v4 }
 0x247   : > { %3125 = vst [vmem:[%s5356_s27 + $0x20] sm:$0x8] %v3124_v5 }
 0x248 PF: > { %s14_s17 = sadd.s32 1, %s4282_s17   ;;  %s5399_s15 = smov %s4278_s16 }
 0x249   : > { %p11_p5 = scmp.ge.s32.totalorder %s14_s17, 4   ;;  %s5400_s16 = smov %s5402_s18 }
 0x24b   :  { %13 = sbr.rel (!%p11_p5) target bundleno = 2 (0x2), region = 76 }

// kernel: discriminator_forward.6
= control target key start
LH: loop header
LB: loop body
LE: loop exit
PB: predicated region body
PF: predicated region fallthrough
CT: control target
= control target key end

     0   :  { %s6164_s0 = inlined_call_operand.vmem [shape: bf16[2,25,512], index: 0, kind: input, shape index: {}]   ;;  %s6165_s1 = inlined_call_operand.vmem [shape: bf16[2048,256], index: 1, kind: input, shape index: {}]   ;;  %s6166_s2 = inlined_call_operand.vmem [shape: f32[1,256], index: 2, kind: input, shape index: {}]   ;;  %s6167_s3 = inlined_call_operand.vmem [shape: f32[19,1], index: 3, kind: input, shape index: {}]   ;;  %s6168_s4 = inlined_call_operand.vmem [shape: bf16[2,20,256], index: 4, kind: output, shape index: {}]  }
   0x1   :  { %6169 = sst [smem:[#allocation5_spill]] %s6165_s1 }
   0x2   :  { %s5250_s15 = smov 0   ;;  %s5252_s16 = smov 0  }
   0x3   :  { %s5254_s17 = smov 0   ;;  %s5256_s18 = smov 0  }
   0x4   :  { %s5258_s19 = smov 0   ;;  %s5260_s20 = smov 0  }
   0x5   :  { %s5262_s21 = smov 0   ;;  %s5264_s22 = smov 0  }
   0x6   :  { %s5266_s23 = smov 0  }
   0x7 LB: > { %s4330_s24 = sadd.s32 4294967295, %s5222_s23   ;;  %s23_s25 = sadd.s32 1, %s5214_s21  ;;  %s5222_s23 = sphi %s5266_s23, %s14_s23   ;;  %s5218_s22 = sphi %s5264_s22, %s6187_s22   ;;  %s5214_s21 = sphi %s5262_s21, %s6186_s21   ;;  %s5210_s20 = sphi %s5260_s20, %s6185_s20   ;;  %s5206_s19 = sphi %s5258_s19, %s6184_s19   ;;  %s5202_s18 = sphi %s5256_s18, %s6183_s18   ;;  %s5198_s17 = sphi %s5254_s17, %s6182_s17   ;;  %s5194_s16 = sphi %s5252_s16, %s6181_s16   ;;  %s5190_s15 = sphi %s5250_s15, %s6180_s15  }
   0x8   : > { %p24_p0 = scmp.ge.s32.totalorder %s23_s25, 2  ;;  %s26_s26 = sadd.s32 1, %s5218_s22 }
   0x9   : > { %s59_s27 = sadd.s32 1, %s5202_s18  ;;  %p66_p1 = scmp.ne.s32.totalorder %s5202_s18, %s5198_s17 }
   0xa   : > { %s6189_s25 = smov (%p24_p0, %s23_s25), 0  ;;  %s6191_s26 = smov (!%p24_p0, %s26_s26), %s5218_s22 }
   0xb   : > { %s56_s28 = ssub.s32 %s5214_s21, %s6189_s25  ;;  %p67_p2 = scmp.eq.s32.totalorder %s5222_s23, 0 }
   0xc   : > { %p28_p3 = scmp.ge.s32.totalorder %s6191_s26, 2  ;;  %p57_p4 = scmp.eq.s32.totalorder %s56_s28, 0 }
   0xd   : > { %p68_p5 = por %p67_p2, %p66_p1  ;;  %s134_s29 = sadd.s32 1, %s5194_s16 }
   0xe   : > { %s6193_s26 = smov (%p28_p3, %s6191_s26), 0  ;;  %p144_p6 = scmp.ne.s32.totalorder %s5194_s16, %s5190_s15 }
   0xf   : > { %s5311_s30 = scalar_select %p57_p4, %s5202_s18, %s59_s27  }
  0x10   : > { %s129_s5 = ssub.s32 %s5218_s22, %s6193_s26  ;;  %p145_p7 = scmp.eq.s32.totalorder %s4330_s24, 3 }
  0x11   : > { %s131_s6 = sor.u32 %s129_s5, %s56_s28  ;;  %p4333_p10 = scmp.ge.s32.totalorder %s5222_s23, 4 }
  0x12   : > { %p132_p8 = scmp.eq.s32.totalorder %s131_s6, 0  ;;  %p5317_p9 = por %p145_p7, %p144_p6 }
  0x13   : > { %170 = sbr.rel (%p4333_p10) target bundleno = 290 (0x122), region = 20 }
  0x14   : > { %s5322_s8 = scalar_select %p132_p8, %s5194_s16, %s134_s29  }
  0x18   : > { %181 = sbr.rel (!%p68_p5) target bundleno = 290 (0x122), region = 28  ;;  %s183_s9 = sand.u32 (%p68_p5), 1, %s5202_s18  }
  0x19   : > { %s4335_s10 = sshll.u32 (%p68_p5), %s5214_s21, 2  ;;  %s4334_s11 = sshll.u32 (%p68_p5), %s183_s9, 10 }
  0x1a   : > { %s6171_s1 = sld [smem:[#allocation5_spill]] (%p68_p5)  ;;  %s5334_s24 = scalar_lea.vmem (%p68_p5), [#allocation3], %s4334_s11 }
  0x20   : > { %s5330_s14 = scalar_lea.vmem %s6171_s1, %s4335_s10 }
  0x21   : > { %v204_v0 = vld [vmem:[%s5330_s14] sm:$0xf]  ;;  %v206_v1 = vld [vmem:[%s5330_s14 + $0x8] sm:$0xf]  ;;  %v208_v2 = vld [vmem:[%s5330_s14 + $0x10] sm:$0xf] }
  0x22   : > { %205 = vst [vmem:[%s5334_s24] sm:$0xf] %v204_v0  ;;  %v210_v3 = vld [vmem:[%s5330_s14 + $0x18] sm:$0xf]  ;;  %v212_v4 = vld [vmem:[%s5330_s14 + $0x20] sm:$0xf] }
  0x23   : > { %207 = vst [vmem:[%s5334_s24 + $0x4] sm:$0xf] %v206_v1  ;;  %v214_v5 = vld [vmem:[%s5330_s14 + $0x28] sm:$0xf]  ;;  %v216_v6 = vld [vmem:[%s5330_s14 + $0x30] sm:$0xf] }
  0x24   : > { %209 = vst [vmem:[%s5334_s24 + $0x8] sm:$0xf] %v208_v2  ;;  %v218_v7 = vld [vmem:[%s5330_s14 + $0x38] sm:$0xf]  ;;  %v220_v8 = vld [vmem:[%s5330_s14 + $0x40] sm:$0xf] }
  0x25   : > { %211 = vst [vmem:[%s5334_s24 + $0xc] sm:$0xf] %v210_v3  ;;  %v222_v9 = vld [vmem:[%s5330_s14 + $0x48] sm:$0xf]  ;;  %v224_v10 = vld [vmem:[%s5330_s14 + $0x50] sm:$0xf] }
  0x26   : > { %213 = vst [vmem:[%s5334_s24 + $0x10] sm:$0xf] %v212_v4  ;;  %v226_v11 = vld [vmem:[%s5330_s14 + $0x58] sm:$0xf]  ;;  %v228_v12 = vld [vmem:[%s5330_s14 + $0x60] sm:$0xf] }
  0x27   : > { %215 = vst [vmem:[%s5334_s24 + $0x14] sm:$0xf] %v214_v5  ;;  %v230_v13 = vld [vmem:[%s5330_s14 + $0x68] sm:$0xf]  ;;  %v232_v14 = vld [vmem:[%s5330_s14 + $0x70] sm:$0xf] }
  0x28   : > { %217 = vst [vmem:[%s5334_s24 + $0x18] sm:$0xf] %v216_v6  ;;  %v234_v15 = vld [vmem:[%s5330_s14 + $0x78] sm:$0xf]  ;;  %v236_v16 = vld [vmem:[%s5330_s14 + $0x80] sm:$0xf] }
  0x29   : > { %219 = vst [vmem:[%s5334_s24 + $0x1c] sm:$0xf] %v218_v7  ;;  %v238_v17 = vld [vmem:[%s5330_s14 + $0x88] sm:$0xf]  ;;  %v240_v18 = vld [vmem:[%s5330_s14 + $0x90] sm:$0xf] }
  0x2a   : > { %221 = vst [vmem:[%s5334_s24 + $0x20] sm:$0xf] %v220_v8  ;;  %v242_v19 = vld [vmem:[%s5330_s14 + $0x98] sm:$0xf]  ;;  %v244_v20 = vld [vmem:[%s5330_s14 + $0xa0] sm:$0xf] }
  0x2b   : > { %223 = vst [vmem:[%s5334_s24 + $0x24] sm:$0xf] %v222_v9  ;;  %v246_v21 = vld [vmem:[%s5330_s14 + $0xa8] sm:$0xf]  ;;  %v248_v22 = vld [vmem:[%s5330_s14 + $0xb0] sm:$0xf] }
  0x2c   : > { %225 = vst [vmem:[%s5334_s24 + $0x28] sm:$0xf] %v224_v10  ;;  %v250_v23 = vld [vmem:[%s5330_s14 + $0xb8] sm:$0xf]  ;;  %v252_v24 = vld [vmem:[%s5330_s14 + $0xc0] sm:$0xf] }
  0x2d   : > { %227 = vst [vmem:[%s5334_s24 + $0x2c] sm:$0xf] %v226_v11  ;;  %v254_v25 = vld [vmem:[%s5330_s14 + $0xc8] sm:$0xf]  ;;  %v256_v26 = vld [vmem:[%s5330_s14 + $0xd0] sm:$0xf] }
  0x2e   : > { %229 = vst [vmem:[%s5334_s24 + $0x30] sm:$0xf] %v228_v12  ;;  %v258_v27 = vld [vmem:[%s5330_s14 + $0xd8] sm:$0xf]  ;;  %v260_v28 = vld [vmem:[%s5330_s14 + $0xe0] sm:$0xf] }
  0x2f   : > { %231 = vst [vmem:[%s5334_s24 + $0x34] sm:$0xf] %v230_v13  ;;  %v262_v29 = vld [vmem:[%s5330_s14 + $0xe8] sm:$0xf]  ;;  %v264_v30 = vld [vmem:[%s5330_s14 + $0xf0] sm:$0xf] }
  0x30   : > { %233 = vst [vmem:[%s5334_s24 + $0x38] sm:$0xf] %v232_v14  ;;  %v266_v31 = vld [vmem:[%s5330_s14 + $0xf8] sm:$0xf]  ;;  %v268_v32 = vld [vmem:[%s5330_s14 + $0x100] sm:$0xf] }
  0x31   : > { %235 = vst [vmem:[%s5334_s24 + $0x3c] sm:$0xf] %v234_v15  ;;  %v270_v33 = vld [vmem:[%s5330_s14 + $0x108] sm:$0xf]  ;;  %v272_v34 = vld [vmem:[%s5330_s14 + $0x110] sm:$0xf] }
  0x32   : > { %237 = vst [vmem:[%s5334_s24 + $0x40] sm:$0xf] %v236_v16  ;;  %v274_v35 = vld [vmem:[%s5330_s14 + $0x118] sm:$0xf]  ;;  %v276_v36 = vld [vmem:[%s5330_s14 + $0x120] sm:$0xf] }
  0x33   : > { %239 = vst [vmem:[%s5334_s24 + $0x44] sm:$0xf] %v238_v17  ;;  %v278_v37 = vld [vmem:[%s5330_s14 + $0x128] sm:$0xf]  ;;  %v280_v38 = vld [vmem:[%s5330_s14 + $0x130] sm:$0xf] }
  0x34   : > { %241 = vst [vmem:[%s5334_s24 + $0x48] sm:$0xf] %v240_v18  ;;  %v282_v39 = vld [vmem:[%s5330_s14 + $0x138] sm:$0xf]  ;;  %v284_v40 = vld [vmem:[%s5330_s14 + $0x140] sm:$0xf] }
  0x35   : > { %243 = vst [vmem:[%s5334_s24 + $0x4c] sm:$0xf] %v242_v19  ;;  %v286_v41 = vld [vmem:[%s5330_s14 + $0x148] sm:$0xf]  ;;  %v288_v42 = vld [vmem:[%s5330_s14 + $0x150] sm:$0xf] }
  0x36   : > { %245 = vst [vmem:[%s5334_s24 + $0x50] sm:$0xf] %v244_v20  ;;  %v290_v43 = vld [vmem:[%s5330_s14 + $0x158] sm:$0xf]  ;;  %v292_v44 = vld [vmem:[%s5330_s14 + $0x160] sm:$0xf] }
  0x37   : > { %247 = vst [vmem:[%s5334_s24 + $0x54] sm:$0xf] %v246_v21  ;;  %v294_v45 = vld [vmem:[%s5330_s14 + $0x168] sm:$0xf]  ;;  %v296_v46 = vld [vmem:[%s5330_s14 + $0x170] sm:$0xf] }
  0x38   : > { %249 = vst [vmem:[%s5334_s24 + $0x58] sm:$0xf] %v248_v22  ;;  %v298_v47 = vld [vmem:[%s5330_s14 + $0x178] sm:$0xf]  ;;  %v300_v48 = vld [vmem:[%s5330_s14 + $0x180] sm:$0xf] }
  0x39   : > { %251 = vst [vmem:[%s5334_s24 + $0x5c] sm:$0xf] %v250_v23  ;;  %v302_v49 = vld [vmem:[%s5330_s14 + $0x188] sm:$0xf]  ;;  %v304_v50 = vld [vmem:[%s5330_s14 + $0x190] sm:$0xf] }
  0x3a   : > { %253 = vst [vmem:[%s5334_s24 + $0x60] sm:$0xf] %v252_v24  ;;  %v306_v51 = vld [vmem:[%s5330_s14 + $0x198] sm:$0xf]  ;;  %v308_v52 = vld [vmem:[%s5330_s14 + $0x1a0] sm:$0xf] }
  0x3b   : > { %255 = vst [vmem:[%s5334_s24 + $0x64] sm:$0xf] %v254_v25  ;;  %v310_v53 = vld [vmem:[%s5330_s14 + $0x1a8] sm:$0xf]  ;;  %v312_v54 = vld [vmem:[%s5330_s14 + $0x1b0] sm:$0xf] }
  0x3c   : > { %257 = vst [vmem:[%s5334_s24 + $0x68] sm:$0xf] %v256_v26  ;;  %v314_v55 = vld [vmem:[%s5330_s14 + $0x1b8] sm:$0xf]  ;;  %v316_v56 = vld [vmem:[%s5330_s14 + $0x1c0] sm:$0xf] }
  0x3d   : > { %259 = vst [vmem:[%s5334_s24 + $0x6c] sm:$0xf] %v258_v27  ;;  %v318_v57 = vld [vmem:[%s5330_s14 + $0x1c8] sm:$0xf]  ;;  %v320_v58 = vld [vmem:[%s5330_s14 + $0x1d0] sm:$0xf] }
  0x3e   : > { %261 = vst [vmem:[%s5334_s24 + $0x70] sm:$0xf] %v260_v28  ;;  %v322_v59 = vld [vmem:[%s5330_s14 + $0x1d8] sm:$0xf]  ;;  %v324_v60 = vld [vmem:[%s5330_s14 + $0x1e0] sm:$0xf] }
  0x3f   : > { %263 = vst [vmem:[%s5334_s24 + $0x74] sm:$0xf] %v262_v29  ;;  %v326_v61 = vld [vmem:[%s5330_s14 + $0x1e8] sm:$0xf]  ;;  %v328_v62 = vld [vmem:[%s5330_s14 + $0x1f0] sm:$0xf] }
  0x40   : > { %265 = vst [vmem:[%s5334_s24 + $0x78] sm:$0xf] %v264_v30  ;;  %v330_v63 = vld [vmem:[%s5330_s14 + $0x1f8] sm:$0xf]  ;;  %v332_v0 = vld [vmem:[%s5330_s14 + $0x200] sm:$0xf] }
  0x41   : > { %267 = vst [vmem:[%s5334_s24 + $0x7c] sm:$0xf] %v266_v31  ;;  %v334_v1 = vld [vmem:[%s5330_s14 + $0x208] sm:$0xf]  ;;  %v336_v2 = vld [vmem:[%s5330_s14 + $0x210] sm:$0xf] }
  0x42   : > { %269 = vst [vmem:[%s5334_s24 + $0x80] sm:$0xf] %v268_v32  ;;  %v338_v3 = vld [vmem:[%s5330_s14 + $0x218] sm:$0xf]  ;;  %v340_v4 = vld [vmem:[%s5330_s14 + $0x220] sm:$0xf] }
  0x43   : > { %271 = vst [vmem:[%s5334_s24 + $0x84] sm:$0xf] %v270_v33  ;;  %v342_v5 = vld [vmem:[%s5330_s14 + $0x228] sm:$0xf]  ;;  %v344_v6 = vld [vmem:[%s5330_s14 + $0x230] sm:$0xf] }
  0x44   : > { %273 = vst [vmem:[%s5334_s24 + $0x88] sm:$0xf] %v272_v34  ;;  %v346_v7 = vld [vmem:[%s5330_s14 + $0x238] sm:$0xf]  ;;  %v348_v8 = vld [vmem:[%s5330_s14 + $0x240] sm:$0xf] }
  0x45   : > { %275 = vst [vmem:[%s5334_s24 + $0x8c] sm:$0xf] %v274_v35  ;;  %v350_v9 = vld [vmem:[%s5330_s14 + $0x248] sm:$0xf]  ;;  %v352_v10 = vld [vmem:[%s5330_s14 + $0x250] sm:$0xf] }
  0x46   : > { %277 = vst [vmem:[%s5334_s24 + $0x90] sm:$0xf] %v276_v36  ;;  %v354_v11 = vld [vmem:[%s5330_s14 + $0x258] sm:$0xf]  ;;  %v356_v12 = vld [vmem:[%s5330_s14 + $0x260] sm:$0xf] }
  0x47   : > { %279 = vst [vmem:[%s5334_s24 + $0x94] sm:$0xf] %v278_v37  ;;  %v358_v13 = vld [vmem:[%s5330_s14 + $0x268] sm:$0xf]  ;;  %v360_v14 = vld [vmem:[%s5330_s14 + $0x270] sm:$0xf] }
  0x48   : > { %281 = vst [vmem:[%s5334_s24 + $0x98] sm:$0xf] %v280_v38  ;;  %v362_v15 = vld [vmem:[%s5330_s14 + $0x278] sm:$0xf]  ;;  %v364_v16 = vld [vmem:[%s5330_s14 + $0x280] sm:$0xf] }
  0x49   : > { %283 = vst [vmem:[%s5334_s24 + $0x9c] sm:$0xf] %v282_v39  ;;  %v366_v17 = vld [vmem:[%s5330_s14 + $0x288] sm:$0xf]  ;;  %v368_v18 = vld [vmem:[%s5330_s14 + $0x290] sm:$0xf] }
  0x4a   : > { %285 = vst [vmem:[%s5334_s24 + $0xa0] sm:$0xf] %v284_v40  ;;  %v370_v19 = vld [vmem:[%s5330_s14 + $0x298] sm:$0xf]  ;;  %v372_v20 = vld [vmem:[%s5330_s14 + $0x2a0] sm:$0xf] }
  0x4b   : > { %287 = vst [vmem:[%s5334_s24 + $0xa4] sm:$0xf] %v286_v41  ;;  %v374_v21 = vld [vmem:[%s5330_s14 + $0x2a8] sm:$0xf]  ;;  %v376_v22 = vld [vmem:[%s5330_s14 + $0x2b0] sm:$0xf] }
  0x4c   : > { %289 = vst [vmem:[%s5334_s24 + $0xa8] sm:$0xf] %v288_v42  ;;  %v378_v23 = vld [vmem:[%s5330_s14 + $0x2b8] sm:$0xf]  ;;  %v380_v24 = vld [vmem:[%s5330_s14 + $0x2c0] sm:$0xf] }
  0x4d   : > { %291 = vst [vmem:[%s5334_s24 + $0xac] sm:$0xf] %v290_v43  ;;  %v382_v25 = vld [vmem:[%s5330_s14 + $0x2c8] sm:$0xf]  ;;  %v384_v26 = vld [vmem:[%s5330_s14 + $0x2d0] sm:$0xf] }
  0x4e   : > { %293 = vst [vmem:[%s5334_s24 + $0xb0] sm:$0xf] %v292_v44  ;;  %v386_v27 = vld [vmem:[%s5330_s14 + $0x2d8] sm:$0xf]  ;;  %v388_v28 = vld [vmem:[%s5330_s14 + $0x2e0] sm:$0xf] }
  0x4f   : > { %295 = vst [vmem:[%s5334_s24 + $0xb4] sm:$0xf] %v294_v45  ;;  %v390_v29 = vld [vmem:[%s5330_s14 + $0x2e8] sm:$0xf]  ;;  %v392_v30 = vld [vmem:[%s5330_s14 + $0x2f0] sm:$0xf] }
  0x50   : > { %297 = vst [vmem:[%s5334_s24 + $0xb8] sm:$0xf] %v296_v46  ;;  %v394_v31 = vld [vmem:[%s5330_s14 + $0x2f8] sm:$0xf]  ;;  %v396_v32 = vld [vmem:[%s5330_s14 + $0x300] sm:$0xf] }
  0x51   : > { %299 = vst [vmem:[%s5334_s24 + $0xbc] sm:$0xf] %v298_v47  ;;  %v398_v33 = vld [vmem:[%s5330_s14 + $0x308] sm:$0xf]  ;;  %v400_v34 = vld [vmem:[%s5330_s14 + $0x310] sm:$0xf] }
  0x52   : > { %301 = vst [vmem:[%s5334_s24 + $0xc0] sm:$0xf] %v300_v48  ;;  %v402_v35 = vld [vmem:[%s5330_s14 + $0x318] sm:$0xf]  ;;  %v404_v36 = vld [vmem:[%s5330_s14 + $0x320] sm:$0xf] }
  0x53   : > { %303 = vst [vmem:[%s5334_s24 + $0xc4] sm:$0xf] %v302_v49  ;;  %v406_v37 = vld [vmem:[%s5330_s14 + $0x328] sm:$0xf]  ;;  %v408_v38 = vld [vmem:[%s5330_s14 + $0x330] sm:$0xf] }
  0x54   : > { %305 = vst [vmem:[%s5334_s24 + $0xc8] sm:$0xf] %v304_v50  ;;  %v410_v39 = vld [vmem:[%s5330_s14 + $0x338] sm:$0xf]  ;;  %v412_v40 = vld [vmem:[%s5330_s14 + $0x340] sm:$0xf] }
  0x55   : > { %307 = vst [vmem:[%s5334_s24 + $0xcc] sm:$0xf] %v306_v51  ;;  %v414_v41 = vld [vmem:[%s5330_s14 + $0x348] sm:$0xf]  ;;  %v416_v42 = vld [vmem:[%s5330_s14 + $0x350] sm:$0xf] }
  0x56   : > { %309 = vst [vmem:[%s5334_s24 + $0xd0] sm:$0xf] %v308_v52  ;;  %v418_v43 = vld [vmem:[%s5330_s14 + $0x358] sm:$0xf]  ;;  %v420_v44 = vld [vmem:[%s5330_s14 + $0x360] sm:$0xf] }
  0x57   : > { %311 = vst [vmem:[%s5334_s24 + $0xd4] sm:$0xf] %v310_v53  ;;  %v422_v45 = vld [vmem:[%s5330_s14 + $0x368] sm:$0xf]  ;;  %v424_v46 = vld [vmem:[%s5330_s14 + $0x370] sm:$0xf] }
  0x58   : > { %313 = vst [vmem:[%s5334_s24 + $0xd8] sm:$0xf] %v312_v54  ;;  %v426_v47 = vld [vmem:[%s5330_s14 + $0x378] sm:$0xf]  ;;  %v428_v48 = vld [vmem:[%s5330_s14 + $0x380] sm:$0xf] }
  0x59   : > { %315 = vst [vmem:[%s5334_s24 + $0xdc] sm:$0xf] %v314_v55  ;;  %v430_v49 = vld [vmem:[%s5330_s14 + $0x388] sm:$0xf]  ;;  %v432_v50 = vld [vmem:[%s5330_s14 + $0x390] sm:$0xf] }
  0x5a   : > { %317 = vst [vmem:[%s5334_s24 + $0xe0] sm:$0xf] %v316_v56  ;;  %v434_v51 = vld [vmem:[%s5330_s14 + $0x398] sm:$0xf]  ;;  %v436_v52 = vld [vmem:[%s5330_s14 + $0x3a0] sm:$0xf] }
  0x5b   : > { %319 = vst [vmem:[%s5334_s24 + $0xe4] sm:$0xf] %v318_v57  ;;  %v438_v53 = vld [vmem:[%s5330_s14 + $0x3a8] sm:$0xf]  ;;  %v440_v54 = vld [vmem:[%s5330_s14 + $0x3b0] sm:$0xf] }
  0x5c   : > { %321 = vst [vmem:[%s5334_s24 + $0xe8] sm:$0xf] %v320_v58  ;;  %v442_v55 = vld [vmem:[%s5330_s14 + $0x3b8] sm:$0xf]  ;;  %v444_v56 = vld [vmem:[%s5330_s14 + $0x3c0] sm:$0xf] }
  0x5d   : > { %323 = vst [vmem:[%s5334_s24 + $0xec] sm:$0xf] %v322_v59  ;;  %v446_v57 = vld [vmem:[%s5330_s14 + $0x3c8] sm:$0xf]  ;;  %v448_v58 = vld [vmem:[%s5330_s14 + $0x3d0] sm:$0xf] }
  0x5e   : > { %325 = vst [vmem:[%s5334_s24 + $0xf0] sm:$0xf] %v324_v60  ;;  %v450_v59 = vld [vmem:[%s5330_s14 + $0x3d8] sm:$0xf]  ;;  %v452_v60 = vld [vmem:[%s5330_s14 + $0x3e0] sm:$0xf] }
  0x5f   : > { %327 = vst [vmem:[%s5334_s24 + $0xf4] sm:$0xf] %v326_v61  ;;  %v454_v61 = vld [vmem:[%s5330_s14 + $0x3e8] sm:$0xf] }
  0x60   : > { %329 = vst [vmem:[%s5334_s24 + $0xf8] sm:$0xf] %v328_v62  ;;  %v456_v62 = vld [vmem:[%s5330_s14 + $0x3f0] sm:$0xf] }
  0x61   : > { %331 = vst [vmem:[%s5334_s24 + $0xfc] sm:$0xf] %v330_v63  ;;  %v458_v63 = vld [vmem:[%s5330_s14 + $0x3f8] sm:$0xf] }
  0x62   : > { %333 = vst [vmem:[%s5334_s24 + $0x100] sm:$0xf] %v332_v0  ;;  %v460_v0 = vld [vmem:[%s5330_s14 + $0x400] sm:$0xf] }
  0x63   : > { %335 = vst [vmem:[%s5334_s24 + $0x104] sm:$0xf] %v334_v1  ;;  %v462_v1 = vld [vmem:[%s5330_s14 + $0x408] sm:$0xf] }
  0x64   : > { %337 = vst [vmem:[%s5334_s24 + $0x108] sm:$0xf] %v336_v2  ;;  %v464_v2 = vld [vmem:[%s5330_s14 + $0x410] sm:$0xf] }
  0x65   : > { %339 = vst [vmem:[%s5334_s24 + $0x10c] sm:$0xf] %v338_v3  ;;  %v466_v3 = vld [vmem:[%s5330_s14 + $0x418] sm:$0xf] }
  0x66   : > { %341 = vst [vmem:[%s5334_s24 + $0x110] sm:$0xf] %v340_v4  ;;  %v468_v4 = vld [vmem:[%s5330_s14 + $0x420] sm:$0xf] }
  0x67   : > { %343 = vst [vmem:[%s5334_s24 + $0x114] sm:$0xf] %v342_v5  ;;  %v470_v5 = vld [vmem:[%s5330_s14 + $0x428] sm:$0xf] }
  0x68   : > { %345 = vst [vmem:[%s5334_s24 + $0x118] sm:$0xf] %v344_v6  ;;  %v472_v6 = vld [vmem:[%s5330_s14 + $0x430] sm:$0xf] }
  0x69   : > { %347 = vst [vmem:[%s5334_s24 + $0x11c] sm:$0xf] %v346_v7  ;;  %v474_v7 = vld [vmem:[%s5330_s14 + $0x438] sm:$0xf] }
  0x6a   : > { %349 = vst [vmem:[%s5334_s24 + $0x120] sm:$0xf] %v348_v8  ;;  %v476_v8 = vld [vmem:[%s5330_s14 + $0x440] sm:$0xf] }
  0x6b   : > { %351 = vst [vmem:[%s5334_s24 + $0x124] sm:$0xf] %v350_v9  ;;  %v478_v9 = vld [vmem:[%s5330_s14 + $0x448] sm:$0xf] }
  0x6c   : > { %353 = vst [vmem:[%s5334_s24 + $0x128] sm:$0xf] %v352_v10  ;;  %v480_v10 = vld [vmem:[%s5330_s14 + $0x450] sm:$0xf] }
  0x6d   : > { %355 = vst [vmem:[%s5334_s24 + $0x12c] sm:$0xf] %v354_v11  ;;  %v482_v11 = vld [vmem:[%s5330_s14 + $0x458] sm:$0xf] }
  0x6e   : > { %357 = vst [vmem:[%s5334_s24 + $0x130] sm:$0xf] %v356_v12  ;;  %v484_v12 = vld [vmem:[%s5330_s14 + $0x460] sm:$0xf] }
  0x6f   : > { %359 = vst [vmem:[%s5334_s24 + $0x134] sm:$0xf] %v358_v13  ;;  %v486_v13 = vld [vmem:[%s5330_s14 + $0x468] sm:$0xf] }
  0x70   : > { %361 = vst [vmem:[%s5334_s24 + $0x138] sm:$0xf] %v360_v14  ;;  %v488_v14 = vld [vmem:[%s5330_s14 + $0x470] sm:$0xf] }
  0x71   : > { %363 = vst [vmem:[%s5334_s24 + $0x13c] sm:$0xf] %v362_v15  ;;  %v490_v15 = vld [vmem:[%s5330_s14 + $0x478] sm:$0xf] }
  0x72   : > { %365 = vst [vmem:[%s5334_s24 + $0x140] sm:$0xf] %v364_v16  ;;  %v492_v16 = vld [vmem:[%s5330_s14 + $0x480] sm:$0xf] }
  0x73   : > { %367 = vst [vmem:[%s5334_s24 + $0x144] sm:$0xf] %v366_v17  ;;  %v494_v17 = vld [vmem:[%s5330_s14 + $0x488] sm:$0xf] }
  0x74   : > { %369 = vst [vmem:[%s5334_s24 + $0x148] sm:$0xf] %v368_v18  ;;  %v496_v18 = vld [vmem:[%s5330_s14 + $0x490] sm:$0xf] }
  0x75   : > { %371 = vst [vmem:[%s5334_s24 + $0x14c] sm:$0xf] %v370_v19  ;;  %v498_v19 = vld [vmem:[%s5330_s14 + $0x498] sm:$0xf] }
  0x76   : > { %373 = vst [vmem:[%s5334_s24 + $0x150] sm:$0xf] %v372_v20  ;;  %v500_v20 = vld [vmem:[%s5330_s14 + $0x4a0] sm:$0xf] }
  0x77   : > { %375 = vst [vmem:[%s5334_s24 + $0x154] sm:$0xf] %v374_v21  ;;  %v502_v21 = vld [vmem:[%s5330_s14 + $0x4a8] sm:$0xf] }
  0x78   : > { %377 = vst [vmem:[%s5334_s24 + $0x158] sm:$0xf] %v376_v22  ;;  %v504_v22 = vld [vmem:[%s5330_s14 + $0x4b0] sm:$0xf] }
  0x79   : > { %379 = vst [vmem:[%s5334_s24 + $0x15c] sm:$0xf] %v378_v23  ;;  %v506_v23 = vld [vmem:[%s5330_s14 + $0x4b8] sm:$0xf] }
  0x7a   : > { %381 = vst [vmem:[%s5334_s24 + $0x160] sm:$0xf] %v380_v24  ;;  %v508_v24 = vld [vmem:[%s5330_s14 + $0x4c0] sm:$0xf] }
  0x7b   : > { %383 = vst [vmem:[%s5334_s24 + $0x164] sm:$0xf] %v382_v25  ;;  %v510_v25 = vld [vmem:[%s5330_s14 + $0x4c8] sm:$0xf] }
  0x7c   : > { %385 = vst [vmem:[%s5334_s24 + $0x168] sm:$0xf] %v384_v26  ;;  %v512_v26 = vld [vmem:[%s5330_s14 + $0x4d0] sm:$0xf] }
  0x7d   : > { %387 = vst [vmem:[%s5334_s24 + $0x16c] sm:$0xf] %v386_v27  ;;  %v514_v27 = vld [vmem:[%s5330_s14 + $0x4d8] sm:$0xf] }
  0x7e   : > { %389 = vst [vmem:[%s5334_s24 + $0x170] sm:$0xf] %v388_v28  ;;  %v516_v28 = vld [vmem:[%s5330_s14 + $0x4e0] sm:$0xf] }
  0x7f   : > { %391 = vst [vmem:[%s5334_s24 + $0x174] sm:$0xf] %v390_v29  ;;  %v518_v29 = vld [vmem:[%s5330_s14 + $0x4e8] sm:$0xf] }
  0x80   : > { %393 = vst [vmem:[%s5334_s24 + $0x178] sm:$0xf] %v392_v30  ;;  %v520_v30 = vld [vmem:[%s5330_s14 + $0x4f0] sm:$0xf] }
  0x81   : > { %395 = vst [vmem:[%s5334_s24 + $0x17c] sm:$0xf] %v394_v31  ;;  %v522_v31 = vld [vmem:[%s5330_s14 + $0x4f8] sm:$0xf] }
  0x82   : > { %397 = vst [vmem:[%s5334_s24 + $0x180] sm:$0xf] %v396_v32  ;;  %v524_v32 = vld [vmem:[%s5330_s14 + $0x500] sm:$0xf] }
  0x83   : > { %399 = vst [vmem:[%s5334_s24 + $0x184] sm:$0xf] %v398_v33  ;;  %v526_v33 = vld [vmem:[%s5330_s14 + $0x508] sm:$0xf] }
  0x84   : > { %401 = vst [vmem:[%s5334_s24 + $0x188] sm:$0xf] %v400_v34  ;;  %v528_v34 = vld [vmem:[%s5330_s14 + $0x510] sm:$0xf] }
  0x85   : > { %403 = vst [vmem:[%s5334_s24 + $0x18c] sm:$0xf] %v402_v35  ;;  %v530_v35 = vld [vmem:[%s5330_s14 + $0x518] sm:$0xf] }
  0x86   : > { %405 = vst [vmem:[%s5334_s24 + $0x190] sm:$0xf] %v404_v36  ;;  %v532_v36 = vld [vmem:[%s5330_s14 + $0x520] sm:$0xf] }
  0x87   : > { %407 = vst [vmem:[%s5334_s24 + $0x194] sm:$0xf] %v406_v37  ;;  %v534_v37 = vld [vmem:[%s5330_s14 + $0x528] sm:$0xf] }
  0x88   : > { %409 = vst [vmem:[%s5334_s24 + $0x198] sm:$0xf] %v408_v38  ;;  %v536_v38 = vld [vmem:[%s5330_s14 + $0x530] sm:$0xf] }
  0x89   : > { %411 = vst [vmem:[%s5334_s24 + $0x19c] sm:$0xf] %v410_v39  ;;  %v538_v39 = vld [vmem:[%s5330_s14 + $0x538] sm:$0xf] }
  0x8a   : > { %413 = vst [vmem:[%s5334_s24 + $0x1a0] sm:$0xf] %v412_v40  ;;  %v540_v40 = vld [vmem:[%s5330_s14 + $0x540] sm:$0xf] }
  0x8b   : > { %415 = vst [vmem:[%s5334_s24 + $0x1a4] sm:$0xf] %v414_v41  ;;  %v542_v41 = vld [vmem:[%s5330_s14 + $0x548] sm:$0xf] }
  0x8c   : > { %417 = vst [vmem:[%s5334_s24 + $0x1a8] sm:$0xf] %v416_v42  ;;  %v544_v42 = vld [vmem:[%s5330_s14 + $0x550] sm:$0xf] }
  0x8d   : > { %419 = vst [vmem:[%s5334_s24 + $0x1ac] sm:$0xf] %v418_v43  ;;  %v546_v43 = vld [vmem:[%s5330_s14 + $0x558] sm:$0xf] }
  0x8e   : > { %421 = vst [vmem:[%s5334_s24 + $0x1b0] sm:$0xf] %v420_v44  ;;  %v548_v44 = vld [vmem:[%s5330_s14 + $0x560] sm:$0xf] }
  0x8f   : > { %423 = vst [vmem:[%s5334_s24 + $0x1b4] sm:$0xf] %v422_v45  ;;  %v550_v45 = vld [vmem:[%s5330_s14 + $0x568] sm:$0xf] }
  0x90   : > { %425 = vst [vmem:[%s5334_s24 + $0x1b8] sm:$0xf] %v424_v46  ;;  %v552_v46 = vld [vmem:[%s5330_s14 + $0x570] sm:$0xf] }
  0x91   : > { %427 = vst [vmem:[%s5334_s24 + $0x1bc] sm:$0xf] %v426_v47  ;;  %v554_v47 = vld [vmem:[%s5330_s14 + $0x578] sm:$0xf] }
  0x92   : > { %429 = vst [vmem:[%s5334_s24 + $0x1c0] sm:$0xf] %v428_v48  ;;  %v556_v48 = vld [vmem:[%s5330_s14 + $0x580] sm:$0xf] }
  0x93   : > { %431 = vst [vmem:[%s5334_s24 + $0x1c4] sm:$0xf] %v430_v49  ;;  %v558_v49 = vld [vmem:[%s5330_s14 + $0x588] sm:$0xf] }
  0x94   : > { %433 = vst [vmem:[%s5334_s24 + $0x1c8] sm:$0xf] %v432_v50  ;;  %v560_v50 = vld [vmem:[%s5330_s14 + $0x590] sm:$0xf] }
  0x95   : > { %435 = vst [vmem:[%s5334_s24 + $0x1cc] sm:$0xf] %v434_v51  ;;  %v562_v51 = vld [vmem:[%s5330_s14 + $0x598] sm:$0xf] }
  0x96   : > { %437 = vst [vmem:[%s5334_s24 + $0x1d0] sm:$0xf] %v436_v52  ;;  %v564_v52 = vld [vmem:[%s5330_s14 + $0x5a0] sm:$0xf] }
  0x97   : > { %439 = vst [vmem:[%s5334_s24 + $0x1d4] sm:$0xf] %v438_v53  ;;  %v566_v53 = vld [vmem:[%s5330_s14 + $0x5a8] sm:$0xf] }
  0x98   : > { %441 = vst [vmem:[%s5334_s24 + $0x1d8] sm:$0xf] %v440_v54  ;;  %v568_v54 = vld [vmem:[%s5330_s14 + $0x5b0] sm:$0xf] }
  0x99   : > { %443 = vst [vmem:[%s5334_s24 + $0x1dc] sm:$0xf] %v442_v55  ;;  %v570_v55 = vld [vmem:[%s5330_s14 + $0x5b8] sm:$0xf] }
  0x9a   : > { %445 = vst [vmem:[%s5334_s24 + $0x1e0] sm:$0xf] %v444_v56  ;;  %v572_v56 = vld [vmem:[%s5330_s14 + $0x5c0] sm:$0xf] }
  0x9b   : > { %447 = vst [vmem:[%s5334_s24 + $0x1e4] sm:$0xf] %v446_v57  ;;  %v574_v57 = vld [vmem:[%s5330_s14 + $0x5c8] sm:$0xf] }
  0x9c   : > { %449 = vst [vmem:[%s5334_s24 + $0x1e8] sm:$0xf] %v448_v58  ;;  %v576_v58 = vld [vmem:[%s5330_s14 + $0x5d0] sm:$0xf] }
  0x9d   : > { %451 = vst [vmem:[%s5334_s24 + $0x1ec] sm:$0xf] %v450_v59  ;;  %v578_v59 = vld [vmem:[%s5330_s14 + $0x5d8] sm:$0xf] }
  0x9e   : > { %453 = vst [vmem:[%s5334_s24 + $0x1f0] sm:$0xf] %v452_v60  ;;  %v580_v60 = vld [vmem:[%s5330_s14 + $0x5e0] sm:$0xf] }
  0x9f   : > { %455 = vst [vmem:[%s5334_s24 + $0x1f4] sm:$0xf] %v454_v61  ;;  %v582_v61 = vld [vmem:[%s5330_s14 + $0x5e8] sm:$0xf] }
  0xa0   : > { %457 = vst [vmem:[%s5334_s24 + $0x1f8] sm:$0xf] %v456_v62  ;;  %v584_v62 = vld [vmem:[%s5330_s14 + $0x5f0] sm:$0xf] }
  0xa1   : > { %459 = vst [vmem:[%s5334_s24 + $0x1fc] sm:$0xf] %v458_v63  ;;  %v586_v63 = vld [vmem:[%s5330_s14 + $0x5f8] sm:$0xf] }
  0xa2   : > { %461 = vst [vmem:[%s5334_s24 + $0x200] sm:$0xf] %v460_v0  ;;  %v588_v0 = vld [vmem:[%s5330_s14 + $0x600] sm:$0xf] }
  0xa3   : > { %463 = vst [vmem:[%s5334_s24 + $0x204] sm:$0xf] %v462_v1  ;;  %v590_v1 = vld [vmem:[%s5330_s14 + $0x608] sm:$0xf] }
  0xa4   : > { %465 = vst [vmem:[%s5334_s24 + $0x208] sm:$0xf] %v464_v2  ;;  %v592_v2 = vld [vmem:[%s5330_s14 + $0x610] sm:$0xf] }
  0xa5   : > { %467 = vst [vmem:[%s5334_s24 + $0x20c] sm:$0xf] %v466_v3  ;;  %v594_v3 = vld [vmem:[%s5330_s14 + $0x618] sm:$0xf] }
  0xa6   : > { %469 = vst [vmem:[%s5334_s24 + $0x210] sm:$0xf] %v468_v4  ;;  %v596_v4 = vld [vmem:[%s5330_s14 + $0x620] sm:$0xf] }
  0xa7   : > { %471 = vst [vmem:[%s5334_s24 + $0x214] sm:$0xf] %v470_v5  ;;  %v598_v5 = vld [vmem:[%s5330_s14 + $0x628] sm:$0xf] }
  0xa8   : > { %473 = vst [vmem:[%s5334_s24 + $0x218] sm:$0xf] %v472_v6  ;;  %v600_v6 = vld [vmem:[%s5330_s14 + $0x630] sm:$0xf] }
  0xa9   : > { %475 = vst [vmem:[%s5334_s24 + $0x21c] sm:$0xf] %v474_v7  ;;  %v602_v7 = vld [vmem:[%s5330_s14 + $0x638] sm:$0xf] }
  0xaa   : > { %477 = vst [vmem:[%s5334_s24 + $0x220] sm:$0xf] %v476_v8  ;;  %v604_v8 = vld [vmem:[%s5330_s14 + $0x640] sm:$0xf] }
  0xab   : > { %479 = vst [vmem:[%s5334_s24 + $0x224] sm:$0xf] %v478_v9  ;;  %v606_v9 = vld [vmem:[%s5330_s14 + $0x648] sm:$0xf] }
  0xac   : > { %481 = vst [vmem:[%s5334_s24 + $0x228] sm:$0xf] %v480_v10  ;;  %v608_v10 = vld [vmem:[%s5330_s14 + $0x650] sm:$0xf] }
  0xad   : > { %483 = vst [vmem:[%s5334_s24 + $0x22c] sm:$0xf] %v482_v11  ;;  %v610_v11 = vld [vmem:[%s5330_s14 + $0x658] sm:$0xf] }
  0xae   : > { %485 = vst [vmem:[%s5334_s24 + $0x230] sm:$0xf] %v484_v12  ;;  %v612_v12 = vld [vmem:[%s5330_s14 + $0x660] sm:$0xf] }
  0xaf   : > { %487 = vst [vmem:[%s5334_s24 + $0x234] sm:$0xf] %v486_v13  ;;  %v614_v13 = vld [vmem:[%s5330_s14 + $0x668] sm:$0xf] }
  0xb0   : > { %489 = vst [vmem:[%s5334_s24 + $0x238] sm:$0xf] %v488_v14  ;;  %v616_v14 = vld [vmem:[%s5330_s14 + $0x670] sm:$0xf] }
  0xb1   : > { %491 = vst [vmem:[%s5334_s24 + $0x23c] sm:$0xf] %v490_v15  ;;  %v618_v15 = vld [vmem:[%s5330_s14 + $0x678] sm:$0xf] }
  0xb2   : > { %493 = vst [vmem:[%s5334_s24 + $0x240] sm:$0xf] %v492_v16  ;;  %v620_v16 = vld [vmem:[%s5330_s14 + $0x680] sm:$0xf] }
  0xb3   : > { %495 = vst [vmem:[%s5334_s24 + $0x244] sm:$0xf] %v494_v17  ;;  %v622_v17 = vld [vmem:[%s5330_s14 + $0x688] sm:$0xf] }
  0xb4   : > { %497 = vst [vmem:[%s5334_s24 + $0x248] sm:$0xf] %v496_v18  ;;  %v624_v18 = vld [vmem:[%s5330_s14 + $0x690] sm:$0xf] }
  0xb5   : > { %499 = vst [vmem:[%s5334_s24 + $0x24c] sm:$0xf] %v498_v19  ;;  %v626_v19 = vld [vmem:[%s5330_s14 + $0x698] sm:$0xf] }
  0xb6   : > { %501 = vst [vmem:[%s5334_s24 + $0x250] sm:$0xf] %v500_v20  ;;  %v628_v20 = vld [vmem:[%s5330_s14 + $0x6a0] sm:$0xf] }
  0xb7   : > { %503 = vst [vmem:[%s5334_s24 + $0x254] sm:$0xf] %v502_v21  ;;  %v630_v21 = vld [vmem:[%s5330_s14 + $0x6a8] sm:$0xf] }
  0xb8   : > { %505 = vst [vmem:[%s5334_s24 + $0x258] sm:$0xf] %v504_v22  ;;  %v632_v22 = vld [vmem:[%s5330_s14 + $0x6b0] sm:$0xf] }
  0xb9   : > { %507 = vst [vmem:[%s5334_s24 + $0x25c] sm:$0xf] %v506_v23  ;;  %v634_v23 = vld [vmem:[%s5330_s14 + $0x6b8] sm:$0xf] }
  0xba   : > { %509 = vst [vmem:[%s5334_s24 + $0x260] sm:$0xf] %v508_v24  ;;  %v636_v24 = vld [vmem:[%s5330_s14 + $0x6c0] sm:$0xf] }
  0xbb   : > { %511 = vst [vmem:[%s5334_s24 + $0x264] sm:$0xf] %v510_v25  ;;  %v638_v25 = vld [vmem:[%s5330_s14 + $0x6c8] sm:$0xf] }
  0xbc   : > { %513 = vst [vmem:[%s5334_s24 + $0x268] sm:$0xf] %v512_v26  ;;  %v640_v26 = vld [vmem:[%s5330_s14 + $0x6d0] sm:$0xf] }
  0xbd   : > { %515 = vst [vmem:[%s5334_s24 + $0x26c] sm:$0xf] %v514_v27  ;;  %v642_v27 = vld [vmem:[%s5330_s14 + $0x6d8] sm:$0xf] }
  0xbe   : > { %517 = vst [vmem:[%s5334_s24 + $0x270] sm:$0xf] %v516_v28  ;;  %v644_v28 = vld [vmem:[%s5330_s14 + $0x6e0] sm:$0xf] }
  0xbf   : > { %519 = vst [vmem:[%s5334_s24 + $0x274] sm:$0xf] %v518_v29  ;;  %v646_v29 = vld [vmem:[%s5330_s14 + $0x6e8] sm:$0xf] }
  0xc0   : > { %521 = vst [vmem:[%s5334_s24 + $0x278] sm:$0xf] %v520_v30  ;;  %v648_v30 = vld [vmem:[%s5330_s14 + $0x6f0] sm:$0xf] }
  0xc1   : > { %523 = vst [vmem:[%s5334_s24 + $0x27c] sm:$0xf] %v522_v31  ;;  %v650_v31 = vld [vmem:[%s5330_s14 + $0x6f8] sm:$0xf] }
  0xc2   : > { %525 = vst [vmem:[%s5334_s24 + $0x280] sm:$0xf] %v524_v32  ;;  %v652_v32 = vld [vmem:[%s5330_s14 + $0x700] sm:$0xf] }
  0xc3   : > { %527 = vst [vmem:[%s5334_s24 + $0x284] sm:$0xf] %v526_v33  ;;  %v654_v33 = vld [vmem:[%s5330_s14 + $0x708] sm:$0xf] }
  0xc4   : > { %529 = vst [vmem:[%s5334_s24 + $0x288] sm:$0xf] %v528_v34  ;;  %v656_v34 = vld [vmem:[%s5330_s14 + $0x710] sm:$0xf] }
  0xc5   : > { %531 = vst [vmem:[%s5334_s24 + $0x28c] sm:$0xf] %v530_v35  ;;  %v658_v35 = vld [vmem:[%s5330_s14 + $0x718] sm:$0xf] }
  0xc6   : > { %533 = vst [vmem:[%s5334_s24 + $0x290] sm:$0xf] %v532_v36  ;;  %v660_v36 = vld [vmem:[%s5330_s14 + $0x720] sm:$0xf] }
  0xc7   : > { %535 = vst [vmem:[%s5334_s24 + $0x294] sm:$0xf] %v534_v37  ;;  %v662_v37 = vld [vmem:[%s5330_s14 + $0x728] sm:$0xf] }
  0xc8   : > { %537 = vst [vmem:[%s5334_s24 + $0x298] sm:$0xf] %v536_v38  ;;  %v664_v38 = vld [vmem:[%s5330_s14 + $0x730] sm:$0xf] }
  0xc9   : > { %539 = vst [vmem:[%s5334_s24 + $0x29c] sm:$0xf] %v538_v39  ;;  %v666_v39 = vld [vmem:[%s5330_s14 + $0x738] sm:$0xf] }
  0xca   : > { %541 = vst [vmem:[%s5334_s24 + $0x2a0] sm:$0xf] %v540_v40  ;;  %v668_v40 = vld [vmem:[%s5330_s14 + $0x740] sm:$0xf] }
  0xcb   : > { %543 = vst [vmem:[%s5334_s24 + $0x2a4] sm:$0xf] %v542_v41  ;;  %v670_v41 = vld [vmem:[%s5330_s14 + $0x748] sm:$0xf] }
  0xcc   : > { %545 = vst [vmem:[%s5334_s24 + $0x2a8] sm:$0xf] %v544_v42  ;;  %v672_v42 = vld [vmem:[%s5330_s14 + $0x750] sm:$0xf] }
  0xcd   : > { %547 = vst [vmem:[%s5334_s24 + $0x2ac] sm:$0xf] %v546_v43  ;;  %v674_v43 = vld [vmem:[%s5330_s14 + $0x758] sm:$0xf] }
  0xce   : > { %549 = vst [vmem:[%s5334_s24 + $0x2b0] sm:$0xf] %v548_v44  ;;  %v676_v44 = vld [vmem:[%s5330_s14 + $0x760] sm:$0xf] }
  0xcf   : > { %551 = vst [vmem:[%s5334_s24 + $0x2b4] sm:$0xf] %v550_v45  ;;  %v678_v45 = vld [vmem:[%s5330_s14 + $0x768] sm:$0xf] }
  0xd0   : > { %553 = vst [vmem:[%s5334_s24 + $0x2b8] sm:$0xf] %v552_v46  ;;  %v680_v46 = vld [vmem:[%s5330_s14 + $0x770] sm:$0xf] }
  0xd1   : > { %555 = vst [vmem:[%s5334_s24 + $0x2bc] sm:$0xf] %v554_v47  ;;  %v682_v47 = vld [vmem:[%s5330_s14 + $0x778] sm:$0xf] }
  0xd2   : > { %557 = vst [vmem:[%s5334_s24 + $0x2c0] sm:$0xf] %v556_v48  ;;  %v684_v48 = vld [vmem:[%s5330_s14 + $0x780] sm:$0xf] }
  0xd3   : > { %559 = vst [vmem:[%s5334_s24 + $0x2c4] sm:$0xf] %v558_v49  ;;  %v686_v49 = vld [vmem:[%s5330_s14 + $0x788] sm:$0xf] }
  0xd4   : > { %561 = vst [vmem:[%s5334_s24 + $0x2c8] sm:$0xf] %v560_v50  ;;  %v688_v50 = vld [vmem:[%s5330_s14 + $0x790] sm:$0xf] }
  0xd5   : > { %563 = vst [vmem:[%s5334_s24 + $0x2cc] sm:$0xf] %v562_v51  ;;  %v690_v51 = vld [vmem:[%s5330_s14 + $0x798] sm:$0xf] }
  0xd6   : > { %565 = vst [vmem:[%s5334_s24 + $0x2d0] sm:$0xf] %v564_v52  ;;  %v692_v52 = vld [vmem:[%s5330_s14 + $0x7a0] sm:$0xf] }
  0xd7   : > { %567 = vst [vmem:[%s5334_s24 + $0x2d4] sm:$0xf] %v566_v53  ;;  %v694_v53 = vld [vmem:[%s5330_s14 + $0x7a8] sm:$0xf] }
  0xd8   : > { %569 = vst [vmem:[%s5334_s24 + $0x2d8] sm:$0xf] %v568_v54  ;;  %v696_v54 = vld [vmem:[%s5330_s14 + $0x7b0] sm:$0xf] }
  0xd9   : > { %571 = vst [vmem:[%s5334_s24 + $0x2dc] sm:$0xf] %v570_v55  ;;  %v698_v55 = vld [vmem:[%s5330_s14 + $0x7b8] sm:$0xf] }
  0xda   : > { %573 = vst [vmem:[%s5334_s24 + $0x2e0] sm:$0xf] %v572_v56  ;;  %v700_v56 = vld [vmem:[%s5330_s14 + $0x7c0] sm:$0xf] }
  0xdb   : > { %575 = vst [vmem:[%s5334_s24 + $0x2e4] sm:$0xf] %v574_v57  ;;  %v702_v57 = vld [vmem:[%s5330_s14 + $0x7c8] sm:$0xf] }
  0xdc   : > { %577 = vst [vmem:[%s5334_s24 + $0x2e8] sm:$0xf] %v576_v58  ;;  %v704_v58 = vld [vmem:[%s5330_s14 + $0x7d0] sm:$0xf] }
  0xdd   : > { %579 = vst [vmem:[%s5334_s24 + $0x2ec] sm:$0xf] %v578_v59  ;;  %v706_v59 = vld [vmem:[%s5330_s14 + $0x7d8] sm:$0xf] }
  0xde   : > { %581 = vst [vmem:[%s5334_s24 + $0x2f0] sm:$0xf] %v580_v60  ;;  %v708_v60 = vld [vmem:[%s5330_s14 + $0x7e0] sm:$0xf] }
  0xdf   : > { %583 = vst [vmem:[%s5334_s24 + $0x2f4] sm:$0xf] %v582_v61  ;;  %v710_v61 = vld [vmem:[%s5330_s14 + $0x7e8] sm:$0xf] }
  0xe0   : > { %585 = vst [vmem:[%s5334_s24 + $0x2f8] sm:$0xf] %v584_v62  ;;  %v712_v62 = vld [vmem:[%s5330_s14 + $0x7f0] sm:$0xf] }
  0xe1   : > { %587 = vst [vmem:[%s5334_s24 + $0x2fc] sm:$0xf] %v586_v63  ;;  %v714_v63 = vld [vmem:[%s5330_s14 + $0x7f8] sm:$0xf] }
  0xe2   : > { %589 = vst [vmem:[%s5334_s24 + $0x300] sm:$0xf] %v588_v0 }
  0xe3   : > { %591 = vst [vmem:[%s5334_s24 + $0x304] sm:$0xf] %v590_v1 }
  0xe4   : > { %593 = vst [vmem:[%s5334_s24 + $0x308] sm:$0xf] %v592_v2 }
  0xe5   : > { %595 = vst [vmem:[%s5334_s24 + $0x30c] sm:$0xf] %v594_v3 }
  0xe6   : > { %597 = vst [vmem:[%s5334_s24 + $0x310] sm:$0xf] %v596_v4 }
  0xe7   : > { %599 = vst [vmem:[%s5334_s24 + $0x314] sm:$0xf] %v598_v5 }
  0xe8   : > { %601 = vst [vmem:[%s5334_s24 + $0x318] sm:$0xf] %v600_v6 }
  0xe9   : > { %603 = vst [vmem:[%s5334_s24 + $0x31c] sm:$0xf] %v602_v7 }
  0xea   : > { %605 = vst [vmem:[%s5334_s24 + $0x320] sm:$0xf] %v604_v8 }
  0xeb   : > { %607 = vst [vmem:[%s5334_s24 + $0x324] sm:$0xf] %v606_v9 }
  0xec   : > { %609 = vst [vmem:[%s5334_s24 + $0x328] sm:$0xf] %v608_v10 }
  0xed   : > { %611 = vst [vmem:[%s5334_s24 + $0x32c] sm:$0xf] %v610_v11 }
  0xee   : > { %613 = vst [vmem:[%s5334_s24 + $0x330] sm:$0xf] %v612_v12 }
  0xef   : > { %615 = vst [vmem:[%s5334_s24 + $0x334] sm:$0xf] %v614_v13 }
  0xf0   : > { %617 = vst [vmem:[%s5334_s24 + $0x338] sm:$0xf] %v616_v14 }
  0xf1   : > { %619 = vst [vmem:[%s5334_s24 + $0x33c] sm:$0xf] %v618_v15 }
  0xf2   : > { %621 = vst [vmem:[%s5334_s24 + $0x340] sm:$0xf] %v620_v16 }
  0xf3   : > { %623 = vst [vmem:[%s5334_s24 + $0x344] sm:$0xf] %v622_v17 }
  0xf4   : > { %625 = vst [vmem:[%s5334_s24 + $0x348] sm:$0xf] %v624_v18 }
  0xf5   : > { %627 = vst [vmem:[%s5334_s24 + $0x34c] sm:$0xf] %v626_v19 }
  0xf6   : > { %629 = vst [vmem:[%s5334_s24 + $0x350] sm:$0xf] %v628_v20 }
  0xf7   : > { %631 = vst [vmem:[%s5334_s24 + $0x354] sm:$0xf] %v630_v21 }
  0xf8   : > { %633 = vst [vmem:[%s5334_s24 + $0x358] sm:$0xf] %v632_v22 }
  0xf9   : > { %635 = vst [vmem:[%s5334_s24 + $0x35c] sm:$0xf] %v634_v23 }
  0xfa   : > { %637 = vst [vmem:[%s5334_s24 + $0x360] sm:$0xf] %v636_v24 }
  0xfb   : > { %639 = vst [vmem:[%s5334_s24 + $0x364] sm:$0xf] %v638_v25 }
  0xfc   : > { %641 = vst [vmem:[%s5334_s24 + $0x368] sm:$0xf] %v640_v26 }
  0xfd   : > { %643 = vst [vmem:[%s5334_s24 + $0x36c] sm:$0xf] %v642_v27 }
  0xfe   : > { %645 = vst [vmem:[%s5334_s24 + $0x370] sm:$0xf] %v644_v28 }
  0xff   : > { %647 = vst [vmem:[%s5334_s24 + $0x374] sm:$0xf] %v646_v29 }
 0x100   : > { %649 = vst [vmem:[%s5334_s24 + $0x378] sm:$0xf] %v648_v30 }
 0x101   : > { %651 = vst [vmem:[%s5334_s24 + $0x37c] sm:$0xf] %v650_v31 }
 0x102   : > { %653 = vst [vmem:[%s5334_s24 + $0x380] sm:$0xf] %v652_v32 }
 0x103   : > { %655 = vst [vmem:[%s5334_s24 + $0x384] sm:$0xf] %v654_v33 }
 0x104   : > { %657 = vst [vmem:[%s5334_s24 + $0x388] sm:$0xf] %v656_v34 }
 0x105   : > { %659 = vst [vmem:[%s5334_s24 + $0x38c] sm:$0xf] %v658_v35 }
 0x106   : > { %661 = vst [vmem:[%s5334_s24 + $0x390] sm:$0xf] %v660_v36 }
 0x107   : > { %663 = vst [vmem:[%s5334_s24 + $0x394] sm:$0xf] %v662_v37 }
 0x108   : > { %665 = vst [vmem:[%s5334_s24 + $0x398] sm:$0xf] %v664_v38 }
 0x109   : > { %667 = vst [vmem:[%s5334_s24 + $0x39c] sm:$0xf] %v666_v39 }
 0x10a   : > { %669 = vst [vmem:[%s5334_s24 + $0x3a0] sm:$0xf] %v668_v40 }
 0x10b   : > { %671 = vst [vmem:[%s5334_s24 + $0x3a4] sm:$0xf] %v670_v41 }
 0x10c   : > { %673 = vst [vmem:[%s5334_s24 + $0x3a8] sm:$0xf] %v672_v42 }
 0x10d   : > { %675 = vst [vmem:[%s5334_s24 + $0x3ac] sm:$0xf] %v674_v43 }
 0x10e   : > { %677 = vst [vmem:[%s5334_s24 + $0x3b0] sm:$0xf] %v676_v44 }
 0x10f   : > { %679 = vst [vmem:[%s5334_s24 + $0x3b4] sm:$0xf] %v678_v45 }
 0x110   : > { %681 = vst [vmem:[%s5334_s24 + $0x3b8] sm:$0xf] %v680_v46 }
 0x111   : > { %683 = vst [vmem:[%s5334_s24 + $0x3bc] sm:$0xf] %v682_v47 }
 0x112   : > { %685 = vst [vmem:[%s5334_s24 + $0x3c0] sm:$0xf] %v684_v48 }
 0x113   : > { %687 = vst [vmem:[%s5334_s24 + $0x3c4] sm:$0xf] %v686_v49 }
 0x114   : > { %689 = vst [vmem:[%s5334_s24 + $0x3c8] sm:$0xf] %v688_v50 }
 0x115   : > { %691 = vst [vmem:[%s5334_s24 + $0x3cc] sm:$0xf] %v690_v51 }
 0x116   : > { %693 = vst [vmem:[%s5334_s24 + $0x3d0] sm:$0xf] %v692_v52 }
 0x117   : > { %695 = vst [vmem:[%s5334_s24 + $0x3d4] sm:$0xf] %v694_v53 }
 0x118   : > { %697 = vst [vmem:[%s5334_s24 + $0x3d8] sm:$0xf] %v696_v54 }
 0x119   : > { %699 = vst [vmem:[%s5334_s24 + $0x3dc] sm:$0xf] %v698_v55 }
 0x11a   : > { %701 = vst [vmem:[%s5334_s24 + $0x3e0] sm:$0xf] %v700_v56 }
 0x11b   : > { %703 = vst [vmem:[%s5334_s24 + $0x3e4] sm:$0xf] %v702_v57 }
 0x11c   : > { %705 = vst [vmem:[%s5334_s24 + $0x3e8] sm:$0xf] %v704_v58 }
 0x11d   : > { %707 = vst [vmem:[%s5334_s24 + $0x3ec] sm:$0xf] %v706_v59 }
 0x11e   : > { %709 = vst [vmem:[%s5334_s24 + $0x3f0] sm:$0xf] %v708_v60 }
 0x11f   : > { %711 = vst [vmem:[%s5334_s24 + $0x3f4] sm:$0xf] %v710_v61 }
 0x120   : > { %713 = vst [vmem:[%s5334_s24 + $0x3f8] sm:$0xf] %v712_v62 }
 0x121   : > { %715 = vst [vmem:[%s5334_s24 + $0x3fc] sm:$0xf] %v714_v63 }
 0x122 PF: > { %p4336_p11 = scmp.ge.s32.totalorder %s5222_s23, 1  ;;  %p2306_p12 = scmp.lt.s32.totalorder %s5222_s23, 5 }
 0x124   : > { %p2307_p13 = pnand %p4336_p11, %p2306_p12 }
 0x125   : > { %s2313_s27 = sand.u32 (!%p2307_p13), 1, %s5198_s17   ;;  %s2342_s28 = sand.u32 (!%p2307_p13), 1, %s5190_s15  }
 0x126   : > { %2310 = sbr.rel (%p2307_p13) target bundleno = 712 (0x2c8), region = 84  ;;  %s4337_s29 = sshll.u32 (!%p2307_p13), %s2313_s27, 10 }
 0x127   : > { %s5072_s5 = smul.u32 (!%p2307_p13), 12, %s2342_s28  ;;  %p2345_p0 = scmp.lt.s32.totalorder (!%p2307_p13), %s5210_s20, 1 }
 0x128   : > { %p2350_p1 = scmp.lt.s32.totalorder (!%p2307_p13), %s5206_s19, 1  ;;  %s5865_s17 = scalar_lea.vmem (!%p2307_p13), [#allocation3], %s4337_s29 }
 0x129   : > { %s5867_s15 = scalar_lea.vmem (!%p2307_p13), [#allocation4], %s5072_s5  ;;  %p4340_p2 = scmp.ne.s32.totalorder (!%p2307_p13), %s5206_s19, 0 }
 0x12b   : > { %s2346_s6 = scalar_select %p2345_p0, %s5210_s20, 1 }
 0x12c   : > { %s5854_s9 = scalar_select %p2350_p1, %s5206_s19, 1 }
 0x12d   : > { %s4922_s10 = sshll.u32 %s2346_s6, 6  ;;  %2357 = sbr.rel (%p4340_p2) target bundleno = 342 (0x156), region = 92 }
 0x12e   : > { %s5859_s13 = scalar_lea.vmem %s6164_s0, %s4922_s10  ;;  %s2352_s1 = scalar_lea.vmem %s6166_s2, %s5854_s9 }
 0x132   : > { %v2358_v0 = vld [vmem:[%s5859_s13] sm:$0xff]  ;;  %v2359_v1 = vld [vmem:[%s5859_s13 + $0x8] sm:$0xff]  ;;  %v5873_v2 = vld [vmem:[%s5859_s13 + $0x10] sm:$0xff]  ;;  %vm2368_vm0 = vcmask 1041408   ;;  %vm2369_vm1 = vsmask.f32 1280 }
 0x133   : > { %2364 = vst [vmem:[#allocation2] sm:$0xff] %v2358_v0  ;;  %v5876_v3 = vld [vmem:[%s5859_s13 + $0x18] sm:$0xff]  ;;  %v2362_v4 = vld [vmem:[%s5859_s13 + $0x20] sm:$0x33]  ;;  %vm2370_vm2 = vmand %vm2368_vm0, %vm2369_vm1  ;;  %vm2371_vm3 = vcmask 1045508   ;;  %v2391_v5 = vshrl.u32 %v2358_v0, 16 }
 0x134   : > { %2365 = vst [vmem:[#allocation2 + $0x8] sm:$0xff] %v2359_v1  ;;  %vm2372_vm4 = vsmask.f32 5376  ;;  %v2375_v6 = vld [vmem:[#allocation2 + $0x80] sm:$0x33]  ;;  %v2394_v7 = vshll.u32 %v2358_v0, 16 }
 0x135   : > { %2366 = vst [vmem:[#allocation2 + $0x40] sm:$0xff] %v5873_v2  ;;  %vm2373_vm5 = vmand %vm2371_vm3, %vm2372_vm4  ;;  %v2363_v8 = vld [vmem:[%s5859_s13 + $0x28] sm:$0x33]  ;;  %v2393_v10 = vrot.slane %v2391_v5, 4  ;;  %vm2387_vm7 = vsmask.f32 3328 }
 0x136   : > { %v2378_v9 = vld [vmem:[#allocation2 + $0x88] sm:$0x33]  ;;  %2367 = vst [vmem:[#allocation2 + $0x48] sm:$0xff] %v5876_v3  ;;  %vm5883_vm6 = vmor %vm2373_vm5, %vm2370_vm2  ;;  %vm2388_vm8 = vsmask.f32 7440  ;;  %v2396_v12 = vrot.slane %v2394_v7, 5 }
 0x137   : > { %v2376_v13 = vsel %vm5883_vm6, %v2362_v4, %v2375_v6  ;;  %v2379_v14 = vsel %vm5883_vm6, %v2363_v8, %v2378_v9  ;;  %v2400_v15 = vshll.u32 %v5873_v2, 16  ;;  %v2418_v16 = vshrl.u32 %v5873_v2, 16  ;;  %v2385_v17 = vld [vmem:[%s5859_s13 + $0x20] sm:$0x33]  ;;  %v2386_v18 = vld [vmem:[%s5859_s13 + $0x28] sm:$0x33]  ;;  %vm5897_vm9 = vmor %vm2387_vm7, %vm2388_vm8 }
 0x138   : > { %2377 = vst [vmem:[#allocation2 + $0x80] sm:$0x33] %v2376_v13  ;;  %v2397_v19 = vor.u32 %v2396_v12, %v2393_v10  ;;  %v2405_v20 = vshrl.u32 %v2359_v1, 16  ;;  %v2408_v21 = vshll.u32 %v2359_v1, 16  ;;  %v2414_v22 = vshll.u32 %v5876_v3, 16  ;;  %v5911_v58 = vld [vmem:[%s5859_s13 + $0x20] sm:$0xff] }
 0x139   : > { %2380 = vst [vmem:[#allocation2 + $0x88] sm:$0x33] %v2379_v14  ;;  %v2402_v24 = vrot.slane %v2400_v15, 5  ;;  %v2428_v25 = vshrl.u32 %v5876_v3, 16  ;;  %v2420_v26 = vrot.slane %v2418_v16, 4  ;;  %v2424_v27 = vshll.u32 %v2385_v17, 16 }
 0x13a   : > { %v2398_v28 = vrot.slane %v2397_v19, 4  ;;  %v2407_v29 = vrot.slane %v2405_v20, 4  ;;  %v2410_v30 = vrot.slane %v2408_v21, 5  ;;  %v2416_v31 = vrot.slane %v2414_v22, 5  ;;  %v2464_v40 = vld [vmem:[%s5859_s13] sm:$0xcc] }
 0x13b   : > { %v2421_v32 = vor.u32 %v2420_v26, %v2402_v24  ;;  %v2426_v33 = vrot.slane %v2424_v27, 5  ;;  %v2438_v34 = vshrl.u32 %v2385_v17, 16  ;;  %v2430_v35 = vrot.slane %v2428_v25, 4  ;;  %v2465_v52 = vld [vmem:[%s5859_s13 + $0x8] sm:$0xcc] }
 0x13c   : > { %v2403_v36 = vsel %vm5897_vm9, %v2398_v28, %v2402_v24  ;;  %v2411_v37 = vor.u32 %v2410_v30, %v2407_v29  ;;  %v2434_v38 = vshll.u32 %v2386_v18, 16  ;;  %v2443_v39 = vshrl.u32 %v2386_v18, 16  ;;  %v2458_v54 = vld [vmem:[#allocation2 + $0x90] sm:$0x33]  ;;  %v2461_v61 = vld [vmem:[#allocation2 + $0x98] sm:$0x33] }
 0x13d   : > { %2454 = vst [vmem:[#allocation2 + $0x10] sm:$0xff] %v2403_v36  ;;  %v2422_v41 = vrot.slane %v2421_v32, 4  ;;  %v2440_v42 = vrot.slane %v2438_v34, 4  ;;  %v2431_v43 = vor.u32 %v2430_v35, %v2416_v31  ;;  %vm2470_vm10 = vsmask.f32 5392  ;;  %v5918_v10 = vld [vmem:[%s5859_s13 + $0x28] sm:$0xff] }
 0x13e   : > { %v2412_v44 = vrot.slane %v2411_v37, 4  ;;  %v2436_v45 = vrot.slane %v2434_v38, 5  ;;  %v2445_v46 = vrot.slane %v2443_v39, 4  ;;  %v2473_v47 = vshrl.u32 %v2464_v40, 16  ;;  %vm5924_vm11 = vmor %vm2369_vm1, %vm2470_vm10  ;;  %v2546_v17 = vld [vmem:[%s5859_s13] sm:$0x88] }
 0x13f   : > { %v2427_v48 = vsel %vm5897_vm9, %v2422_v41, %v2426_v33  ;;  %v2432_v49 = vrot.slane %v2431_v43, 4  ;;  %v2441_v50 = vor.u32 %v2440_v42, %v2426_v33  ;;  %v2476_v51 = vshll.u32 %v2464_v40, 16  ;;  %v2547_v26 = vld [vmem:[%s5859_s13 + $0x8] sm:$0x88]  ;;  %v2540_v34 = vld [vmem:[#allocation2 + $0xa0] sm:$0x33] }
 0x140   : > { %v2417_v53 = vsel %vm5897_vm9, %v2412_v44, %v2416_v31  ;;  %2456 = vst [vmem:[#allocation2 + $0x50] sm:$0xff] %v2427_v48  ;;  %v2446_v55 = vor.u32 %v2445_v46, %v2436_v45  ;;  %v2475_v56 = vrot.slane %v2473_v47, 6  ;;  %v2484_v57 = vrot.slane %v2418_v16, 6  ;;  %v2543_v40 = vld [vmem:[#allocation2 + $0xa8] sm:$0x33] }
 0x141   : > { %2455 = vst [vmem:[#allocation2 + $0x18] sm:$0xff] %v2417_v53  ;;  %v2437_v59 = vsel %vm5897_vm9, %v2432_v49, %v2436_v45  ;;  %v2442_v60 = vrot.slane %v2441_v50, 4  ;;  %v2478_v62 = vrot.slane %v2476_v51, 7  ;;  %v2487_v63 = vrot.slane %v2400_v15, 7  ;;  %v2552_v44 = vld [vmem:[%s5859_s13 + $0x30] sm:$0x11] }
 0x142   : > { %2457 = vst [vmem:[#allocation2 + $0x58] sm:$0xff] %v2437_v59  ;;  %v2447_v0 = vrot.slane %v2446_v55, 4  ;;  %v2491_v1 = vshrl.u32 %v2465_v52, 16  ;;  %v2494_v4 = vshll.u32 %v2465_v52, 16  ;;  %v2502_v5 = vrot.slane %v2428_v25, 6 }
 0x143   : > { %v2459_v6 = vsel %vm5883_vm6, %v2442_v60, %v2458_v54  ;;  %v2479_v7 = vor.u32 %v2478_v62, %v2475_v56  ;;  %v2488_v8 = vor.u32 %v2487_v63, %v2484_v57  ;;  %v2505_v9 = vrot.slane %v2414_v22, 7  ;;  %v2553_v47 = vld [vmem:[%s5859_s13 + $0x38] sm:$0x11]  ;;  %v2595_v57 = vld [vmem:[#allocation2 + $0xb0] sm:$0x33] }
 0x144   : > { %2460 = vst [vmem:[#allocation2 + $0x90] sm:$0x33] %v2459_v6  ;;  %v2462_v12 = vsel %vm5883_vm6, %v2447_v0, %v2461_v61  ;;  %v2493_v14 = vrot.slane %v2491_v1, 6  ;;  %v2496_v15 = vrot.slane %v2494_v4, 7  ;;  %v2510_v16 = vshrl.u32 %v5911_v58, 16 }
 0x145   : > { %2463 = vst [vmem:[#allocation2 + $0x98] sm:$0x33] %v2462_v12  ;;  %v2480_v18 = vrot.slane %v2479_v7, 4  ;;  %v2506_v19 = vor.u32 %v2505_v9, %v2502_v5  ;;  %v2508_v20 = vrot.slane %v2488_v8, 4  ;;  %v2513_v21 = vshll.u32 %v5911_v58, 16 }
 0x146   : > { %v2497_v22 = vor.u32 %v2496_v15, %v2493_v14  ;;  %v2512_v23 = vrot.slane %v2510_v16, 6  ;;  %v2520_v24 = vshrl.u32 %v5918_v10, 16  ;;  %v2523_v25 = vshll.u32 %v5918_v10, 16  ;;  %v2598_v61 = vld [vmem:[#allocation2 + $0xb8] sm:$0x33] }
 0x147   : > { %v2489_v27 = vsel %vm5924_vm11, %v2480_v18, %v2488_v8  ;;  %v2515_v28 = vrot.slane %v2513_v21, 7  ;;  %v2518_v29 = vrot.slane %v2506_v19, 4  ;;  %vm2562_vm12 = vcmask 1040384  }
 0x148   : > { %2536 = vst [vmem:[#allocation2 + $0x20] sm:$0xff] %v2489_v27  ;;  %v2498_v30 = vrot.slane %v2497_v22, 4  ;;  %v2522_v31 = vrot.slane %v2520_v24, 6  ;;  %v2525_v32 = vrot.slane %v2523_v25, 7  ;;  %vm2563_vm13 = vcmask 1044484  }
 0x149   : > { %v2516_v33 = vor.u32 %v2515_v28, %v2512_v23  ;;  %v4341_v35 = vrot.slane %v2546_v17, 11  ;;  %v2567_v36 = vrot.slane %v5873_v2, 7  ;;  %v4342_v37 = vrot.slane %v2547_v26, 11  ;;  %vm5939_vm14 = vmor %vm2562_vm12, %vm2563_vm13 }
 0x14a   : > { %v2507_v38 = vsel %vm5924_vm11, %v2498_v30, %v2506_v19  ;;  %v2526_v39 = vor.u32 %v2525_v32, %v2522_v31  ;;  %v2571_v42 = vrot.slane %v5876_v3, 7  ;;  %v2574_v43 = vrot.slane %v5911_v58, 7 }
 0x14b   : > { %2537 = vst [vmem:[#allocation2 + $0x28] sm:$0xff] %v2507_v38  ;;  %v2517_v45 = vsel %vm5924_vm11, %v2508_v20, %v2516_v33  ;;  %v2528_v2 = vrot.slane %v2516_v33, 4  ;;  %v2573_v46 = vrot.slane %v2567_v36, 4  ;;  %v2568_v51 = vsel %vm5939_vm14, %v4341_v35, %v2567_v36 }
 0x14c   : > { %2538 = vst [vmem:[#allocation2 + $0x60] sm:$0xff] %v2517_v45  ;;  %v2527_v48 = vsel %vm5924_vm11, %v2518_v29, %v2526_v39  ;;  %v2529_v49 = vrot.slane %v2526_v39, 4  ;;  %v2579_v50 = vrot.slane %v2574_v43, 4  ;;  %v2576_v52 = vrot.slane %v2571_v42, 4 }
 0x14d   : > { %2539 = vst [vmem:[#allocation2 + $0x68] sm:$0xff] %v2527_v48  ;;  %v2541_v3 = vsel %vm5883_vm6, %v2528_v2, %v2540_v34  ;;  %v2577_v53 = vrot.slane %v5918_v10, 7  ;;  %v2572_v55 = vsel %vm5939_vm14, %v4342_v37, %v2571_v42  ;;  %v2580_v56 = vrot.slane %v2552_v44, 7 }
 0x14e   : > { %2542 = vst [vmem:[#allocation2 + $0xa0] sm:$0x33] %v2541_v3  ;;  %v2544_v54 = vsel %vm5883_vm6, %v2529_v49, %v2543_v40  ;;  %v2583_v58 = vrot.slane %v2553_v47, 7  ;;  %v2575_v59 = vsel %vm5939_vm14, %v2573_v46, %v2574_v43 }
 0x14f   : > { %2545 = vst [vmem:[#allocation2 + $0xa8] sm:$0x33] %v2544_v54  ;;  %v2582_v60 = vrot.slane %v2577_v53, 4  ;;  %v2578_v62 = vsel %vm5939_vm14, %v2576_v52, %v2577_v53  ;;  %v2581_v63 = vsel %vm5939_vm14, %v2579_v50, %v2580_v56 }
 0x150   : > { %2591 = vst [vmem:[#allocation2 + $0x30] sm:$0xff] %v2568_v51  ;;  %v2596_v0 = vsel %vm5883_vm6, %v2581_v63, %v2595_v57 }
 0x151   : > { %2592 = vst [vmem:[#allocation2 + $0x38] sm:$0xff] %v2572_v55  ;;  %v2584_v1 = vsel %vm5939_vm14, %v2582_v60, %v2583_v58 }
 0x152   : > { %2593 = vst [vmem:[#allocation2 + $0x70] sm:$0xff] %v2575_v59  ;;  %v2599_v4 = vsel %vm5883_vm6, %v2584_v1, %v2598_v61 }
 0x153   : > { %2594 = vst [vmem:[#allocation2 + $0x78] sm:$0xff] %v2578_v62 }
 0x154   : > { %2597 = vst [vmem:[#allocation2 + $0xb0] sm:$0x33] %v2596_v0 }
 0x155   : > { %2600 = vst [vmem:[#allocation2 + $0xb8] sm:$0x33] %v2599_v4 }
 0x156 PF: > { %v4946_v5 = vld [vmem:[%s5865_s17 + $0x38] sm:$0xff]  ;;  %v4945_v8 = vld [vmem:[%s5865_s17 + $0x30] sm:$0xff]  ;;  %v4944_v13 = vld [vmem:[%s5865_s17 + $0x28] sm:$0xff]  ;;  %vm4102_vm5 = vcmask 1042432   ;;  %vm4159_vm9 = vcmask 1041408  }
 0x157   : > { %v4954_v6 = vld [vmem:[%s5865_s17 + $0x78] sm:$0xff]  ;;  %3789 = vmatpush.bf16.msra.mxu0 %v4946_v5  ;;  %v4953_v9 = vld [vmem:[%s5865_s17 + $0x70] sm:$0xff]  ;;  %v4952_v14 = vld [vmem:[%s5865_s17 + $0x68] sm:$0xff]  ;;  %vm4160_vm10 = vsmask.f32 1280 }
 0x158   : > { %v4962_v7 = vld [vmem:[%s5865_s17 + $0xb8] sm:$0xff]  ;;  %3807 = vmatpush.bf16.msra.mxu1 %v4954_v6  ;;  %v4961_v10 = vld [vmem:[%s5865_s17 + $0xb0] sm:$0xff]  ;;  %v4960_v15 = vld [vmem:[%s5865_s17 + $0xa8] sm:$0xff] }
 0x159   : > { %v4970_v11 = vld [vmem:[%s5865_s17 + $0xf8] sm:$0xff]  ;;  %3825 = vmatpush.bf16.msra.mxu2 %v4962_v7  ;;  %v4969_v12 = vld [vmem:[%s5865_s17 + $0xf0] sm:$0xff]  ;;  %v4968_v16 = vld [vmem:[%s5865_s17 + $0xe8] sm:$0xff] }
 0x15a   : > { %3843 = vmatpush.bf16.msra.mxu3 %v4970_v11  ;;  %v4943_v17 = vld [vmem:[%s5865_s17 + $0x20] sm:$0xff]  ;;  %v4942_v21 = vld [vmem:[%s5865_s17 + $0x18] sm:$0xff]  ;;  %v4941_v25 = vld [vmem:[%s5865_s17 + $0x10] sm:$0xff] }
 0x15b   : > { %3790 = vmatpush.bf16.msra.mxu0 %v4945_v8  ;;  %v4951_v18 = vld [vmem:[%s5865_s17 + $0x60] sm:$0xff]  ;;  %v4950_v22 = vld [vmem:[%s5865_s17 + $0x58] sm:$0xff]  ;;  %v4949_v26 = vld [vmem:[%s5865_s17 + $0x50] sm:$0xff] }
 0x15c   : > { %3808 = vmatpush.bf16.msra.mxu1 %v4953_v9  ;;  %v4959_v19 = vld [vmem:[%s5865_s17 + $0xa0] sm:$0xff]  ;;  %v4958_v23 = vld [vmem:[%s5865_s17 + $0x98] sm:$0xff]  ;;  %v4957_v27 = vld [vmem:[%s5865_s17 + $0x90] sm:$0xff] }
 0x15d   : > { %3826 = vmatpush.bf16.msra.mxu2 %v4961_v10  ;;  %v4967_v20 = vld [vmem:[%s5865_s17 + $0xe0] sm:$0xff]  ;;  %v4966_v24 = vld [vmem:[%s5865_s17 + $0xd8] sm:$0xff]  ;;  %v4965_v28 = vld [vmem:[%s5865_s17 + $0xd0] sm:$0xff] }
 0x15e   : > { %3844 = vmatpush.bf16.msra.mxu3 %v4969_v12  ;;  %v4940_v29 = vld [vmem:[%s5865_s17 + $0x8] sm:$0xff]  ;;  %v4939_v33 = vld [vmem:[%s5865_s17] sm:$0xff]  ;;  %v4994_v45 = vld [vmem:[%s5865_s17 + $0x1b8] sm:$0xff] }
 0x15f   : > { %3791 = vmatpush.bf16.msra.mxu0 %v4944_v13  ;;  %v4948_v30 = vld [vmem:[%s5865_s17 + $0x48] sm:$0xff]  ;;  %v4947_v34 = vld [vmem:[%s5865_s17 + $0x40] sm:$0xff]  ;;  %v4978_v2 = vld [vmem:[%s5865_s17 + $0x138] sm:$0xff] }
 0x160   : > { %3809 = vmatpush.bf16.msra.mxu1 %v4952_v14  ;;  %v4956_v31 = vld [vmem:[%s5865_s17 + $0x88] sm:$0xff]  ;;  %v4955_v35 = vld [vmem:[%s5865_s17 + $0x80] sm:$0xff]  ;;  %v4986_v50 = vld [vmem:[%s5865_s17 + $0x178] sm:$0xff] }
 0x161   : > { %3827 = vmatpush.bf16.msra.mxu2 %v4960_v15  ;;  %v4964_v32 = vld [vmem:[%s5865_s17 + $0xc8] sm:$0xff]  ;;  %v4963_v36 = vld [vmem:[%s5865_s17 + $0xc0] sm:$0xff]  ;;  %v5002_v3 = vld [vmem:[%s5865_s17 + $0x1f8] sm:$0xff] }
 0x162   : > { %3845 = vmatpush.bf16.msra.mxu3 %v4968_v16  ;;  %v4345_v37 = vld [vmem:[#allocation2] sm:$0xf]  ;;  %v4923_v39 = vld [vmem:[#allocation2 + $0x4] sm:$0xf]  ;;  %v4353_v41 = vld [vmem:[#allocation2 + $0x8] sm:$0xf] }
 0x163   : > { %3792 = vmatpush.bf16.msra.mxu0 %v4943_v17  ;;  %v4931_v38 = vld [vmem:[#allocation2 + $0x3c] sm:$0xf0]  ;;  %v4347_v40 = vld [vmem:[#allocation2 + $0x40] sm:$0xf0]  ;;  %v4932_v42 = vld [vmem:[#allocation2 + $0x44] sm:$0xf0] }
 0x164   : > { %3810 = vmatpush.bf16.msra.mxu1 %v4951_v18  ;;  %v4924_v43 = vld [vmem:[#allocation2 + $0xc] sm:$0xf]  ;;  %v4346_v46 = vor.u32 %v4931_v38, %v4345_v37  ;;  %v4350_v47 = vor.u32 %v4923_v39, %v4347_v40  ;;  %v4354_v48 = vor.u32 %v4932_v42, %v4353_v41  ;;  %v4993_v51 = vld [vmem:[%s5865_s17 + $0x1b0] sm:$0xff]  ;;  %v2617_v57 = vld [vmem:[#allocation2 + $0x80] sm:$0x33] }
 0x165   : > { %3828 = vmatpush.bf16.msra.mxu2 %v4959_v19  ;;  %v4355_v44 = vld [vmem:[#allocation2 + $0x48] sm:$0xf0]  ;;  %v4977_v52 = vld [vmem:[%s5865_s17 + $0x130] sm:$0xff]  ;;  %v4991_v61 = vld [vmem:[%s5865_s17 + $0x1a0] sm:$0xff]  ;;  %v2941_v63 = vunpack.c.l.b16 %v2617_v57  ;;  %v2942_v0 = vunpack.c.h.b16 %v2617_v57 }
 0x166   : > { %3846 = vmatpush.bf16.msra.mxu3 %v4967_v20  ;;  %v4358_v49 = vor.u32 %v4924_v43, %v4355_v44  ;;  %v4985_v53 = vld [vmem:[%s5865_s17 + $0x170] sm:$0xff]  ;;  %v4992_v55 = vld [vmem:[%s5865_s17 + $0x1a8] sm:$0xff]  ;;  %v4975_v62 = vld [vmem:[%s5865_s17 + $0x120] sm:$0xff] }
 0x167   : > { %3793 = vmatpush.bf16.msra.mxu0 %v4942_v21  ;;  %v5001_v54 = vld [vmem:[%s5865_s17 + $0x1f0] sm:$0xff]  ;;  %v4976_v56 = vld [vmem:[%s5865_s17 + $0x128] sm:$0xff]  ;;  %v4983_v5 = vld [vmem:[%s5865_s17 + $0x160] sm:$0xff]  ;;  %v2973_v8 = vpack.c.b16 %v2941_v63, %v2941_v63  ;;  %v2974_v9 = vpack.c.b16 %v2942_v0, %v2942_v0 }
 0x168   : > { %3811 = vmatpush.bf16.msra.mxu1 %v4950_v22  ;;  %v4984_v58 = vld [vmem:[%s5865_s17 + $0x168] sm:$0xff]  ;;  %v4999_v6 = vld [vmem:[%s5865_s17 + $0x1e0] sm:$0xff]  ;;  %v4990_v7 = vld [vmem:[%s5865_s17 + $0x198] sm:$0xff] }
 0x169   : > { %3829 = vmatpush.bf16.msra.mxu2 %v4958_v23  ;;  %v5000_v59 = vld [vmem:[%s5865_s17 + $0x1e8] sm:$0xff]  ;;  %v4974_v11 = vld [vmem:[%s5865_s17 + $0x118] sm:$0xff]  ;;  %v4989_v15 = vld [vmem:[%s5865_s17 + $0x190] sm:$0xff] }
 0x16a   : > { %3847 = vmatpush.bf16.msra.mxu3 %v4966_v24  ;;  %v2618_v60 = vld [vmem:[#allocation2 + $0x88] sm:$0x33]  ;;  %v4982_v13 = vld [vmem:[%s5865_s17 + $0x158] sm:$0xff]  ;;  %v4973_v16 = vld [vmem:[%s5865_s17 + $0x110] sm:$0xff] }
 0x16b   : > { %3794 = vmatpush.bf16.msra.mxu0 %v4941_v25  ;;  %v2943_v1 = vunpack.c.l.b16 %v2618_v60  ;;  %v2944_v4 = vunpack.c.h.b16 %v2618_v60  ;;  %v4998_v14 = vld [vmem:[%s5865_s17 + $0x1d8] sm:$0xff]  ;;  %v4981_v17 = vld [vmem:[%s5865_s17 + $0x150] sm:$0xff]  ;;  %v4988_v19 = vld [vmem:[%s5865_s17 + $0x188] sm:$0xff] }
 0x16c   : > { %3812 = vmatpush.bf16.msra.mxu1 %v4949_v26  ;;  %v4997_v18 = vld [vmem:[%s5865_s17 + $0x1d0] sm:$0xff]  ;;  %v4972_v20 = vld [vmem:[%s5865_s17 + $0x108] sm:$0xff]  ;;  %v4987_v23 = vld [vmem:[%s5865_s17 + $0x180] sm:$0xff] }
 0x16d   : > { %3830 = vmatpush.bf16.msra.mxu2 %v4957_v27  ;;  %v2975_v10 = vpack.c.b16 %v2943_v1, %v2943_v1  ;;  %v2976_v12 = vpack.c.b16 %v2944_v4, %v2944_v4  ;;  %v4980_v21 = vld [vmem:[%s5865_s17 + $0x148] sm:$0xff]  ;;  %v4971_v24 = vld [vmem:[%s5865_s17 + $0x100] sm:$0xff]  ;;  %v4361_v27 = vld [vmem:[#allocation2 + $0x10] sm:$0xf] }
 0x16e   : > { %3848 = vmatpush.bf16.msra.mxu3 %v4965_v28  ;;  %v4996_v22 = vld [vmem:[%s5865_s17 + $0x1c8] sm:$0xff]  ;;  %v4979_v25 = vld [vmem:[%s5865_s17 + $0x140] sm:$0xff]  ;;  %v5026_v28 = vld [vmem:[%s5865_s17 + $0x2b8] sm:$0xff] }
 0x16f   : > { %3795 = vmatpush.bf16.msra.mxu0 %v4940_v29  ;;  %v4995_v26 = vld [vmem:[%s5865_s17 + $0x1c0] sm:$0xff]  ;;  %v5010_v29 = vld [vmem:[%s5865_s17 + $0x238] sm:$0xff]  ;;  %v5025_v40 = vld [vmem:[%s5865_s17 + $0x2b0] sm:$0xff] }
 0x170   : > { %3813 = vmatpush.bf16.msra.mxu1 %v4948_v30  ;;  %v4933_v30 = vld [vmem:[#allocation2 + $0x4c] sm:$0xf0]  ;;  %v5018_v37 = vld [vmem:[%s5865_s17 + $0x278] sm:$0xff]  ;;  %vm4161_vm14 = vmand %vm4159_vm9, %vm4160_vm10 }
 0x171   : > { %3831 = vmatpush.bf16.msra.mxu2 %v4956_v31  ;;  %v4925_v31 = vld [vmem:[#allocation2 + $0x14] sm:$0xf]  ;;  %v5034_v38 = vld [vmem:[%s5865_s17 + $0x2f8] sm:$0xff]  ;;  %v4362_v39 = vor.u32 %v4933_v30, %v4361_v27  ;;  %v4936_v27 = vld [vmem:[#allocation2 + $0x64] sm:$0xf0] }
 0x172   : > { %3849 = vmatpush.bf16.msra.mxu3 %v4964_v32  ;;  %v4363_v32 = vld [vmem:[#allocation2 + $0x50] sm:$0xf0]  ;;  %v5006_v60 = vld [vmem:[%s5865_s17 + $0x218] sm:$0xff] }
 0x173   : > { %3796 = vmatpush.bf16.msra.mxu0 %v4939_v33  ;;  %v4369_v33 = vld [vmem:[#allocation2 + $0x18] sm:$0xf]  ;;  %v4366_v41 = vor.u32 %v4925_v31, %v4363_v32  ;;  %v5009_v44 = vld [vmem:[%s5865_s17 + $0x230] sm:$0xff] }
 0x174   : > { %3814 = vmatpush.bf16.msra.mxu1 %v4947_v34  ;;  %v4934_v34 = vld [vmem:[#allocation2 + $0x54] sm:$0xf0]  ;;  %v5021_v0 = vld [vmem:[%s5865_s17 + $0x290] sm:$0xff] }
 0x175   : > { %3832 = vmatpush.bf16.msra.mxu2 %v4955_v35  ;;  %v4926_v35 = vld [vmem:[#allocation2 + $0x1c] sm:$0xf]  ;;  %v4370_v42 = vor.u32 %v4934_v34, %v4369_v33  ;;  %v5049_v31 = vld [vmem:[%s5865_s17 + $0x370] sm:$0xff] }
 0x176   : > { %3850 = vmatpush.bf16.msra.mxu3 %v4963_v36  ;;  %3797 = vmatmul.bf16.vlgmr.msra.gmra.mxu0 %v4346_v46  ;;  %v4371_v36 = vld [vmem:[#allocation2 + $0x58] sm:$0xf0]  ;;  %v5024_v46 = vld [vmem:[%s5865_s17 + $0x2a8] sm:$0xff] }
 0x177   : > { %3861 = vmatpush.bf16.msrb.mxu0 %v4978_v2  ;;  %3815 = vmatmul.bf16.vlgmr.msra.gmra.mxu1 %v4350_v47  ;;  %v4374_v43 = vor.u32 %v4926_v35, %v4371_v36  ;;  %v5033_v2 = vld [vmem:[%s5865_s17 + $0x2f0] sm:$0xff]  ;;  %v5008_v47 = vld [vmem:[%s5865_s17 + $0x228] sm:$0xff] }
 0x178   : > { %3833 = vmatmul.bf16.vlgmr.msra.gmra.mxu2 %v4354_v48  ;;  %3879 = vmatpush.bf16.msrb.mxu1 %v4986_v50  ;;  %v5016_v48 = vld [vmem:[%s5865_s17 + $0x268] sm:$0xff]  ;;  %v5023_v50 = vld [vmem:[%s5865_s17 + $0x2a0] sm:$0xff]  ;;  %v5041_v35 = vld [vmem:[%s5865_s17 + $0x330] sm:$0xff] }
 0x179   : > { %3897 = vmatpush.bf16.msrb.mxu2 %v4994_v45  ;;  %3851 = vmatmul.bf16.vlgmr.msra.gmra.mxu3 %v4358_v49  ;;  %v5017_v45 = vld [vmem:[%s5865_s17 + $0x270] sm:$0xff]  ;;  %v5032_v49 = vld [vmem:[%s5865_s17 + $0x2e8] sm:$0xff] }
 0x17a   : > { %3915 = vmatpush.bf16.msrb.mxu3 %v5002_v3  ;;  %v2619_v3 = vld [vmem:[#allocation2 + $0x90] sm:$0x33] }
 0x17b   : > { %3862 = vmatpush.bf16.msrb.mxu0 %v4977_v52  ;;  %v2620_v52 = vld [vmem:[#allocation2 + $0x98] sm:$0x33]  ;;  %v2946_v57 = vunpack.c.h.b16 %v2619_v3  ;;  %v5065_v36 = vld [vmem:[%s5865_s17 + $0x3f0] sm:$0xff] }
 0x17c   : > { %3880 = vmatpush.bf16.msrb.mxu1 %v4985_v53  ;;  %v5015_v53 = vld [vmem:[%s5865_s17 + $0x260] sm:$0xff] }
 0x17d   : > { %3898 = vmatpush.bf16.msrb.mxu2 %v4993_v51  ;;  %v5007_v51 = vld [vmem:[%s5865_s17 + $0x220] sm:$0xff]  ;;  %v2978_v1 = vpack.c.b16 %v2946_v57, %v2946_v57 }
 0x17e   : > { %3916 = vmatpush.bf16.msrb.mxu3 %v5001_v54  ;;  %v5031_v54 = vld [vmem:[%s5865_s17 + $0x2e0] sm:$0xff] }
 0x17f   : > { %3863 = vmatpush.bf16.msrb.mxu0 %v4976_v56  ;;  %v5022_v56 = vld [vmem:[%s5865_s17 + $0x298] sm:$0xff] }
 0x180   : > { %3881 = vmatpush.bf16.msrb.mxu1 %v4984_v58  ;;  %v2947_v58 = vunpack.c.l.b16 %v2620_v52 }
 0x181   : > { %3899 = vmatpush.bf16.msrb.mxu2 %v4992_v55  ;;  %v2945_v55 = vunpack.c.l.b16 %v2619_v3 }
 0x182   : > { %3917 = vmatpush.bf16.msrb.mxu3 %v5000_v59  ;;  %v2948_v59 = vunpack.c.h.b16 %v2620_v52  ;;  %v2979_v4 = vpack.c.b16 %v2947_v58, %v2947_v58  ;;  %v5062_v52 = vld [vmem:[%s5865_s17 + $0x3d8] sm:$0xff] }
 0x183   : > { %3864 = vmatpush.bf16.msrb.mxu0 %v4975_v62  ;;  %v5030_v62 = vld [vmem:[%s5865_s17 + $0x2d8] sm:$0xff]  ;;  %v2977_v63 = vpack.c.b16 %v2945_v55, %v2945_v55  ;;  %v5045_v55 = vld [vmem:[%s5865_s17 + $0x350] sm:$0xff] }
 0x184   : > { %3882 = vmatpush.bf16.msrb.mxu1 %v4983_v5  ;;  %v2980_v5 = vpack.c.b16 %v2948_v59, %v2948_v59  ;;  %v5037_v59 = vld [vmem:[%s5865_s17 + $0x310] sm:$0xff] }
 0x185   : > { %3900 = vmatpush.bf16.msrb.mxu2 %v4991_v61  ;;  %v5014_v61 = vld [vmem:[%s5865_s17 + $0x258] sm:$0xff] }
 0x186   : > { %3918 = vmatpush.bf16.msrb.mxu3 %v4999_v6  ;;  %3802 = vmatmul.bf16.gmra.mxu0 %v2973_v8  ;;  %v5005_v6 = vld [vmem:[%s5865_s17 + $0x210] sm:$0xff]  ;;  %v5020_v8 = vld [vmem:[%s5865_s17 + $0x288] sm:$0xff] }
 0x187   : > { %3865 = vmatpush.bf16.msrb.mxu0 %v4974_v11  ;;  %3820 = vmatmul.bf16.gmra.mxu1 %v2974_v9  ;;  %v5029_v11 = vld [vmem:[%s5865_s17 + $0x2d0] sm:$0xff]  ;;  %v5004_v9 = vld [vmem:[%s5865_s17 + $0x208] sm:$0xff] }
 0x188   : > { %3838 = vmatmul.bf16.gmra.mxu2 %v2975_v10  ;;  %3883 = vmatpush.bf16.msrb.mxu1 %v4982_v13  ;;  %v5012_v10 = vld [vmem:[%s5865_s17 + $0x248] sm:$0xff]  ;;  %v5019_v13 = vld [vmem:[%s5865_s17 + $0x280] sm:$0xff] }
 0x189   : > { %3901 = vmatpush.bf16.msrb.mxu2 %v4990_v7  ;;  %3856 = vmatmul.bf16.gmra.mxu3 %v2976_v12  ;;  %v5013_v7 = vld [vmem:[%s5865_s17 + $0x250] sm:$0xff]  ;;  %v5028_v12 = vld [vmem:[%s5865_s17 + $0x2c8] sm:$0xff] }
 0x18a   : > { %3919 = vmatpush.bf16.msrb.mxu3 %v4998_v14  ;;  %v5058_v14 = vld [vmem:[%s5865_s17 + $0x3b8] sm:$0xff] }
 0x18b   : > { %3866 = vmatpush.bf16.msrb.mxu0 %v4973_v16  ;;  %v5011_v16 = vld [vmem:[%s5865_s17 + $0x240] sm:$0xff] }
 0x18c   : > { %3884 = vmatpush.bf16.msrb.mxu1 %v4981_v17  ;;  %v5027_v17 = vld [vmem:[%s5865_s17 + $0x2c0] sm:$0xff] }
 0x18d   : > { %3902 = vmatpush.bf16.msrb.mxu2 %v4989_v15  ;;  %v5003_v15 = vld [vmem:[%s5865_s17 + $0x200] sm:$0xff] }
 0x18e   : > { %3920 = vmatpush.bf16.msrb.mxu3 %v4997_v18  ;;  %v4377_v18 = vld [vmem:[#allocation2 + $0x20] sm:$0xf] }
 0x18f   : > { %3867 = vmatpush.bf16.msrb.mxu0 %v4972_v20  ;;  %v5042_v20 = vld [vmem:[%s5865_s17 + $0x338] sm:$0xff] }
 0x190   : > { %3885 = vmatpush.bf16.msrb.mxu1 %v4980_v21  ;;  %v5050_v21 = vld [vmem:[%s5865_s17 + $0x378] sm:$0xff] }
 0x191   : > { %3903 = vmatpush.bf16.msrb.mxu2 %v4988_v19  ;;  %v4935_v19 = vld [vmem:[#allocation2 + $0x5c] sm:$0xf0] }
 0x192   : > { %3921 = vmatpush.bf16.msrb.mxu3 %v4996_v22  ;;  %v4927_v22 = vld [vmem:[#allocation2 + $0x24] sm:$0xf]  ;;  %v4378_v30 = vor.u32 %v4935_v19, %v4377_v18  ;;  %v4930_v18 = vld [vmem:[#allocation2 + $0x3c] sm:$0xf] }
 0x193   : > { %3868 = vmatpush.bf16.msrb.mxu0 %v4971_v24  ;;  %v5057_v24 = vld [vmem:[%s5865_s17 + $0x3b0] sm:$0xff]  ;;  %v4403_v19 = vld [vmem:[#allocation2 + $0x78] sm:$0xf0] }
 0x194   : > { %3886 = vmatpush.bf16.msrb.mxu1 %v4979_v25  ;;  %v4379_v25 = vld [vmem:[#allocation2 + $0x60] sm:$0xf0] }
 0x195   : > { %3904 = vmatpush.bf16.msrb.mxu2 %v4987_v23  ;;  %v5066_v23 = vld [vmem:[%s5865_s17 + $0x3f8] sm:$0xff]  ;;  %v4382_v32 = vor.u32 %v4927_v22, %v4379_v25  ;;  %v2623_v25 = vld [vmem:[#allocation2 + $0xb0] sm:$0x33] }
 0x196   : > { %3922 = vmatpush.bf16.msrb.mxu3 %v4995_v26  ;;  %3869 = vmatmul.bf16.vlgmr.msrb.gmra.mxu0 %v4362_v39  ;;  %v4385_v26 = vld [vmem:[#allocation2 + $0x28] sm:$0xf] }
 0x197   : > { %3933 = vmatpush.bf16.msra.mxu0 %v5010_v29  ;;  %3887 = vmatmul.bf16.vlgmr.msrb.gmra.mxu1 %v4366_v41  ;;  %v4387_v29 = vld [vmem:[#allocation2 + $0x68] sm:$0xf0]  ;;  %v4386_v33 = vor.u32 %v4936_v27, %v4385_v26  ;;  %v5055_v41 = vld [vmem:[%s5865_s17 + $0x3a0] sm:$0xff]  ;;  %v2624_v27 = vld [vmem:[#allocation2 + $0xb8] sm:$0x33] }
 0x198   : > { %3951 = vmatpush.bf16.msra.mxu1 %v5018_v37  ;;  %3905 = vmatmul.bf16.vlgmr.msrb.gmra.mxu2 %v4370_v42  ;;  %v5056_v37 = vld [vmem:[%s5865_s17 + $0x3a8] sm:$0xff]  ;;  %v5047_v42 = vld [vmem:[%s5865_s17 + $0x360] sm:$0xff] }
 0x199   : > { %3969 = vmatpush.bf16.msra.mxu2 %v5026_v28  ;;  %3923 = vmatmul.bf16.vlgmr.msrb.gmra.mxu3 %v4374_v43  ;;  %v4928_v28 = vld [vmem:[#allocation2 + $0x2c] sm:$0xf]  ;;  %v2621_v43 = vld [vmem:[#allocation2 + $0xa0] sm:$0x33] }
 0x19a   : > { %3987 = vmatpush.bf16.msra.mxu3 %v5034_v38  ;;  %v4390_v34 = vor.u32 %v4928_v28, %v4387_v29  ;;  %v5048_v38 = vld [vmem:[%s5865_s17 + $0x368] sm:$0xff]  ;;  %v2953_v28 = vunpack.c.l.b16 %v2623_v25  ;;  %v2954_v29 = vunpack.c.h.b16 %v2623_v25 }
 0x19b   : > { %3934 = vmatpush.bf16.msra.mxu0 %v5009_v44  ;;  %v5040_v39 = vld [vmem:[%s5865_s17 + $0x328] sm:$0xff]  ;;  %v5039_v44 = vld [vmem:[%s5865_s17 + $0x320] sm:$0xff] }
 0x19c   : > { %3952 = vmatpush.bf16.msra.mxu1 %v5017_v45  ;;  %v2622_v45 = vld [vmem:[#allocation2 + $0xa8] sm:$0x33] }
 0x19d   : > { %3970 = vmatpush.bf16.msra.mxu2 %v5025_v40  ;;  %v5064_v40 = vld [vmem:[%s5865_s17 + $0x3e8] sm:$0xff]  ;;  %v2952_v3 = vunpack.c.h.b16 %v2622_v45 }
 0x19e   : > { %3988 = vmatpush.bf16.msra.mxu3 %v5033_v2  ;;  %v5063_v2 = vld [vmem:[%s5865_s17 + $0x3e0] sm:$0xff] }
 0x19f   : > { %3935 = vmatpush.bf16.msra.mxu0 %v5008_v47  ;;  %v2949_v47 = vunpack.c.l.b16 %v2621_v43  ;;  %v2984_v58 = vpack.c.b16 %v2952_v3, %v2952_v3 }
 0x1a0   : > { %3953 = vmatpush.bf16.msra.mxu1 %v5016_v48  ;;  %v5046_v48 = vld [vmem:[%s5865_s17 + $0x358] sm:$0xff] }
 0x1a1   : > { %3971 = vmatpush.bf16.msra.mxu2 %v5024_v46  ;;  %v5054_v46 = vld [vmem:[%s5865_s17 + $0x398] sm:$0xff] }
 0x1a2   : > { %3989 = vmatpush.bf16.msra.mxu3 %v5032_v49  ;;  %v2950_v49 = vunpack.c.h.b16 %v2621_v43 }
 0x1a3   : > { %3936 = vmatpush.bf16.msra.mxu0 %v5007_v51  ;;  %v5038_v51 = vld [vmem:[%s5865_s17 + $0x318] sm:$0xff] }
 0x1a4   : > { %3954 = vmatpush.bf16.msra.mxu1 %v5015_v53  ;;  %v5053_v53 = vld [vmem:[%s5865_s17 + $0x390] sm:$0xff] }
 0x1a5   : > { %3972 = vmatpush.bf16.msra.mxu2 %v5023_v50  ;;  %v2951_v50 = vunpack.c.l.b16 %v2622_v45 }
 0x1a6   : > { %3990 = vmatpush.bf16.msra.mxu3 %v5031_v54  ;;  %3874 = vmatmul.bf16.gmra.mxu0 %v2977_v63  ;;  %v2981_v54 = vpack.c.b16 %v2949_v47, %v2949_v47  ;;  %v5036_v63 = vld [vmem:[%s5865_s17 + $0x308] sm:$0xff] }
 0x1a7   : > { %3937 = vmatpush.bf16.msra.mxu0 %v5006_v60  ;;  %3892 = vmatmul.bf16.gmra.mxu1 %v2978_v1  ;;  %v2983_v57 = vpack.c.b16 %v2951_v50, %v2951_v50  ;;  %v5061_v60 = vld [vmem:[%s5865_s17 + $0x3d0] sm:$0xff]  ;;  %v5060_v1 = vld [vmem:[%s5865_s17 + $0x3c8] sm:$0xff] }
 0x1a8   : > { %3955 = vmatpush.bf16.msra.mxu1 %v5014_v61  ;;  %3910 = vmatmul.bf16.gmra.mxu2 %v2979_v4  ;;  %v5052_v61 = vld [vmem:[%s5865_s17 + $0x388] sm:$0xff]  ;;  %v5051_v4 = vld [vmem:[%s5865_s17 + $0x380] sm:$0xff] }
 0x1a9   : > { %3973 = vmatpush.bf16.msra.mxu2 %v5022_v56  ;;  %3928 = vmatmul.bf16.gmra.mxu3 %v2980_v5  ;;  %v2982_v56 = vpack.c.b16 %v2950_v49, %v2950_v49  ;;  %v5043_v5 = vld [vmem:[%s5865_s17 + $0x340] sm:$0xff] }
 0x1aa   : > { %3991 = vmatpush.bf16.msra.mxu3 %v5030_v62  ;;  %v5044_v62 = vld [vmem:[%s5865_s17 + $0x348] sm:$0xff] }
 0x1ab   : > { %3938 = vmatpush.bf16.msra.mxu0 %v5005_v6  ;;  %v5224_v6 = vmov 0  }
 0x1ac   : > { %3956 = vmatpush.bf16.msra.mxu1 %v5013_v7  ;;  %5147 = vset.pattern.permute.xlu0 %v5224_v6 }
 0x1ad   : > { %3974 = vmatpush.bf16.msra.mxu2 %v5021_v0  ;;  %v4077_v0 = vld [vmem:[%s6167_s3] sm:$0xff]  ;;  %5148 = vset.pattern.permute.xlu1 %v5224_v6 }
 0x1ae   : > { %3992 = vmatpush.bf16.msra.mxu3 %v5029_v11  ;;  %vm4080_vm15 = vcmp.gt.f32.partialorder %v4077_v0, 0.0  ;;  %v4078_v11 = vld [vmem:[%s6167_s3 + $0x8] sm:$0xff] }
 0x1af   : > { %3939 = vmatpush.bf16.msra.mxu0 %v5004_v9  ;;  %v4083_v7 = vsel %vm4080_vm15, 1, %v5224_v6  ;;  %v5059_v9 = vld [vmem:[%s5865_s17 + $0x3c0] sm:$0xff]  ;;  %vm4081_vm0 = vcmp.gt.f32.partialorder %v4078_v11, 0.0  ;;  %vm4165_vm15 = vcmask 1041409  }
 0x1b0   : > { %3957 = vmatpush.bf16.msra.mxu1 %v5012_v10  ;;  %4087 = vperm.xlu0 %5147, %v4083_v7   ;;  %v4393_v10 = vld [vmem:[#allocation2 + $0x30] sm:$0xf] }
 0x1b1   : > { %3975 = vmatpush.bf16.msra.mxu2 %v5020_v8  ;;  %v5035_v8 = vld [vmem:[%s5865_s17 + $0x300] sm:$0xff] }
 0x1b2   : > { %3993 = vmatpush.bf16.msra.mxu3 %v5028_v12  ;;  %v4937_v12 = vld [vmem:[#allocation2 + $0x6c] sm:$0xf0] }
 0x1b3   : > { %3940 = vmatpush.bf16.msra.mxu0 %v5003_v15  ;;  %v4401_v15 = vld [vmem:[#allocation2 + $0x38] sm:$0xf] }
 0x1b4   : > { %3958 = vmatpush.bf16.msra.mxu1 %v5011_v16  ;;  %v4938_v16 = vld [vmem:[#allocation2 + $0x74] sm:$0xf0] }
 0x1b5   : > { %3976 = vmatpush.bf16.msra.mxu2 %v5019_v13  ;;  %v4929_v13 = vld [vmem:[#allocation2 + $0x34] sm:$0xf]  ;;  %v4402_v22 = vor.u32 %v4938_v16, %v4401_v15 }
 0x1b6   : > { %3994 = vmatpush.bf16.msra.mxu3 %v5027_v17  ;;  %3941 = vmatmul.bf16.vlgmr.msra.gmra.mxu0 %v4378_v30  ;;  %v4084_v17 = vsel %vm4081_vm0, 1, %v5224_v6  ;;  %v2955_v30 = vunpack.c.l.b16 %v2624_v27  ;;  %vm4166_vm0 = vsmask.f32 7942 }
 0x1b7   : > { %4005 = vmatpush.bf16.msrb.mxu0 %v5042_v20  ;;  %3959 = vmatmul.bf16.vlgmr.msra.gmra.mxu1 %v4382_v32  ;;  %v4394_v20 = vor.u32 %v4937_v12, %v4393_v10  ;;  %v2985_v32 = vpack.c.b16 %v2953_v28, %v2953_v28 }
 0x1b8   : > { %4023 = vmatpush.bf16.msrb.mxu1 %v5050_v21  ;;  %3977 = vmatmul.bf16.vlgmr.msra.gmra.mxu2 %v4386_v33  ;;  %v2986_v33 = vpack.c.b16 %v2954_v29, %v2954_v29 }
 0x1b9   : > { %4041 = vmatpush.bf16.msrb.mxu2 %v5058_v14  ;;  %3995 = vmatmul.bf16.vlgmr.msra.gmra.mxu3 %v4390_v34  ;;  %v4395_v14 = vld [vmem:[#allocation2 + $0x70] sm:$0xf0]  ;;  %v2987_v34 = vpack.c.b16 %v2955_v30, %v2955_v30 }
 0x1ba   : > { %4059 = vmatpush.bf16.msrb.mxu3 %v5066_v23  ;;  %v4398_v21 = vor.u32 %v4929_v13, %v4395_v14  ;;  %4090 = vperm.xlu0 %5147, %v4084_v17   ;;  %v4406_v23 = vor.u32 %v4930_v18, %v4403_v19 }
 0x1bb   : > { %4006 = vmatpush.bf16.msrb.mxu0 %v5041_v35 }
 0x1bc   : > { %4024 = vmatpush.bf16.msrb.mxu1 %v5049_v31  ;;  %v2956_v31 = vunpack.c.h.b16 %v2624_v27 }
 0x1bd   : > { %4042 = vmatpush.bf16.msrb.mxu2 %v5057_v24  ;;  %v4079_v24 = vld [vmem:[%s6167_s3 + $0x10] sm:$0x7] }
 0x1be   : > { %4060 = vmatpush.bf16.msrb.mxu3 %v5065_v36  ;;  %vm4082_vm1 = vcmp.gt.f32.partialorder %v4079_v24, 0.0  ;;  %v2988_v35 = vpack.c.b16 %v2956_v31, %v2956_v31  ;;  %v5149_v36 = vld [vmem:[%s2352_s1] ss:$0 sm:$0xff]  ;;  %s5073_s1 = smul.u32 (%p5317_p9), 6, %s5210_s20 }
 0x1bf   : > { %4007 = vmatpush.bf16.msrb.mxu0 %v5040_v39  ;;  %v4085_v26 = vsel %vm4082_vm1, 1, %v5224_v6  ;;  %vm4167_vm1 = vmand %vm4165_vm15, %vm4166_vm0 }
 0x1c0   : > { %4025 = vmatpush.bf16.msrb.mxu1 %v5048_v38  ;;  %4093 = vperm.xlu1 %5148, %v4085_v26   ;;  %s4179_s9 = sadd.s32 (%p5317_p9), %s5206_s19, %s5073_s1 }
 0x1c1   : > { %4043 = vmatpush.bf16.msrb.mxu2 %v5056_v37  ;;  %s4919_s13 = sshll.u32 (%p5317_p9), %s4179_s9, 2 }
 0x1c2   : > { %4061 = vmatpush.bf16.msrb.mxu3 %v5064_v40  ;;  %s4181_s17 = scalar_lea.vmem (%p5317_p9), %s6168_s4, %s4919_s13 }
 0x1c3   : > { %4008 = vmatpush.bf16.msrb.mxu0 %v5039_v44 }
 0x1c4   : > { %4026 = vmatpush.bf16.msrb.mxu1 %v5047_v42 }
 0x1c5   : > { %4044 = vmatpush.bf16.msrb.mxu2 %v5055_v41 }
 0x1c6   : > { %4062 = vmatpush.bf16.msrb.mxu3 %v5063_v2  ;;  %3946 = vmatmul.bf16.gmra.mxu0 %v2981_v54 }
 0x1c7   : > { %4009 = vmatpush.bf16.msrb.mxu0 %v5038_v51  ;;  %3964 = vmatmul.bf16.gmra.mxu1 %v2982_v56 }
 0x1c8   : > { %4027 = vmatpush.bf16.msrb.mxu1 %v5046_v48  ;;  %3982 = vmatmul.bf16.gmra.mxu2 %v2983_v57 }
 0x1c9   : > { %4045 = vmatpush.bf16.msrb.mxu2 %v5054_v46  ;;  %4000 = vmatmul.bf16.gmra.mxu3 %v2984_v58 }
 0x1ca   : > { %4063 = vmatpush.bf16.msrb.mxu3 %v5062_v52 }
 0x1cb   : > { %4010 = vmatpush.bf16.msrb.mxu0 %v5037_v59 }
 0x1cc   : > { %4028 = vmatpush.bf16.msrb.mxu1 %v5045_v55 }
 0x1cd   : > { %4046 = vmatpush.bf16.msrb.mxu2 %v5053_v53 }
 0x1ce   : > { %4064 = vmatpush.bf16.msrb.mxu3 %v5061_v60 }
 0x1cf   : > { %4011 = vmatpush.bf16.msrb.mxu0 %v5036_v63 }
 0x1d0   : > { %4029 = vmatpush.bf16.msrb.mxu1 %v5044_v62 }
 0x1d1   : > { %4047 = vmatpush.bf16.msrb.mxu2 %v5052_v61 }
 0x1d2   : > { %4065 = vmatpush.bf16.msrb.mxu3 %v5060_v1 }
 0x1d3   : > { %4012 = vmatpush.bf16.msrb.mxu0 %v5035_v8 }
 0x1d4   : > { %4030 = vmatpush.bf16.msrb.mxu1 %v5043_v5 }
 0x1d5   : > { %4048 = vmatpush.bf16.msrb.mxu2 %v5051_v4 }
 0x1d6   : > { %4066 = vmatpush.bf16.msrb.mxu3 %v5059_v9  ;;  %4013 = vmatmul.bf16.vlgmr.msrb.gmra.mxu0 %v4394_v20 }
 0x1d7   : > { %4031 = vmatmul.bf16.vlgmr.msrb.gmra.mxu1 %v4398_v21 }
 0x1d8   : > { %4049 = vmatmul.bf16.vlgmr.msrb.gmra.mxu2 %v4402_v22 }
 0x1d9   : > { %4067 = vmatmul.bf16.vlgmr.msrb.gmra.mxu3 %v4406_v23 }
 0x1e6   : > { %4018 = vmatmul.bf16.gmra.mxu0 %v2985_v32 }
 0x1e7   : > { %4036 = vmatmul.bf16.gmra.mxu1 %v2986_v33 }
 0x1e8   : > { %4054 = vmatmul.bf16.gmra.mxu2 %v2987_v34 }
 0x1e9   : > { %4072 = vmatmul.bf16.gmra.mxu3 %v2988_v35 }
 0x1f3   : > { %v3798_v37 = vpop.f32.mrf.mxu0 }
 0x1f4   : > { %v3816_v38 = vpop.f32.mrf.mxu1  ;;  %v3799_v39 = vadd.f32 %v5149_v36, %v3798_v37 }
 0x1f6   : > { %v3817_v40 = vadd.f32 %v3816_v38, %v3799_v39 }
 0x1fb   : > { %v3834_v41 = vpop.f32.mrf.mxu2  ;;  %v3800_v44 = vpop.f32.mrf.mxu0 }
 0x1fc   : > { %v3852_v42 = vpop.f32.mrf.mxu3  ;;  %v3835_v43 = vadd.f32 %v3834_v41, %v3817_v40  ;;  %v3818_v45 = vpop.f32.mrf.mxu1  ;;  %v3801_v2 = vadd.f32 %v5149_v36, %v3800_v44 }
 0x1fe   : > { %v3853_v46 = vadd.f32 %v3852_v42, %v3835_v43  ;;  %v3819_v47 = vadd.f32 %v3818_v45, %v3801_v2 }
 0x203   : > { %v3836_v48 = vpop.f32.mrf.mxu2  ;;  %v3803_v3 = vpop.f32.mrf.mxu0 }
 0x204   : > { %v3854_v49 = vpop.f32.mrf.mxu3  ;;  %v3837_v50 = vadd.f32 %v3836_v48, %v3819_v47  ;;  %v3821_v51 = vpop.f32.mrf.mxu1  ;;  %v3804_v52 = vadd.f32 %v5149_v36, %v3803_v3 }
 0x206   : > { %v3855_v53 = vadd.f32 %v3854_v49, %v3837_v50  ;;  %v3822_v54 = vadd.f32 %v3821_v51, %v3804_v52 }
 0x20b   : > { %v3839_v55 = vpop.f32.mrf.mxu2  ;;  %v3805_v58 = vpop.f32.mrf.mxu0 }
 0x20c   : > { %v3857_v56 = vpop.f32.mrf.mxu3  ;;  %v3840_v57 = vadd.f32 %v3839_v55, %v3822_v54  ;;  %v3823_v59 = vpop.f32.mrf.mxu1 }
 0x20e   : > { %v3858_v60 = vadd.f32 %v3857_v56, %v3840_v57 }
 0x213   : > { %v3841_v61 = vpop.f32.mrf.mxu2  ;;  %v3870_v63 = vpop.f32.mrf.mxu0 }
 0x214   : > { %v3859_v62 = vpop.f32.mrf.mxu3  ;;  %v3871_v0 = vadd.f32 %v3870_v63, %v3853_v46  ;;  %v3888_v1 = vpop.f32.mrf.mxu1 }
 0x216   : > { %v3889_v4 = vadd.f32 %v3888_v1, %v3871_v0 }
 0x21b   : > { %v3906_v5 = vpop.f32.mrf.mxu2  ;;  %v3872_v11 = vpop.f32.mrf.mxu0 }
 0x21c   : > { %v3907_v6 = vadd.f32 %v3906_v5, %v3889_v4  ;;  %v3924_v7 = vpop.f32.mrf.mxu3  ;;  %v3890_v8 = vpop.f32.mrf.mxu1  ;;  %v3873_v31 = vadd.f32 %v3872_v11, %v3855_v53 }
 0x21e   : > { %v3925_v9 = vadd.f32 %v3924_v7, %v3907_v6  ;;  %v3891_v32 = vadd.f32 %v3890_v8, %v3873_v31 }
 0x222   : > { %v4088_v52 = vpop.permute.xlu0 %4087 }
 0x223   : > { %v3908_v10 = vpop.f32.mrf.mxu2  ;;  %v3875_v13 = vpop.f32.mrf.mxu0  ;;  %vm4095_vm2 = vcmp.eq.s32.totalorder %v4088_v52, 1 }
 0x224   : > { %v3926_v12 = vpop.f32.mrf.mxu3  ;;  %v3893_v14 = vpop.f32.mrf.mxu1  ;;  %v3909_v34 = vadd.f32 %v3908_v10, %v3891_v32  ;;  %v3876_v38 = vadd.f32 %v3875_v13, %v3858_v60 }
 0x226   : > { %v3927_v40 = vadd.f32 %v3926_v12, %v3909_v34  ;;  %v3894_v41 = vadd.f32 %v3893_v14, %v3876_v38 }
 0x22b   : > { %v3911_v15 = vpop.f32.mrf.mxu2  ;;  %v3877_v17 = vpop.f32.mrf.mxu0 }
 0x22c   : > { %v3929_v16 = vpop.f32.mrf.mxu3  ;;  %v3895_v18 = vpop.f32.mrf.mxu1  ;;  %v3912_v45 = vadd.f32 %v3911_v15, %v3894_v41 }
 0x22d   : > { %v4091_v4 = vpop.permute.xlu0 %4090 }
 0x22e   : > { %v3930_v50 = vadd.f32 %v3929_v16, %v3912_v45  ;;  %vm4096_vm3 = vcmp.eq.s32.totalorder %v4091_v4, 1 }
 0x232   : > { %v4094_v18 = vpop.permute.xlu1 %4093 }
 0x233   : > { %v3913_v19 = vpop.f32.mrf.mxu2  ;;  %v3942_v21 = vpop.f32.mrf.mxu0  ;;  %vm4097_vm4 = vcmp.eq.s32.totalorder %v4094_v18, 1 }
 0x234   : > { %v3931_v20 = vpop.f32.mrf.mxu3  ;;  %v3960_v22 = vpop.f32.mrf.mxu1  ;;  %v3943_v39 = vadd.f32 %v3942_v21, %v3925_v9 }
 0x236   : > { %v3961_v42 = vadd.f32 %v3960_v22, %v3943_v39 }
 0x23b   : > { %v3978_v23 = vpop.f32.mrf.mxu2  ;;  %v3944_v25 = vpop.f32.mrf.mxu0 }
 0x23c   : > { %v3996_v24 = vpop.f32.mrf.mxu3  ;;  %v3962_v26 = vpop.f32.mrf.mxu1  ;;  %v3945_v43 = vadd.f32 %v3944_v25, %v3927_v40  ;;  %v3979_v2 = vadd.f32 %v3978_v23, %v3961_v42 }
 0x23e   : > { %v3963_v49 = vadd.f32 %v3962_v26, %v3945_v43  ;;  %v3997_v3 = vadd.f32 %v3996_v24, %v3979_v2 }
 0x243   : > { %v3980_v27 = vpop.f32.mrf.mxu2  ;;  %v3947_v29 = vpop.f32.mrf.mxu0 }
 0x244   : > { %v3998_v28 = vpop.f32.mrf.mxu3  ;;  %v3965_v30 = vpop.f32.mrf.mxu1  ;;  %v3981_v51 = vadd.f32 %v3980_v27, %v3963_v49  ;;  %v3948_v53 = vadd.f32 %v3947_v29, %v3930_v50 }
 0x246   : > { %v3999_v56 = vadd.f32 %v3998_v28, %v3981_v51  ;;  %v3966_v60 = vadd.f32 %v3965_v30, %v3948_v53 }
 0x24b   : > { %v3983_v33 = vpop.f32.mrf.mxu2  ;;  %v3949_v36 = vpop.f32.mrf.mxu0 }
 0x24c   : > { %v4001_v35 = vpop.f32.mrf.mxu3  ;;  %v3967_v37 = vpop.f32.mrf.mxu1  ;;  %v3984_v63 = vadd.f32 %v3983_v33, %v3966_v60 }
 0x24e   : > { %v4002_v6 = vadd.f32 %v4001_v35, %v3984_v63 }
 0x253   : > { %v3985_v44 = vpop.f32.mrf.mxu2  ;;  %v4014_v47 = vpop.f32.mrf.mxu0 }
 0x254   : > { %v4003_v46 = vpop.f32.mrf.mxu3  ;;  %v4032_v48 = vpop.f32.mrf.mxu1  ;;  %v4015_v54 = vadd.f32 %v4014_v47, %v3997_v3 }
 0x256   : > { %v4033_v61 = vadd.f32 %v4032_v48, %v4015_v54 }
 0x25b   : > { %v4050_v55 = vpop.f32.mrf.mxu2  ;;  %v4016_v58 = vpop.f32.mrf.mxu0 }
 0x25c   : > { %v4068_v57 = vpop.f32.mrf.mxu3  ;;  %v4034_v59 = vpop.f32.mrf.mxu1  ;;  %v4017_v62 = vadd.f32 %v4016_v58, %v3999_v56  ;;  %v4051_v0 = vadd.f32 %v4050_v55, %v4033_v61 }
 0x25e   : > { %v4035_v1 = vadd.f32 %v4034_v59, %v4017_v62  ;;  %v4069_v7 = vadd.f32 %v4068_v57, %v4051_v0 }
 0x260   : > { %v4098_v14 = vsel %vm4095_vm2, %v4069_v7, 0.0 }
 0x263   : > { %v4052_v5 = vpop.f32.mrf.mxu2  ;;  %v4019_v9 = vpop.f32.mrf.mxu0 }
 0x264   : > { %v4053_v11 = vadd.f32 %v4052_v5, %v4035_v1  ;;  %v4070_v8 = vpop.f32.mrf.mxu3  ;;  %v4037_v10 = vpop.f32.mrf.mxu1  ;;  %v4020_v13 = vadd.f32 %v4019_v9, %v4002_v6 }
 0x266   : > { %v4071_v12 = vadd.f32 %v4070_v8, %v4053_v11  ;;  %v4038_v17 = vadd.f32 %v4037_v10, %v4020_v13 }
 0x268   : > { %v4099_v15 = vsel %vm4096_vm3, %v4071_v12, 0.0 }
 0x269   : > { %v4101_v16 = vadd.f32 %v4099_v15, %v4098_v14 }
 0x26b   : > { %v4055_v19 = vpop.f32.mrf.mxu2  ;;  %v4021_v22 = vpop.f32.mrf.mxu0 }
 0x26c   : > { %v4056_v20 = vadd.f32 %v4055_v19, %v4038_v17  ;;  %v4073_v21 = vpop.f32.mrf.mxu3  ;;  %v4039_v23 = vpop.f32.mrf.mxu1 }
 0x26e   : > { %v4074_v24 = vadd.f32 %v4073_v21, %v4056_v20 }
 0x270   : > { %v4100_v25 = vsel %vm4097_vm4, %v4074_v24, 0.0 }
 0x271   : > { %v4103_v26 = vsel %vm4102_vm5, %v4100_v25, 0.0 }
 0x272   : > { %v4104_v27 = vadd.f32 %v4103_v26, %v4101_v16 }
 0x273   : > { %v4057_v28 = vpop.f32.mrf.mxu2 }
 0x274   : > { %v4105_v29 = vrot.slane %v4104_v27, 4  ;;  %v4075_v30 = vpop.f32.mrf.mxu3 }
 0x276   : > { %v4106_v31 = vadd.f32 %v4105_v29, %v4104_v27 }
 0x278   : > { %v4107_v32 = vrot.slane %v4106_v31, 2 }
 0x27a   : > { %v4108_v33 = vadd.f32 %v4107_v32, %v4106_v31 }
 0x27c   : > { %v4109_v34 = vrot.slane %v4108_v33, 1 }
 0x27e   : > { %v4110_v35 = vadd.f32 %v4109_v34, %v4108_v33 }
 0x280   : > { %v4111_v36 = vmul.f32 0.0625, %v4110_v35 }
 0x282   : > { %v4112_v37 = vsub.f32 %v4069_v7, %v4111_v36  ;;  %v4113_v38 = vsub.f32 %v4071_v12, %v4111_v36  ;;  %v4114_v39 = vsub.f32 %v4074_v24, %v4111_v36  ;;  %v4162_v7 = vld [vmem:[%s5867_s15 + $0x8] sm:$0x3] }
 0x284   : > { %v4115_v40 = vsel %vm4095_vm2, %v4112_v37, 0.0  ;;  %v4116_v41 = vsel %vm4096_vm3, %v4113_v38, 0.0  ;;  %v4117_v42 = vsel %vm4097_vm4, %v4114_v39, 0.0 }
 0x285   : > { %v4118_v43 = vmul.f32 %v4115_v40, %v4115_v40  ;;  %v4119_v44 = vmul.f32 %v4116_v41, %v4116_v41  ;;  %v4120_v45 = vmul.f32 %v4117_v42, %v4117_v42 }
 0x287   : > { %v4121_v2 = vadd.f32 %v4119_v44, %v4118_v43  ;;  %v4122_v46 = vsel %vm4102_vm5, %v4120_v45, 0.0 }
 0x289   : > { %v4123_v47 = vadd.f32 %v4122_v46, %v4121_v2 }
 0x28b   : > { %v4124_v48 = vrot.slane %v4123_v47, 4 }
 0x28d   : > { %v4125_v49 = vadd.f32 %v4124_v48, %v4123_v47 }
 0x28f   : > { %v4126_v50 = vrot.slane %v4125_v49, 2 }
 0x291   : > { %v4127_v3 = vadd.f32 %v4126_v50, %v4125_v49 }
 0x293   : > { %v4128_v51 = vrot.slane %v4127_v3, 1 }
 0x295   : > { %v4129_v53 = vadd.f32 %v4128_v51, %v4127_v3 }
 0x297   : > { %v4130_v54 = vmul.f32 0.0625, %v4129_v53 }
 0x299   : > { %v4131_v52 = vadd.f32 1e-05, %v4130_v54 }
 0x29b   : > { %5150 = vrsqrt.f32 %v4131_v52  ;;  %vm4138_vm7 = vweird.f32 %v4131_v52 }
 0x2a1   : > { %v5151_v55 = vpop.eup %5150 }
 0x2a2   : > { %v4133_v56 = vmul.f32 %v5151_v55, %v4131_v52  ;;  %vm4139_vm6 = vweird.f32 %v5151_v55 }
 0x2a3   : > { %vm4140_vm8 = vmor %vm4138_vm7, %vm4139_vm6 }
 0x2a4   : > { %v4134_v57 = vmul.f32 %v5151_v55, %v4133_v56 }
 0x2a6   : > { %v4135_v58 = vmul.f32 0.5, %v4134_v57 }
 0x2a8   : > { %v4136_v59 = vsub.f32 1.5, %v4135_v58 }
 0x2aa   : > { %v4137_v60 = vmul.f32 %v5151_v55, %v4136_v59 }
 0x2ac   : > { %v4141_v61 = vsel %vm4140_vm8, %v5151_v55, %v4137_v60 }
 0x2ad   : > { %v4142_v62 = vmul.f32 %v4141_v61, %v4112_v37  ;;  %v4143_v63 = vmul.f32 %v4141_v61, %v4113_v38  ;;  %v4144_v0 = vmul.f32 %v4141_v61, %v4114_v39 }
 0x2af   : > { %vm4145_vm11 = vcmp.ge.f32.partialorder %v4142_v62, 0.0  ;;  %vm4146_vm12 = vcmp.ge.f32.partialorder %v4143_v63, 0.0  ;;  %vm4147_vm13 = vcmp.ge.f32.partialorder %v4144_v0, 0.0  ;;  %v4148_v1 = vmul.f32 0.2, %v4142_v62 }
 0x2b0   : > { %v4149_v4 = vmul.f32 0.2, %v4143_v63  ;;  %v4150_v5 = vmul.f32 0.2, %v4144_v0 }
 0x2b1   : > { %v4151_v6 = vsel %vm4145_vm11, %v4142_v62, %v4148_v1 }
 0x2b2   : > { %v4152_v11 = vsel %vm4146_vm12, %v4143_v63, %v4149_v4  ;;  %v4153_v8 = vsel %vm4147_vm13, %v4144_v0, %v4150_v5 }
 0x2b3   : > { %v4156_v9 = vpack.c.bf16 %v4153_v8, %v4153_v8  ;;  %v5070_v10 = vpack.c.bf16 %v4152_v11, %v4151_v6 }
 0x2b5   : > { %5071 = vst [vmem:[%s5867_s15] sm:$0xff] %v5070_v10   ;;  %v4163_v12 = vsel %vm4161_vm14, %v4156_v9, %v4162_v7 }
 0x2b6   : > { %4164 = vst [vmem:[%s5867_s15 + $0x8] sm:$0x3] %v4163_v12 }
 0x2bb   : > { %4177 = sbr.rel (!%p5317_p9) target bundleno = 712 (0x2c8), region = 96 }
 0x2bc   : > { %v4198_v15 = vld [vmem:[%s5867_s15] sm:$0xf] (%p5317_p9)  ;;  %v4200_v16 = vld [vmem:[%s5867_s15 + $0x4] sm:$0xf] (%p5317_p9) }
 0x2bd   : > { %v4168_v13 = vld [vmem:[%s5867_s15 + $0x8] sm:$0x2]  ;;  %4199 = vst [vmem:[%s4181_s17] sm:$0xf] (%p5317_p9), %v4198_v15 }
 0x2be   : > { %v4169_v14 = vsel %vm4167_vm1, 0, %v4168_v13  ;;  %4201 = vst [vmem:[%s4181_s17 + $0x8] sm:$0xf] (%p5317_p9), %v4200_v16 }
 0x2bf   : > { %4170 = vst [vmem:[%s5867_s15 + $0x8] sm:$0x2] %v4169_v14 }
 0x2c6   : > { %v4202_v17 = vld [vmem:[%s5867_s15 + $0x8] sm:$0xf] }
 0x2c7   : > { %4203 = vst [vmem:[%s4181_s17 + $0x10] sm:$0xf] %v4202_v17 }
 0x2c8 PF: > { %s14_s23 = sadd.s32 1, %s5222_s23   ;;  %s6180_s15 = smov %s5194_s16 }
 0x2c9   : > { %p11_p3 = scmp.ge.s32.totalorder %s14_s23, 6   ;;  %s6181_s16 = smov %s5322_s8 }
 0x2ca   : > { %s6182_s17 = smov %s5202_s18  ;;  %s6183_s18 = smov %s5311_s30 }
 0x2cb   : > { %s6184_s19 = smov %s5214_s21  ;;  %s6185_s20 = smov %s5218_s22 }
 0x2cc   : > { %s6186_s21 = smov %s6189_s25  ;;  %s6187_s22 = smov %s6193_s26 }
 0x2cd   :  { %13 = sbr.rel (!%p11_p3) target bundleno = 7 (0x7), region = 178 }

// kernel: discriminator_forward.7
= control target key start
LH: loop header
LB: loop body
LE: loop exit
PB: predicated region body
PF: predicated region fallthrough
CT: control target
= control target key end

     0   :  { %s11037_s0 = inlined_call_operand.vmem [shape: bf16[2,36,256], index: 0, kind: input, shape index: {}]   ;;  %s11038_s1 = inlined_call_operand.vmem [shape: bf16[4096,512], index: 1, kind: input, shape index: {}]   ;;  %s11039_s2 = inlined_call_operand.vmem [shape: f32[1,512], index: 2, kind: input, shape index: {}]   ;;  %s11040_s3 = inlined_call_operand.vmem [shape: f32[15,1], index: 3, kind: input, shape index: {}]   ;;  %s11041_s4 = inlined_call_operand.vmem [shape: bf16[2,18,512], index: 4, kind: output, shape index: {}]  }
   0x1   :  { %11042 = sst [smem:[#allocation5_spill]] %s11038_s1 }
   0x2   :  { %s9389_s15 = smov 0   ;;  %s9391_s16 = smov 0  }
   0x3   :  { %s9393_s17 = smov 0   ;;  %s9395_s18 = smov 0  }
   0x4   :  { %s9397_s19 = smov 0   ;;  %s9399_s20 = smov 0  }
   0x5   :  { %s9401_s21 = smov 0   ;;  %s9403_s22 = smov 0  }
   0x6   :  { %s9405_s23 = smov 0  }
   0x7 LB: > { %s7750_s24 = sadd.s32 4294967295, %s9361_s23   ;;  %s23_s25 = sadd.s32 1, %s9353_s21  ;;  %s9361_s23 = sphi %s9405_s23, %s14_s23   ;;  %s9357_s22 = sphi %s9403_s22, %s11068_s22   ;;  %s9353_s21 = sphi %s9401_s21, %s11067_s21   ;;  %s9349_s20 = sphi %s9399_s20, %s11066_s20   ;;  %s9345_s19 = sphi %s9397_s19, %s11065_s19   ;;  %s9341_s18 = sphi %s9395_s18, %s11064_s18   ;;  %s9337_s17 = sphi %s9393_s17, %s11063_s17   ;;  %s9333_s16 = sphi %s9391_s16, %s11062_s16   ;;  %s9329_s15 = sphi %s9389_s15, %s11061_s15  }
   0x8   : > { %p24_p0 = scmp.ge.s32.totalorder %s23_s25, 4  ;;  %s26_s26 = sadd.s32 1, %s9357_s22 }
   0x9   : > { %s59_s27 = sadd.s32 1, %s9341_s18  ;;  %p66_p1 = scmp.ne.s32.totalorder %s9341_s18, %s9337_s17 }
   0xa   : > { %s11070_s25 = smov (%p24_p0, %s23_s25), 0  ;;  %s11072_s26 = smov (!%p24_p0, %s26_s26), %s9357_s22 }
   0xb   : > { %s56_s28 = ssub.s32 %s9353_s21, %s11070_s25  ;;  %p67_p2 = scmp.eq.s32.totalorder %s9361_s23, 0 }
   0xc   : > { %p28_p3 = scmp.ge.s32.totalorder %s11072_s26, 2  ;;  %p57_p4 = scmp.eq.s32.totalorder %s56_s28, 0 }
   0xd   : > { %p68_p5 = por %p67_p2, %p66_p1  ;;  %s134_s29 = sadd.s32 1, %s9333_s16 }
   0xe   : > { %s11074_s26 = smov (%p28_p3, %s11072_s26), 0  ;;  %p144_p6 = scmp.ne.s32.totalorder %s9333_s16, %s9329_s15 }
   0xf   : > { %s9450_s30 = scalar_select %p57_p4, %s9341_s18, %s59_s27  }
  0x10   : > { %s129_s5 = ssub.s32 %s9357_s22, %s11074_s26  ;;  %p145_p7 = scmp.eq.s32.totalorder %s7750_s24, 7 }
  0x11   : > { %s131_s6 = sor.u32 %s129_s5, %s56_s28  ;;  %p7753_p10 = scmp.ge.s32.totalorder %s9361_s23, 8 }
  0x12   : > { %p132_p8 = scmp.eq.s32.totalorder %s131_s6, 0  ;;  %p9456_p9 = por %p145_p7, %p144_p6 }
  0x13   : > { %170 = sbr.rel (%p7753_p10) target bundleno = 546 (0x222), region = 20 }
  0x14   : > { %s9461_s8 = scalar_select %p132_p8, %s9333_s16, %s134_s29  }
  0x18   : > { %181 = sbr.rel (!%p68_p5) target bundleno = 546 (0x222), region = 28  ;;  %s183_s9 = sand.u32 (%p68_p5), 1, %s9341_s18  }
  0x19   : > { %s7755_s10 = sshll.u32 (%p68_p5), %s9353_s21, 2  ;;  %s7754_s11 = sshll.u32 (%p68_p5), %s183_s9, 11 }
  0x1a   : > { %s11044_s1 = sld [smem:[#allocation5_spill]] (%p68_p5)  ;;  %s9473_s24 = scalar_lea.vmem (%p68_p5), [#allocation3], %s7754_s11 }
  0x20   : > { %s9469_s14 = scalar_lea.vmem %s11044_s1, %s7755_s10 }
  0x21   : > { %v204_v0 = vld [vmem:[%s9469_s14] sm:$0xf]  ;;  %v206_v1 = vld [vmem:[%s9469_s14 + $0x10] sm:$0xf] }
  0x22   : > { %205 = vst [vmem:[%s9473_s24] sm:$0xf] %v204_v0  ;;  %v208_v2 = vld [vmem:[%s9469_s14 + $0x20] sm:$0xf]  ;;  %v210_v3 = vld [vmem:[%s9469_s14 + $0x30] sm:$0xf] }
  0x23   : > { %207 = vst [vmem:[%s9473_s24 + $0x4] sm:$0xf] %v206_v1  ;;  %v212_v4 = vld [vmem:[%s9469_s14 + $0x40] sm:$0xf]  ;;  %v214_v5 = vld [vmem:[%s9469_s14 + $0x50] sm:$0xf] }
  0x24   : > { %209 = vst [vmem:[%s9473_s24 + $0x8] sm:$0xf] %v208_v2  ;;  %v216_v6 = vld [vmem:[%s9469_s14 + $0x60] sm:$0xf]  ;;  %v218_v7 = vld [vmem:[%s9469_s14 + $0x70] sm:$0xf] }
  0x25   : > { %211 = vst [vmem:[%s9473_s24 + $0xc] sm:$0xf] %v210_v3  ;;  %v220_v8 = vld [vmem:[%s9469_s14 + $0x80] sm:$0xf]  ;;  %v222_v9 = vld [vmem:[%s9469_s14 + $0x90] sm:$0xf] }
  0x26   : > { %213 = vst [vmem:[%s9473_s24 + $0x10] sm:$0xf] %v212_v4  ;;  %v224_v10 = vld [vmem:[%s9469_s14 + $0xa0] sm:$0xf]  ;;  %v226_v11 = vld [vmem:[%s9469_s14 + $0xb0] sm:$0xf] }
  0x27   : > { %215 = vst [vmem:[%s9473_s24 + $0x14] sm:$0xf] %v214_v5  ;;  %v228_v12 = vld [vmem:[%s9469_s14 + $0xc0] sm:$0xf]  ;;  %v230_v13 = vld [vmem:[%s9469_s14 + $0xd0] sm:$0xf] }
  0x28   : > { %217 = vst [vmem:[%s9473_s24 + $0x18] sm:$0xf] %v216_v6  ;;  %v232_v14 = vld [vmem:[%s9469_s14 + $0xe0] sm:$0xf]  ;;  %v234_v15 = vld [vmem:[%s9469_s14 + $0xf0] sm:$0xf] }
  0x29   : > { %219 = vst [vmem:[%s9473_s24 + $0x1c] sm:$0xf] %v218_v7  ;;  %v236_v16 = vld [vmem:[%s9469_s14 + $0x100] sm:$0xf]  ;;  %v238_v17 = vld [vmem:[%s9469_s14 + $0x110] sm:$0xf] }
  0x2a   : > { %221 = vst [vmem:[%s9473_s24 + $0x20] sm:$0xf] %v220_v8  ;;  %v240_v18 = vld [vmem:[%s9469_s14 + $0x120] sm:$0xf]  ;;  %v242_v19 = vld [vmem:[%s9469_s14 + $0x130] sm:$0xf] }
  0x2b   : > { %223 = vst [vmem:[%s9473_s24 + $0x24] sm:$0xf] %v222_v9  ;;  %v244_v20 = vld [vmem:[%s9469_s14 + $0x140] sm:$0xf]  ;;  %v246_v21 = vld [vmem:[%s9469_s14 + $0x150] sm:$0xf] }
  0x2c   : > { %225 = vst [vmem:[%s9473_s24 + $0x28] sm:$0xf] %v224_v10  ;;  %v248_v22 = vld [vmem:[%s9469_s14 + $0x160] sm:$0xf]  ;;  %v250_v23 = vld [vmem:[%s9469_s14 + $0x170] sm:$0xf] }
  0x2d   : > { %227 = vst [vmem:[%s9473_s24 + $0x2c] sm:$0xf] %v226_v11  ;;  %v252_v24 = vld [vmem:[%s9469_s14 + $0x180] sm:$0xf]  ;;  %v254_v25 = vld [vmem:[%s9469_s14 + $0x190] sm:$0xf] }
  0x2e   : > { %229 = vst [vmem:[%s9473_s24 + $0x30] sm:$0xf] %v228_v12  ;;  %v256_v26 = vld [vmem:[%s9469_s14 + $0x1a0] sm:$0xf]  ;;  %v258_v27 = vld [vmem:[%s9469_s14 + $0x1b0] sm:$0xf] }
  0x2f   : > { %231 = vst [vmem:[%s9473_s24 + $0x34] sm:$0xf] %v230_v13  ;;  %v260_v28 = vld [vmem:[%s9469_s14 + $0x1c0] sm:$0xf]  ;;  %v262_v29 = vld [vmem:[%s9469_s14 + $0x1d0] sm:$0xf] }
  0x30   : > { %233 = vst [vmem:[%s9473_s24 + $0x38] sm:$0xf] %v232_v14  ;;  %v264_v30 = vld [vmem:[%s9469_s14 + $0x1e0] sm:$0xf]  ;;  %v266_v31 = vld [vmem:[%s9469_s14 + $0x1f0] sm:$0xf] }
  0x31   : > { %235 = vst [vmem:[%s9473_s24 + $0x3c] sm:$0xf] %v234_v15  ;;  %v268_v32 = vld [vmem:[%s9469_s14 + $0x200] sm:$0xf]  ;;  %v270_v33 = vld [vmem:[%s9469_s14 + $0x210] sm:$0xf] }
  0x32   : > { %237 = vst [vmem:[%s9473_s24 + $0x40] sm:$0xf] %v236_v16  ;;  %v272_v34 = vld [vmem:[%s9469_s14 + $0x220] sm:$0xf]  ;;  %v274_v35 = vld [vmem:[%s9469_s14 + $0x230] sm:$0xf] }
  0x33   : > { %239 = vst [vmem:[%s9473_s24 + $0x44] sm:$0xf] %v238_v17  ;;  %v276_v36 = vld [vmem:[%s9469_s14 + $0x240] sm:$0xf]  ;;  %v278_v37 = vld [vmem:[%s9469_s14 + $0x250] sm:$0xf] }
  0x34   : > { %241 = vst [vmem:[%s9473_s24 + $0x48] sm:$0xf] %v240_v18  ;;  %v280_v38 = vld [vmem:[%s9469_s14 + $0x260] sm:$0xf]  ;;  %v282_v39 = vld [vmem:[%s9469_s14 + $0x270] sm:$0xf] }
  0x35   : > { %243 = vst [vmem:[%s9473_s24 + $0x4c] sm:$0xf] %v242_v19  ;;  %v284_v40 = vld [vmem:[%s9469_s14 + $0x280] sm:$0xf]  ;;  %v286_v41 = vld [vmem:[%s9469_s14 + $0x290] sm:$0xf] }
  0x36   : > { %245 = vst [vmem:[%s9473_s24 + $0x50] sm:$0xf] %v244_v20  ;;  %v288_v42 = vld [vmem:[%s9469_s14 + $0x2a0] sm:$0xf]  ;;  %v290_v43 = vld [vmem:[%s9469_s14 + $0x2b0] sm:$0xf] }
  0x37   : > { %247 = vst [vmem:[%s9473_s24 + $0x54] sm:$0xf] %v246_v21  ;;  %v292_v44 = vld [vmem:[%s9469_s14 + $0x2c0] sm:$0xf]  ;;  %v294_v45 = vld [vmem:[%s9469_s14 + $0x2d0] sm:$0xf] }
  0x38   : > { %249 = vst [vmem:[%s9473_s24 + $0x58] sm:$0xf] %v248_v22  ;;  %v296_v46 = vld [vmem:[%s9469_s14 + $0x2e0] sm:$0xf]  ;;  %v298_v47 = vld [vmem:[%s9469_s14 + $0x2f0] sm:$0xf] }
  0x39   : > { %251 = vst [vmem:[%s9473_s24 + $0x5c] sm:$0xf] %v250_v23  ;;  %v300_v48 = vld [vmem:[%s9469_s14 + $0x300] sm:$0xf]  ;;  %v302_v49 = vld [vmem:[%s9469_s14 + $0x310] sm:$0xf] }
  0x3a   : > { %253 = vst [vmem:[%s9473_s24 + $0x60] sm:$0xf] %v252_v24  ;;  %v304_v50 = vld [vmem:[%s9469_s14 + $0x320] sm:$0xf]  ;;  %v306_v51 = vld [vmem:[%s9469_s14 + $0x330] sm:$0xf] }
  0x3b   : > { %255 = vst [vmem:[%s9473_s24 + $0x64] sm:$0xf] %v254_v25  ;;  %v308_v52 = vld [vmem:[%s9469_s14 + $0x340] sm:$0xf]  ;;  %v310_v53 = vld [vmem:[%s9469_s14 + $0x350] sm:$0xf] }
  0x3c   : > { %257 = vst [vmem:[%s9473_s24 + $0x68] sm:$0xf] %v256_v26  ;;  %v312_v54 = vld [vmem:[%s9469_s14 + $0x360] sm:$0xf]  ;;  %v314_v55 = vld [vmem:[%s9469_s14 + $0x370] sm:$0xf] }
  0x3d   : > { %259 = vst [vmem:[%s9473_s24 + $0x6c] sm:$0xf] %v258_v27  ;;  %v316_v56 = vld [vmem:[%s9469_s14 + $0x380] sm:$0xf]  ;;  %v318_v57 = vld [vmem:[%s9469_s14 + $0x390] sm:$0xf] }
  0x3e   : > { %261 = vst [vmem:[%s9473_s24 + $0x70] sm:$0xf] %v260_v28  ;;  %v320_v58 = vld [vmem:[%s9469_s14 + $0x3a0] sm:$0xf]  ;;  %v322_v59 = vld [vmem:[%s9469_s14 + $0x3b0] sm:$0xf] }
  0x3f   : > { %263 = vst [vmem:[%s9473_s24 + $0x74] sm:$0xf] %v262_v29  ;;  %v324_v60 = vld [vmem:[%s9469_s14 + $0x3c0] sm:$0xf]  ;;  %v326_v61 = vld [vmem:[%s9469_s14 + $0x3d0] sm:$0xf] }
  0x40   : > { %265 = vst [vmem:[%s9473_s24 + $0x78] sm:$0xf] %v264_v30  ;;  %v328_v62 = vld [vmem:[%s9469_s14 + $0x3e0] sm:$0xf]  ;;  %v330_v63 = vld [vmem:[%s9469_s14 + $0x3f0] sm:$0xf] }
  0x41   : > { %267 = vst [vmem:[%s9473_s24 + $0x7c] sm:$0xf] %v266_v31  ;;  %v332_v0 = vld [vmem:[%s9469_s14 + $0x400] sm:$0xf]  ;;  %v334_v1 = vld [vmem:[%s9469_s14 + $0x410] sm:$0xf] }
  0x42   : > { %269 = vst [vmem:[%s9473_s24 + $0x80] sm:$0xf] %v268_v32  ;;  %v336_v2 = vld [vmem:[%s9469_s14 + $0x420] sm:$0xf]  ;;  %v338_v3 = vld [vmem:[%s9469_s14 + $0x430] sm:$0xf] }
  0x43   : > { %271 = vst [vmem:[%s9473_s24 + $0x84] sm:$0xf] %v270_v33  ;;  %v340_v4 = vld [vmem:[%s9469_s14 + $0x440] sm:$0xf]  ;;  %v342_v5 = vld [vmem:[%s9469_s14 + $0x450] sm:$0xf] }
  0x44   : > { %273 = vst [vmem:[%s9473_s24 + $0x88] sm:$0xf] %v272_v34  ;;  %v344_v6 = vld [vmem:[%s9469_s14 + $0x460] sm:$0xf]  ;;  %v346_v7 = vld [vmem:[%s9469_s14 + $0x470] sm:$0xf] }
  0x45   : > { %275 = vst [vmem:[%s9473_s24 + $0x8c] sm:$0xf] %v274_v35  ;;  %v348_v8 = vld [vmem:[%s9469_s14 + $0x480] sm:$0xf]  ;;  %v350_v9 = vld [vmem:[%s9469_s14 + $0x490] sm:$0xf] }
  0x46   : > { %277 = vst [vmem:[%s9473_s24 + $0x90] sm:$0xf] %v276_v36  ;;  %v352_v10 = vld [vmem:[%s9469_s14 + $0x4a0] sm:$0xf]  ;;  %v354_v11 = vld [vmem:[%s9469_s14 + $0x4b0] sm:$0xf] }
  0x47   : > { %279 = vst [vmem:[%s9473_s24 + $0x94] sm:$0xf] %v278_v37  ;;  %v356_v12 = vld [vmem:[%s9469_s14 + $0x4c0] sm:$0xf]  ;;  %v358_v13 = vld [vmem:[%s9469_s14 + $0x4d0] sm:$0xf] }
  0x48   : > { %281 = vst [vmem:[%s9473_s24 + $0x98] sm:$0xf] %v280_v38  ;;  %v360_v14 = vld [vmem:[%s9469_s14 + $0x4e0] sm:$0xf]  ;;  %v362_v15 = vld [vmem:[%s9469_s14 + $0x4f0] sm:$0xf] }
  0x49   : > { %283 = vst [vmem:[%s9473_s24 + $0x9c] sm:$0xf] %v282_v39  ;;  %v364_v16 = vld [vmem:[%s9469_s14 + $0x500] sm:$0xf]  ;;  %v366_v17 = vld [vmem:[%s9469_s14 + $0x510] sm:$0xf] }
  0x4a   : > { %285 = vst [vmem:[%s9473_s24 + $0xa0] sm:$0xf] %v284_v40  ;;  %v368_v18 = vld [vmem:[%s9469_s14 + $0x520] sm:$0xf]  ;;  %v370_v19 = vld [vmem:[%s9469_s14 + $0x530] sm:$0xf] }
  0x4b   : > { %287 = vst [vmem:[%s9473_s24 + $0xa4] sm:$0xf] %v286_v41  ;;  %v372_v20 = vld [vmem:[%s9469_s14 + $0x540] sm:$0xf]  ;;  %v374_v21 = vld [vmem:[%s9469_s14 + $0x550] sm:$0xf] }
  0x4c   : > { %289 = vst [vmem:[%s9473_s24 + $0xa8] sm:$0xf] %v288_v42  ;;  %v376_v22 = vld [vmem:[%s9469_s14 + $0x560] sm:$0xf]  ;;  %v378_v23 = vld [vmem:[%s9469_s14 + $0x570] sm:$0xf] }
  0x4d   : > { %291 = vst [vmem:[%s9473_s24 + $0xac] sm:$0xf] %v290_v43  ;;  %v380_v24 = vld [vmem:[%s9469_s14 + $0x580] sm:$0xf]  ;;  %v382_v25 = vld [vmem:[%s9469_s14 + $0x590] sm:$0xf] }
  0x4e   : > { %293 = vst [vmem:[%s9473_s24 + $0xb0] sm:$0xf] %v292_v44  ;;  %v384_v26 = vld [vmem:[%s9469_s14 + $0x5a0] sm:$0xf]  ;;  %v386_v27 = vld [vmem:[%s9469_s14 + $0x5b0] sm:$0xf] }
  0x4f   : > { %295 = vst [vmem:[%s9473_s24 + $0xb4] sm:$0xf] %v294_v45  ;;  %v388_v28 = vld [vmem:[%s9469_s14 + $0x5c0] sm:$0xf]  ;;  %v390_v29 = vld [vmem:[%s9469_s14 + $0x5d0] sm:$0xf] }
  0x50   : > { %297 = vst [vmem:[%s9473_s24 + $0xb8] sm:$0xf] %v296_v46  ;;  %v392_v30 = vld [vmem:[%s9469_s14 + $0x5e0] sm:$0xf]  ;;  %v394_v31 = vld [vmem:[%s9469_s14 + $0x5f0] sm:$0xf] }
  0x51   : > { %299 = vst [vmem:[%s9473_s24 + $0xbc] sm:$0xf] %v298_v47  ;;  %v396_v32 = vld [vmem:[%s9469_s14 + $0x600] sm:$0xf]  ;;  %v398_v33 = vld [vmem:[%s9469_s14 + $0x610] sm:$0xf] }
  0x52   : > { %301 = vst [vmem:[%s9473_s24 + $0xc0] sm:$0xf] %v300_v48  ;;  %v400_v34 = vld [vmem:[%s9469_s14 + $0x620] sm:$0xf]  ;;  %v402_v35 = vld [vmem:[%s9469_s14 + $0x630] sm:$0xf] }
  0x53   : > { %303 = vst [vmem:[%s9473_s24 + $0xc4] sm:$0xf] %v302_v49  ;;  %v404_v36 = vld [vmem:[%s9469_s14 + $0x640] sm:$0xf]  ;;  %v406_v37 = vld [vmem:[%s9469_s14 + $0x650] sm:$0xf] }
  0x54   : > { %305 = vst [vmem:[%s9473_s24 + $0xc8] sm:$0xf] %v304_v50  ;;  %v408_v38 = vld [vmem:[%s9469_s14 + $0x660] sm:$0xf]  ;;  %v410_v39 = vld [vmem:[%s9469_s14 + $0x670] sm:$0xf] }
  0x55   : > { %307 = vst [vmem:[%s9473_s24 + $0xcc] sm:$0xf] %v306_v51  ;;  %v412_v40 = vld [vmem:[%s9469_s14 + $0x680] sm:$0xf]  ;;  %v414_v41 = vld [vmem:[%s9469_s14 + $0x690] sm:$0xf] }
  0x56   : > { %309 = vst [vmem:[%s9473_s24 + $0xd0] sm:$0xf] %v308_v52  ;;  %v416_v42 = vld [vmem:[%s9469_s14 + $0x6a0] sm:$0xf]  ;;  %v418_v43 = vld [vmem:[%s9469_s14 + $0x6b0] sm:$0xf] }
  0x57   : > { %311 = vst [vmem:[%s9473_s24 + $0xd4] sm:$0xf] %v310_v53  ;;  %v420_v44 = vld [vmem:[%s9469_s14 + $0x6c0] sm:$0xf]  ;;  %v422_v45 = vld [vmem:[%s9469_s14 + $0x6d0] sm:$0xf] }
  0x58   : > { %313 = vst [vmem:[%s9473_s24 + $0xd8] sm:$0xf] %v312_v54  ;;  %v424_v46 = vld [vmem:[%s9469_s14 + $0x6e0] sm:$0xf]  ;;  %v426_v47 = vld [vmem:[%s9469_s14 + $0x6f0] sm:$0xf] }
  0x59   : > { %315 = vst [vmem:[%s9473_s24 + $0xdc] sm:$0xf] %v314_v55  ;;  %v428_v48 = vld [vmem:[%s9469_s14 + $0x700] sm:$0xf]  ;;  %v430_v49 = vld [vmem:[%s9469_s14 + $0x710] sm:$0xf] }
  0x5a   : > { %317 = vst [vmem:[%s9473_s24 + $0xe0] sm:$0xf] %v316_v56  ;;  %v432_v50 = vld [vmem:[%s9469_s14 + $0x720] sm:$0xf]  ;;  %v434_v51 = vld [vmem:[%s9469_s14 + $0x730] sm:$0xf] }
  0x5b   : > { %319 = vst [vmem:[%s9473_s24 + $0xe4] sm:$0xf] %v318_v57  ;;  %v436_v52 = vld [vmem:[%s9469_s14 + $0x740] sm:$0xf]  ;;  %v438_v53 = vld [vmem:[%s9469_s14 + $0x750] sm:$0xf] }
  0x5c   : > { %321 = vst [vmem:[%s9473_s24 + $0xe8] sm:$0xf] %v320_v58  ;;  %v440_v54 = vld [vmem:[%s9469_s14 + $0x760] sm:$0xf]  ;;  %v442_v55 = vld [vmem:[%s9469_s14 + $0x770] sm:$0xf] }
  0x5d   : > { %323 = vst [vmem:[%s9473_s24 + $0xec] sm:$0xf] %v322_v59  ;;  %v444_v56 = vld [vmem:[%s9469_s14 + $0x780] sm:$0xf]  ;;  %v446_v57 = vld [vmem:[%s9469_s14 + $0x790] sm:$0xf] }
  0x5e   : > { %325 = vst [vmem:[%s9473_s24 + $0xf0] sm:$0xf] %v324_v60  ;;  %v448_v58 = vld [vmem:[%s9469_s14 + $0x7a0] sm:$0xf]  ;;  %v450_v59 = vld [vmem:[%s9469_s14 + $0x7b0] sm:$0xf] }
  0x5f   : > { %327 = vst [vmem:[%s9473_s24 + $0xf4] sm:$0xf] %v326_v61  ;;  %v452_v60 = vld [vmem:[%s9469_s14 + $0x7c0] sm:$0xf]  ;;  %v454_v61 = vld [vmem:[%s9469_s14 + $0x7d0] sm:$0xf] }
  0x60   : > { %329 = vst [vmem:[%s9473_s24 + $0xf8] sm:$0xf] %v328_v62  ;;  %v456_v62 = vld [vmem:[%s9469_s14 + $0x7e0] sm:$0xf] }
  0x61   : > { %331 = vst [vmem:[%s9473_s24 + $0xfc] sm:$0xf] %v330_v63  ;;  %v458_v63 = vld [vmem:[%s9469_s14 + $0x7f0] sm:$0xf] }
  0x62   : > { %333 = vst [vmem:[%s9473_s24 + $0x100] sm:$0xf] %v332_v0  ;;  %v460_v0 = vld [vmem:[%s9469_s14 + $0x800] sm:$0xf] }
  0x63   : > { %335 = vst [vmem:[%s9473_s24 + $0x104] sm:$0xf] %v334_v1  ;;  %v462_v1 = vld [vmem:[%s9469_s14 + $0x810] sm:$0xf] }
  0x64   : > { %337 = vst [vmem:[%s9473_s24 + $0x108] sm:$0xf] %v336_v2  ;;  %v464_v2 = vld [vmem:[%s9469_s14 + $0x820] sm:$0xf] }
  0x65   : > { %339 = vst [vmem:[%s9473_s24 + $0x10c] sm:$0xf] %v338_v3  ;;  %v466_v3 = vld [vmem:[%s9469_s14 + $0x830] sm:$0xf] }
  0x66   : > { %341 = vst [vmem:[%s9473_s24 + $0x110] sm:$0xf] %v340_v4  ;;  %v468_v4 = vld [vmem:[%s9469_s14 + $0x840] sm:$0xf] }
  0x67   : > { %343 = vst [vmem:[%s9473_s24 + $0x114] sm:$0xf] %v342_v5  ;;  %v470_v5 = vld [vmem:[%s9469_s14 + $0x850] sm:$0xf] }
  0x68   : > { %345 = vst [vmem:[%s9473_s24 + $0x118] sm:$0xf] %v344_v6  ;;  %v472_v6 = vld [vmem:[%s9469_s14 + $0x860] sm:$0xf] }
  0x69   : > { %347 = vst [vmem:[%s9473_s24 + $0x11c] sm:$0xf] %v346_v7  ;;  %v474_v7 = vld [vmem:[%s9469_s14 + $0x870] sm:$0xf] }
  0x6a   : > { %349 = vst [vmem:[%s9473_s24 + $0x120] sm:$0xf] %v348_v8  ;;  %v476_v8 = vld [vmem:[%s9469_s14 + $0x880] sm:$0xf] }
  0x6b   : > { %351 = vst [vmem:[%s9473_s24 + $0x124] sm:$0xf] %v350_v9  ;;  %v478_v9 = vld [vmem:[%s9469_s14 + $0x890] sm:$0xf] }
  0x6c   : > { %353 = vst [vmem:[%s9473_s24 + $0x128] sm:$0xf] %v352_v10  ;;  %v480_v10 = vld [vmem:[%s9469_s14 + $0x8a0] sm:$0xf] }
  0x6d   : > { %355 = vst [vmem:[%s9473_s24 + $0x12c] sm:$0xf] %v354_v11  ;;  %v482_v11 = vld [vmem:[%s9469_s14 + $0x8b0] sm:$0xf] }
  0x6e   : > { %357 = vst [vmem:[%s9473_s24 + $0x130] sm:$0xf] %v356_v12  ;;  %v484_v12 = vld [vmem:[%s9469_s14 + $0x8c0] sm:$0xf] }
  0x6f   : > { %359 = vst [vmem:[%s9473_s24 + $0x134] sm:$0xf] %v358_v13  ;;  %v486_v13 = vld [vmem:[%s9469_s14 + $0x8d0] sm:$0xf] }
  0x70   : > { %361 = vst [vmem:[%s9473_s24 + $0x138] sm:$0xf] %v360_v14  ;;  %v488_v14 = vld [vmem:[%s9469_s14 + $0x8e0] sm:$0xf] }
  0x71   : > { %363 = vst [vmem:[%s9473_s24 + $0x13c] sm:$0xf] %v362_v15  ;;  %v490_v15 = vld [vmem:[%s9469_s14 + $0x8f0] sm:$0xf] }
  0x72   : > { %365 = vst [vmem:[%s9473_s24 + $0x140] sm:$0xf] %v364_v16  ;;  %v492_v16 = vld [vmem:[%s9469_s14 + $0x900] sm:$0xf] }
  0x73   : > { %367 = vst [vmem:[%s9473_s24 + $0x144] sm:$0xf] %v366_v17  ;;  %v494_v17 = vld [vmem:[%s9469_s14 + $0x910] sm:$0xf] }
  0x74   : > { %369 = vst [vmem:[%s9473_s24 + $0x148] sm:$0xf] %v368_v18  ;;  %v496_v18 = vld [vmem:[%s9469_s14 + $0x920] sm:$0xf] }
  0x75   : > { %371 = vst [vmem:[%s9473_s24 + $0x14c] sm:$0xf] %v370_v19  ;;  %v498_v19 = vld [vmem:[%s9469_s14 + $0x930] sm:$0xf] }
  0x76   : > { %373 = vst [vmem:[%s9473_s24 + $0x150] sm:$0xf] %v372_v20  ;;  %v500_v20 = vld [vmem:[%s9469_s14 + $0x940] sm:$0xf] }
  0x77   : > { %375 = vst [vmem:[%s9473_s24 + $0x154] sm:$0xf] %v374_v21  ;;  %v502_v21 = vld [vmem:[%s9469_s14 + $0x950] sm:$0xf] }
  0x78   : > { %377 = vst [vmem:[%s9473_s24 + $0x158] sm:$0xf] %v376_v22  ;;  %v504_v22 = vld [vmem:[%s9469_s14 + $0x960] sm:$0xf] }
  0x79   : > { %379 = vst [vmem:[%s9473_s24 + $0x15c] sm:$0xf] %v378_v23  ;;  %v506_v23 = vld [vmem:[%s9469_s14 + $0x970] sm:$0xf] }
  0x7a   : > { %381 = vst [vmem:[%s9473_s24 + $0x160] sm:$0xf] %v380_v24  ;;  %v508_v24 = vld [vmem:[%s9469_s14 + $0x980] sm:$0xf] }
  0x7b   : > { %383 = vst [vmem:[%s9473_s24 + $0x164] sm:$0xf] %v382_v25  ;;  %v510_v25 = vld [vmem:[%s9469_s14 + $0x990] sm:$0xf] }
  0x7c   : > { %385 = vst [vmem:[%s9473_s24 + $0x168] sm:$0xf] %v384_v26  ;;  %v512_v26 = vld [vmem:[%s9469_s14 + $0x9a0] sm:$0xf] }
  0x7d   : > { %387 = vst [vmem:[%s9473_s24 + $0x16c] sm:$0xf] %v386_v27  ;;  %v514_v27 = vld [vmem:[%s9469_s14 + $0x9b0] sm:$0xf] }
  0x7e   : > { %389 = vst [vmem:[%s9473_s24 + $0x170] sm:$0xf] %v388_v28  ;;  %v516_v28 = vld [vmem:[%s9469_s14 + $0x9c0] sm:$0xf] }
  0x7f   : > { %391 = vst [vmem:[%s9473_s24 + $0x174] sm:$0xf] %v390_v29  ;;  %v518_v29 = vld [vmem:[%s9469_s14 + $0x9d0] sm:$0xf] }
  0x80   : > { %393 = vst [vmem:[%s9473_s24 + $0x178] sm:$0xf] %v392_v30  ;;  %v520_v30 = vld [vmem:[%s9469_s14 + $0x9e0] sm:$0xf] }
  0x81   : > { %395 = vst [vmem:[%s9473_s24 + $0x17c] sm:$0xf] %v394_v31  ;;  %v522_v31 = vld [vmem:[%s9469_s14 + $0x9f0] sm:$0xf] }
  0x82   : > { %397 = vst [vmem:[%s9473_s24 + $0x180] sm:$0xf] %v396_v32  ;;  %v524_v32 = vld [vmem:[%s9469_s14 + $0xa00] sm:$0xf] }
  0x83   : > { %399 = vst [vmem:[%s9473_s24 + $0x184] sm:$0xf] %v398_v33  ;;  %v526_v33 = vld [vmem:[%s9469_s14 + $0xa10] sm:$0xf] }
  0x84   : > { %401 = vst [vmem:[%s9473_s24 + $0x188] sm:$0xf] %v400_v34  ;;  %v528_v34 = vld [vmem:[%s9469_s14 + $0xa20] sm:$0xf] }
  0x85   : > { %403 = vst [vmem:[%s9473_s24 + $0x18c] sm:$0xf] %v402_v35  ;;  %v530_v35 = vld [vmem:[%s9469_s14 + $0xa30] sm:$0xf] }
  0x86   : > { %405 = vst [vmem:[%s9473_s24 + $0x190] sm:$0xf] %v404_v36  ;;  %v532_v36 = vld [vmem:[%s9469_s14 + $0xa40] sm:$0xf] }
  0x87   : > { %407 = vst [vmem:[%s9473_s24 + $0x194] sm:$0xf] %v406_v37  ;;  %v534_v37 = vld [vmem:[%s9469_s14 + $0xa50] sm:$0xf] }
  0x88   : > { %409 = vst [vmem:[%s9473_s24 + $0x198] sm:$0xf] %v408_v38  ;;  %v536_v38 = vld [vmem:[%s9469_s14 + $0xa60] sm:$0xf] }
  0x89   : > { %411 = vst [vmem:[%s9473_s24 + $0x19c] sm:$0xf] %v410_v39  ;;  %v538_v39 = vld [vmem:[%s9469_s14 + $0xa70] sm:$0xf] }
  0x8a   : > { %413 = vst [vmem:[%s9473_s24 + $0x1a0] sm:$0xf] %v412_v40  ;;  %v540_v40 = vld [vmem:[%s9469_s14 + $0xa80] sm:$0xf] }
  0x8b   : > { %415 = vst [vmem:[%s9473_s24 + $0x1a4] sm:$0xf] %v414_v41  ;;  %v542_v41 = vld [vmem:[%s9469_s14 + $0xa90] sm:$0xf] }
  0x8c   : > { %417 = vst [vmem:[%s9473_s24 + $0x1a8] sm:$0xf] %v416_v42  ;;  %v544_v42 = vld [vmem:[%s9469_s14 + $0xaa0] sm:$0xf] }
  0x8d   : > { %419 = vst [vmem:[%s9473_s24 + $0x1ac] sm:$0xf] %v418_v43  ;;  %v546_v43 = vld [vmem:[%s9469_s14 + $0xab0] sm:$0xf] }
  0x8e   : > { %421 = vst [vmem:[%s9473_s24 + $0x1b0] sm:$0xf] %v420_v44  ;;  %v548_v44 = vld [vmem:[%s9469_s14 + $0xac0] sm:$0xf] }
  0x8f   : > { %423 = vst [vmem:[%s9473_s24 + $0x1b4] sm:$0xf] %v422_v45  ;;  %v550_v45 = vld [vmem:[%s9469_s14 + $0xad0] sm:$0xf] }
  0x90   : > { %425 = vst [vmem:[%s9473_s24 + $0x1b8] sm:$0xf] %v424_v46  ;;  %v552_v46 = vld [vmem:[%s9469_s14 + $0xae0] sm:$0xf] }
  0x91   : > { %427 = vst [vmem:[%s9473_s24 + $0x1bc] sm:$0xf] %v426_v47  ;;  %v554_v47 = vld [vmem:[%s9469_s14 + $0xaf0] sm:$0xf] }
  0x92   : > { %429 = vst [vmem:[%s9473_s24 + $0x1c0] sm:$0xf] %v428_v48  ;;  %v556_v48 = vld [vmem:[%s9469_s14 + $0xb00] sm:$0xf] }
  0x93   : > { %431 = vst [vmem:[%s9473_s24 + $0x1c4] sm:$0xf] %v430_v49  ;;  %v558_v49 = vld [vmem:[%s9469_s14 + $0xb10] sm:$0xf] }
  0x94   : > { %433 = vst [vmem:[%s9473_s24 + $0x1c8] sm:$0xf] %v432_v50  ;;  %v560_v50 = vld [vmem:[%s9469_s14 + $0xb20] sm:$0xf] }
  0x95   : > { %435 = vst [vmem:[%s9473_s24 + $0x1cc] sm:$0xf] %v434_v51  ;;  %v562_v51 = vld [vmem:[%s9469_s14 + $0xb30] sm:$0xf] }
  0x96   : > { %437 = vst [vmem:[%s9473_s24 + $0x1d0] sm:$0xf] %v436_v52  ;;  %v564_v52 = vld [vmem:[%s9469_s14 + $0xb40] sm:$0xf] }
  0x97   : > { %439 = vst [vmem:[%s9473_s24 + $0x1d4] sm:$0xf] %v438_v53  ;;  %v566_v53 = vld [vmem:[%s9469_s14 + $0xb50] sm:$0xf] }
  0x98   : > { %441 = vst [vmem:[%s9473_s24 + $0x1d8] sm:$0xf] %v440_v54  ;;  %v568_v54 = vld [vmem:[%s9469_s14 + $0xb60] sm:$0xf] }
  0x99   : > { %443 = vst [vmem:[%s9473_s24 + $0x1dc] sm:$0xf] %v442_v55  ;;  %v570_v55 = vld [vmem:[%s9469_s14 + $0xb70] sm:$0xf] }
  0x9a   : > { %445 = vst [vmem:[%s9473_s24 + $0x1e0] sm:$0xf] %v444_v56  ;;  %v572_v56 = vld [vmem:[%s9469_s14 + $0xb80] sm:$0xf] }
  0x9b   : > { %447 = vst [vmem:[%s9473_s24 + $0x1e4] sm:$0xf] %v446_v57  ;;  %v574_v57 = vld [vmem:[%s9469_s14 + $0xb90] sm:$0xf] }
  0x9c   : > { %449 = vst [vmem:[%s9473_s24 + $0x1e8] sm:$0xf] %v448_v58  ;;  %v576_v58 = vld [vmem:[%s9469_s14 + $0xba0] sm:$0xf] }
  0x9d   : > { %451 = vst [vmem:[%s9473_s24 + $0x1ec] sm:$0xf] %v450_v59  ;;  %v578_v59 = vld [vmem:[%s9469_s14 + $0xbb0] sm:$0xf] }
  0x9e   : > { %453 = vst [vmem:[%s9473_s24 + $0x1f0] sm:$0xf] %v452_v60  ;;  %v580_v60 = vld [vmem:[%s9469_s14 + $0xbc0] sm:$0xf] }
  0x9f   : > { %455 = vst [vmem:[%s9473_s24 + $0x1f4] sm:$0xf] %v454_v61  ;;  %v582_v61 = vld [vmem:[%s9469_s14 + $0xbd0] sm:$0xf] }
  0xa0   : > { %457 = vst [vmem:[%s9473_s24 + $0x1f8] sm:$0xf] %v456_v62  ;;  %v584_v62 = vld [vmem:[%s9469_s14 + $0xbe0] sm:$0xf] }
  0xa1   : > { %459 = vst [vmem:[%s9473_s24 + $0x1fc] sm:$0xf] %v458_v63  ;;  %v586_v63 = vld [vmem:[%s9469_s14 + $0xbf0] sm:$0xf] }
  0xa2   : > { %461 = vst [vmem:[%s9473_s24 + $0x200] sm:$0xf] %v460_v0  ;;  %v588_v0 = vld [vmem:[%s9469_s14 + $0xc00] sm:$0xf] }
  0xa3   : > { %463 = vst [vmem:[%s9473_s24 + $0x204] sm:$0xf] %v462_v1  ;;  %v590_v1 = vld [vmem:[%s9469_s14 + $0xc10] sm:$0xf] }
  0xa4   : > { %465 = vst [vmem:[%s9473_s24 + $0x208] sm:$0xf] %v464_v2  ;;  %v592_v2 = vld [vmem:[%s9469_s14 + $0xc20] sm:$0xf] }
  0xa5   : > { %467 = vst [vmem:[%s9473_s24 + $0x20c] sm:$0xf] %v466_v3  ;;  %v594_v3 = vld [vmem:[%s9469_s14 + $0xc30] sm:$0xf] }
  0xa6   : > { %469 = vst [vmem:[%s9473_s24 + $0x210] sm:$0xf] %v468_v4  ;;  %v596_v4 = vld [vmem:[%s9469_s14 + $0xc40] sm:$0xf] }
  0xa7   : > { %471 = vst [vmem:[%s9473_s24 + $0x214] sm:$0xf] %v470_v5  ;;  %v598_v5 = vld [vmem:[%s9469_s14 + $0xc50] sm:$0xf] }
  0xa8   : > { %473 = vst [vmem:[%s9473_s24 + $0x218] sm:$0xf] %v472_v6  ;;  %v600_v6 = vld [vmem:[%s9469_s14 + $0xc60] sm:$0xf] }
  0xa9   : > { %475 = vst [vmem:[%s9473_s24 + $0x21c] sm:$0xf] %v474_v7  ;;  %v602_v7 = vld [vmem:[%s9469_s14 + $0xc70] sm:$0xf] }
  0xaa   : > { %477 = vst [vmem:[%s9473_s24 + $0x220] sm:$0xf] %v476_v8  ;;  %v604_v8 = vld [vmem:[%s9469_s14 + $0xc80] sm:$0xf] }
  0xab   : > { %479 = vst [vmem:[%s9473_s24 + $0x224] sm:$0xf] %v478_v9  ;;  %v606_v9 = vld [vmem:[%s9469_s14 + $0xc90] sm:$0xf] }
  0xac   : > { %481 = vst [vmem:[%s9473_s24 + $0x228] sm:$0xf] %v480_v10  ;;  %v608_v10 = vld [vmem:[%s9469_s14 + $0xca0] sm:$0xf] }
  0xad   : > { %483 = vst [vmem:[%s9473_s24 + $0x22c] sm:$0xf] %v482_v11  ;;  %v610_v11 = vld [vmem:[%s9469_s14 + $0xcb0] sm:$0xf] }
  0xae   : > { %485 = vst [vmem:[%s9473_s24 + $0x230] sm:$0xf] %v484_v12  ;;  %v612_v12 = vld [vmem:[%s9469_s14 + $0xcc0] sm:$0xf] }
  0xaf   : > { %487 = vst [vmem:[%s9473_s24 + $0x234] sm:$0xf] %v486_v13  ;;  %v614_v13 = vld [vmem:[%s9469_s14 + $0xcd0] sm:$0xf] }
  0xb0   : > { %489 = vst [vmem:[%s9473_s24 + $0x238] sm:$0xf] %v488_v14  ;;  %v616_v14 = vld [vmem:[%s9469_s14 + $0xce0] sm:$0xf] }
  0xb1   : > { %491 = vst [vmem:[%s9473_s24 + $0x23c] sm:$0xf] %v490_v15  ;;  %v618_v15 = vld [vmem:[%s9469_s14 + $0xcf0] sm:$0xf] }
  0xb2   : > { %493 = vst [vmem:[%s9473_s24 + $0x240] sm:$0xf] %v492_v16  ;;  %v620_v16 = vld [vmem:[%s9469_s14 + $0xd00] sm:$0xf] }
  0xb3   : > { %495 = vst [vmem:[%s9473_s24 + $0x244] sm:$0xf] %v494_v17  ;;  %v622_v17 = vld [vmem:[%s9469_s14 + $0xd10] sm:$0xf] }
  0xb4   : > { %497 = vst [vmem:[%s9473_s24 + $0x248] sm:$0xf] %v496_v18  ;;  %v624_v18 = vld [vmem:[%s9469_s14 + $0xd20] sm:$0xf] }
  0xb5   : > { %499 = vst [vmem:[%s9473_s24 + $0x24c] sm:$0xf] %v498_v19  ;;  %v626_v19 = vld [vmem:[%s9469_s14 + $0xd30] sm:$0xf] }
  0xb6   : > { %501 = vst [vmem:[%s9473_s24 + $0x250] sm:$0xf] %v500_v20  ;;  %v628_v20 = vld [vmem:[%s9469_s14 + $0xd40] sm:$0xf] }
  0xb7   : > { %503 = vst [vmem:[%s9473_s24 + $0x254] sm:$0xf] %v502_v21  ;;  %v630_v21 = vld [vmem:[%s9469_s14 + $0xd50] sm:$0xf] }
  0xb8   : > { %505 = vst [vmem:[%s9473_s24 + $0x258] sm:$0xf] %v504_v22  ;;  %v632_v22 = vld [vmem:[%s9469_s14 + $0xd60] sm:$0xf] }
  0xb9   : > { %507 = vst [vmem:[%s9473_s24 + $0x25c] sm:$0xf] %v506_v23  ;;  %v634_v23 = vld [vmem:[%s9469_s14 + $0xd70] sm:$0xf] }
  0xba   : > { %509 = vst [vmem:[%s9473_s24 + $0x260] sm:$0xf] %v508_v24  ;;  %v636_v24 = vld [vmem:[%s9469_s14 + $0xd80] sm:$0xf] }
  0xbb   : > { %511 = vst [vmem:[%s9473_s24 + $0x264] sm:$0xf] %v510_v25  ;;  %v638_v25 = vld [vmem:[%s9469_s14 + $0xd90] sm:$0xf] }
  0xbc   : > { %513 = vst [vmem:[%s9473_s24 + $0x268] sm:$0xf] %v512_v26  ;;  %v640_v26 = vld [vmem:[%s9469_s14 + $0xda0] sm:$0xf] }
  0xbd   : > { %515 = vst [vmem:[%s9473_s24 + $0x26c] sm:$0xf] %v514_v27  ;;  %v642_v27 = vld [vmem:[%s9469_s14 + $0xdb0] sm:$0xf] }
  0xbe   : > { %517 = vst [vmem:[%s9473_s24 + $0x270] sm:$0xf] %v516_v28  ;;  %v644_v28 = vld [vmem:[%s9469_s14 + $0xdc0] sm:$0xf] }
  0xbf   : > { %519 = vst [vmem:[%s9473_s24 + $0x274] sm:$0xf] %v518_v29  ;;  %v646_v29 = vld [vmem:[%s9469_s14 + $0xdd0] sm:$0xf] }
  0xc0   : > { %521 = vst [vmem:[%s9473_s24 + $0x278] sm:$0xf] %v520_v30  ;;  %v648_v30 = vld [vmem:[%s9469_s14 + $0xde0] sm:$0xf] }
  0xc1   : > { %523 = vst [vmem:[%s9473_s24 + $0x27c] sm:$0xf] %v522_v31  ;;  %v650_v31 = vld [vmem:[%s9469_s14 + $0xdf0] sm:$0xf] }
  0xc2   : > { %525 = vst [vmem:[%s9473_s24 + $0x280] sm:$0xf] %v524_v32  ;;  %v652_v32 = vld [vmem:[%s9469_s14 + $0xe00] sm:$0xf] }
  0xc3   : > { %527 = vst [vmem:[%s9473_s24 + $0x284] sm:$0xf] %v526_v33  ;;  %v654_v33 = vld [vmem:[%s9469_s14 + $0xe10] sm:$0xf] }
  0xc4   : > { %529 = vst [vmem:[%s9473_s24 + $0x288] sm:$0xf] %v528_v34  ;;  %v656_v34 = vld [vmem:[%s9469_s14 + $0xe20] sm:$0xf] }
  0xc5   : > { %531 = vst [vmem:[%s9473_s24 + $0x28c] sm:$0xf] %v530_v35  ;;  %v658_v35 = vld [vmem:[%s9469_s14 + $0xe30] sm:$0xf] }
  0xc6   : > { %533 = vst [vmem:[%s9473_s24 + $0x290] sm:$0xf] %v532_v36  ;;  %v660_v36 = vld [vmem:[%s9469_s14 + $0xe40] sm:$0xf] }
  0xc7   : > { %535 = vst [vmem:[%s9473_s24 + $0x294] sm:$0xf] %v534_v37  ;;  %v662_v37 = vld [vmem:[%s9469_s14 + $0xe50] sm:$0xf] }
  0xc8   : > { %537 = vst [vmem:[%s9473_s24 + $0x298] sm:$0xf] %v536_v38  ;;  %v664_v38 = vld [vmem:[%s9469_s14 + $0xe60] sm:$0xf] }
  0xc9   : > { %539 = vst [vmem:[%s9473_s24 + $0x29c] sm:$0xf] %v538_v39  ;;  %v666_v39 = vld [vmem:[%s9469_s14 + $0xe70] sm:$0xf] }
  0xca   : > { %541 = vst [vmem:[%s9473_s24 + $0x2a0] sm:$0xf] %v540_v40  ;;  %v668_v40 = vld [vmem:[%s9469_s14 + $0xe80] sm:$0xf] }
  0xcb   : > { %543 = vst [vmem:[%s9473_s24 + $0x2a4] sm:$0xf] %v542_v41  ;;  %v670_v41 = vld [vmem:[%s9469_s14 + $0xe90] sm:$0xf] }
  0xcc   : > { %545 = vst [vmem:[%s9473_s24 + $0x2a8] sm:$0xf] %v544_v42  ;;  %v672_v42 = vld [vmem:[%s9469_s14 + $0xea0] sm:$0xf] }
  0xcd   : > { %547 = vst [vmem:[%s9473_s24 + $0x2ac] sm:$0xf] %v546_v43  ;;  %v674_v43 = vld [vmem:[%s9469_s14 + $0xeb0] sm:$0xf] }
  0xce   : > { %549 = vst [vmem:[%s9473_s24 + $0x2b0] sm:$0xf] %v548_v44  ;;  %v676_v44 = vld [vmem:[%s9469_s14 + $0xec0] sm:$0xf] }
  0xcf   : > { %551 = vst [vmem:[%s9473_s24 + $0x2b4] sm:$0xf] %v550_v45  ;;  %v678_v45 = vld [vmem:[%s9469_s14 + $0xed0] sm:$0xf] }
  0xd0   : > { %553 = vst [vmem:[%s9473_s24 + $0x2b8] sm:$0xf] %v552_v46  ;;  %v680_v46 = vld [vmem:[%s9469_s14 + $0xee0] sm:$0xf] }
  0xd1   : > { %555 = vst [vmem:[%s9473_s24 + $0x2bc] sm:$0xf] %v554_v47  ;;  %v682_v47 = vld [vmem:[%s9469_s14 + $0xef0] sm:$0xf] }
  0xd2   : > { %557 = vst [vmem:[%s9473_s24 + $0x2c0] sm:$0xf] %v556_v48  ;;  %v684_v48 = vld [vmem:[%s9469_s14 + $0xf00] sm:$0xf] }
  0xd3   : > { %559 = vst [vmem:[%s9473_s24 + $0x2c4] sm:$0xf] %v558_v49  ;;  %v686_v49 = vld [vmem:[%s9469_s14 + $0xf10] sm:$0xf] }
  0xd4   : > { %561 = vst [vmem:[%s9473_s24 + $0x2c8] sm:$0xf] %v560_v50  ;;  %v688_v50 = vld [vmem:[%s9469_s14 + $0xf20] sm:$0xf] }
  0xd5   : > { %563 = vst [vmem:[%s9473_s24 + $0x2cc] sm:$0xf] %v562_v51  ;;  %v690_v51 = vld [vmem:[%s9469_s14 + $0xf30] sm:$0xf] }
  0xd6   : > { %565 = vst [vmem:[%s9473_s24 + $0x2d0] sm:$0xf] %v564_v52  ;;  %v692_v52 = vld [vmem:[%s9469_s14 + $0xf40] sm:$0xf] }
  0xd7   : > { %567 = vst [vmem:[%s9473_s24 + $0x2d4] sm:$0xf] %v566_v53  ;;  %v694_v53 = vld [vmem:[%s9469_s14 + $0xf50] sm:$0xf] }
  0xd8   : > { %569 = vst [vmem:[%s9473_s24 + $0x2d8] sm:$0xf] %v568_v54  ;;  %v696_v54 = vld [vmem:[%s9469_s14 + $0xf60] sm:$0xf] }
  0xd9   : > { %571 = vst [vmem:[%s9473_s24 + $0x2dc] sm:$0xf] %v570_v55  ;;  %v698_v55 = vld [vmem:[%s9469_s14 + $0xf70] sm:$0xf] }
  0xda   : > { %573 = vst [vmem:[%s9473_s24 + $0x2e0] sm:$0xf] %v572_v56  ;;  %v700_v56 = vld [vmem:[%s9469_s14 + $0xf80] sm:$0xf] }
  0xdb   : > { %575 = vst [vmem:[%s9473_s24 + $0x2e4] sm:$0xf] %v574_v57  ;;  %v702_v57 = vld [vmem:[%s9469_s14 + $0xf90] sm:$0xf] }
  0xdc   : > { %577 = vst [vmem:[%s9473_s24 + $0x2e8] sm:$0xf] %v576_v58  ;;  %v704_v58 = vld [vmem:[%s9469_s14 + $0xfa0] sm:$0xf] }
  0xdd   : > { %579 = vst [vmem:[%s9473_s24 + $0x2ec] sm:$0xf] %v578_v59  ;;  %v706_v59 = vld [vmem:[%s9469_s14 + $0xfb0] sm:$0xf] }
  0xde   : > { %581 = vst [vmem:[%s9473_s24 + $0x2f0] sm:$0xf] %v580_v60  ;;  %v708_v60 = vld [vmem:[%s9469_s14 + $0xfc0] sm:$0xf] }
  0xdf   : > { %583 = vst [vmem:[%s9473_s24 + $0x2f4] sm:$0xf] %v582_v61  ;;  %v710_v61 = vld [vmem:[%s9469_s14 + $0xfd0] sm:$0xf] }
  0xe0   : > { %585 = vst [vmem:[%s9473_s24 + $0x2f8] sm:$0xf] %v584_v62  ;;  %v712_v62 = vld [vmem:[%s9469_s14 + $0xfe0] sm:$0xf] }
  0xe1   : > { %587 = vst [vmem:[%s9473_s24 + $0x2fc] sm:$0xf] %v586_v63  ;;  %v714_v63 = vld [vmem:[%s9469_s14 + $0xff0] sm:$0xf] }
  0xe2   : > { %589 = vst [vmem:[%s9473_s24 + $0x300] sm:$0xf] %v588_v0  ;;  %v716_v0 = vld [vmem:[%s9469_s14 + $0x1000] sm:$0xf] }
  0xe3   : > { %591 = vst [vmem:[%s9473_s24 + $0x304] sm:$0xf] %v590_v1  ;;  %v718_v1 = vld [vmem:[%s9469_s14 + $0x1010] sm:$0xf] }
  0xe4   : > { %593 = vst [vmem:[%s9473_s24 + $0x308] sm:$0xf] %v592_v2  ;;  %v720_v2 = vld [vmem:[%s9469_s14 + $0x1020] sm:$0xf] }
  0xe5   : > { %595 = vst [vmem:[%s9473_s24 + $0x30c] sm:$0xf] %v594_v3  ;;  %v722_v3 = vld [vmem:[%s9469_s14 + $0x1030] sm:$0xf] }
  0xe6   : > { %597 = vst [vmem:[%s9473_s24 + $0x310] sm:$0xf] %v596_v4  ;;  %v724_v4 = vld [vmem:[%s9469_s14 + $0x1040] sm:$0xf] }
  0xe7   : > { %599 = vst [vmem:[%s9473_s24 + $0x314] sm:$0xf] %v598_v5  ;;  %v726_v5 = vld [vmem:[%s9469_s14 + $0x1050] sm:$0xf] }
  0xe8   : > { %601 = vst [vmem:[%s9473_s24 + $0x318] sm:$0xf] %v600_v6  ;;  %v728_v6 = vld [vmem:[%s9469_s14 + $0x1060] sm:$0xf] }
  0xe9   : > { %603 = vst [vmem:[%s9473_s24 + $0x31c] sm:$0xf] %v602_v7  ;;  %v730_v7 = vld [vmem:[%s9469_s14 + $0x1070] sm:$0xf] }
  0xea   : > { %605 = vst [vmem:[%s9473_s24 + $0x320] sm:$0xf] %v604_v8  ;;  %v732_v8 = vld [vmem:[%s9469_s14 + $0x1080] sm:$0xf] }
  0xeb   : > { %607 = vst [vmem:[%s9473_s24 + $0x324] sm:$0xf] %v606_v9  ;;  %v734_v9 = vld [vmem:[%s9469_s14 + $0x1090] sm:$0xf] }
  0xec   : > { %609 = vst [vmem:[%s9473_s24 + $0x328] sm:$0xf] %v608_v10  ;;  %v736_v10 = vld [vmem:[%s9469_s14 + $0x10a0] sm:$0xf] }
  0xed   : > { %611 = vst [vmem:[%s9473_s24 + $0x32c] sm:$0xf] %v610_v11  ;;  %v738_v11 = vld [vmem:[%s9469_s14 + $0x10b0] sm:$0xf] }
  0xee   : > { %613 = vst [vmem:[%s9473_s24 + $0x330] sm:$0xf] %v612_v12  ;;  %v740_v12 = vld [vmem:[%s9469_s14 + $0x10c0] sm:$0xf] }
  0xef   : > { %615 = vst [vmem:[%s9473_s24 + $0x334] sm:$0xf] %v614_v13  ;;  %v742_v13 = vld [vmem:[%s9469_s14 + $0x10d0] sm:$0xf] }
  0xf0   : > { %617 = vst [vmem:[%s9473_s24 + $0x338] sm:$0xf] %v616_v14  ;;  %v744_v14 = vld [vmem:[%s9469_s14 + $0x10e0] sm:$0xf] }
  0xf1   : > { %619 = vst [vmem:[%s9473_s24 + $0x33c] sm:$0xf] %v618_v15  ;;  %v746_v15 = vld [vmem:[%s9469_s14 + $0x10f0] sm:$0xf] }
  0xf2   : > { %621 = vst [vmem:[%s9473_s24 + $0x340] sm:$0xf] %v620_v16  ;;  %v748_v16 = vld [vmem:[%s9469_s14 + $0x1100] sm:$0xf] }
  0xf3   : > { %623 = vst [vmem:[%s9473_s24 + $0x344] sm:$0xf] %v622_v17  ;;  %v750_v17 = vld [vmem:[%s9469_s14 + $0x1110] sm:$0xf] }
  0xf4   : > { %625 = vst [vmem:[%s9473_s24 + $0x348] sm:$0xf] %v624_v18  ;;  %v752_v18 = vld [vmem:[%s9469_s14 + $0x1120] sm:$0xf] }
  0xf5   : > { %627 = vst [vmem:[%s9473_s24 + $0x34c] sm:$0xf] %v626_v19  ;;  %v754_v19 = vld [vmem:[%s9469_s14 + $0x1130] sm:$0xf] }
  0xf6   : > { %629 = vst [vmem:[%s9473_s24 + $0x350] sm:$0xf] %v628_v20  ;;  %v756_v20 = vld [vmem:[%s9469_s14 + $0x1140] sm:$0xf] }
  0xf7   : > { %631 = vst [vmem:[%s9473_s24 + $0x354] sm:$0xf] %v630_v21  ;;  %v758_v21 = vld [vmem:[%s9469_s14 + $0x1150] sm:$0xf] }
  0xf8   : > { %633 = vst [vmem:[%s9473_s24 + $0x358] sm:$0xf] %v632_v22  ;;  %v760_v22 = vld [vmem:[%s9469_s14 + $0x1160] sm:$0xf] }
  0xf9   : > { %635 = vst [vmem:[%s9473_s24 + $0x35c] sm:$0xf] %v634_v23  ;;  %v762_v23 = vld [vmem:[%s9469_s14 + $0x1170] sm:$0xf] }
  0xfa   : > { %637 = vst [vmem:[%s9473_s24 + $0x360] sm:$0xf] %v636_v24  ;;  %v764_v24 = vld [vmem:[%s9469_s14 + $0x1180] sm:$0xf] }
  0xfb   : > { %639 = vst [vmem:[%s9473_s24 + $0x364] sm:$0xf] %v638_v25  ;;  %v766_v25 = vld [vmem:[%s9469_s14 + $0x1190] sm:$0xf] }
  0xfc   : > { %641 = vst [vmem:[%s9473_s24 + $0x368] sm:$0xf] %v640_v26  ;;  %v768_v26 = vld [vmem:[%s9469_s14 + $0x11a0] sm:$0xf] }
  0xfd   : > { %643 = vst [vmem:[%s9473_s24 + $0x36c] sm:$0xf] %v642_v27  ;;  %v770_v27 = vld [vmem:[%s9469_s14 + $0x11b0] sm:$0xf] }
  0xfe   : > { %645 = vst [vmem:[%s9473_s24 + $0x370] sm:$0xf] %v644_v28  ;;  %v772_v28 = vld [vmem:[%s9469_s14 + $0x11c0] sm:$0xf] }
  0xff   : > { %647 = vst [vmem:[%s9473_s24 + $0x374] sm:$0xf] %v646_v29  ;;  %v774_v29 = vld [vmem:[%s9469_s14 + $0x11d0] sm:$0xf] }
 0x100   : > { %649 = vst [vmem:[%s9473_s24 + $0x378] sm:$0xf] %v648_v30  ;;  %v776_v30 = vld [vmem:[%s9469_s14 + $0x11e0] sm:$0xf] }
 0x101   : > { %651 = vst [vmem:[%s9473_s24 + $0x37c] sm:$0xf] %v650_v31  ;;  %v778_v31 = vld [vmem:[%s9469_s14 + $0x11f0] sm:$0xf] }
 0x102   : > { %653 = vst [vmem:[%s9473_s24 + $0x380] sm:$0xf] %v652_v32  ;;  %v780_v32 = vld [vmem:[%s9469_s14 + $0x1200] sm:$0xf] }
 0x103   : > { %655 = vst [vmem:[%s9473_s24 + $0x384] sm:$0xf] %v654_v33  ;;  %v782_v33 = vld [vmem:[%s9469_s14 + $0x1210] sm:$0xf] }
 0x104   : > { %657 = vst [vmem:[%s9473_s24 + $0x388] sm:$0xf] %v656_v34  ;;  %v784_v34 = vld [vmem:[%s9469_s14 + $0x1220] sm:$0xf] }
 0x105   : > { %659 = vst [vmem:[%s9473_s24 + $0x38c] sm:$0xf] %v658_v35  ;;  %v786_v35 = vld [vmem:[%s9469_s14 + $0x1230] sm:$0xf] }
 0x106   : > { %661 = vst [vmem:[%s9473_s24 + $0x390] sm:$0xf] %v660_v36  ;;  %v788_v36 = vld [vmem:[%s9469_s14 + $0x1240] sm:$0xf] }
 0x107   : > { %663 = vst [vmem:[%s9473_s24 + $0x394] sm:$0xf] %v662_v37  ;;  %v790_v37 = vld [vmem:[%s9469_s14 + $0x1250] sm:$0xf] }
 0x108   : > { %665 = vst [vmem:[%s9473_s24 + $0x398] sm:$0xf] %v664_v38  ;;  %v792_v38 = vld [vmem:[%s9469_s14 + $0x1260] sm:$0xf] }
 0x109   : > { %667 = vst [vmem:[%s9473_s24 + $0x39c] sm:$0xf] %v666_v39  ;;  %v794_v39 = vld [vmem:[%s9469_s14 + $0x1270] sm:$0xf] }
 0x10a   : > { %669 = vst [vmem:[%s9473_s24 + $0x3a0] sm:$0xf] %v668_v40  ;;  %v796_v40 = vld [vmem:[%s9469_s14 + $0x1280] sm:$0xf] }
 0x10b   : > { %671 = vst [vmem:[%s9473_s24 + $0x3a4] sm:$0xf] %v670_v41  ;;  %v798_v41 = vld [vmem:[%s9469_s14 + $0x1290] sm:$0xf] }
 0x10c   : > { %673 = vst [vmem:[%s9473_s24 + $0x3a8] sm:$0xf] %v672_v42  ;;  %v800_v42 = vld [vmem:[%s9469_s14 + $0x12a0] sm:$0xf] }
 0x10d   : > { %675 = vst [vmem:[%s9473_s24 + $0x3ac] sm:$0xf] %v674_v43  ;;  %v802_v43 = vld [vmem:[%s9469_s14 + $0x12b0] sm:$0xf] }
 0x10e   : > { %677 = vst [vmem:[%s9473_s24 + $0x3b0] sm:$0xf] %v676_v44  ;;  %v804_v44 = vld [vmem:[%s9469_s14 + $0x12c0] sm:$0xf] }
 0x10f   : > { %679 = vst [vmem:[%s9473_s24 + $0x3b4] sm:$0xf] %v678_v45  ;;  %v806_v45 = vld [vmem:[%s9469_s14 + $0x12d0] sm:$0xf] }
 0x110   : > { %681 = vst [vmem:[%s9473_s24 + $0x3b8] sm:$0xf] %v680_v46  ;;  %v808_v46 = vld [vmem:[%s9469_s14 + $0x12e0] sm:$0xf] }
 0x111   : > { %683 = vst [vmem:[%s9473_s24 + $0x3bc] sm:$0xf] %v682_v47  ;;  %v810_v47 = vld [vmem:[%s9469_s14 + $0x12f0] sm:$0xf] }
 0x112   : > { %685 = vst [vmem:[%s9473_s24 + $0x3c0] sm:$0xf] %v684_v48  ;;  %v812_v48 = vld [vmem:[%s9469_s14 + $0x1300] sm:$0xf] }
 0x113   : > { %687 = vst [vmem:[%s9473_s24 + $0x3c4] sm:$0xf] %v686_v49  ;;  %v814_v49 = vld [vmem:[%s9469_s14 + $0x1310] sm:$0xf] }
 0x114   : > { %689 = vst [vmem:[%s9473_s24 + $0x3c8] sm:$0xf] %v688_v50  ;;  %v816_v50 = vld [vmem:[%s9469_s14 + $0x1320] sm:$0xf] }
 0x115   : > { %691 = vst [vmem:[%s9473_s24 + $0x3cc] sm:$0xf] %v690_v51  ;;  %v818_v51 = vld [vmem:[%s9469_s14 + $0x1330] sm:$0xf] }
 0x116   : > { %693 = vst [vmem:[%s9473_s24 + $0x3d0] sm:$0xf] %v692_v52  ;;  %v820_v52 = vld [vmem:[%s9469_s14 + $0x1340] sm:$0xf] }
 0x117   : > { %695 = vst [vmem:[%s9473_s24 + $0x3d4] sm:$0xf] %v694_v53  ;;  %v822_v53 = vld [vmem:[%s9469_s14 + $0x1350] sm:$0xf] }
 0x118   : > { %697 = vst [vmem:[%s9473_s24 + $0x3d8] sm:$0xf] %v696_v54  ;;  %v824_v54 = vld [vmem:[%s9469_s14 + $0x1360] sm:$0xf] }
 0x119   : > { %699 = vst [vmem:[%s9473_s24 + $0x3dc] sm:$0xf] %v698_v55  ;;  %v826_v55 = vld [vmem:[%s9469_s14 + $0x1370] sm:$0xf] }
 0x11a   : > { %701 = vst [vmem:[%s9473_s24 + $0x3e0] sm:$0xf] %v700_v56  ;;  %v828_v56 = vld [vmem:[%s9469_s14 + $0x1380] sm:$0xf] }
 0x11b   : > { %703 = vst [vmem:[%s9473_s24 + $0x3e4] sm:$0xf] %v702_v57  ;;  %v830_v57 = vld [vmem:[%s9469_s14 + $0x1390] sm:$0xf] }
 0x11c   : > { %705 = vst [vmem:[%s9473_s24 + $0x3e8] sm:$0xf] %v704_v58  ;;  %v832_v58 = vld [vmem:[%s9469_s14 + $0x13a0] sm:$0xf] }
 0x11d   : > { %707 = vst [vmem:[%s9473_s24 + $0x3ec] sm:$0xf] %v706_v59  ;;  %v834_v59 = vld [vmem:[%s9469_s14 + $0x13b0] sm:$0xf] }
 0x11e   : > { %709 = vst [vmem:[%s9473_s24 + $0x3f0] sm:$0xf] %v708_v60  ;;  %v836_v60 = vld [vmem:[%s9469_s14 + $0x13c0] sm:$0xf] }
 0x11f   : > { %711 = vst [vmem:[%s9473_s24 + $0x3f4] sm:$0xf] %v710_v61  ;;  %v838_v61 = vld [vmem:[%s9469_s14 + $0x13d0] sm:$0xf] }
 0x120   : > { %713 = vst [vmem:[%s9473_s24 + $0x3f8] sm:$0xf] %v712_v62  ;;  %v840_v62 = vld [vmem:[%s9469_s14 + $0x13e0] sm:$0xf] }
 0x121   : > { %715 = vst [vmem:[%s9473_s24 + $0x3fc] sm:$0xf] %v714_v63  ;;  %v842_v63 = vld [vmem:[%s9469_s14 + $0x13f0] sm:$0xf] }
 0x122   : > { %717 = vst [vmem:[%s9473_s24 + $0x400] sm:$0xf] %v716_v0  ;;  %v844_v0 = vld [vmem:[%s9469_s14 + $0x1400] sm:$0xf] }
 0x123   : > { %719 = vst [vmem:[%s9473_s24 + $0x404] sm:$0xf] %v718_v1  ;;  %v846_v1 = vld [vmem:[%s9469_s14 + $0x1410] sm:$0xf] }
 0x124   : > { %721 = vst [vmem:[%s9473_s24 + $0x408] sm:$0xf] %v720_v2  ;;  %v848_v2 = vld [vmem:[%s9469_s14 + $0x1420] sm:$0xf] }
 0x125   : > { %723 = vst [vmem:[%s9473_s24 + $0x40c] sm:$0xf] %v722_v3  ;;  %v850_v3 = vld [vmem:[%s9469_s14 + $0x1430] sm:$0xf] }
 0x126   : > { %725 = vst [vmem:[%s9473_s24 + $0x410] sm:$0xf] %v724_v4  ;;  %v852_v4 = vld [vmem:[%s9469_s14 + $0x1440] sm:$0xf] }
 0x127   : > { %727 = vst [vmem:[%s9473_s24 + $0x414] sm:$0xf] %v726_v5  ;;  %v854_v5 = vld [vmem:[%s9469_s14 + $0x1450] sm:$0xf] }
 0x128   : > { %729 = vst [vmem:[%s9473_s24 + $0x418] sm:$0xf] %v728_v6  ;;  %v856_v6 = vld [vmem:[%s9469_s14 + $0x1460] sm:$0xf] }
 0x129   : > { %731 = vst [vmem:[%s9473_s24 + $0x41c] sm:$0xf] %v730_v7  ;;  %v858_v7 = vld [vmem:[%s9469_s14 + $0x1470] sm:$0xf] }
 0x12a   : > { %733 = vst [vmem:[%s9473_s24 + $0x420] sm:$0xf] %v732_v8  ;;  %v860_v8 = vld [vmem:[%s9469_s14 + $0x1480] sm:$0xf] }
 0x12b   : > { %735 = vst [vmem:[%s9473_s24 + $0x424] sm:$0xf] %v734_v9  ;;  %v862_v9 = vld [vmem:[%s9469_s14 + $0x1490] sm:$0xf] }
 0x12c   : > { %737 = vst [vmem:[%s9473_s24 + $0x428] sm:$0xf] %v736_v10  ;;  %v864_v10 = vld [vmem:[%s9469_s14 + $0x14a0] sm:$0xf] }
 0x12d   : > { %739 = vst [vmem:[%s9473_s24 + $0x42c] sm:$0xf] %v738_v11  ;;  %v866_v11 = vld [vmem:[%s9469_s14 + $0x14b0] sm:$0xf] }
 0x12e   : > { %741 = vst [vmem:[%s9473_s24 + $0x430] sm:$0xf] %v740_v12  ;;  %v868_v12 = vld [vmem:[%s9469_s14 + $0x14c0] sm:$0xf] }
 0x12f   : > { %743 = vst [vmem:[%s9473_s24 + $0x434] sm:$0xf] %v742_v13  ;;  %v870_v13 = vld [vmem:[%s9469_s14 + $0x14d0] sm:$0xf] }
 0x130   : > { %745 = vst [vmem:[%s9473_s24 + $0x438] sm:$0xf] %v744_v14  ;;  %v872_v14 = vld [vmem:[%s9469_s14 + $0x14e0] sm:$0xf] }
 0x131   : > { %747 = vst [vmem:[%s9473_s24 + $0x43c] sm:$0xf] %v746_v15  ;;  %v874_v15 = vld [vmem:[%s9469_s14 + $0x14f0] sm:$0xf] }
 0x132   : > { %749 = vst [vmem:[%s9473_s24 + $0x440] sm:$0xf] %v748_v16  ;;  %v876_v16 = vld [vmem:[%s9469_s14 + $0x1500] sm:$0xf] }
 0x133   : > { %751 = vst [vmem:[%s9473_s24 + $0x444] sm:$0xf] %v750_v17  ;;  %v878_v17 = vld [vmem:[%s9469_s14 + $0x1510] sm:$0xf] }
 0x134   : > { %753 = vst [vmem:[%s9473_s24 + $0x448] sm:$0xf] %v752_v18  ;;  %v880_v18 = vld [vmem:[%s9469_s14 + $0x1520] sm:$0xf] }
 0x135   : > { %755 = vst [vmem:[%s9473_s24 + $0x44c] sm:$0xf] %v754_v19  ;;  %v882_v19 = vld [vmem:[%s9469_s14 + $0x1530] sm:$0xf] }
 0x136   : > { %757 = vst [vmem:[%s9473_s24 + $0x450] sm:$0xf] %v756_v20  ;;  %v884_v20 = vld [vmem:[%s9469_s14 + $0x1540] sm:$0xf] }
 0x137   : > { %759 = vst [vmem:[%s9473_s24 + $0x454] sm:$0xf] %v758_v21  ;;  %v886_v21 = vld [vmem:[%s9469_s14 + $0x1550] sm:$0xf] }
 0x138   : > { %761 = vst [vmem:[%s9473_s24 + $0x458] sm:$0xf] %v760_v22  ;;  %v888_v22 = vld [vmem:[%s9469_s14 + $0x1560] sm:$0xf] }
 0x139   : > { %763 = vst [vmem:[%s9473_s24 + $0x45c] sm:$0xf] %v762_v23  ;;  %v890_v23 = vld [vmem:[%s9469_s14 + $0x1570] sm:$0xf] }
 0x13a   : > { %765 = vst [vmem:[%s9473_s24 + $0x460] sm:$0xf] %v764_v24  ;;  %v892_v24 = vld [vmem:[%s9469_s14 + $0x1580] sm:$0xf] }
 0x13b   : > { %767 = vst [vmem:[%s9473_s24 + $0x464] sm:$0xf] %v766_v25  ;;  %v894_v25 = vld [vmem:[%s9469_s14 + $0x1590] sm:$0xf] }
 0x13c   : > { %769 = vst [vmem:[%s9473_s24 + $0x468] sm:$0xf] %v768_v26  ;;  %v896_v26 = vld [vmem:[%s9469_s14 + $0x15a0] sm:$0xf] }
 0x13d   : > { %771 = vst [vmem:[%s9473_s24 + $0x46c] sm:$0xf] %v770_v27  ;;  %v898_v27 = vld [vmem:[%s9469_s14 + $0x15b0] sm:$0xf] }
 0x13e   : > { %773 = vst [vmem:[%s9473_s24 + $0x470] sm:$0xf] %v772_v28  ;;  %v900_v28 = vld [vmem:[%s9469_s14 + $0x15c0] sm:$0xf] }
 0x13f   : > { %775 = vst [vmem:[%s9473_s24 + $0x474] sm:$0xf] %v774_v29  ;;  %v902_v29 = vld [vmem:[%s9469_s14 + $0x15d0] sm:$0xf] }
 0x140   : > { %777 = vst [vmem:[%s9473_s24 + $0x478] sm:$0xf] %v776_v30  ;;  %v904_v30 = vld [vmem:[%s9469_s14 + $0x15e0] sm:$0xf] }
 0x141   : > { %779 = vst [vmem:[%s9473_s24 + $0x47c] sm:$0xf] %v778_v31  ;;  %v906_v31 = vld [vmem:[%s9469_s14 + $0x15f0] sm:$0xf] }
 0x142   : > { %781 = vst [vmem:[%s9473_s24 + $0x480] sm:$0xf] %v780_v32  ;;  %v908_v32 = vld [vmem:[%s9469_s14 + $0x1600] sm:$0xf] }
 0x143   : > { %783 = vst [vmem:[%s9473_s24 + $0x484] sm:$0xf] %v782_v33  ;;  %v910_v33 = vld [vmem:[%s9469_s14 + $0x1610] sm:$0xf] }
 0x144   : > { %785 = vst [vmem:[%s9473_s24 + $0x488] sm:$0xf] %v784_v34  ;;  %v912_v34 = vld [vmem:[%s9469_s14 + $0x1620] sm:$0xf] }
 0x145   : > { %787 = vst [vmem:[%s9473_s24 + $0x48c] sm:$0xf] %v786_v35  ;;  %v914_v35 = vld [vmem:[%s9469_s14 + $0x1630] sm:$0xf] }
 0x146   : > { %789 = vst [vmem:[%s9473_s24 + $0x490] sm:$0xf] %v788_v36  ;;  %v916_v36 = vld [vmem:[%s9469_s14 + $0x1640] sm:$0xf] }
 0x147   : > { %791 = vst [vmem:[%s9473_s24 + $0x494] sm:$0xf] %v790_v37  ;;  %v918_v37 = vld [vmem:[%s9469_s14 + $0x1650] sm:$0xf] }
 0x148   : > { %793 = vst [vmem:[%s9473_s24 + $0x498] sm:$0xf] %v792_v38  ;;  %v920_v38 = vld [vmem:[%s9469_s14 + $0x1660] sm:$0xf] }
 0x149   : > { %795 = vst [vmem:[%s9473_s24 + $0x49c] sm:$0xf] %v794_v39  ;;  %v922_v39 = vld [vmem:[%s9469_s14 + $0x1670] sm:$0xf] }
 0x14a   : > { %797 = vst [vmem:[%s9473_s24 + $0x4a0] sm:$0xf] %v796_v40  ;;  %v924_v40 = vld [vmem:[%s9469_s14 + $0x1680] sm:$0xf] }
 0x14b   : > { %799 = vst [vmem:[%s9473_s24 + $0x4a4] sm:$0xf] %v798_v41  ;;  %v926_v41 = vld [vmem:[%s9469_s14 + $0x1690] sm:$0xf] }
 0x14c   : > { %801 = vst [vmem:[%s9473_s24 + $0x4a8] sm:$0xf] %v800_v42  ;;  %v928_v42 = vld [vmem:[%s9469_s14 + $0x16a0] sm:$0xf] }
 0x14d   : > { %803 = vst [vmem:[%s9473_s24 + $0x4ac] sm:$0xf] %v802_v43  ;;  %v930_v43 = vld [vmem:[%s9469_s14 + $0x16b0] sm:$0xf] }
 0x14e   : > { %805 = vst [vmem:[%s9473_s24 + $0x4b0] sm:$0xf] %v804_v44  ;;  %v932_v44 = vld [vmem:[%s9469_s14 + $0x16c0] sm:$0xf] }
 0x14f   : > { %807 = vst [vmem:[%s9473_s24 + $0x4b4] sm:$0xf] %v806_v45  ;;  %v934_v45 = vld [vmem:[%s9469_s14 + $0x16d0] sm:$0xf] }
 0x150   : > { %809 = vst [vmem:[%s9473_s24 + $0x4b8] sm:$0xf] %v808_v46  ;;  %v936_v46 = vld [vmem:[%s9469_s14 + $0x16e0] sm:$0xf] }
 0x151   : > { %811 = vst [vmem:[%s9473_s24 + $0x4bc] sm:$0xf] %v810_v47  ;;  %v938_v47 = vld [vmem:[%s9469_s14 + $0x16f0] sm:$0xf] }
 0x152   : > { %813 = vst [vmem:[%s9473_s24 + $0x4c0] sm:$0xf] %v812_v48  ;;  %v940_v48 = vld [vmem:[%s9469_s14 + $0x1700] sm:$0xf] }
 0x153   : > { %815 = vst [vmem:[%s9473_s24 + $0x4c4] sm:$0xf] %v814_v49  ;;  %v942_v49 = vld [vmem:[%s9469_s14 + $0x1710] sm:$0xf] }
 0x154   : > { %817 = vst [vmem:[%s9473_s24 + $0x4c8] sm:$0xf] %v816_v50  ;;  %v944_v50 = vld [vmem:[%s9469_s14 + $0x1720] sm:$0xf] }
 0x155   : > { %819 = vst [vmem:[%s9473_s24 + $0x4cc] sm:$0xf] %v818_v51  ;;  %v946_v51 = vld [vmem:[%s9469_s14 + $0x1730] sm:$0xf] }
 0x156   : > { %821 = vst [vmem:[%s9473_s24 + $0x4d0] sm:$0xf] %v820_v52  ;;  %v948_v52 = vld [vmem:[%s9469_s14 + $0x1740] sm:$0xf] }
 0x157   : > { %823 = vst [vmem:[%s9473_s24 + $0x4d4] sm:$0xf] %v822_v53  ;;  %v950_v53 = vld [vmem:[%s9469_s14 + $0x1750] sm:$0xf] }
 0x158   : > { %825 = vst [vmem:[%s9473_s24 + $0x4d8] sm:$0xf] %v824_v54  ;;  %v952_v54 = vld [vmem:[%s9469_s14 + $0x1760] sm:$0xf] }
 0x159   : > { %827 = vst [vmem:[%s9473_s24 + $0x4dc] sm:$0xf] %v826_v55  ;;  %v954_v55 = vld [vmem:[%s9469_s14 + $0x1770] sm:$0xf] }
 0x15a   : > { %829 = vst [vmem:[%s9473_s24 + $0x4e0] sm:$0xf] %v828_v56  ;;  %v956_v56 = vld [vmem:[%s9469_s14 + $0x1780] sm:$0xf] }
 0x15b   : > { %831 = vst [vmem:[%s9473_s24 + $0x4e4] sm:$0xf] %v830_v57  ;;  %v958_v57 = vld [vmem:[%s9469_s14 + $0x1790] sm:$0xf] }
 0x15c   : > { %833 = vst [vmem:[%s9473_s24 + $0x4e8] sm:$0xf] %v832_v58  ;;  %v960_v58 = vld [vmem:[%s9469_s14 + $0x17a0] sm:$0xf] }
 0x15d   : > { %835 = vst [vmem:[%s9473_s24 + $0x4ec] sm:$0xf] %v834_v59  ;;  %v962_v59 = vld [vmem:[%s9469_s14 + $0x17b0] sm:$0xf] }
 0x15e   : > { %837 = vst [vmem:[%s9473_s24 + $0x4f0] sm:$0xf] %v836_v60  ;;  %v964_v60 = vld [vmem:[%s9469_s14 + $0x17c0] sm:$0xf] }
 0x15f   : > { %839 = vst [vmem:[%s9473_s24 + $0x4f4] sm:$0xf] %v838_v61  ;;  %v966_v61 = vld [vmem:[%s9469_s14 + $0x17d0] sm:$0xf] }
 0x160   : > { %841 = vst [vmem:[%s9473_s24 + $0x4f8] sm:$0xf] %v840_v62  ;;  %v968_v62 = vld [vmem:[%s9469_s14 + $0x17e0] sm:$0xf] }
 0x161   : > { %843 = vst [vmem:[%s9473_s24 + $0x4fc] sm:$0xf] %v842_v63  ;;  %v970_v63 = vld [vmem:[%s9469_s14 + $0x17f0] sm:$0xf] }
 0x162   : > { %845 = vst [vmem:[%s9473_s24 + $0x500] sm:$0xf] %v844_v0  ;;  %v972_v0 = vld [vmem:[%s9469_s14 + $0x1800] sm:$0xf] }
 0x163   : > { %847 = vst [vmem:[%s9473_s24 + $0x504] sm:$0xf] %v846_v1  ;;  %v974_v1 = vld [vmem:[%s9469_s14 + $0x1810] sm:$0xf] }
 0x164   : > { %849 = vst [vmem:[%s9473_s24 + $0x508] sm:$0xf] %v848_v2  ;;  %v976_v2 = vld [vmem:[%s9469_s14 + $0x1820] sm:$0xf] }
 0x165   : > { %851 = vst [vmem:[%s9473_s24 + $0x50c] sm:$0xf] %v850_v3  ;;  %v978_v3 = vld [vmem:[%s9469_s14 + $0x1830] sm:$0xf] }
 0x166   : > { %853 = vst [vmem:[%s9473_s24 + $0x510] sm:$0xf] %v852_v4  ;;  %v980_v4 = vld [vmem:[%s9469_s14 + $0x1840] sm:$0xf] }
 0x167   : > { %855 = vst [vmem:[%s9473_s24 + $0x514] sm:$0xf] %v854_v5  ;;  %v982_v5 = vld [vmem:[%s9469_s14 + $0x1850] sm:$0xf] }
 0x168   : > { %857 = vst [vmem:[%s9473_s24 + $0x518] sm:$0xf] %v856_v6  ;;  %v984_v6 = vld [vmem:[%s9469_s14 + $0x1860] sm:$0xf] }
 0x169   : > { %859 = vst [vmem:[%s9473_s24 + $0x51c] sm:$0xf] %v858_v7  ;;  %v986_v7 = vld [vmem:[%s9469_s14 + $0x1870] sm:$0xf] }
 0x16a   : > { %861 = vst [vmem:[%s9473_s24 + $0x520] sm:$0xf] %v860_v8  ;;  %v988_v8 = vld [vmem:[%s9469_s14 + $0x1880] sm:$0xf] }
 0x16b   : > { %863 = vst [vmem:[%s9473_s24 + $0x524] sm:$0xf] %v862_v9  ;;  %v990_v9 = vld [vmem:[%s9469_s14 + $0x1890] sm:$0xf] }
 0x16c   : > { %865 = vst [vmem:[%s9473_s24 + $0x528] sm:$0xf] %v864_v10  ;;  %v992_v10 = vld [vmem:[%s9469_s14 + $0x18a0] sm:$0xf] }
 0x16d   : > { %867 = vst [vmem:[%s9473_s24 + $0x52c] sm:$0xf] %v866_v11  ;;  %v994_v11 = vld [vmem:[%s9469_s14 + $0x18b0] sm:$0xf] }
 0x16e   : > { %869 = vst [vmem:[%s9473_s24 + $0x530] sm:$0xf] %v868_v12  ;;  %v996_v12 = vld [vmem:[%s9469_s14 + $0x18c0] sm:$0xf] }
 0x16f   : > { %871 = vst [vmem:[%s9473_s24 + $0x534] sm:$0xf] %v870_v13  ;;  %v998_v13 = vld [vmem:[%s9469_s14 + $0x18d0] sm:$0xf] }
 0x170   : > { %873 = vst [vmem:[%s9473_s24 + $0x538] sm:$0xf] %v872_v14  ;;  %v1000_v14 = vld [vmem:[%s9469_s14 + $0x18e0] sm:$0xf] }
 0x171   : > { %875 = vst [vmem:[%s9473_s24 + $0x53c] sm:$0xf] %v874_v15  ;;  %v1002_v15 = vld [vmem:[%s9469_s14 + $0x18f0] sm:$0xf] }
 0x172   : > { %877 = vst [vmem:[%s9473_s24 + $0x540] sm:$0xf] %v876_v16  ;;  %v1004_v16 = vld [vmem:[%s9469_s14 + $0x1900] sm:$0xf] }
 0x173   : > { %879 = vst [vmem:[%s9473_s24 + $0x544] sm:$0xf] %v878_v17  ;;  %v1006_v17 = vld [vmem:[%s9469_s14 + $0x1910] sm:$0xf] }
 0x174   : > { %881 = vst [vmem:[%s9473_s24 + $0x548] sm:$0xf] %v880_v18  ;;  %v1008_v18 = vld [vmem:[%s9469_s14 + $0x1920] sm:$0xf] }
 0x175   : > { %883 = vst [vmem:[%s9473_s24 + $0x54c] sm:$0xf] %v882_v19  ;;  %v1010_v19 = vld [vmem:[%s9469_s14 + $0x1930] sm:$0xf] }
 0x176   : > { %885 = vst [vmem:[%s9473_s24 + $0x550] sm:$0xf] %v884_v20  ;;  %v1012_v20 = vld [vmem:[%s9469_s14 + $0x1940] sm:$0xf] }
 0x177   : > { %887 = vst [vmem:[%s9473_s24 + $0x554] sm:$0xf] %v886_v21  ;;  %v1014_v21 = vld [vmem:[%s9469_s14 + $0x1950] sm:$0xf] }
 0x178   : > { %889 = vst [vmem:[%s9473_s24 + $0x558] sm:$0xf] %v888_v22  ;;  %v1016_v22 = vld [vmem:[%s9469_s14 + $0x1960] sm:$0xf] }
 0x179   : > { %891 = vst [vmem:[%s9473_s24 + $0x55c] sm:$0xf] %v890_v23  ;;  %v1018_v23 = vld [vmem:[%s9469_s14 + $0x1970] sm:$0xf] }
 0x17a   : > { %893 = vst [vmem:[%s9473_s24 + $0x560] sm:$0xf] %v892_v24  ;;  %v1020_v24 = vld [vmem:[%s9469_s14 + $0x1980] sm:$0xf] }
 0x17b   : > { %895 = vst [vmem:[%s9473_s24 + $0x564] sm:$0xf] %v894_v25  ;;  %v1022_v25 = vld [vmem:[%s9469_s14 + $0x1990] sm:$0xf] }
 0x17c   : > { %897 = vst [vmem:[%s9473_s24 + $0x568] sm:$0xf] %v896_v26  ;;  %v1024_v26 = vld [vmem:[%s9469_s14 + $0x19a0] sm:$0xf] }
 0x17d   : > { %899 = vst [vmem:[%s9473_s24 + $0x56c] sm:$0xf] %v898_v27  ;;  %v1026_v27 = vld [vmem:[%s9469_s14 + $0x19b0] sm:$0xf] }
 0x17e   : > { %901 = vst [vmem:[%s9473_s24 + $0x570] sm:$0xf] %v900_v28  ;;  %v1028_v28 = vld [vmem:[%s9469_s14 + $0x19c0] sm:$0xf] }
 0x17f   : > { %903 = vst [vmem:[%s9473_s24 + $0x574] sm:$0xf] %v902_v29  ;;  %v1030_v29 = vld [vmem:[%s9469_s14 + $0x19d0] sm:$0xf] }
 0x180   : > { %905 = vst [vmem:[%s9473_s24 + $0x578] sm:$0xf] %v904_v30  ;;  %v1032_v30 = vld [vmem:[%s9469_s14 + $0x19e0] sm:$0xf] }
 0x181   : > { %907 = vst [vmem:[%s9473_s24 + $0x57c] sm:$0xf] %v906_v31  ;;  %v1034_v31 = vld [vmem:[%s9469_s14 + $0x19f0] sm:$0xf] }
 0x182   : > { %909 = vst [vmem:[%s9473_s24 + $0x580] sm:$0xf] %v908_v32  ;;  %v1036_v32 = vld [vmem:[%s9469_s14 + $0x1a00] sm:$0xf] }
 0x183   : > { %911 = vst [vmem:[%s9473_s24 + $0x584] sm:$0xf] %v910_v33  ;;  %v1038_v33 = vld [vmem:[%s9469_s14 + $0x1a10] sm:$0xf] }
 0x184   : > { %913 = vst [vmem:[%s9473_s24 + $0x588] sm:$0xf] %v912_v34  ;;  %v1040_v34 = vld [vmem:[%s9469_s14 + $0x1a20] sm:$0xf] }
 0x185   : > { %915 = vst [vmem:[%s9473_s24 + $0x58c] sm:$0xf] %v914_v35  ;;  %v1042_v35 = vld [vmem:[%s9469_s14 + $0x1a30] sm:$0xf] }
 0x186   : > { %917 = vst [vmem:[%s9473_s24 + $0x590] sm:$0xf] %v916_v36  ;;  %v1044_v36 = vld [vmem:[%s9469_s14 + $0x1a40] sm:$0xf] }
 0x187   : > { %919 = vst [vmem:[%s9473_s24 + $0x594] sm:$0xf] %v918_v37  ;;  %v1046_v37 = vld [vmem:[%s9469_s14 + $0x1a50] sm:$0xf] }
 0x188   : > { %921 = vst [vmem:[%s9473_s24 + $0x598] sm:$0xf] %v920_v38  ;;  %v1048_v38 = vld [vmem:[%s9469_s14 + $0x1a60] sm:$0xf] }
 0x189   : > { %923 = vst [vmem:[%s9473_s24 + $0x59c] sm:$0xf] %v922_v39  ;;  %v1050_v39 = vld [vmem:[%s9469_s14 + $0x1a70] sm:$0xf] }
 0x18a   : > { %925 = vst [vmem:[%s9473_s24 + $0x5a0] sm:$0xf] %v924_v40  ;;  %v1052_v40 = vld [vmem:[%s9469_s14 + $0x1a80] sm:$0xf] }
 0x18b   : > { %927 = vst [vmem:[%s9473_s24 + $0x5a4] sm:$0xf] %v926_v41  ;;  %v1054_v41 = vld [vmem:[%s9469_s14 + $0x1a90] sm:$0xf] }
 0x18c   : > { %929 = vst [vmem:[%s9473_s24 + $0x5a8] sm:$0xf] %v928_v42  ;;  %v1056_v42 = vld [vmem:[%s9469_s14 + $0x1aa0] sm:$0xf] }
 0x18d   : > { %931 = vst [vmem:[%s9473_s24 + $0x5ac] sm:$0xf] %v930_v43  ;;  %v1058_v43 = vld [vmem:[%s9469_s14 + $0x1ab0] sm:$0xf] }
 0x18e   : > { %933 = vst [vmem:[%s9473_s24 + $0x5b0] sm:$0xf] %v932_v44  ;;  %v1060_v44 = vld [vmem:[%s9469_s14 + $0x1ac0] sm:$0xf] }
 0x18f   : > { %935 = vst [vmem:[%s9473_s24 + $0x5b4] sm:$0xf] %v934_v45  ;;  %v1062_v45 = vld [vmem:[%s9469_s14 + $0x1ad0] sm:$0xf] }
 0x190   : > { %937 = vst [vmem:[%s9473_s24 + $0x5b8] sm:$0xf] %v936_v46  ;;  %v1064_v46 = vld [vmem:[%s9469_s14 + $0x1ae0] sm:$0xf] }
 0x191   : > { %939 = vst [vmem:[%s9473_s24 + $0x5bc] sm:$0xf] %v938_v47  ;;  %v1066_v47 = vld [vmem:[%s9469_s14 + $0x1af0] sm:$0xf] }
 0x192   : > { %941 = vst [vmem:[%s9473_s24 + $0x5c0] sm:$0xf] %v940_v48  ;;  %v1068_v48 = vld [vmem:[%s9469_s14 + $0x1b00] sm:$0xf] }
 0x193   : > { %943 = vst [vmem:[%s9473_s24 + $0x5c4] sm:$0xf] %v942_v49  ;;  %v1070_v49 = vld [vmem:[%s9469_s14 + $0x1b10] sm:$0xf] }
 0x194   : > { %945 = vst [vmem:[%s9473_s24 + $0x5c8] sm:$0xf] %v944_v50  ;;  %v1072_v50 = vld [vmem:[%s9469_s14 + $0x1b20] sm:$0xf] }
 0x195   : > { %947 = vst [vmem:[%s9473_s24 + $0x5cc] sm:$0xf] %v946_v51  ;;  %v1074_v51 = vld [vmem:[%s9469_s14 + $0x1b30] sm:$0xf] }
 0x196   : > { %949 = vst [vmem:[%s9473_s24 + $0x5d0] sm:$0xf] %v948_v52  ;;  %v1076_v52 = vld [vmem:[%s9469_s14 + $0x1b40] sm:$0xf] }
 0x197   : > { %951 = vst [vmem:[%s9473_s24 + $0x5d4] sm:$0xf] %v950_v53  ;;  %v1078_v53 = vld [vmem:[%s9469_s14 + $0x1b50] sm:$0xf] }
 0x198   : > { %953 = vst [vmem:[%s9473_s24 + $0x5d8] sm:$0xf] %v952_v54  ;;  %v1080_v54 = vld [vmem:[%s9469_s14 + $0x1b60] sm:$0xf] }
 0x199   : > { %955 = vst [vmem:[%s9473_s24 + $0x5dc] sm:$0xf] %v954_v55  ;;  %v1082_v55 = vld [vmem:[%s9469_s14 + $0x1b70] sm:$0xf] }
 0x19a   : > { %957 = vst [vmem:[%s9473_s24 + $0x5e0] sm:$0xf] %v956_v56  ;;  %v1084_v56 = vld [vmem:[%s9469_s14 + $0x1b80] sm:$0xf] }
 0x19b   : > { %959 = vst [vmem:[%s9473_s24 + $0x5e4] sm:$0xf] %v958_v57  ;;  %v1086_v57 = vld [vmem:[%s9469_s14 + $0x1b90] sm:$0xf] }
 0x19c   : > { %961 = vst [vmem:[%s9473_s24 + $0x5e8] sm:$0xf] %v960_v58  ;;  %v1088_v58 = vld [vmem:[%s9469_s14 + $0x1ba0] sm:$0xf] }
 0x19d   : > { %963 = vst [vmem:[%s9473_s24 + $0x5ec] sm:$0xf] %v962_v59  ;;  %v1090_v59 = vld [vmem:[%s9469_s14 + $0x1bb0] sm:$0xf] }
 0x19e   : > { %965 = vst [vmem:[%s9473_s24 + $0x5f0] sm:$0xf] %v964_v60  ;;  %v1092_v60 = vld [vmem:[%s9469_s14 + $0x1bc0] sm:$0xf] }
 0x19f   : > { %967 = vst [vmem:[%s9473_s24 + $0x5f4] sm:$0xf] %v966_v61  ;;  %v1094_v61 = vld [vmem:[%s9469_s14 + $0x1bd0] sm:$0xf] }
 0x1a0   : > { %969 = vst [vmem:[%s9473_s24 + $0x5f8] sm:$0xf] %v968_v62  ;;  %v1096_v62 = vld [vmem:[%s9469_s14 + $0x1be0] sm:$0xf] }
 0x1a1   : > { %971 = vst [vmem:[%s9473_s24 + $0x5fc] sm:$0xf] %v970_v63  ;;  %v1098_v63 = vld [vmem:[%s9469_s14 + $0x1bf0] sm:$0xf] }
 0x1a2   : > { %973 = vst [vmem:[%s9473_s24 + $0x600] sm:$0xf] %v972_v0  ;;  %v1100_v0 = vld [vmem:[%s9469_s14 + $0x1c00] sm:$0xf] }
 0x1a3   : > { %975 = vst [vmem:[%s9473_s24 + $0x604] sm:$0xf] %v974_v1  ;;  %v1102_v1 = vld [vmem:[%s9469_s14 + $0x1c10] sm:$0xf] }
 0x1a4   : > { %977 = vst [vmem:[%s9473_s24 + $0x608] sm:$0xf] %v976_v2  ;;  %v1104_v2 = vld [vmem:[%s9469_s14 + $0x1c20] sm:$0xf] }
 0x1a5   : > { %979 = vst [vmem:[%s9473_s24 + $0x60c] sm:$0xf] %v978_v3  ;;  %v1106_v3 = vld [vmem:[%s9469_s14 + $0x1c30] sm:$0xf] }
 0x1a6   : > { %981 = vst [vmem:[%s9473_s24 + $0x610] sm:$0xf] %v980_v4  ;;  %v1108_v4 = vld [vmem:[%s9469_s14 + $0x1c40] sm:$0xf] }
 0x1a7   : > { %983 = vst [vmem:[%s9473_s24 + $0x614] sm:$0xf] %v982_v5  ;;  %v1110_v5 = vld [vmem:[%s9469_s14 + $0x1c50] sm:$0xf] }
 0x1a8   : > { %985 = vst [vmem:[%s9473_s24 + $0x618] sm:$0xf] %v984_v6  ;;  %v1112_v6 = vld [vmem:[%s9469_s14 + $0x1c60] sm:$0xf] }
 0x1a9   : > { %987 = vst [vmem:[%s9473_s24 + $0x61c] sm:$0xf] %v986_v7  ;;  %v1114_v7 = vld [vmem:[%s9469_s14 + $0x1c70] sm:$0xf] }
 0x1aa   : > { %989 = vst [vmem:[%s9473_s24 + $0x620] sm:$0xf] %v988_v8  ;;  %v1116_v8 = vld [vmem:[%s9469_s14 + $0x1c80] sm:$0xf] }
 0x1ab   : > { %991 = vst [vmem:[%s9473_s24 + $0x624] sm:$0xf] %v990_v9  ;;  %v1118_v9 = vld [vmem:[%s9469_s14 + $0x1c90] sm:$0xf] }
 0x1ac   : > { %993 = vst [vmem:[%s9473_s24 + $0x628] sm:$0xf] %v992_v10  ;;  %v1120_v10 = vld [vmem:[%s9469_s14 + $0x1ca0] sm:$0xf] }
 0x1ad   : > { %995 = vst [vmem:[%s9473_s24 + $0x62c] sm:$0xf] %v994_v11  ;;  %v1122_v11 = vld [vmem:[%s9469_s14 + $0x1cb0] sm:$0xf] }
 0x1ae   : > { %997 = vst [vmem:[%s9473_s24 + $0x630] sm:$0xf] %v996_v12  ;;  %v1124_v12 = vld [vmem:[%s9469_s14 + $0x1cc0] sm:$0xf] }
 0x1af   : > { %999 = vst [vmem:[%s9473_s24 + $0x634] sm:$0xf] %v998_v13  ;;  %v1126_v13 = vld [vmem:[%s9469_s14 + $0x1cd0] sm:$0xf] }
 0x1b0   : > { %1001 = vst [vmem:[%s9473_s24 + $0x638] sm:$0xf] %v1000_v14  ;;  %v1128_v14 = vld [vmem:[%s9469_s14 + $0x1ce0] sm:$0xf] }
 0x1b1   : > { %1003 = vst [vmem:[%s9473_s24 + $0x63c] sm:$0xf] %v1002_v15  ;;  %v1130_v15 = vld [vmem:[%s9469_s14 + $0x1cf0] sm:$0xf] }
 0x1b2   : > { %1005 = vst [vmem:[%s9473_s24 + $0x640] sm:$0xf] %v1004_v16  ;;  %v1132_v16 = vld [vmem:[%s9469_s14 + $0x1d00] sm:$0xf] }
 0x1b3   : > { %1007 = vst [vmem:[%s9473_s24 + $0x644] sm:$0xf] %v1006_v17  ;;  %v1134_v17 = vld [vmem:[%s9469_s14 + $0x1d10] sm:$0xf] }
 0x1b4   : > { %1009 = vst [vmem:[%s9473_s24 + $0x648] sm:$0xf] %v1008_v18  ;;  %v1136_v18 = vld [vmem:[%s9469_s14 + $0x1d20] sm:$0xf] }
 0x1b5   : > { %1011 = vst [vmem:[%s9473_s24 + $0x64c] sm:$0xf] %v1010_v19  ;;  %v1138_v19 = vld [vmem:[%s9469_s14 + $0x1d30] sm:$0xf] }
 0x1b6   : > { %1013 = vst [vmem:[%s9473_s24 + $0x650] sm:$0xf] %v1012_v20  ;;  %v1140_v20 = vld [vmem:[%s9469_s14 + $0x1d40] sm:$0xf] }
 0x1b7   : > { %1015 = vst [vmem:[%s9473_s24 + $0x654] sm:$0xf] %v1014_v21  ;;  %v1142_v21 = vld [vmem:[%s9469_s14 + $0x1d50] sm:$0xf] }
 0x1b8   : > { %1017 = vst [vmem:[%s9473_s24 + $0x658] sm:$0xf] %v1016_v22  ;;  %v1144_v22 = vld [vmem:[%s9469_s14 + $0x1d60] sm:$0xf] }
 0x1b9   : > { %1019 = vst [vmem:[%s9473_s24 + $0x65c] sm:$0xf] %v1018_v23  ;;  %v1146_v23 = vld [vmem:[%s9469_s14 + $0x1d70] sm:$0xf] }
 0x1ba   : > { %1021 = vst [vmem:[%s9473_s24 + $0x660] sm:$0xf] %v1020_v24  ;;  %v1148_v24 = vld [vmem:[%s9469_s14 + $0x1d80] sm:$0xf] }
 0x1bb   : > { %1023 = vst [vmem:[%s9473_s24 + $0x664] sm:$0xf] %v1022_v25  ;;  %v1150_v25 = vld [vmem:[%s9469_s14 + $0x1d90] sm:$0xf] }
 0x1bc   : > { %1025 = vst [vmem:[%s9473_s24 + $0x668] sm:$0xf] %v1024_v26  ;;  %v1152_v26 = vld [vmem:[%s9469_s14 + $0x1da0] sm:$0xf] }
 0x1bd   : > { %1027 = vst [vmem:[%s9473_s24 + $0x66c] sm:$0xf] %v1026_v27  ;;  %v1154_v27 = vld [vmem:[%s9469_s14 + $0x1db0] sm:$0xf] }
 0x1be   : > { %1029 = vst [vmem:[%s9473_s24 + $0x670] sm:$0xf] %v1028_v28  ;;  %v1156_v28 = vld [vmem:[%s9469_s14 + $0x1dc0] sm:$0xf] }
 0x1bf   : > { %1031 = vst [vmem:[%s9473_s24 + $0x674] sm:$0xf] %v1030_v29  ;;  %v1158_v29 = vld [vmem:[%s9469_s14 + $0x1dd0] sm:$0xf] }
 0x1c0   : > { %1033 = vst [vmem:[%s9473_s24 + $0x678] sm:$0xf] %v1032_v30  ;;  %v1160_v30 = vld [vmem:[%s9469_s14 + $0x1de0] sm:$0xf] }
 0x1c1   : > { %1035 = vst [vmem:[%s9473_s24 + $0x67c] sm:$0xf] %v1034_v31  ;;  %v1162_v31 = vld [vmem:[%s9469_s14 + $0x1df0] sm:$0xf] }
 0x1c2   : > { %1037 = vst [vmem:[%s9473_s24 + $0x680] sm:$0xf] %v1036_v32  ;;  %v1164_v32 = vld [vmem:[%s9469_s14 + $0x1e00] sm:$0xf] }
 0x1c3   : > { %1039 = vst [vmem:[%s9473_s24 + $0x684] sm:$0xf] %v1038_v33  ;;  %v1166_v33 = vld [vmem:[%s9469_s14 + $0x1e10] sm:$0xf] }
 0x1c4   : > { %1041 = vst [vmem:[%s9473_s24 + $0x688] sm:$0xf] %v1040_v34  ;;  %v1168_v34 = vld [vmem:[%s9469_s14 + $0x1e20] sm:$0xf] }
 0x1c5   : > { %1043 = vst [vmem:[%s9473_s24 + $0x68c] sm:$0xf] %v1042_v35  ;;  %v1170_v35 = vld [vmem:[%s9469_s14 + $0x1e30] sm:$0xf] }
 0x1c6   : > { %1045 = vst [vmem:[%s9473_s24 + $0x690] sm:$0xf] %v1044_v36  ;;  %v1172_v36 = vld [vmem:[%s9469_s14 + $0x1e40] sm:$0xf] }
 0x1c7   : > { %1047 = vst [vmem:[%s9473_s24 + $0x694] sm:$0xf] %v1046_v37  ;;  %v1174_v37 = vld [vmem:[%s9469_s14 + $0x1e50] sm:$0xf] }
 0x1c8   : > { %1049 = vst [vmem:[%s9473_s24 + $0x698] sm:$0xf] %v1048_v38  ;;  %v1176_v38 = vld [vmem:[%s9469_s14 + $0x1e60] sm:$0xf] }
 0x1c9   : > { %1051 = vst [vmem:[%s9473_s24 + $0x69c] sm:$0xf] %v1050_v39  ;;  %v1178_v39 = vld [vmem:[%s9469_s14 + $0x1e70] sm:$0xf] }
 0x1ca   : > { %1053 = vst [vmem:[%s9473_s24 + $0x6a0] sm:$0xf] %v1052_v40  ;;  %v1180_v40 = vld [vmem:[%s9469_s14 + $0x1e80] sm:$0xf] }
 0x1cb   : > { %1055 = vst [vmem:[%s9473_s24 + $0x6a4] sm:$0xf] %v1054_v41  ;;  %v1182_v41 = vld [vmem:[%s9469_s14 + $0x1e90] sm:$0xf] }
 0x1cc   : > { %1057 = vst [vmem:[%s9473_s24 + $0x6a8] sm:$0xf] %v1056_v42  ;;  %v1184_v42 = vld [vmem:[%s9469_s14 + $0x1ea0] sm:$0xf] }
 0x1cd   : > { %1059 = vst [vmem:[%s9473_s24 + $0x6ac] sm:$0xf] %v1058_v43  ;;  %v1186_v43 = vld [vmem:[%s9469_s14 + $0x1eb0] sm:$0xf] }
 0x1ce   : > { %1061 = vst [vmem:[%s9473_s24 + $0x6b0] sm:$0xf] %v1060_v44  ;;  %v1188_v44 = vld [vmem:[%s9469_s14 + $0x1ec0] sm:$0xf] }
 0x1cf   : > { %1063 = vst [vmem:[%s9473_s24 + $0x6b4] sm:$0xf] %v1062_v45  ;;  %v1190_v45 = vld [vmem:[%s9469_s14 + $0x1ed0] sm:$0xf] }
 0x1d0   : > { %1065 = vst [vmem:[%s9473_s24 + $0x6b8] sm:$0xf] %v1064_v46  ;;  %v1192_v46 = vld [vmem:[%s9469_s14 + $0x1ee0] sm:$0xf] }
 0x1d1   : > { %1067 = vst [vmem:[%s9473_s24 + $0x6bc] sm:$0xf] %v1066_v47  ;;  %v1194_v47 = vld [vmem:[%s9469_s14 + $0x1ef0] sm:$0xf] }
 0x1d2   : > { %1069 = vst [vmem:[%s9473_s24 + $0x6c0] sm:$0xf] %v1068_v48  ;;  %v1196_v48 = vld [vmem:[%s9469_s14 + $0x1f00] sm:$0xf] }
 0x1d3   : > { %1071 = vst [vmem:[%s9473_s24 + $0x6c4] sm:$0xf] %v1070_v49  ;;  %v1198_v49 = vld [vmem:[%s9469_s14 + $0x1f10] sm:$0xf] }
 0x1d4   : > { %1073 = vst [vmem:[%s9473_s24 + $0x6c8] sm:$0xf] %v1072_v50  ;;  %v1200_v50 = vld [vmem:[%s9469_s14 + $0x1f20] sm:$0xf] }
 0x1d5   : > { %1075 = vst [vmem:[%s9473_s24 + $0x6cc] sm:$0xf] %v1074_v51  ;;  %v1202_v51 = vld [vmem:[%s9469_s14 + $0x1f30] sm:$0xf] }
 0x1d6   : > { %1077 = vst [vmem:[%s9473_s24 + $0x6d0] sm:$0xf] %v1076_v52  ;;  %v1204_v52 = vld [vmem:[%s9469_s14 + $0x1f40] sm:$0xf] }
 0x1d7   : > { %1079 = vst [vmem:[%s9473_s24 + $0x6d4] sm:$0xf] %v1078_v53  ;;  %v1206_v53 = vld [vmem:[%s9469_s14 + $0x1f50] sm:$0xf] }
 0x1d8   : > { %1081 = vst [vmem:[%s9473_s24 + $0x6d8] sm:$0xf] %v1080_v54  ;;  %v1208_v54 = vld [vmem:[%s9469_s14 + $0x1f60] sm:$0xf] }
 0x1d9   : > { %1083 = vst [vmem:[%s9473_s24 + $0x6dc] sm:$0xf] %v1082_v55  ;;  %v1210_v55 = vld [vmem:[%s9469_s14 + $0x1f70] sm:$0xf] }
 0x1da   : > { %1085 = vst [vmem:[%s9473_s24 + $0x6e0] sm:$0xf] %v1084_v56  ;;  %v1212_v56 = vld [vmem:[%s9469_s14 + $0x1f80] sm:$0xf] }
 0x1db   : > { %1087 = vst [vmem:[%s9473_s24 + $0x6e4] sm:$0xf] %v1086_v57  ;;  %v1214_v57 = vld [vmem:[%s9469_s14 + $0x1f90] sm:$0xf] }
 0x1dc   : > { %1089 = vst [vmem:[%s9473_s24 + $0x6e8] sm:$0xf] %v1088_v58  ;;  %v1216_v58 = vld [vmem:[%s9469_s14 + $0x1fa0] sm:$0xf] }
 0x1dd   : > { %1091 = vst [vmem:[%s9473_s24 + $0x6ec] sm:$0xf] %v1090_v59  ;;  %v1218_v59 = vld [vmem:[%s9469_s14 + $0x1fb0] sm:$0xf] }
 0x1de   : > { %1093 = vst [vmem:[%s9473_s24 + $0x6f0] sm:$0xf] %v1092_v60  ;;  %v1220_v60 = vld [vmem:[%s9469_s14 + $0x1fc0] sm:$0xf] }
 0x1df   : > { %1095 = vst [vmem:[%s9473_s24 + $0x6f4] sm:$0xf] %v1094_v61  ;;  %v1222_v61 = vld [vmem:[%s9469_s14 + $0x1fd0] sm:$0xf] }
 0x1e0   : > { %1097 = vst [vmem:[%s9473_s24 + $0x6f8] sm:$0xf] %v1096_v62  ;;  %v1224_v62 = vld [vmem:[%s9469_s14 + $0x1fe0] sm:$0xf] }
 0x1e1   : > { %1099 = vst [vmem:[%s9473_s24 + $0x6fc] sm:$0xf] %v1098_v63  ;;  %v1226_v63 = vld [vmem:[%s9469_s14 + $0x1ff0] sm:$0xf] }
 0x1e2   : > { %1101 = vst [vmem:[%s9473_s24 + $0x700] sm:$0xf] %v1100_v0 }
 0x1e3   : > { %1103 = vst [vmem:[%s9473_s24 + $0x704] sm:$0xf] %v1102_v1 }
 0x1e4   : > { %1105 = vst [vmem:[%s9473_s24 + $0x708] sm:$0xf] %v1104_v2 }
 0x1e5   : > { %1107 = vst [vmem:[%s9473_s24 + $0x70c] sm:$0xf] %v1106_v3 }
 0x1e6   : > { %1109 = vst [vmem:[%s9473_s24 + $0x710] sm:$0xf] %v1108_v4 }
 0x1e7   : > { %1111 = vst [vmem:[%s9473_s24 + $0x714] sm:$0xf] %v1110_v5 }
 0x1e8   : > { %1113 = vst [vmem:[%s9473_s24 + $0x718] sm:$0xf] %v1112_v6 }
 0x1e9   : > { %1115 = vst [vmem:[%s9473_s24 + $0x71c] sm:$0xf] %v1114_v7 }
 0x1ea   : > { %1117 = vst [vmem:[%s9473_s24 + $0x720] sm:$0xf] %v1116_v8 }
 0x1eb   : > { %1119 = vst [vmem:[%s9473_s24 + $0x724] sm:$0xf] %v1118_v9 }
 0x1ec   : > { %1121 = vst [vmem:[%s9473_s24 + $0x728] sm:$0xf] %v1120_v10 }
 0x1ed   : > { %1123 = vst [vmem:[%s9473_s24 + $0x72c] sm:$0xf] %v1122_v11 }
 0x1ee   : > { %1125 = vst [vmem:[%s9473_s24 + $0x730] sm:$0xf] %v1124_v12 }
 0x1ef   : > { %1127 = vst [vmem:[%s9473_s24 + $0x734] sm:$0xf] %v1126_v13 }
 0x1f0   : > { %1129 = vst [vmem:[%s9473_s24 + $0x738] sm:$0xf] %v1128_v14 }
 0x1f1   : > { %1131 = vst [vmem:[%s9473_s24 + $0x73c] sm:$0xf] %v1130_v15 }
 0x1f2   : > { %1133 = vst [vmem:[%s9473_s24 + $0x740] sm:$0xf] %v1132_v16 }
 0x1f3   : > { %1135 = vst [vmem:[%s9473_s24 + $0x744] sm:$0xf] %v1134_v17 }
 0x1f4   : > { %1137 = vst [vmem:[%s9473_s24 + $0x748] sm:$0xf] %v1136_v18 }
 0x1f5   : > { %1139 = vst [vmem:[%s9473_s24 + $0x74c] sm:$0xf] %v1138_v19 }
 0x1f6   : > { %1141 = vst [vmem:[%s9473_s24 + $0x750] sm:$0xf] %v1140_v20 }
 0x1f7   : > { %1143 = vst [vmem:[%s9473_s24 + $0x754] sm:$0xf] %v1142_v21 }
 0x1f8   : > { %1145 = vst [vmem:[%s9473_s24 + $0x758] sm:$0xf] %v1144_v22 }
 0x1f9   : > { %1147 = vst [vmem:[%s9473_s24 + $0x75c] sm:$0xf] %v1146_v23 }
 0x1fa   : > { %1149 = vst [vmem:[%s9473_s24 + $0x760] sm:$0xf] %v1148_v24 }
 0x1fb   : > { %1151 = vst [vmem:[%s9473_s24 + $0x764] sm:$0xf] %v1150_v25 }
 0x1fc   : > { %1153 = vst [vmem:[%s9473_s24 + $0x768] sm:$0xf] %v1152_v26 }
 0x1fd   : > { %1155 = vst [vmem:[%s9473_s24 + $0x76c] sm:$0xf] %v1154_v27 }
 0x1fe   : > { %1157 = vst [vmem:[%s9473_s24 + $0x770] sm:$0xf] %v1156_v28 }
 0x1ff   : > { %1159 = vst [vmem:[%s9473_s24 + $0x774] sm:$0xf] %v1158_v29 }
 0x200   : > { %1161 = vst [vmem:[%s9473_s24 + $0x778] sm:$0xf] %v1160_v30 }
 0x201   : > { %1163 = vst [vmem:[%s9473_s24 + $0x77c] sm:$0xf] %v1162_v31 }
 0x202   : > { %1165 = vst [vmem:[%s9473_s24 + $0x780] sm:$0xf] %v1164_v32 }
 0x203   : > { %1167 = vst [vmem:[%s9473_s24 + $0x784] sm:$0xf] %v1166_v33 }
 0x204   : > { %1169 = vst [vmem:[%s9473_s24 + $0x788] sm:$0xf] %v1168_v34 }
 0x205   : > { %1171 = vst [vmem:[%s9473_s24 + $0x78c] sm:$0xf] %v1170_v35 }
 0x206   : > { %1173 = vst [vmem:[%s9473_s24 + $0x790] sm:$0xf] %v1172_v36 }
 0x207   : > { %1175 = vst [vmem:[%s9473_s24 + $0x794] sm:$0xf] %v1174_v37 }
 0x208   : > { %1177 = vst [vmem:[%s9473_s24 + $0x798] sm:$0xf] %v1176_v38 }
 0x209   : > { %1179 = vst [vmem:[%s9473_s24 + $0x79c] sm:$0xf] %v1178_v39 }
 0x20a   : > { %1181 = vst [vmem:[%s9473_s24 + $0x7a0] sm:$0xf] %v1180_v40 }
 0x20b   : > { %1183 = vst [vmem:[%s9473_s24 + $0x7a4] sm:$0xf] %v1182_v41 }
 0x20c   : > { %1185 = vst [vmem:[%s9473_s24 + $0x7a8] sm:$0xf] %v1184_v42 }
 0x20d   : > { %1187 = vst [vmem:[%s9473_s24 + $0x7ac] sm:$0xf] %v1186_v43 }
 0x20e   : > { %1189 = vst [vmem:[%s9473_s24 + $0x7b0] sm:$0xf] %v1188_v44 }
 0x20f   : > { %1191 = vst [vmem:[%s9473_s24 + $0x7b4] sm:$0xf] %v1190_v45 }
 0x210   : > { %1193 = vst [vmem:[%s9473_s24 + $0x7b8] sm:$0xf] %v1192_v46 }
 0x211   : > { %1195 = vst [vmem:[%s9473_s24 + $0x7bc] sm:$0xf] %v1194_v47 }
 0x212   : > { %1197 = vst [vmem:[%s9473_s24 + $0x7c0] sm:$0xf] %v1196_v48 }
 0x213   : > { %1199 = vst [vmem:[%s9473_s24 + $0x7c4] sm:$0xf] %v1198_v49 }
 0x214   : > { %1201 = vst [vmem:[%s9473_s24 + $0x7c8] sm:$0xf] %v1200_v50 }
 0x215   : > { %1203 = vst [vmem:[%s9473_s24 + $0x7cc] sm:$0xf] %v1202_v51 }
 0x216   : > { %1205 = vst [vmem:[%s9473_s24 + $0x7d0] sm:$0xf] %v1204_v52 }
 0x217   : > { %1207 = vst [vmem:[%s9473_s24 + $0x7d4] sm:$0xf] %v1206_v53 }
 0x218   : > { %1209 = vst [vmem:[%s9473_s24 + $0x7d8] sm:$0xf] %v1208_v54 }
 0x219   : > { %1211 = vst [vmem:[%s9473_s24 + $0x7dc] sm:$0xf] %v1210_v55 }
 0x21a   : > { %1213 = vst [vmem:[%s9473_s24 + $0x7e0] sm:$0xf] %v1212_v56 }
 0x21b   : > { %1215 = vst [vmem:[%s9473_s24 + $0x7e4] sm:$0xf] %v1214_v57 }
 0x21c   : > { %1217 = vst [vmem:[%s9473_s24 + $0x7e8] sm:$0xf] %v1216_v58 }
 0x21d   : > { %1219 = vst [vmem:[%s9473_s24 + $0x7ec] sm:$0xf] %v1218_v59 }
 0x21e   : > { %1221 = vst [vmem:[%s9473_s24 + $0x7f0] sm:$0xf] %v1220_v60 }
 0x21f   : > { %1223 = vst [vmem:[%s9473_s24 + $0x7f4] sm:$0xf] %v1222_v61 }
 0x220   : > { %1225 = vst [vmem:[%s9473_s24 + $0x7f8] sm:$0xf] %v1224_v62 }
 0x221   : > { %1227 = vst [vmem:[%s9473_s24 + $0x7fc] sm:$0xf] %v1226_v63 }
 0x222 PF: > { %p7756_p11 = scmp.ge.s32.totalorder %s9361_s23, 1  ;;  %p4354_p12 = scmp.lt.s32.totalorder %s9361_s23, 9 }
 0x224   : > { %p4355_p13 = pnand %p7756_p11, %p4354_p12 }
 0x225   : > { %s4361_s27 = sand.u32 (!%p4355_p13), 1, %s9337_s17   ;;  %s4390_s28 = sand.u32 (!%p4355_p13), 1, %s9329_s15  }
 0x226   : > { %4358 = sbr.rel (%p4355_p13) target bundleno = 1102 (0x44e), region = 84  ;;  %s7757_s29 = sshll.u32 (!%p4355_p13), %s4361_s27, 11 }
 0x227   : > { %s9211_s5 = smul.u32 (!%p4355_p13), 12, %s4390_s28  ;;  %p4393_p0 = scmp.lt.s32.totalorder (!%p4355_p13), %s9349_s20, 1 }
 0x228   : > { %p4398_p1 = scmp.lt.s32.totalorder (!%p4355_p13), %s9345_s19, 3  ;;  %s10516_s17 = scalar_lea.vmem (!%p4355_p13), [#allocation3], %s7757_s29 }
 0x229   : > { %s10518_s15 = scalar_lea.vmem (!%p4355_p13), [#allocation4], %s9211_s5  ;;  %p7759_p2 = scmp.ne.s32.totalorder (!%p4355_p13), %s9345_s19, 0 }
 0x22b   : > { %s4394_s6 = scalar_select %p4393_p0, %s9349_s20, 1 }
 0x22c   : > { %s10505_s9 = scalar_select %p4398_p1, %s9345_s19, 3 }
 0x22d   : > { %s9212_s10 = smul.u32 40, %s4394_s6 }
 0x22e   : > { %s4400_s13 = scalar_lea.vmem %s11039_s2, %s10505_s9  ;;  %4405 = sbr.rel (%p7759_p2) target bundleno = 614 (0x266), region = 92 }
 0x22f   : > { %s10514_s1 = scalar_lea.vmem %s11037_s0, %s9212_s10 }
 0x233   : > { %v4406_v0 = vld [vmem:[%s10514_s1] sm:$0xff]  ;;  %v10523_v1 = vld [vmem:[%s10514_s1 + $0x8] sm:$0xff]  ;;  %vm4409_vm0 = vcmask 1043456   ;;  %vm4410_vm1 = vsmask.f32 3328  ;;  %vm4412_vm2 = vcmask 1047556  }
 0x234   : > { %4408 = vst [vmem:[#allocation2] sm:$0xff] %v4406_v0  ;;  %vm4411_vm3 = vmand %vm4409_vm0, %vm4410_vm1  ;;  %vm4413_vm4 = vsmask.f32 7424  ;;  %v4416_v2 = vld [vmem:[#allocation2 + $0x80] sm:$0xff]  ;;  %vm4421_vm5 = vsmask.f32 7440 }
 0x235   : > { %vm4414_vm6 = vmand %vm4412_vm2, %vm4413_vm4  ;;  %v4424_v3 = vshrl.u32 %v4406_v0, 16  ;;  %v4427_v4 = vshll.u32 %v4406_v0, 16  ;;  %v10527_v5 = vshll.u32 %v10523_v1, 16  ;;  %v10530_v6 = vshrl.u32 %v10523_v1, 16  ;;  %v4448_v8 = vld [vmem:[%s10514_s1] sm:$0xee] }
 0x236   : > { %vm10532_vm7 = vmor %vm4414_vm6, %vm4411_vm3  ;;  %vm4454_vm8 = vcmask 1042432   ;;  %vm4455_vm9 = vcmask 1046532   ;;  %v4459_v9 = vrot.slane %v10523_v1, 5  ;;  %v4450_v14 = vld [vmem:[%s10514_s1 + $0x10] sm:$0x11]  ;;  %v7760_v17 = vrot.slane %v4448_v8, 9 }
 0x237   : > { %v4417_v10 = vsel %vm10532_vm7, %v10523_v1, %v4416_v2  ;;  %v4426_v11 = vrot.slane %v4424_v3, 4  ;;  %v4429_v12 = vrot.slane %v4427_v4, 5  ;;  %v4435_v13 = vrot.slane %v10527_v5, 5  ;;  %vm10544_vm10 = vmor %vm4454_vm8, %vm4455_vm9  ;;  %v4467_v20 = vld [vmem:[#allocation2 + $0x90] sm:$0xff]  ;;  %v4470_v22 = vld [vmem:[%s10514_s1] sm:$0xee] }
 0x238   : > { %4418 = vst [vmem:[#allocation2 + $0x80] sm:$0xff] %v4417_v10  ;;  %v4439_v15 = vrot.slane %v10530_v6, 4  ;;  %v4461_v18 = vrot.slane %v4459_v9, 4  ;;  %v4462_v19 = vrot.slane %v4450_v14, 5  ;;  %vm4473_vm11 = vsmask.f32 2304  ;;  %vm10551_vm13 = vmor %vm4410_vm1, %vm4421_vm5 }
 0x239   : > { %v4430_v21 = vor.u32 %v4429_v12, %v4426_v11  ;;  %vm4474_vm12 = vsmask.f32 6416  ;;  %v4445_v25 = vld [vmem:[#allocation2 + $0x88] sm:$0xff]  ;;  %v4460_v26 = vsel %vm10544_vm10, %v7760_v17, %v4459_v9  ;;  %v4477_v28 = vshrl.u32 %v4470_v22, 16  ;;  %v4472_v29 = vld [vmem:[%s10514_s1 + $0x10] sm:$0x11] }
 0x23a   : > { %v10555_v24 = vor.u32 %v4439_v15, %v4435_v13  ;;  %v4463_v27 = vsel %vm10544_vm10, %v4461_v18, %v4462_v19  ;;  %4568 = vst [vmem:[#allocation2 + $0x30] sm:$0xff] %v10523_v1  ;;  %v4480_v32 = vshll.u32 %v4470_v22, 16  ;;  %v4488_v33 = vrot.slane %v10530_v6, 5  ;;  %v4510_v34 = vld [vmem:[%s10514_s1] sm:$0x88]  ;;  %v4569_v47 = vld [vmem:[#allocation2 + $0xb0] sm:$0xff]  ;;  %vm10585_vm1 = vmor %vm4473_vm11, %vm4474_vm12 }
 0x23b   : > { %v4431_v30 = vrot.slane %v4430_v21, 4  ;;  %4466 = vst [vmem:[#allocation2 + $0x10] sm:$0xff] %v4460_v26  ;;  %v4468_v31 = vsel %vm10532_vm7, %v4463_v27, %v4467_v20  ;;  %v4479_v36 = vrot.slane %v4477_v28, 5  ;;  %v4491_v37 = vrot.slane %v10527_v5, 6  ;;  %v4512_v42 = vld [vmem:[%s10514_s1 + $0x10] sm:$0x77] }
 0x23c   : > { %v4441_v35 = vrot.slane %v10555_v24, 4  ;;  %4469 = vst [vmem:[#allocation2 + $0x90] sm:$0xff] %v4468_v31  ;;  %v4496_v38 = vshrl.u32 %v4472_v29, 16  ;;  %v4482_v40 = vrot.slane %v4480_v32, 6  ;;  %v4499_v41 = vshll.u32 %v4472_v29, 16  ;;  %v4507_v59 = vld [vmem:[#allocation2 + $0x98] sm:$0xff] }
 0x23d   : > { %v4436_v39 = vsel %vm10551_vm13, %v4431_v30, %v4435_v13  ;;  %vm4516_vm14 = vcmask 1040384   ;;  %v4492_v44 = vor.u32 %v4491_v37, %v4488_v33  ;;  %vm4517_vm15 = vcmask 1044484   ;;  %v4532_v46 = vld [vmem:[%s10514_s1] sm:$0x88]  ;;  %v4534_v53 = vld [vmem:[%s10514_s1 + $0x10] sm:$0x77] }
 0x23e   : > { %4444 = vst [vmem:[#allocation2 + $0x8] sm:$0xff] %v4436_v39  ;;  %v4446_v43 = vsel %vm10532_vm7, %v4441_v35, %v4445_v25  ;;  %v4498_v45 = vrot.slane %v4496_v38, 5  ;;  %v4483_v48 = vor.u32 %v4482_v40, %v4479_v36  ;;  %v4501_v49 = vrot.slane %v4499_v41, 6  ;;  %vm10577_vm0 = vmor %vm4516_vm14, %vm4517_vm15  ;;  %v4529_v62 = vld [vmem:[#allocation2 + $0xa0] sm:$0xff]  ;;  %v10593_v3 = vld [vmem:[%s10514_s1 + $0x10] sm:$0xff] }
 0x23f   : > { %4447 = vst [vmem:[#allocation2 + $0x88] sm:$0xff] %v4446_v43  ;;  %v7761_v51 = vrot.slane %v4510_v34, 11  ;;  %v4521_v52 = vrot.slane %v10523_v1, 7  ;;  %v4494_v55 = vrot.slane %v4492_v44, 4  ;;  %v4524_v56 = vrot.slane %v4512_v42, 7  ;;  %v4563_v26 = vld [vmem:[#allocation2 + $0xa8] sm:$0xff] }
 0x240   : > { %vm4535_vm2 = vsmask.f32 256  ;;  %vm4536_vm3 = vsmask.f32 4368  ;;  %v4484_v57 = vrot.slane %v4483_v48, 4  ;;  %v4502_v58 = vor.u32 %v4501_v49, %v4498_v45  ;;  %v4618_v36 = vld [vmem:[#allocation2 + $0xc0] sm:$0xff] }
 0x241   : > { %v4522_v60 = vsel %vm10577_vm0, %v7761_v51, %v4521_v52  ;;  %v4523_v61 = vrot.slane %v4521_v52, 4  ;;  %v4539_v63 = vshrl.u32 %v4532_v46, 16  ;;  %v4546_v0 = vrot.slane %v10530_v6, 7  ;;  %vm10603_vm4 = vmor %vm4535_vm2, %vm4536_vm3  ;;  %v4599_v15 = vld [vmem:[%s10514_s1 + $0x8] sm:$0xcc]  ;;  %v4596_v24 = vld [vmem:[#allocation2 + $0xb8] sm:$0xff] }
 0x242   : > { %4528 = vst [vmem:[#allocation2 + $0x20] sm:$0xff] %v4522_v60  ;;  %v4553_v1 = vshrl.u32 %v4534_v53, 16  ;;  %v4556_v2 = vshll.u32 %v4534_v53, 16  ;;  %v4493_v4 = vsel %vm10585_vm1, %v4484_v57, %v4492_v44  ;;  %v4503_v8 = vsel %vm10585_vm1, %v4494_v55, %v4502_v58  ;;  %v4601_v20 = vld [vmem:[%s10514_s1 + $0x18] sm:$0x33] }
 0x243   : > { %v4525_v9 = vsel %vm10577_vm0, %v4523_v61, %v4524_v56  ;;  %v4570_v6 = vsel %vm10532_vm7, %v10593_v3, %v4569_v47  ;;  %4506 = vst [vmem:[#allocation2 + $0x18] sm:$0xff] %v4493_v4  ;;  %v4508_v11 = vsel %vm10532_vm7, %v4503_v8, %v4507_v59  ;;  %v7762_v13 = vrot.slane %v4539_v63, 11  ;;  %v4621_v25 = vld [vmem:[%s10514_s1 + $0x8] sm:$0xcc]  ;;  %v4623_v38 = vld [vmem:[%s10514_s1 + $0x18] sm:$0x33] }
 0x244   : > { %v4530_v12 = vsel %vm10532_vm7, %v4525_v9, %v4529_v62  ;;  %v4549_v14 = vor.u32 %v4546_v0, %v10527_v5  ;;  %4509 = vst [vmem:[#allocation2 + $0x98] sm:$0xff] %v4508_v11  ;;  %v4551_v17 = vrot.slane %v4546_v0, 4  ;;  %v4555_v18 = vrot.slane %v4553_v1, 7  ;;  %v4661_v43 = vld [vmem:[%s10514_s1 + $0x8] sm:$0x88]  ;;  %v4677_v8 = vld [vmem:[#allocation2 + $0xd0] sm:$0xff] }
 0x245   : > { %v10617_v19 = vshll.u32 %v10593_v3, 16  ;;  %4531 = vst [vmem:[#allocation2 + $0xa0] sm:$0xff] %v4530_v12  ;;  %v10623_v22 = vshrl.u32 %v10593_v3, 16  ;;  %vm4605_vm5 = vcmask 1041408   ;;  %vm4606_vm6 = vcmask 1045508  }
 0x246   : > { %v4550_v21 = vsel %vm10603_vm4, %v7762_v13, %v4549_v14  ;;  %v4558_v5 = vor.u32 %v4556_v2, %v4555_v18  ;;  %vm10627_vm8 = vmor %vm4605_vm5, %vm4606_vm6  ;;  %v7763_v29 = vrot.slane %v4599_v15, 10  ;;  %4571 = vst [vmem:[#allocation2 + $0xb0] sm:$0xff] %v4570_v6  ;;  %v4610_v31 = vrot.slane %v10593_v3, 6  ;;  %v4663_v44 = vld [vmem:[%s10514_s1 + $0x18] sm:$0x77]  ;;  %v4658_v2 = vld [vmem:[#allocation2 + $0xc8] sm:$0xff] }
 0x247   : > { %4562 = vst [vmem:[#allocation2 + $0x28] sm:$0xff] %v4550_v21  ;;  %v4586_v27 = vrot.slane %v10617_v19, 5  ;;  %v4590_v30 = vrot.slane %v10623_v22, 4  ;;  %v4613_v32 = vrot.slane %v4601_v20, 6  ;;  %vm4624_vm9 = vsmask.f32 1280 }
 0x248   : > { %v4559_v33 = vsel %vm10603_vm4, %v4551_v17, %v4558_v5  ;;  %vm4625_vm11 = vsmask.f32 5392  ;;  %v4628_v37 = vshrl.u32 %v4621_v25, 16  ;;  %v4611_v41 = vsel %vm10627_vm8, %v7763_v29, %v4610_v31  ;;  %v4680_v52 = vld [vmem:[%s10514_s1 + $0x8] sm:$0x88] }
 0x249   : > { %v4587_v34 = vsel %vm10551_vm13, %v4441_v35, %v4586_v27  ;;  %v4564_v39 = vsel %vm10532_vm7, %v4559_v33, %v4563_v26  ;;  %v4591_v40 = vor.u32 %v4590_v30, %v4586_v27  ;;  %v4612_v42 = vrot.slane %v4610_v31, 4  ;;  %4617 = vst [vmem:[#allocation2 + $0x40] sm:$0xff] %v4611_v41  ;;  %v4682_v62 = vld [vmem:[%s10514_s1 + $0x18] sm:$0x77]  ;;  %vm10659_vm12 = vmor %vm4624_vm9, %vm4625_vm11  ;;  %v4711_v13 = vld [vmem:[%s10514_s1 + $0x10] sm:$0xee] }
 0x24a   : > { %4595 = vst [vmem:[#allocation2 + $0x38] sm:$0xff] %v4587_v34  ;;  %v4630_v23 = vrot.slane %v4628_v37, 6  ;;  %v4631_v35 = vshll.u32 %v4621_v25, 16  ;;  %v4639_v45 = vrot.slane %v10623_v22, 6  ;;  %v4642_v46 = vrot.slane %v10617_v19, 7  ;;  %v4712_v27 = vld [vmem:[%s10514_s1 + $0x18] sm:$0xff] }
 0x24b   : > { %4565 = vst [vmem:[#allocation2 + $0xa8] sm:$0xff] %v4564_v39  ;;  %v4592_v47 = vrot.slane %v4591_v40, 4  ;;  %v4614_v48 = vsel %vm10627_vm8, %v4612_v42, %v4613_v32  ;;  %v4647_v49 = vshrl.u32 %v4623_v38, 16  ;;  %v4650_v51 = vshll.u32 %v4623_v38, 16  ;;  %v4713_v14 = vld [vmem:[%s10514_s1 + $0x20] sm:$0x11] }
 0x24c   : > { %v4619_v53 = vsel %vm10532_vm7, %v4614_v48, %v4618_v36  ;;  %v4633_v55 = vrot.slane %v4631_v35, 7  ;;  %v4643_v56 = vor.u32 %v4642_v46, %v4639_v45  ;;  %v7764_v57 = vrot.slane %v4661_v43, 11  ;;  %v4730_v29 = vld [vmem:[%s10514_s1 + $0x10] sm:$0xee]  ;;  %v4732_v33 = vld [vmem:[%s10514_s1 + $0x20] sm:$0x11] }
 0x24d   : > { %v4597_v58 = vsel %vm10532_vm7, %v4592_v47, %v4596_v24  ;;  %4620 = vst [vmem:[#allocation2 + $0xc0] sm:$0xff] %v4619_v53  ;;  %v4649_v59 = vrot.slane %v4647_v49, 6  ;;  %v4652_v60 = vrot.slane %v4650_v51, 7  ;;  %v4669_v61 = vrot.slane %v10593_v3, 7  ;;  %v4727_v38 = vld [vmem:[#allocation2 + $0xe0] sm:$0xff] }
 0x24e   : > { %4598 = vst [vmem:[#allocation2 + $0xb8] sm:$0xff] %v4597_v58  ;;  %v4634_v0 = vor.u32 %v4633_v55, %v4630_v23  ;;  %v4645_v1 = vrot.slane %v4643_v56, 4  ;;  %v4672_v4 = vrot.slane %v4663_v44, 7  ;;  %v4684_v9 = vshrl.u32 %v4680_v52, 16  ;;  %v4767_v43 = vld [vmem:[%s10514_s1 + $0x10] sm:$0xcc] }
 0x24f   : > { %v4653_v6 = vor.u32 %v4652_v60, %v4649_v59  ;;  %v4670_v3 = vsel %vm10577_vm0, %v7764_v57, %v4669_v61  ;;  %v4671_v11 = vrot.slane %v4669_v61, 4  ;;  %v4691_v12 = vrot.slane %v10623_v22, 7  ;;  %v4769_v45 = vld [vmem:[%s10514_s1 + $0x20] sm:$0x33]  ;;  %v4786_v51 = vld [vmem:[%s10514_s1 + $0x10] sm:$0xcc] }
 0x250   : > { %v4635_v15 = vrot.slane %v4634_v0, 4  ;;  %4676 = vst [vmem:[#allocation2 + $0x50] sm:$0xff] %v4670_v3  ;;  %v7765_v17 = vrot.slane %v4684_v9, 11  ;;  %v4698_v18 = vshrl.u32 %v4682_v62, 16  ;;  %v4701_v20 = vshll.u32 %v4682_v62, 16 }
 0x251   : > { %v4654_v21 = vsel %vm10659_vm12, %v4645_v1, %v4653_v6  ;;  %v4673_v25 = vsel %vm10577_vm0, %v4671_v11, %v4672_v4  ;;  %v4694_v5 = vor.u32 %v4691_v12, %v10617_v19  ;;  %v4696_v26 = vrot.slane %v4691_v12, 4  ;;  %v4708_v19 = vld [vmem:[#allocation2 + $0xd8] sm:$0xff]  ;;  %v4783_v11 = vld [vmem:[#allocation2 + $0xf0] sm:$0xff] }
 0x252   : > { %v4644_v22 = vsel %vm10659_vm12, %v4635_v15, %v4643_v56  ;;  %v4659_v30 = vsel %vm10532_vm7, %v4654_v21, %v4658_v2  ;;  %v4678_v31 = vsel %vm10532_vm7, %v4673_v25, %v4677_v8  ;;  %v4700_v32 = vrot.slane %v4698_v18, 7  ;;  %v4788_v8 = vld [vmem:[%s10514_s1 + $0x20] sm:$0x33]  ;;  %v4764_v15 = vld [vmem:[#allocation2 + $0xe8] sm:$0xff] }
 0x253   : > { %4657 = vst [vmem:[#allocation2 + $0x48] sm:$0xff] %v4644_v22  ;;  %v4695_v50 = vsel %vm10603_vm4, %v7765_v17, %v4694_v5  ;;  %v7766_v34 = vrot.slane %v4711_v13, 9  ;;  %v4719_v36 = vrot.slane %v4712_v27, 5  ;;  %v4722_v37 = vrot.slane %v4713_v14, 5 }
 0x254   : > { %4660 = vst [vmem:[#allocation2 + $0xc8] sm:$0xff] %v4659_v30  ;;  %v4703_v39 = vor.u32 %v4701_v20, %v4700_v32  ;;  %v4734_v40 = vshrl.u32 %v4730_v29, 16  ;;  %v4737_v41 = vshll.u32 %v4730_v29, 16  ;;  %v4743_v42 = vshrl.u32 %v4712_v27, 16 }
 0x255   : > { %4679 = vst [vmem:[#allocation2 + $0xd0] sm:$0xff] %v4678_v31  ;;  %v4720_v44 = vsel %vm10544_vm10, %v7766_v34, %v4719_v36  ;;  %v4721_v24 = vrot.slane %v4719_v36, 4  ;;  %v4746_v23 = vshll.u32 %v4712_v27, 16  ;;  %v4753_v35 = vshrl.u32 %v4732_v33, 16 }
 0x256   : > { %4707 = vst [vmem:[#allocation2 + $0x58] sm:$0xff] %v4695_v50  ;;  %v4704_v46 = vsel %vm10603_vm4, %v4696_v26, %v4703_v39  ;;  %v4736_v47 = vrot.slane %v4734_v40, 5  ;;  %v4739_v48 = vrot.slane %v4737_v41, 6  ;;  %v4745_v49 = vrot.slane %v4743_v42, 5  ;;  %v4820_v50 = vld [vmem:[#allocation2 + $0xf8] sm:$0xff] }
 0x257   : > { %v4709_v52 = vsel %vm10532_vm7, %v4704_v46, %v4708_v19  ;;  %4726 = vst [vmem:[#allocation2 + $0x60] sm:$0xff] %v4720_v44  ;;  %v4723_v53 = vsel %vm10544_vm10, %v4721_v24, %v4722_v37  ;;  %v4748_v55 = vrot.slane %v4746_v23, 6  ;;  %v4755_v56 = vrot.slane %v4753_v35, 5 }
 0x258   : > { %4710 = vst [vmem:[#allocation2 + $0xd8] sm:$0xff] %v4709_v52  ;;  %v4728_v57 = vsel %vm10532_vm7, %v4723_v53, %v4727_v38  ;;  %v4740_v10 = vor.u32 %v4739_v48, %v4736_v47  ;;  %v4756_v58 = vshll.u32 %v4732_v33, 16  ;;  %v7767_v59 = vrot.slane %v4767_v43, 10 }
 0x259   : > { %4729 = vst [vmem:[#allocation2 + $0xe0] sm:$0xff] %v4728_v57  ;;  %v4749_v60 = vor.u32 %v4748_v55, %v4745_v49  ;;  %v4775_v61 = vrot.slane %v4712_v27, 6  ;;  %v4778_v62 = vrot.slane %v4769_v45, 6  ;;  %v4790_v0 = vshrl.u32 %v4786_v51, 16 }
 0x25a   : > { %v4741_v1 = vrot.slane %v4740_v10, 4  ;;  %v4758_v2 = vrot.slane %v4756_v58, 6  ;;  %v4793_v4 = vshll.u32 %v4786_v51, 16  ;;  %v4801_v16 = vrot.slane %v4743_v42, 6 }
 0x25b   : > { %v4751_v9 = vrot.slane %v4749_v60, 4  ;;  %v4776_v6 = vsel %vm10627_vm8, %v7767_v59, %v4775_v61  ;;  %v4777_v3 = vrot.slane %v4775_v61, 4  ;;  %v4792_v12 = vrot.slane %v4790_v0, 6 }
 0x25c   : > { %v4750_v13 = vsel %vm10585_vm1, %v4741_v1, %v4749_v60  ;;  %v4759_v14 = vor.u32 %v4758_v2, %v4755_v56  ;;  %4782 = vst [vmem:[#allocation2 + $0x70] sm:$0xff] %v4776_v6  ;;  %v4795_v17 = vrot.slane %v4793_v4, 7  ;;  %v4804_v18 = vrot.slane %v4746_v23, 7 }
 0x25d   : > { %4763 = vst [vmem:[#allocation2 + $0x68] sm:$0xff] %v4750_v13  ;;  %v4779_v20 = vsel %vm10627_vm8, %v4777_v3, %v4778_v62  ;;  %v4809_v21 = vshrl.u32 %v4788_v8, 16  ;;  %v4812_v25 = vshll.u32 %v4788_v8, 16 }
 0x25e   : > { %v4760_v5 = vsel %vm10585_vm1, %v4751_v9, %v4759_v14  ;;  %v4784_v26 = vsel %vm10532_vm7, %v4779_v20, %v4783_v11  ;;  %v4796_v27 = vor.u32 %v4795_v17, %v4792_v12  ;;  %v4805_v29 = vor.u32 %v4804_v18, %v4801_v16 }
 0x25f   : > { %v4765_v22 = vsel %vm10532_vm7, %v4760_v5, %v4764_v15  ;;  %4785 = vst [vmem:[#allocation2 + $0xf0] sm:$0xff] %v4784_v26  ;;  %v4811_v30 = vrot.slane %v4809_v21, 6  ;;  %v4814_v31 = vrot.slane %v4812_v25, 7 }
 0x260   : > { %4766 = vst [vmem:[#allocation2 + $0xe8] sm:$0xff] %v4765_v22  ;;  %v4797_v32 = vrot.slane %v4796_v27, 4  ;;  %v4807_v28 = vrot.slane %v4805_v29, 4 }
 0x261   : > { %v4815_v33 = vor.u32 %v4814_v31, %v4811_v30 }
 0x262   : > { %v4806_v54 = vsel %vm10659_vm12, %v4797_v32, %v4805_v29 }
 0x263   : > { %4819 = vst [vmem:[#allocation2 + $0x78] sm:$0xff] %v4806_v54  ;;  %v4816_v19 = vsel %vm10659_vm12, %v4807_v28, %v4815_v33 }
 0x264   : > { %v4821_v34 = vsel %vm10532_vm7, %v4816_v19, %v4820_v50 }
 0x265   : > { %4822 = vst [vmem:[#allocation2 + $0xf8] sm:$0xff] %v4821_v34 }
 0x266 PF: > { %v8962_v36 = vld [vmem:[%s10516_s17 + $0x38] sm:$0xff]  ;;  %v8961_v7 = vld [vmem:[%s10516_s17 + $0x30] sm:$0xff]  ;;  %v8960_v42 = vld [vmem:[%s10516_s17 + $0x28] sm:$0xff]  ;;  %vm7531_vm14 = vcmask 1046528   ;;  %vm7578_vm3 = vcmask 1043456   ;;  %vm7584_vm9 = vcmask 1043459  }
 0x267   : > { %v8970_v37 = vld [vmem:[%s10516_s17 + $0x78] sm:$0xff]  ;;  %7067 = vmatpush.bf16.msra.mxu0 %v8962_v36  ;;  %v8969_v39 = vld [vmem:[%s10516_s17 + $0x70] sm:$0xff]  ;;  %v8968_v43 = vld [vmem:[%s10516_s17 + $0x68] sm:$0xff]  ;;  %vm7579_vm4 = vsmask.f32 3328  ;;  %s9213_s9 = smul.u32 (%p9456_p9), 12, %s9349_s20 }
 0x268   : > { %v8978_v38 = vld [vmem:[%s10516_s17 + $0xb8] sm:$0xff]  ;;  %7081 = vmatpush.bf16.msra.mxu1 %v8970_v37  ;;  %v8977_v40 = vld [vmem:[%s10516_s17 + $0xb0] sm:$0xff]  ;;  %v8976_v44 = vld [vmem:[%s10516_s17 + $0xa8] sm:$0xff]  ;;  %vm7585_vm11 = vsmask.f32 7950 }
 0x269   : > { %v8986_v63 = vld [vmem:[%s10516_s17 + $0xf8] sm:$0xff]  ;;  %7095 = vmatpush.bf16.msra.mxu2 %v8978_v38  ;;  %v8985_v41 = vld [vmem:[%s10516_s17 + $0xf0] sm:$0xff]  ;;  %v8984_v24 = vld [vmem:[%s10516_s17 + $0xe8] sm:$0xff]  ;;  %s7599_s10 = sadd.s32 (%p9456_p9), %s9345_s19, %s9213_s9 }
 0x26a   : > { %7109 = vmatpush.bf16.msra.mxu3 %v8986_v63  ;;  %v8959_v23 = vld [vmem:[%s10516_s17 + $0x20] sm:$0xff]  ;;  %v8958_v47 = vld [vmem:[%s10516_s17 + $0x18] sm:$0xff]  ;;  %v8957_v52 = vld [vmem:[%s10516_s17 + $0x10] sm:$0xff]  ;;  %s8920_s11 = sshll.u32 (%p9456_p9), %s7599_s10, 2 }
 0x26b   : > { %7068 = vmatpush.bf16.msra.mxu0 %v8961_v7  ;;  %v8967_v35 = vld [vmem:[%s10516_s17 + $0x60] sm:$0xff]  ;;  %v8966_v48 = vld [vmem:[%s10516_s17 + $0x58] sm:$0xff]  ;;  %v8965_v53 = vld [vmem:[%s10516_s17 + $0x50] sm:$0xff]  ;;  %s7601_s14 = scalar_lea.vmem (%p9456_p9), %s11041_s4, %s8920_s11 }
 0x26c   : > { %7082 = vmatpush.bf16.msra.mxu1 %v8969_v39  ;;  %v8975_v45 = vld [vmem:[%s10516_s17 + $0xa0] sm:$0xff]  ;;  %v8974_v49 = vld [vmem:[%s10516_s17 + $0x98] sm:$0xff]  ;;  %v8973_v55 = vld [vmem:[%s10516_s17 + $0x90] sm:$0xff] }
 0x26d   : > { %7096 = vmatpush.bf16.msra.mxu2 %v8977_v40  ;;  %v8983_v46 = vld [vmem:[%s10516_s17 + $0xe0] sm:$0xff]  ;;  %v8982_v51 = vld [vmem:[%s10516_s17 + $0xd8] sm:$0xff]  ;;  %v8981_v56 = vld [vmem:[%s10516_s17 + $0xd0] sm:$0xff] }
 0x26e   : > { %7110 = vmatpush.bf16.msra.mxu3 %v8985_v41  ;;  %v8956_v57 = vld [vmem:[%s10516_s17 + $0x8] sm:$0xff]  ;;  %v8955_v60 = vld [vmem:[%s10516_s17] sm:$0xff]  ;;  %v8994_v1 = vld [vmem:[%s10516_s17 + $0x138] sm:$0xff] }
 0x26f   : > { %7069 = vmatpush.bf16.msra.mxu0 %v8960_v42  ;;  %v8964_v10 = vld [vmem:[%s10516_s17 + $0x48] sm:$0xff]  ;;  %v8963_v61 = vld [vmem:[%s10516_s17 + $0x40] sm:$0xff]  ;;  %v9002_v2 = vld [vmem:[%s10516_s17 + $0x178] sm:$0xff] }
 0x270   : > { %7083 = vmatpush.bf16.msra.mxu1 %v8968_v43  ;;  %v8972_v58 = vld [vmem:[%s10516_s17 + $0x88] sm:$0xff]  ;;  %v8971_v62 = vld [vmem:[%s10516_s17 + $0x80] sm:$0xff]  ;;  %v9010_v13 = vld [vmem:[%s10516_s17 + $0x1b8] sm:$0xff] }
 0x271   : > { %7097 = vmatpush.bf16.msra.mxu2 %v8976_v44  ;;  %v8980_v59 = vld [vmem:[%s10516_s17 + $0xc8] sm:$0xff]  ;;  %v8979_v0 = vld [vmem:[%s10516_s17 + $0xc0] sm:$0xff]  ;;  %v9018_v14 = vld [vmem:[%s10516_s17 + $0x1f8] sm:$0xff] }
 0x272   : > { %7111 = vmatpush.bf16.msra.mxu3 %v8984_v24  ;;  %v7770_v4 = vld [vmem:[#allocation2] sm:$0xf]  ;;  %v7778_v8 = vld [vmem:[#allocation2 + $0x8] sm:$0xf]  ;;  %v8923_v6 = vld [vmem:[#allocation2 + $0x4] sm:$0xf] }
 0x273   : > { %7070 = vmatpush.bf16.msra.mxu0 %v8959_v23  ;;  %v8939_v16 = vld [vmem:[#allocation2 + $0x7c] sm:$0xf0]  ;;  %v8940_v9 = vld [vmem:[#allocation2 + $0x84] sm:$0xf0]  ;;  %v7772_v3 = vld [vmem:[#allocation2 + $0x80] sm:$0xf0] }
 0x274   : > { %7084 = vmatpush.bf16.msra.mxu1 %v8967_v35  ;;  %v8924_v11 = vld [vmem:[#allocation2 + $0xc] sm:$0xf]  ;;  %v7771_v15 = vor.u32 %v8939_v16, %v7770_v4  ;;  %v7779_v17 = vor.u32 %v8940_v9, %v7778_v8  ;;  %v7775_v18 = vor.u32 %v8923_v6, %v7772_v3  ;;  %v8993_v21 = vld [vmem:[%s10516_s17 + $0x130] sm:$0xff]  ;;  %v8991_v31 = vld [vmem:[%s10516_s17 + $0x120] sm:$0xff] }
 0x275   : > { %7098 = vmatpush.bf16.msra.mxu2 %v8975_v45  ;;  %v7780_v12 = vld [vmem:[#allocation2 + $0x88] sm:$0xf0]  ;;  %v9001_v25 = vld [vmem:[%s10516_s17 + $0x170] sm:$0xff]  ;;  %v8999_v32 = vld [vmem:[%s10516_s17 + $0x160] sm:$0xff] }
 0x276   : > { %7112 = vmatpush.bf16.msra.mxu3 %v8983_v46  ;;  %v7783_v20 = vor.u32 %v8924_v11, %v7780_v12  ;;  %v9009_v5 = vld [vmem:[%s10516_s17 + $0x1b0] sm:$0xff]  ;;  %v8992_v27 = vld [vmem:[%s10516_s17 + $0x128] sm:$0xff]  ;;  %v9007_v28 = vld [vmem:[%s10516_s17 + $0x1a0] sm:$0xff] }
 0x277   : > { %7071 = vmatpush.bf16.msra.mxu0 %v8958_v47  ;;  %v9017_v26 = vld [vmem:[%s10516_s17 + $0x1f0] sm:$0xff]  ;;  %v9000_v29 = vld [vmem:[%s10516_s17 + $0x168] sm:$0xff]  ;;  %v9015_v33 = vld [vmem:[%s10516_s17 + $0x1e0] sm:$0xff] }
 0x278   : > { %7085 = vmatpush.bf16.msra.mxu1 %v8966_v48  ;;  %v9008_v22 = vld [vmem:[%s10516_s17 + $0x1a8] sm:$0xff]  ;;  %v8990_v50 = vld [vmem:[%s10516_s17 + $0x118] sm:$0xff]  ;;  %v8989_v36 = vld [vmem:[%s10516_s17 + $0x110] sm:$0xff] }
 0x279   : > { %7099 = vmatpush.bf16.msra.mxu2 %v8974_v49  ;;  %v9016_v30 = vld [vmem:[%s10516_s17 + $0x1e8] sm:$0xff]  ;;  %v8998_v54 = vld [vmem:[%s10516_s17 + $0x158] sm:$0xff]  ;;  %v8997_v37 = vld [vmem:[%s10516_s17 + $0x150] sm:$0xff] }
 0x27a   : > { %7113 = vmatpush.bf16.msra.mxu3 %v8982_v51  ;;  %v9006_v19 = vld [vmem:[%s10516_s17 + $0x198] sm:$0xff]  ;;  %v9005_v38 = vld [vmem:[%s10516_s17 + $0x190] sm:$0xff]  ;;  %v8988_v7 = vld [vmem:[%s10516_s17 + $0x108] sm:$0xff] }
 0x27b   : > { %7072 = vmatpush.bf16.msra.mxu0 %v8957_v52  ;;  %v9014_v34 = vld [vmem:[%s10516_s17 + $0x1d8] sm:$0xff]  ;;  %v9013_v63 = vld [vmem:[%s10516_s17 + $0x1d0] sm:$0xff]  ;;  %v8996_v39 = vld [vmem:[%s10516_s17 + $0x148] sm:$0xff] }
 0x27c   : > { %7086 = vmatpush.bf16.msra.mxu1 %v8965_v53  ;;  %v9004_v40 = vld [vmem:[%s10516_s17 + $0x188] sm:$0xff]  ;;  %v8987_v42 = vld [vmem:[%s10516_s17 + $0x100] sm:$0xff]  ;;  %v9026_v23 = vld [vmem:[%s10516_s17 + $0x238] sm:$0xff] }
 0x27d   : > { %7100 = vmatpush.bf16.msra.mxu2 %v8973_v55  ;;  %v9012_v41 = vld [vmem:[%s10516_s17 + $0x1c8] sm:$0xff]  ;;  %v8995_v43 = vld [vmem:[%s10516_s17 + $0x140] sm:$0xff]  ;;  %v9034_v35 = vld [vmem:[%s10516_s17 + $0x278] sm:$0xff] }
 0x27e   : > { %7114 = vmatpush.bf16.msra.mxu3 %v8981_v56  ;;  %v9003_v44 = vld [vmem:[%s10516_s17 + $0x180] sm:$0xff]  ;;  %v7786_v45 = vld [vmem:[#allocation2 + $0x10] sm:$0xf]  ;;  %v7794_v47 = vld [vmem:[#allocation2 + $0x18] sm:$0xf] }
 0x27f   : > { %7073 = vmatpush.bf16.msra.mxu0 %v8956_v57  ;;  %v9011_v24 = vld [vmem:[%s10516_s17 + $0x1c0] sm:$0xff]  ;;  %v8941_v46 = vld [vmem:[#allocation2 + $0x8c] sm:$0xf0]  ;;  %v8942_v48 = vld [vmem:[#allocation2 + $0x94] sm:$0xf0] }
 0x280   : > { %7087 = vmatpush.bf16.msra.mxu1 %v8964_v10  ;;  %v8925_v49 = vld [vmem:[#allocation2 + $0x14] sm:$0xf]  ;;  %v8926_v52 = vld [vmem:[#allocation2 + $0x1c] sm:$0xf]  ;;  %v7787_v57 = vor.u32 %v8941_v46, %v7786_v45  ;;  %v7795_v10 = vor.u32 %v8942_v48, %v7794_v47  ;;  %v9040_v4 = vld [vmem:[%s10516_s17 + $0x2a8] sm:$0xff] }
 0x281   : > { %7101 = vmatpush.bf16.msra.mxu2 %v8972_v58  ;;  %v7788_v51 = vld [vmem:[#allocation2 + $0x90] sm:$0xf0]  ;;  %v7796_v53 = vld [vmem:[#allocation2 + $0x98] sm:$0xf0]  ;;  %v9048_v16 = vld [vmem:[%s10516_s17 + $0x2e8] sm:$0xff] }
 0x282   : > { %7115 = vmatpush.bf16.msra.mxu3 %v8980_v59  ;;  %v9042_v55 = vld [vmem:[%s10516_s17 + $0x2b8] sm:$0xff]  ;;  %v7791_v58 = vor.u32 %v8925_v49, %v7788_v51  ;;  %v7799_v59 = vor.u32 %v8926_v52, %v7796_v53  ;;  %v9023_v8 = vld [vmem:[%s10516_s17 + $0x220] sm:$0xff]  ;;  %v9072_v45 = vld [vmem:[%s10516_s17 + $0x3a8] sm:$0xff] }
 0x283   : > { %7074 = vmatpush.bf16.msra.mxu0 %v8955_v60  ;;  %v9050_v56 = vld [vmem:[%s10516_s17 + $0x2f8] sm:$0xff]  ;;  %v9025_v60 = vld [vmem:[%s10516_s17 + $0x230] sm:$0xff]  ;;  %v9031_v9 = vld [vmem:[%s10516_s17 + $0x260] sm:$0xff] }
 0x284   : > { %7088 = vmatpush.bf16.msra.mxu1 %v8963_v61  ;;  %v9033_v61 = vld [vmem:[%s10516_s17 + $0x270] sm:$0xff]  ;;  %v9039_v6 = vld [vmem:[%s10516_s17 + $0x2a0] sm:$0xff]  ;;  %v9022_v11 = vld [vmem:[%s10516_s17 + $0x218] sm:$0xff] }
 0x285   : > { %7102 = vmatpush.bf16.msra.mxu2 %v8971_v62  ;;  %v9041_v62 = vld [vmem:[%s10516_s17 + $0x2b0] sm:$0xff]  ;;  %v9047_v3 = vld [vmem:[%s10516_s17 + $0x2e0] sm:$0xff]  ;;  %v9030_v12 = vld [vmem:[%s10516_s17 + $0x258] sm:$0xff] }
 0x286   : > { %7116 = vmatpush.bf16.msra.mxu3 %v8979_v0  ;;  %7075 = vmatmul.bf16.vlgmr.msra.gmra.mxu0 %v7771_v15  ;;  %v9049_v0 = vld [vmem:[%s10516_s17 + $0x2f0] sm:$0xff]  ;;  %v9080_v46 = vld [vmem:[%s10516_s17 + $0x3e8] sm:$0xff]  ;;  %v9055_v47 = vld [vmem:[%s10516_s17 + $0x320] sm:$0xff] }
 0x287   : > { %7123 = vmatpush.bf16.msrb.mxu0 %v8994_v1  ;;  %7089 = vmatmul.bf16.vlgmr.msra.gmra.mxu1 %v7775_v18  ;;  %v9024_v1 = vld [vmem:[%s10516_s17 + $0x228] sm:$0xff]  ;;  %v9021_v15 = vld [vmem:[%s10516_s17 + $0x210] sm:$0xff]  ;;  %v9063_v48 = vld [vmem:[%s10516_s17 + $0x360] sm:$0xff] }
 0x288   : > { %7137 = vmatpush.bf16.msrb.mxu1 %v9002_v2  ;;  %7103 = vmatmul.bf16.vlgmr.msra.gmra.mxu2 %v7779_v17  ;;  %v9032_v2 = vld [vmem:[%s10516_s17 + $0x268] sm:$0xff]  ;;  %v9029_v17 = vld [vmem:[%s10516_s17 + $0x250] sm:$0xff]  ;;  %v9071_v49 = vld [vmem:[%s10516_s17 + $0x3a0] sm:$0xff] }
 0x289   : > { %7151 = vmatpush.bf16.msrb.mxu2 %v9010_v13  ;;  %7117 = vmatmul.bf16.vlgmr.msra.gmra.mxu3 %v7783_v20  ;;  %v9038_v13 = vld [vmem:[%s10516_s17 + $0x298] sm:$0xff]  ;;  %v9037_v18 = vld [vmem:[%s10516_s17 + $0x290] sm:$0xff]  ;;  %v9079_v51 = vld [vmem:[%s10516_s17 + $0x3e0] sm:$0xff] }
 0x28a   : > { %7165 = vmatpush.bf16.msrb.mxu3 %v9018_v14  ;;  %v9046_v14 = vld [vmem:[%s10516_s17 + $0x2d8] sm:$0xff]  ;;  %v9045_v20 = vld [vmem:[%s10516_s17 + $0x2d0] sm:$0xff]  ;;  %vm7580_vm8 = vmand %vm7578_vm3, %vm7579_vm4 }
 0x28b   : > { %7124 = vmatpush.bf16.msrb.mxu0 %v8993_v21  ;;  %v9020_v21 = vld [vmem:[%s10516_s17 + $0x208] sm:$0xff]  ;;  %v9054_v52 = vld [vmem:[%s10516_s17 + $0x318] sm:$0xff]  ;;  %vm7586_vm12 = vmand %vm7584_vm9, %vm7585_vm11 }
 0x28c   : > { %7138 = vmatpush.bf16.msrb.mxu1 %v9001_v25  ;;  %v9028_v25 = vld [vmem:[%s10516_s17 + $0x248] sm:$0xff]  ;;  %v9062_v53 = vld [vmem:[%s10516_s17 + $0x358] sm:$0xff] }
 0x28d   : > { %7152 = vmatpush.bf16.msrb.mxu2 %v9009_v5  ;;  %v9036_v5 = vld [vmem:[%s10516_s17 + $0x288] sm:$0xff] }
 0x28e   : > { %7166 = vmatpush.bf16.msrb.mxu3 %v9017_v26  ;;  %v9044_v26 = vld [vmem:[%s10516_s17 + $0x2c8] sm:$0xff] }
 0x28f   : > { %7125 = vmatpush.bf16.msrb.mxu0 %v8992_v27  ;;  %v9019_v27 = vld [vmem:[%s10516_s17 + $0x200] sm:$0xff] }
 0x290   : > { %7139 = vmatpush.bf16.msrb.mxu1 %v9000_v29  ;;  %v9027_v29 = vld [vmem:[%s10516_s17 + $0x240] sm:$0xff] }
 0x291   : > { %7153 = vmatpush.bf16.msrb.mxu2 %v9008_v22  ;;  %v9035_v22 = vld [vmem:[%s10516_s17 + $0x280] sm:$0xff] }
 0x292   : > { %7167 = vmatpush.bf16.msrb.mxu3 %v9016_v30  ;;  %v9043_v30 = vld [vmem:[%s10516_s17 + $0x2c0] sm:$0xff] }
 0x293   : > { %7126 = vmatpush.bf16.msrb.mxu0 %v8991_v31  ;;  %v9058_v31 = vld [vmem:[%s10516_s17 + $0x338] sm:$0xff] }
 0x294   : > { %7140 = vmatpush.bf16.msrb.mxu1 %v8999_v32  ;;  %v9066_v32 = vld [vmem:[%s10516_s17 + $0x378] sm:$0xff] }
 0x295   : > { %7154 = vmatpush.bf16.msrb.mxu2 %v9007_v28  ;;  %v7802_v28 = vld [vmem:[#allocation2 + $0x20] sm:$0xf] }
 0x296   : > { %7168 = vmatpush.bf16.msrb.mxu3 %v9015_v33  ;;  %v8943_v33 = vld [vmem:[#allocation2 + $0x9c] sm:$0xf0] }
 0x297   : > { %7127 = vmatpush.bf16.msrb.mxu0 %v8990_v50  ;;  %v7810_v50 = vld [vmem:[#allocation2 + $0x28] sm:$0xf] }
 0x298   : > { %7141 = vmatpush.bf16.msrb.mxu1 %v8998_v54  ;;  %v8944_v54 = vld [vmem:[#allocation2 + $0xa4] sm:$0xf0] }
 0x299   : > { %7155 = vmatpush.bf16.msrb.mxu2 %v9006_v19  ;;  %v8927_v19 = vld [vmem:[#allocation2 + $0x24] sm:$0xf] }
 0x29a   : > { %7169 = vmatpush.bf16.msrb.mxu3 %v9014_v34  ;;  %v7804_v34 = vld [vmem:[#allocation2 + $0xa0] sm:$0xf0] }
 0x29b   : > { %7128 = vmatpush.bf16.msrb.mxu0 %v8989_v36  ;;  %v8928_v36 = vld [vmem:[#allocation2 + $0x2c] sm:$0xf] }
 0x29c   : > { %7142 = vmatpush.bf16.msrb.mxu1 %v8997_v37  ;;  %v7812_v37 = vld [vmem:[#allocation2 + $0xa8] sm:$0xf0] }
 0x29d   : > { %7156 = vmatpush.bf16.msrb.mxu2 %v9005_v38  ;;  %v9074_v38 = vld [vmem:[%s10516_s17 + $0x3b8] sm:$0xff] }
 0x29e   : > { %7170 = vmatpush.bf16.msrb.mxu3 %v9013_v63  ;;  %v9082_v63 = vld [vmem:[%s10516_s17 + $0x3f8] sm:$0xff] }
 0x29f   : > { %7129 = vmatpush.bf16.msrb.mxu0 %v8988_v7  ;;  %v7803_v7 = vor.u32 %v8943_v33, %v7802_v28  ;;  %v9104_v28 = vld [vmem:[%s10516_s17 + $0x4a8] sm:$0xff] }
 0x2a0   : > { %7143 = vmatpush.bf16.msrb.mxu1 %v8996_v39  ;;  %v7811_v39 = vor.u32 %v8944_v54, %v7810_v50  ;;  %v9112_v33 = vld [vmem:[%s10516_s17 + $0x4e8] sm:$0xff]  ;;  %v9087_v50 = vld [vmem:[%s10516_s17 + $0x420] sm:$0xff] }
 0x2a1   : > { %7157 = vmatpush.bf16.msrb.mxu2 %v9004_v40  ;;  %v7807_v40 = vor.u32 %v8927_v19, %v7804_v34  ;;  %v9095_v54 = vld [vmem:[%s10516_s17 + $0x460] sm:$0xff] }
 0x2a2   : > { %7171 = vmatpush.bf16.msrb.mxu3 %v9012_v41  ;;  %v7815_v41 = vor.u32 %v8928_v36, %v7812_v37  ;;  %v9103_v19 = vld [vmem:[%s10516_s17 + $0x4a0] sm:$0xff]  ;;  %v9086_v36 = vld [vmem:[%s10516_s17 + $0x418] sm:$0xff] }
 0x2a3   : > { %7130 = vmatpush.bf16.msrb.mxu0 %v8987_v42  ;;  %v9057_v42 = vld [vmem:[%s10516_s17 + $0x330] sm:$0xff]  ;;  %v9111_v34 = vld [vmem:[%s10516_s17 + $0x4e0] sm:$0xff]  ;;  %v9094_v37 = vld [vmem:[%s10516_s17 + $0x458] sm:$0xff] }
 0x2a4   : > { %7144 = vmatpush.bf16.msrb.mxu1 %v8995_v43  ;;  %v9065_v43 = vld [vmem:[%s10516_s17 + $0x370] sm:$0xff] }
 0x2a5   : > { %7158 = vmatpush.bf16.msrb.mxu2 %v9003_v44  ;;  %v9073_v44 = vld [vmem:[%s10516_s17 + $0x3b0] sm:$0xff] }
 0x2a6   : > { %7172 = vmatpush.bf16.msrb.mxu3 %v9011_v24  ;;  %7131 = vmatmul.bf16.vlgmr.msrb.gmra.mxu0 %v7787_v57  ;;  %v9081_v24 = vld [vmem:[%s10516_s17 + $0x3f0] sm:$0xff] }
 0x2a7   : > { %7179 = vmatpush.bf16.msra.mxu0 %v9026_v23  ;;  %7145 = vmatmul.bf16.vlgmr.msrb.gmra.mxu1 %v7791_v58  ;;  %v9056_v23 = vld [vmem:[%s10516_s17 + $0x328] sm:$0xff]  ;;  %v9053_v57 = vld [vmem:[%s10516_s17 + $0x310] sm:$0xff] }
 0x2a8   : > { %7193 = vmatpush.bf16.msra.mxu1 %v9034_v35  ;;  %7159 = vmatmul.bf16.vlgmr.msrb.gmra.mxu2 %v7795_v10  ;;  %v9064_v35 = vld [vmem:[%s10516_s17 + $0x368] sm:$0xff]  ;;  %v9061_v10 = vld [vmem:[%s10516_s17 + $0x350] sm:$0xff] }
 0x2a9   : > { %7207 = vmatpush.bf16.msra.mxu2 %v9042_v55  ;;  %7173 = vmatmul.bf16.vlgmr.msrb.gmra.mxu3 %v7799_v59  ;;  %v9070_v55 = vld [vmem:[%s10516_s17 + $0x398] sm:$0xff]  ;;  %v9069_v58 = vld [vmem:[%s10516_s17 + $0x390] sm:$0xff] }
 0x2aa   : > { %7221 = vmatpush.bf16.msra.mxu3 %v9050_v56  ;;  %v9078_v56 = vld [vmem:[%s10516_s17 + $0x3d8] sm:$0xff]  ;;  %v9077_v59 = vld [vmem:[%s10516_s17 + $0x3d0] sm:$0xff] }
 0x2ab   : > { %7180 = vmatpush.bf16.msra.mxu0 %v9025_v60  ;;  %v9052_v60 = vld [vmem:[%s10516_s17 + $0x308] sm:$0xff] }
 0x2ac   : > { %7194 = vmatpush.bf16.msra.mxu1 %v9033_v61  ;;  %v9060_v61 = vld [vmem:[%s10516_s17 + $0x348] sm:$0xff] }
 0x2ad   : > { %7208 = vmatpush.bf16.msra.mxu2 %v9041_v62  ;;  %v9068_v62 = vld [vmem:[%s10516_s17 + $0x388] sm:$0xff] }
 0x2ae   : > { %7222 = vmatpush.bf16.msra.mxu3 %v9049_v0  ;;  %v9076_v0 = vld [vmem:[%s10516_s17 + $0x3c8] sm:$0xff] }
 0x2af   : > { %7181 = vmatpush.bf16.msra.mxu0 %v9024_v1  ;;  %v9051_v1 = vld [vmem:[%s10516_s17 + $0x300] sm:$0xff] }
 0x2b0   : > { %7195 = vmatpush.bf16.msra.mxu1 %v9032_v2  ;;  %v9059_v2 = vld [vmem:[%s10516_s17 + $0x340] sm:$0xff] }
 0x2b1   : > { %7209 = vmatpush.bf16.msra.mxu2 %v9040_v4  ;;  %v9067_v4 = vld [vmem:[%s10516_s17 + $0x380] sm:$0xff] }
 0x2b2   : > { %7223 = vmatpush.bf16.msra.mxu3 %v9048_v16  ;;  %v9075_v16 = vld [vmem:[%s10516_s17 + $0x3c0] sm:$0xff] }
 0x2b3   : > { %7182 = vmatpush.bf16.msra.mxu0 %v9023_v8  ;;  %v9090_v8 = vld [vmem:[%s10516_s17 + $0x438] sm:$0xff] }
 0x2b4   : > { %7196 = vmatpush.bf16.msra.mxu1 %v9031_v9  ;;  %v9098_v9 = vld [vmem:[%s10516_s17 + $0x478] sm:$0xff] }
 0x2b5   : > { %7210 = vmatpush.bf16.msra.mxu2 %v9039_v6  ;;  %v7818_v6 = vld [vmem:[#allocation2 + $0x30] sm:$0xf] }
 0x2b6   : > { %7224 = vmatpush.bf16.msra.mxu3 %v9047_v3  ;;  %v8945_v3 = vld [vmem:[#allocation2 + $0xac] sm:$0xf0] }
 0x2b7   : > { %7183 = vmatpush.bf16.msra.mxu0 %v9022_v11  ;;  %v7826_v11 = vld [vmem:[#allocation2 + $0x38] sm:$0xf] }
 0x2b8   : > { %7197 = vmatpush.bf16.msra.mxu1 %v9030_v12  ;;  %v8946_v12 = vld [vmem:[#allocation2 + $0xb4] sm:$0xf0] }
 0x2b9   : > { %7211 = vmatpush.bf16.msra.mxu2 %v9038_v13  ;;  %v8929_v13 = vld [vmem:[#allocation2 + $0x34] sm:$0xf] }
 0x2ba   : > { %7225 = vmatpush.bf16.msra.mxu3 %v9046_v14  ;;  %v7820_v14 = vld [vmem:[#allocation2 + $0xb0] sm:$0xf0] }
 0x2bb   : > { %7184 = vmatpush.bf16.msra.mxu0 %v9021_v15  ;;  %v8930_v15 = vld [vmem:[#allocation2 + $0x3c] sm:$0xf] }
 0x2bc   : > { %7198 = vmatpush.bf16.msra.mxu1 %v9029_v17  ;;  %v7828_v17 = vld [vmem:[#allocation2 + $0xb8] sm:$0xf0] }
 0x2bd   : > { %7212 = vmatpush.bf16.msra.mxu2 %v9037_v18  ;;  %v9106_v18 = vld [vmem:[%s10516_s17 + $0x4b8] sm:$0xff] }
 0x2be   : > { %7226 = vmatpush.bf16.msra.mxu3 %v9045_v20  ;;  %v9114_v20 = vld [vmem:[%s10516_s17 + $0x4f8] sm:$0xff] }
 0x2bf   : > { %7185 = vmatpush.bf16.msra.mxu0 %v9020_v21  ;;  %v7819_v21 = vor.u32 %v8945_v3, %v7818_v6  ;;  %v10891_v6 = vld [vmem:[%s4400_s13] ss:$0 sm:$0xff]  ;;  %v9136_v3 = vld [vmem:[%s10516_s17 + $0x5a8] sm:$0xff] }
 0x2c0   : > { %7199 = vmatpush.bf16.msra.mxu1 %v9028_v25  ;;  %v7827_v25 = vor.u32 %v8946_v12, %v7826_v11  ;;  %v9144_v11 = vld [vmem:[%s10516_s17 + $0x5e8] sm:$0xff] }
 0x2c1   : > { %7213 = vmatpush.bf16.msra.mxu2 %v9036_v5  ;;  %v7823_v5 = vor.u32 %v8929_v13, %v7820_v14  ;;  %v9119_v13 = vld [vmem:[%s10516_s17 + $0x520] sm:$0xff] }
 0x2c2   : > { %7227 = vmatpush.bf16.msra.mxu3 %v9044_v26  ;;  %v7831_v26 = vor.u32 %v8930_v15, %v7828_v17  ;;  %v9127_v14 = vld [vmem:[%s10516_s17 + $0x560] sm:$0xff] }
 0x2c3   : > { %7186 = vmatpush.bf16.msra.mxu0 %v9019_v27  ;;  %v9089_v27 = vld [vmem:[%s10516_s17 + $0x430] sm:$0xff]  ;;  %v9135_v17 = vld [vmem:[%s10516_s17 + $0x5a0] sm:$0xff] }
 0x2c4   : > { %7200 = vmatpush.bf16.msra.mxu1 %v9027_v29  ;;  %v9097_v29 = vld [vmem:[%s10516_s17 + $0x470] sm:$0xff] }
 0x2c5   : > { %7214 = vmatpush.bf16.msra.mxu2 %v9035_v22  ;;  %v9105_v22 = vld [vmem:[%s10516_s17 + $0x4b0] sm:$0xff] }
 0x2c6   : > { %7228 = vmatpush.bf16.msra.mxu3 %v9043_v30  ;;  %7187 = vmatmul.bf16.vlgmr.msra.gmra.mxu0 %v7803_v7  ;;  %v9113_v30 = vld [vmem:[%s10516_s17 + $0x4f0] sm:$0xff] }
 0x2c7   : > { %7235 = vmatpush.bf16.msrb.mxu0 %v9058_v31  ;;  %7201 = vmatmul.bf16.vlgmr.msra.gmra.mxu1 %v7807_v40  ;;  %v9088_v31 = vld [vmem:[%s10516_s17 + $0x428] sm:$0xff]  ;;  %v9085_v7 = vld [vmem:[%s10516_s17 + $0x410] sm:$0xff] }
 0x2c8   : > { %7249 = vmatpush.bf16.msrb.mxu1 %v9066_v32  ;;  %7215 = vmatmul.bf16.vlgmr.msra.gmra.mxu2 %v7811_v39  ;;  %v9096_v32 = vld [vmem:[%s10516_s17 + $0x468] sm:$0xff]  ;;  %v9093_v39 = vld [vmem:[%s10516_s17 + $0x450] sm:$0xff] }
 0x2c9   : > { %7263 = vmatpush.bf16.msrb.mxu2 %v9074_v38  ;;  %7229 = vmatmul.bf16.vlgmr.msra.gmra.mxu3 %v7815_v41  ;;  %v9102_v38 = vld [vmem:[%s10516_s17 + $0x498] sm:$0xff]  ;;  %v9101_v40 = vld [vmem:[%s10516_s17 + $0x490] sm:$0xff] }
 0x2ca   : > { %7277 = vmatpush.bf16.msrb.mxu3 %v9082_v63  ;;  %v9110_v63 = vld [vmem:[%s10516_s17 + $0x4d8] sm:$0xff]  ;;  %v9109_v41 = vld [vmem:[%s10516_s17 + $0x4d0] sm:$0xff] }
 0x2cb   : > { %7236 = vmatpush.bf16.msrb.mxu0 %v9057_v42  ;;  %v9084_v42 = vld [vmem:[%s10516_s17 + $0x408] sm:$0xff] }
 0x2cc   : > { %7250 = vmatpush.bf16.msrb.mxu1 %v9065_v43  ;;  %v9092_v43 = vld [vmem:[%s10516_s17 + $0x448] sm:$0xff] }
 0x2cd   : > { %7264 = vmatpush.bf16.msrb.mxu2 %v9073_v44  ;;  %v9100_v44 = vld [vmem:[%s10516_s17 + $0x488] sm:$0xff] }
 0x2ce   : > { %7278 = vmatpush.bf16.msrb.mxu3 %v9081_v24  ;;  %v9108_v24 = vld [vmem:[%s10516_s17 + $0x4c8] sm:$0xff] }
 0x2cf   : > { %7237 = vmatpush.bf16.msrb.mxu0 %v9056_v23  ;;  %v9083_v23 = vld [vmem:[%s10516_s17 + $0x400] sm:$0xff] }
 0x2d0   : > { %7251 = vmatpush.bf16.msrb.mxu1 %v9064_v35  ;;  %v9091_v35 = vld [vmem:[%s10516_s17 + $0x440] sm:$0xff] }
 0x2d1   : > { %7265 = vmatpush.bf16.msrb.mxu2 %v9072_v45  ;;  %v9099_v45 = vld [vmem:[%s10516_s17 + $0x480] sm:$0xff] }
 0x2d2   : > { %7279 = vmatpush.bf16.msrb.mxu3 %v9080_v46  ;;  %v9107_v46 = vld [vmem:[%s10516_s17 + $0x4c0] sm:$0xff] }
 0x2d3   : > { %7238 = vmatpush.bf16.msrb.mxu0 %v9055_v47  ;;  %v9122_v47 = vld [vmem:[%s10516_s17 + $0x538] sm:$0xff] }
 0x2d4   : > { %7252 = vmatpush.bf16.msrb.mxu1 %v9063_v48  ;;  %v9130_v48 = vld [vmem:[%s10516_s17 + $0x578] sm:$0xff] }
 0x2d5   : > { %7266 = vmatpush.bf16.msrb.mxu2 %v9071_v49  ;;  %v7834_v49 = vld [vmem:[#allocation2 + $0x40] sm:$0xf] }
 0x2d6   : > { %7280 = vmatpush.bf16.msrb.mxu3 %v9079_v51  ;;  %v8947_v51 = vld [vmem:[#allocation2 + $0xbc] sm:$0xf0] }
 0x2d7   : > { %7239 = vmatpush.bf16.msrb.mxu0 %v9054_v52  ;;  %v7842_v52 = vld [vmem:[#allocation2 + $0x48] sm:$0xf] }
 0x2d8   : > { %7253 = vmatpush.bf16.msrb.mxu1 %v9062_v53  ;;  %v8948_v53 = vld [vmem:[#allocation2 + $0xc4] sm:$0xf0] }
 0x2d9   : > { %7267 = vmatpush.bf16.msrb.mxu2 %v9070_v55  ;;  %v8931_v55 = vld [vmem:[#allocation2 + $0x44] sm:$0xf] }
 0x2da   : > { %7281 = vmatpush.bf16.msrb.mxu3 %v9078_v56  ;;  %v7836_v56 = vld [vmem:[#allocation2 + $0xc0] sm:$0xf0] }
 0x2db   : > { %7240 = vmatpush.bf16.msrb.mxu0 %v9053_v57  ;;  %v8932_v57 = vld [vmem:[#allocation2 + $0x4c] sm:$0xf] }
 0x2dc   : > { %7254 = vmatpush.bf16.msrb.mxu1 %v9061_v10  ;;  %v7844_v10 = vld [vmem:[#allocation2 + $0xc8] sm:$0xf0] }
 0x2dd   : > { %7268 = vmatpush.bf16.msrb.mxu2 %v9069_v58  ;;  %v9138_v58 = vld [vmem:[%s10516_s17 + $0x5b8] sm:$0xff] }
 0x2de   : > { %7282 = vmatpush.bf16.msrb.mxu3 %v9077_v59  ;;  %v9146_v59 = vld [vmem:[%s10516_s17 + $0x5f8] sm:$0xff] }
 0x2df   : > { %7241 = vmatpush.bf16.msrb.mxu0 %v9052_v60  ;;  %v7835_v60 = vor.u32 %v8947_v51, %v7834_v49 }
 0x2e0   : > { %7255 = vmatpush.bf16.msrb.mxu1 %v9060_v61  ;;  %v7843_v61 = vor.u32 %v8948_v53, %v7842_v52  ;;  %v9153_v53 = vld [vmem:[%s10516_s17 + $0x630] sm:$0xff] }
 0x2e1   : > { %7269 = vmatpush.bf16.msrb.mxu2 %v9068_v62  ;;  %v7839_v62 = vor.u32 %v8931_v55, %v7836_v56  ;;  %v9161_v55 = vld [vmem:[%s10516_s17 + $0x670] sm:$0xff] }
 0x2e2   : > { %7283 = vmatpush.bf16.msrb.mxu3 %v9076_v0  ;;  %v7847_v0 = vor.u32 %v8932_v57, %v7844_v10  ;;  %v9169_v56 = vld [vmem:[%s10516_s17 + $0x6b0] sm:$0xff]  ;;  %v9152_v10 = vld [vmem:[%s10516_s17 + $0x628] sm:$0xff] }
 0x2e3   : > { %7242 = vmatpush.bf16.msrb.mxu0 %v9051_v1  ;;  %v9121_v1 = vld [vmem:[%s10516_s17 + $0x530] sm:$0xff] }
 0x2e4   : > { %7256 = vmatpush.bf16.msrb.mxu1 %v9059_v2  ;;  %v9129_v2 = vld [vmem:[%s10516_s17 + $0x570] sm:$0xff] }
 0x2e5   : > { %7270 = vmatpush.bf16.msrb.mxu2 %v9067_v4  ;;  %v9137_v4 = vld [vmem:[%s10516_s17 + $0x5b0] sm:$0xff] }
 0x2e6   : > { %7284 = vmatpush.bf16.msrb.mxu3 %v9075_v16  ;;  %7243 = vmatmul.bf16.vlgmr.msrb.gmra.mxu0 %v7819_v21  ;;  %v9145_v16 = vld [vmem:[%s10516_s17 + $0x5f0] sm:$0xff] }
 0x2e7   : > { %7291 = vmatpush.bf16.msra.mxu0 %v9090_v8  ;;  %7257 = vmatmul.bf16.vlgmr.msrb.gmra.mxu1 %v7823_v5  ;;  %v9120_v8 = vld [vmem:[%s10516_s17 + $0x528] sm:$0xff]  ;;  %v9126_v5 = vld [vmem:[%s10516_s17 + $0x558] sm:$0xff]  ;;  %v9177_v57 = vld [vmem:[%s10516_s17 + $0x6f0] sm:$0xff] }
 0x2e8   : > { %7305 = vmatpush.bf16.msra.mxu1 %v9098_v9  ;;  %7271 = vmatmul.bf16.vlgmr.msrb.gmra.mxu2 %v7827_v25  ;;  %v9128_v9 = vld [vmem:[%s10516_s17 + $0x568] sm:$0xff]  ;;  %v9118_v25 = vld [vmem:[%s10516_s17 + $0x518] sm:$0xff] }
 0x2e9   : > { %7319 = vmatpush.bf16.msra.mxu2 %v9106_v18  ;;  %7285 = vmatmul.bf16.vlgmr.msrb.gmra.mxu3 %v7831_v26  ;;  %v9143_v18 = vld [vmem:[%s10516_s17 + $0x5e0] sm:$0xff]  ;;  %v9134_v26 = vld [vmem:[%s10516_s17 + $0x598] sm:$0xff] }
 0x2ea   : > { %7333 = vmatpush.bf16.msra.mxu3 %v9114_v20 }
 0x2eb   : > { %7292 = vmatpush.bf16.msra.mxu0 %v9089_v27  ;;  %v9142_v27 = vld [vmem:[%s10516_s17 + $0x5d8] sm:$0xff] }
 0x2ec   : > { %7306 = vmatpush.bf16.msra.mxu1 %v9097_v29 }
 0x2ed   : > { %7320 = vmatpush.bf16.msra.mxu2 %v9105_v22 }
 0x2ee   : > { %7334 = vmatpush.bf16.msra.mxu3 %v9113_v30 }
 0x2ef   : > { %7293 = vmatpush.bf16.msra.mxu0 %v9088_v31  ;;  %v9117_v31 = vld [vmem:[%s10516_s17 + $0x510] sm:$0xff] }
 0x2f0   : > { %7307 = vmatpush.bf16.msra.mxu1 %v9096_v32  ;;  %v9125_v32 = vld [vmem:[%s10516_s17 + $0x550] sm:$0xff] }
 0x2f1   : > { %7321 = vmatpush.bf16.msra.mxu2 %v9104_v28 }
 0x2f2   : > { %7335 = vmatpush.bf16.msra.mxu3 %v9112_v33  ;;  %v9133_v33 = vld [vmem:[%s10516_s17 + $0x590] sm:$0xff] }
 0x2f3   : > { %7294 = vmatpush.bf16.msra.mxu0 %v9087_v50  ;;  %v9141_v50 = vld [vmem:[%s10516_s17 + $0x5d0] sm:$0xff] }
 0x2f4   : > { %7308 = vmatpush.bf16.msra.mxu1 %v9095_v54  ;;  %v9116_v54 = vld [vmem:[%s10516_s17 + $0x508] sm:$0xff] }
 0x2f5   : > { %7322 = vmatpush.bf16.msra.mxu2 %v9103_v19  ;;  %v9124_v19 = vld [vmem:[%s10516_s17 + $0x548] sm:$0xff] }
 0x2f6   : > { %7336 = vmatpush.bf16.msra.mxu3 %v9111_v34  ;;  %v9132_v34 = vld [vmem:[%s10516_s17 + $0x588] sm:$0xff] }
 0x2f7   : > { %7295 = vmatpush.bf16.msra.mxu0 %v9086_v36  ;;  %v9140_v36 = vld [vmem:[%s10516_s17 + $0x5c8] sm:$0xff] }
 0x2f8   : > { %7309 = vmatpush.bf16.msra.mxu1 %v9094_v37  ;;  %v9115_v37 = vld [vmem:[%s10516_s17 + $0x500] sm:$0xff] }
 0x2f9   : > { %7323 = vmatpush.bf16.msra.mxu2 %v9102_v38  ;;  %v9123_v38 = vld [vmem:[%s10516_s17 + $0x540] sm:$0xff] }
 0x2fa   : > { %7337 = vmatpush.bf16.msra.mxu3 %v9110_v63  ;;  %v9131_v63 = vld [vmem:[%s10516_s17 + $0x580] sm:$0xff] }
 0x2fb   : > { %7296 = vmatpush.bf16.msra.mxu0 %v9085_v7  ;;  %v9139_v7 = vld [vmem:[%s10516_s17 + $0x5c0] sm:$0xff] }
 0x2fc   : > { %7310 = vmatpush.bf16.msra.mxu1 %v9093_v39  ;;  %v9154_v39 = vld [vmem:[%s10516_s17 + $0x638] sm:$0xff] }
 0x2fd   : > { %7324 = vmatpush.bf16.msra.mxu2 %v9101_v40  ;;  %v9162_v40 = vld [vmem:[%s10516_s17 + $0x678] sm:$0xff] }
 0x2fe   : > { %7338 = vmatpush.bf16.msra.mxu3 %v9109_v41  ;;  %v7850_v41 = vld [vmem:[#allocation2 + $0x50] sm:$0xf] }
 0x2ff   : > { %7297 = vmatpush.bf16.msra.mxu0 %v9084_v42  ;;  %v8949_v42 = vld [vmem:[#allocation2 + $0xcc] sm:$0xf0] }
 0x300   : > { %7311 = vmatpush.bf16.msra.mxu1 %v9092_v43  ;;  %v7858_v43 = vld [vmem:[#allocation2 + $0x58] sm:$0xf] }
 0x301   : > { %7325 = vmatpush.bf16.msra.mxu2 %v9100_v44  ;;  %v8950_v44 = vld [vmem:[#allocation2 + $0xd4] sm:$0xf0] }
 0x302   : > { %7339 = vmatpush.bf16.msra.mxu3 %v9108_v24  ;;  %v8933_v24 = vld [vmem:[#allocation2 + $0x54] sm:$0xf]  ;;  %v7859_v49 = vor.u32 %v8950_v44, %v7858_v43  ;;  %v9200_v43 = vld [vmem:[%s10516_s17 + $0x7a8] sm:$0xff] }
 0x303   : > { %7298 = vmatpush.bf16.msra.mxu0 %v9083_v23  ;;  %v7076_v12 = vpop.f32.mrf.mxu0  ;;  %v7852_v23 = vld [vmem:[#allocation2 + $0xd0] sm:$0xf0]  ;;  %v9208_v44 = vld [vmem:[%s10516_s17 + $0x7e8] sm:$0xff] }
 0x304   : > { %7312 = vmatpush.bf16.msra.mxu1 %v9091_v35  ;;  %v7077_v15 = vadd.f32 %v10891_v6, %v7076_v12  ;;  %v7090_v20 = vpop.f32.mrf.mxu1  ;;  %v8934_v35 = vld [vmem:[#allocation2 + $0x5c] sm:$0xf]  ;;  %v7855_v51 = vor.u32 %v8933_v24, %v7852_v23  ;;  %v9173_v12 = vld [vmem:[%s10516_s17 + $0x6d0] sm:$0xff]  ;;  %v9363_v24 = vmov 0   ;;  %v9183_v23 = vld [vmem:[%s10516_s17 + $0x720] sm:$0xff] }
 0x305   : > { %7326 = vmatpush.bf16.msra.mxu2 %v9099_v45  ;;  %v7860_v45 = vld [vmem:[#allocation2 + $0xd8] sm:$0xf0]  ;;  %9287 = vset.pattern.permute.xlu0 %v9363_v24  ;;  %7590 = vst [vmem:[%s10518_s15 + $0x8] sm:$0x1] %v9363_v24 }
 0x306   : > { %7340 = vmatpush.bf16.msra.mxu3 %v9107_v46  ;;  %7299 = vmatmul.bf16.vlgmr.msra.gmra.mxu0 %v7835_v60  ;;  %v7091_v21 = vadd.f32 %v7090_v20, %v7077_v15  ;;  %v9170_v46 = vld [vmem:[%s10516_s17 + $0x6b8] sm:$0xff]  ;;  %v7863_v52 = vor.u32 %v8934_v35, %v7860_v45  ;;  %v9176_v60 = vld [vmem:[%s10516_s17 + $0x6e8] sm:$0xff]  ;;  %v9155_v20 = vld [vmem:[%s10516_s17 + $0x640] sm:$0xff] }
 0x307   : > { %7347 = vmatpush.bf16.msrb.mxu0 %v9122_v47  ;;  %7313 = vmatmul.bf16.vlgmr.msra.gmra.mxu1 %v7839_v62  ;;  %v9178_v47 = vld [vmem:[%s10516_s17 + $0x6f8] sm:$0xff]  ;;  %v9159_v62 = vld [vmem:[%s10516_s17 + $0x660] sm:$0xff]  ;;  %v9164_v15 = vld [vmem:[%s10516_s17 + $0x688] sm:$0xff] }
 0x308   : > { %7361 = vmatpush.bf16.msrb.mxu1 %v9130_v48  ;;  %7327 = vmatmul.bf16.vlgmr.msra.gmra.mxu2 %v7843_v61  ;;  %v7851_v48 = vor.u32 %v8949_v42, %v7850_v41  ;;  %v9151_v61 = vld [vmem:[%s10516_s17 + $0x620] sm:$0xff]  ;;  %v9184_v41 = vld [vmem:[%s10516_s17 + $0x728] sm:$0xff] }
 0x309   : > { %7375 = vmatpush.bf16.msrb.mxu2 %v9138_v58  ;;  %7341 = vmatmul.bf16.vlgmr.msra.gmra.mxu3 %v7847_v0  ;;  %v9160_v58 = vld [vmem:[%s10516_s17 + $0x668] sm:$0xff]  ;;  %v9167_v0 = vld [vmem:[%s10516_s17 + $0x6a0] sm:$0xff] }
 0x30a   : > { %7389 = vmatpush.bf16.msrb.mxu3 %v9146_v59  ;;  %v9168_v59 = vld [vmem:[%s10516_s17 + $0x6a8] sm:$0xff]  ;;  %v9191_v35 = vld [vmem:[%s10516_s17 + $0x760] sm:$0xff] }
 0x30b   : > { %7348 = vmatpush.bf16.msrb.mxu0 %v9121_v1  ;;  %v7104_v29 = vpop.f32.mrf.mxu2  ;;  %v9175_v1 = vld [vmem:[%s10516_s17 + $0x6e0] sm:$0xff]  ;;  %v9192_v42 = vld [vmem:[%s10516_s17 + $0x768] sm:$0xff] }
 0x30c   : > { %7362 = vmatpush.bf16.msrb.mxu1 %v9129_v2  ;;  %v7105_v22 = vadd.f32 %v7104_v29, %v7091_v21  ;;  %v7118_v30 = vpop.f32.mrf.mxu3  ;;  %v9150_v2 = vld [vmem:[%s10516_s17 + $0x618] sm:$0xff]  ;;  %v9163_v21 = vld [vmem:[%s10516_s17 + $0x680] sm:$0xff]  ;;  %v7516_v45 = vld [vmem:[%s11040_s3 + $0x8] sm:$0x7f] }
 0x30d   : > { %7376 = vmatpush.bf16.msrb.mxu2 %v9137_v4  ;;  %v9158_v4 = vld [vmem:[%s10516_s17 + $0x658] sm:$0xff]  ;;  %v8951_v29 = vld [vmem:[#allocation2 + $0xdc] sm:$0xf0]  ;;  %vm7518_vm7 = vcmp.gt.f32.partialorder %v7516_v45, 0.0 }
 0x30e   : > { %7390 = vmatpush.bf16.msrb.mxu3 %v9145_v16  ;;  %v10906_v28 = vadd.f32 %v7118_v30, %v7105_v22  ;;  %v9166_v16 = vld [vmem:[%s10516_s17 + $0x698] sm:$0xff]  ;;  %v7874_v22 = vld [vmem:[#allocation2 + $0x68] sm:$0xf] }
 0x30f   : > { %7349 = vmatpush.bf16.msrb.mxu0 %v9120_v8  ;;  %v9174_v8 = vld [vmem:[%s10516_s17 + $0x6d8] sm:$0xff]  ;;  %v8952_v30 = vld [vmem:[#allocation2 + $0xe4] sm:$0xf0] }
 0x310   : > { %7363 = vmatpush.bf16.msrb.mxu1 %v9128_v9  ;;  %v9149_v9 = vld [vmem:[%s10516_s17 + $0x610] sm:$0xff] }
 0x311   : > { %7377 = vmatpush.bf16.msrb.mxu2 %v9136_v3  ;;  %v9157_v3 = vld [vmem:[%s10516_s17 + $0x650] sm:$0xff] }
 0x312   : > { %7391 = vmatpush.bf16.msrb.mxu3 %v9144_v11  ;;  %v9165_v11 = vld [vmem:[%s10516_s17 + $0x690] sm:$0xff] }
 0x313   : > { %7350 = vmatpush.bf16.msrb.mxu0 %v9119_v13  ;;  %v9148_v13 = vld [vmem:[%s10516_s17 + $0x608] sm:$0xff] }
 0x314   : > { %7364 = vmatpush.bf16.msrb.mxu1 %v9127_v14  ;;  %v9156_v14 = vld [vmem:[%s10516_s17 + $0x648] sm:$0xff] }
 0x315   : > { %7378 = vmatpush.bf16.msrb.mxu2 %v9135_v17  ;;  %v9172_v17 = vld [vmem:[%s10516_s17 + $0x6c8] sm:$0xff] }
 0x316   : > { %7392 = vmatpush.bf16.msrb.mxu3 %v9143_v18  ;;  %v9147_v18 = vld [vmem:[%s10516_s17 + $0x600] sm:$0xff] }
 0x317   : > { %7351 = vmatpush.bf16.msrb.mxu0 %v9118_v25  ;;  %v9171_v25 = vld [vmem:[%s10516_s17 + $0x6c0] sm:$0xff] }
 0x318   : > { %7365 = vmatpush.bf16.msrb.mxu1 %v9126_v5  ;;  %v9186_v5 = vld [vmem:[%s10516_s17 + $0x738] sm:$0xff] }
 0x319   : > { %7379 = vmatpush.bf16.msrb.mxu2 %v9134_v26  ;;  %v9194_v26 = vld [vmem:[%s10516_s17 + $0x778] sm:$0xff] }
 0x31a   : > { %7393 = vmatpush.bf16.msrb.mxu3 %v9142_v27  ;;  %v7866_v27 = vld [vmem:[#allocation2 + $0x60] sm:$0xf] }
 0x31b   : > { %7352 = vmatpush.bf16.msrb.mxu0 %v9117_v31  ;;  %v8935_v31 = vld [vmem:[#allocation2 + $0x64] sm:$0xf] }
 0x31c   : > { %7366 = vmatpush.bf16.msrb.mxu1 %v9125_v32  ;;  %v7868_v32 = vld [vmem:[#allocation2 + $0xe0] sm:$0xf0] }
 0x31d   : > { %7380 = vmatpush.bf16.msrb.mxu2 %v9133_v33  ;;  %v8936_v33 = vld [vmem:[#allocation2 + $0x6c] sm:$0xf] }
 0x31e   : > { %7394 = vmatpush.bf16.msrb.mxu3 %v9141_v50  ;;  %v7876_v50 = vld [vmem:[#allocation2 + $0xe8] sm:$0xf0] }
 0x31f   : > { %7353 = vmatpush.bf16.msrb.mxu0 %v9116_v54  ;;  %v9202_v54 = vld [vmem:[%s10516_s17 + $0x7b8] sm:$0xff] }
 0x320   : > { %7367 = vmatpush.bf16.msrb.mxu1 %v9124_v19  ;;  %v9210_v19 = vld [vmem:[%s10516_s17 + $0x7f8] sm:$0xff] }
 0x321   : > { %7381 = vmatpush.bf16.msrb.mxu2 %v9132_v34  ;;  %v7867_v34 = vor.u32 %v8951_v29, %v7866_v27  ;;  %v7120_v27 = vpop.f32.mrf.mxu3 }
 0x322   : > { %7395 = vmatpush.bf16.msrb.mxu3 %v9140_v36  ;;  %v7875_v36 = vor.u32 %v8952_v30, %v7874_v22 }
 0x323   : > { %7354 = vmatpush.bf16.msrb.mxu0 %v9115_v37  ;;  %v7871_v37 = vor.u32 %v8935_v31, %v7868_v32 }
 0x324   : > { %7368 = vmatpush.bf16.msrb.mxu1 %v9123_v38  ;;  %v7879_v38 = vor.u32 %v8936_v33, %v7876_v50 }
 0x325   : > { %7382 = vmatpush.bf16.msrb.mxu2 %v9131_v63  ;;  %v9185_v63 = vld [vmem:[%s10516_s17 + $0x730] sm:$0xff] }
 0x326   : > { %7396 = vmatpush.bf16.msrb.mxu3 %v9139_v7  ;;  %7355 = vmatmul.bf16.vlgmr.msrb.gmra.mxu0 %v7851_v48  ;;  %v9193_v7 = vld [vmem:[%s10516_s17 + $0x770] sm:$0xff]  ;;  %v7520_v48 = vsel %vm7518_vm7, 1, %v9363_v24 }
 0x327   : > { %7403 = vmatpush.bf16.msra.mxu0 %v9154_v39  ;;  %7369 = vmatmul.bf16.vlgmr.msrb.gmra.mxu1 %v7855_v51  ;;  %v9201_v39 = vld [vmem:[%s10516_s17 + $0x7b0] sm:$0xff]  ;;  %v9190_v51 = vld [vmem:[%s10516_s17 + $0x758] sm:$0xff] }
 0x328   : > { %7417 = vmatpush.bf16.msra.mxu1 %v9162_v40  ;;  %7383 = vmatmul.bf16.vlgmr.msrb.gmra.mxu2 %v7859_v49  ;;  %v9209_v40 = vld [vmem:[%s10516_s17 + $0x7f0] sm:$0xff]  ;;  %v9182_v49 = vld [vmem:[%s10516_s17 + $0x718] sm:$0xff] }
 0x329   : > { %7431 = vmatpush.bf16.msra.mxu2 %v9170_v46  ;;  %7397 = vmatmul.bf16.vlgmr.msrb.gmra.mxu3 %v7863_v52  ;;  %v9199_v46 = vld [vmem:[%s10516_s17 + $0x7a0] sm:$0xff]  ;;  %v9198_v52 = vld [vmem:[%s10516_s17 + $0x798] sm:$0xff] }
 0x32a   : > { %7445 = vmatpush.bf16.msra.mxu3 %v9178_v47  ;;  %v9207_v47 = vld [vmem:[%s10516_s17 + $0x7e0] sm:$0xff]  ;;  %7525 = vperm.xlu0 %9287, %v7520_v48  }
 0x32b   : > { %7404 = vmatpush.bf16.msra.mxu0 %v9153_v53  ;;  %v9206_v53 = vld [vmem:[%s10516_s17 + $0x7d8] sm:$0xff] }
 0x32c   : > { %7418 = vmatpush.bf16.msra.mxu1 %v9161_v55  ;;  %v9181_v55 = vld [vmem:[%s10516_s17 + $0x710] sm:$0xff]  ;;  %v7174_v31 = vpop.f32.mrf.mxu3 }
 0x32d   : > { %7432 = vmatpush.bf16.msra.mxu2 %v9169_v56  ;;  %v9189_v56 = vld [vmem:[%s10516_s17 + $0x750] sm:$0xff] }
 0x32e   : > { %7446 = vmatpush.bf16.msra.mxu3 %v9177_v57  ;;  %v7515_v57 = vld [vmem:[%s11040_s3] sm:$0xff] }
 0x32f   : > { %7405 = vmatpush.bf16.msra.mxu0 %v9152_v10  ;;  %v9197_v10 = vld [vmem:[%s10516_s17 + $0x790] sm:$0xff]  ;;  %vm7517_vm10 = vcmp.gt.f32.partialorder %v7515_v57, 0.0 }
 0x330   : > { %7419 = vmatpush.bf16.msra.mxu1 %v9160_v58  ;;  %v9205_v58 = vld [vmem:[%s10516_s17 + $0x7d0] sm:$0xff] }
 0x331   : > { %7433 = vmatpush.bf16.msra.mxu2 %v9168_v59  ;;  %v7519_v59 = vsel %vm7517_vm10, 1, %v9363_v24 }
 0x332   : > { %7447 = vmatpush.bf16.msra.mxu3 %v9176_v60  ;;  %7522 = vperm.xlu0 %9287, %v7519_v59   ;;  %v9180_v60 = vld [vmem:[%s10516_s17 + $0x708] sm:$0xff] }
 0x333   : > { %7406 = vmatpush.bf16.msra.mxu0 %v9151_v61  ;;  %v9188_v61 = vld [vmem:[%s10516_s17 + $0x748] sm:$0xff] }
 0x334   : > { %7420 = vmatpush.bf16.msra.mxu1 %v9159_v62  ;;  %v9196_v62 = vld [vmem:[%s10516_s17 + $0x788] sm:$0xff] }
 0x335   : > { %7434 = vmatpush.bf16.msra.mxu2 %v9167_v0  ;;  %v9204_v0 = vld [vmem:[%s10516_s17 + $0x7c8] sm:$0xff] }
 0x336   : > { %7448 = vmatpush.bf16.msra.mxu3 %v9175_v1  ;;  %v9179_v1 = vld [vmem:[%s10516_s17 + $0x700] sm:$0xff] }
 0x337   : > { %7407 = vmatpush.bf16.msra.mxu0 %v9150_v2  ;;  %v9187_v2 = vld [vmem:[%s10516_s17 + $0x740] sm:$0xff] }
 0x338   : > { %7421 = vmatpush.bf16.msra.mxu1 %v9158_v4  ;;  %v9195_v4 = vld [vmem:[%s10516_s17 + $0x780] sm:$0xff] }
 0x339   : > { %7435 = vmatpush.bf16.msra.mxu2 %v9166_v16  ;;  %v9203_v16 = vld [vmem:[%s10516_s17 + $0x7c0] sm:$0xff] }
 0x33a   : > { %7449 = vmatpush.bf16.msra.mxu3 %v9174_v8  ;;  %v7882_v8 = vld [vmem:[#allocation2 + $0x70] sm:$0xf] }
 0x33b   : > { %7408 = vmatpush.bf16.msra.mxu0 %v9149_v9  ;;  %v8953_v9 = vld [vmem:[#allocation2 + $0xec] sm:$0xf0] }
 0x33c   : > { %7422 = vmatpush.bf16.msra.mxu1 %v9157_v3  ;;  %v8937_v3 = vld [vmem:[#allocation2 + $0x74] sm:$0xf] }
 0x33d   : > { %7436 = vmatpush.bf16.msra.mxu2 %v9165_v11  ;;  %v7884_v11 = vld [vmem:[#allocation2 + $0xf0] sm:$0xf0] }
 0x33e   : > { %7450 = vmatpush.bf16.msra.mxu3 %v9173_v12  ;;  %v7890_v12 = vld [vmem:[#allocation2 + $0x78] sm:$0xf] }
 0x33f   : > { %7409 = vmatpush.bf16.msra.mxu0 %v9148_v13  ;;  %v8954_v13 = vld [vmem:[#allocation2 + $0xf4] sm:$0xf0] }
 0x340   : > { %7423 = vmatpush.bf16.msra.mxu1 %v9156_v14  ;;  %v8938_v14 = vld [vmem:[#allocation2 + $0x7c] sm:$0xf] }
 0x341   : > { %7437 = vmatpush.bf16.msra.mxu2 %v9164_v15  ;;  %v7892_v15 = vld [vmem:[#allocation2 + $0xf8] sm:$0xf0] }
 0x342   : > { %7451 = vmatpush.bf16.msra.mxu3 %v9172_v17  ;;  %v7883_v17 = vor.u32 %v8953_v9, %v7882_v8 }
 0x343   : > { %7410 = vmatpush.bf16.msra.mxu0 %v9147_v18  ;;  %v7887_v18 = vor.u32 %v8937_v3, %v7884_v11 }
 0x344   : > { %7424 = vmatpush.bf16.msra.mxu1 %v9155_v20  ;;  %v7891_v20 = vor.u32 %v8954_v13, %v7890_v12 }
 0x345   : > { %7438 = vmatpush.bf16.msra.mxu2 %v9163_v21  ;;  %v7895_v21 = vor.u32 %v8938_v14, %v7892_v15 }
 0x346   : > { %7452 = vmatpush.bf16.msra.mxu3 %v9171_v25  ;;  %7411 = vmatmul.bf16.vlgmr.msra.gmra.mxu0 %v7867_v34  ;;  %v7078_v25 = vpop.f32.mrf.mxu0 }
 0x347   : > { %7459 = vmatpush.bf16.msrb.mxu0 %v9186_v5  ;;  %7425 = vmatmul.bf16.vlgmr.msra.gmra.mxu1 %v7871_v37  ;;  %v7092_v5 = vpop.f32.mrf.mxu1 }
 0x348   : > { %7473 = vmatpush.bf16.msrb.mxu1 %v9194_v26  ;;  %7439 = vmatmul.bf16.vlgmr.msra.gmra.mxu2 %v7875_v36  ;;  %v7106_v26 = vpop.f32.mrf.mxu2 }
 0x349   : > { %7487 = vmatpush.bf16.msrb.mxu2 %v9202_v54  ;;  %7453 = vmatmul.bf16.vlgmr.msra.gmra.mxu3 %v7879_v38  ;;  %v7176_v54 = vpop.f32.mrf.mxu3 }
 0x34a   : > { %7501 = vmatpush.bf16.msrb.mxu3 %v9210_v19 }
 0x34b   : > { %7460 = vmatpush.bf16.msrb.mxu0 %v9185_v63  ;;  %v7079_v63 = vadd.f32 %v10891_v6, %v7078_v25 }
 0x34c   : > { %7474 = vmatpush.bf16.msrb.mxu1 %v9193_v7 }
 0x34d   : > { %7488 = vmatpush.bf16.msrb.mxu2 %v9201_v39  ;;  %v7093_v39 = vadd.f32 %v7092_v5, %v7079_v63 }
 0x34e   : > { %7502 = vmatpush.bf16.msrb.mxu3 %v9209_v40  ;;  %v7132_v29 = vpop.f32.mrf.mxu0 }
 0x34f   : > { %7461 = vmatpush.bf16.msrb.mxu0 %v9184_v41  ;;  %v7146_v22 = vpop.f32.mrf.mxu1  ;;  %v7133_v24 = vadd.f32 %v7132_v29, %v10906_v28 }
 0x350   : > { %7475 = vmatpush.bf16.msrb.mxu1 %v9192_v42  ;;  %v7160_v30 = vpop.f32.mrf.mxu2 }
 0x351   : > { %7489 = vmatpush.bf16.msrb.mxu2 %v9200_v43  ;;  %v7230_v37 = vpop.f32.mrf.mxu3  ;;  %v7107_v43 = vadd.f32 %v7106_v26, %v7093_v39 }
 0x352   : > { %7503 = vmatpush.bf16.msrb.mxu3 %v9208_v44 }
 0x353   : > { %7462 = vmatpush.bf16.msrb.mxu0 %v9183_v23  ;;  %v7121_v23 = vadd.f32 %v7120_v27, %v7107_v43 }
 0x354   : > { %7476 = vmatpush.bf16.msrb.mxu1 %v9191_v35 }
 0x355   : > { %7490 = vmatpush.bf16.msrb.mxu2 %v9199_v46  ;;  %v7147_v46 = vadd.f32 %v7146_v22, %v7133_v24 }
 0x356   : > { %7504 = vmatpush.bf16.msrb.mxu3 %v9207_v47  ;;  %v7134_v32 = vpop.f32.mrf.mxu0 }
 0x357   : > { %7463 = vmatpush.bf16.msrb.mxu0 %v9182_v49  ;;  %v7148_v33 = vpop.f32.mrf.mxu1  ;;  %v7135_v47 = vadd.f32 %v7134_v32, %v7121_v23  ;;  %v7161_v49 = vadd.f32 %v7160_v30, %v7147_v46 }
 0x358   : > { %7477 = vmatpush.bf16.msrb.mxu1 %v9190_v51  ;;  %v7162_v50 = vpop.f32.mrf.mxu2 }
 0x359   : > { %7491 = vmatpush.bf16.msrb.mxu2 %v9198_v52  ;;  %v7232_v41 = vpop.f32.mrf.mxu3  ;;  %v7149_v52 = vadd.f32 %v7148_v33, %v7135_v47  ;;  %v7175_v6 = vadd.f32 %v7174_v31, %v7161_v49 }
 0x35a   : > { %7505 = vmatpush.bf16.msrb.mxu3 %v9206_v53 }
 0x35b   : > { %7464 = vmatpush.bf16.msrb.mxu0 %v9181_v55  ;;  %v7163_v53 = vadd.f32 %v7162_v50, %v7149_v52 }
 0x35c   : > { %7478 = vmatpush.bf16.msrb.mxu1 %v9189_v56 }
 0x35d   : > { %7492 = vmatpush.bf16.msrb.mxu2 %v9197_v10 }
 0x35e   : > { %7506 = vmatpush.bf16.msrb.mxu3 %v9205_v58  ;;  %v7188_v19 = vpop.f32.mrf.mxu0  ;;  %v7177_v58 = vadd.f32 %v7176_v54, %v7163_v53 }
 0x35f   : > { %7465 = vmatpush.bf16.msrb.mxu0 %v9180_v60  ;;  %v7202_v34 = vpop.f32.mrf.mxu1  ;;  %v7189_v10 = vadd.f32 %v7188_v19, %v7175_v6 }
 0x360   : > { %7479 = vmatpush.bf16.msrb.mxu1 %v9188_v61  ;;  %v7216_v36 = vpop.f32.mrf.mxu2 }
 0x361   : > { %7493 = vmatpush.bf16.msrb.mxu2 %v9196_v62  ;;  %v7203_v61 = vadd.f32 %v7202_v34, %v7189_v10 }
 0x362   : > { %7507 = vmatpush.bf16.msrb.mxu3 %v9204_v0 }
 0x363   : > { %7466 = vmatpush.bf16.msrb.mxu0 %v9179_v1  ;;  %v7217_v28 = vadd.f32 %v7216_v36, %v7203_v61 }
 0x364   : > { %7480 = vmatpush.bf16.msrb.mxu1 %v9187_v2 }
 0x365   : > { %7494 = vmatpush.bf16.msrb.mxu2 %v9195_v4 }
 0x366   : > { %7508 = vmatpush.bf16.msrb.mxu3 %v9203_v16  ;;  %7467 = vmatmul.bf16.vlgmr.msrb.gmra.mxu0 %v7883_v17  ;;  %v7190_v38 = vpop.f32.mrf.mxu0  ;;  %v7231_v16 = vadd.f32 %v7230_v37, %v7217_v28 }
 0x367   : > { %7481 = vmatmul.bf16.vlgmr.msrb.gmra.mxu1 %v7887_v18  ;;  %v7204_v7 = vpop.f32.mrf.mxu1  ;;  %v7191_v60 = vadd.f32 %v7190_v38, %v7177_v58 }
 0x368   : > { %7495 = vmatmul.bf16.vlgmr.msrb.gmra.mxu2 %v7891_v20  ;;  %v7218_v40 = vpop.f32.mrf.mxu2 }
 0x369   : > { %7509 = vmatmul.bf16.vlgmr.msrb.gmra.mxu3 %v7895_v21  ;;  %v7205_v1 = vadd.f32 %v7204_v7, %v7191_v60 }
 0x36b   : > { %v7219_v2 = vadd.f32 %v7218_v40, %v7205_v1 }
 0x36c   : > { %v7286_v45 = vpop.f32.mrf.mxu3 }
 0x36d   : > { %v7233_v3 = vadd.f32 %v7232_v41, %v7219_v2 }
 0x36e   : > { %v7244_v42 = vpop.f32.mrf.mxu0 }
 0x36f   : > { %v7258_v44 = vpop.f32.mrf.mxu1  ;;  %v7245_v8 = vadd.f32 %v7244_v42, %v7231_v16 }
 0x370   : > { %v7272_v35 = vpop.f32.mrf.mxu2 }
 0x371   : > { %v7259_v12 = vadd.f32 %v7258_v44, %v7245_v8 }
 0x373   : > { %v7273_v17 = vadd.f32 %v7272_v35, %v7259_v12 }
 0x374   : > { %v7288_v56 = vpop.f32.mrf.mxu3 }
 0x375   : > { %v7287_v25 = vadd.f32 %v7286_v45, %v7273_v17 }
 0x376   : > { %v7246_v48 = vpop.f32.mrf.mxu0 }
 0x377   : > { %v7260_v51 = vpop.f32.mrf.mxu1  ;;  %v7247_v11 = vadd.f32 %v7246_v48, %v7233_v3 }
 0x378   : > { %v7274_v55 = vpop.f32.mrf.mxu2 }
 0x379   : > { %v7261_v18 = vadd.f32 %v7260_v51, %v7247_v11 }
 0x37b   : > { %v7275_v21 = vadd.f32 %v7274_v55, %v7261_v18 }
 0x37d   : > { %v7289_v29 = vadd.f32 %v7288_v56, %v7275_v21 }
 0x383   : > { %v7300_v57 = vpop.f32.mrf.mxu0 }
 0x384   : > { %v7314_v59 = vpop.f32.mrf.mxu1  ;;  %v7301_v5 = vadd.f32 %v7300_v57, %v7287_v25 }
 0x386   : > { %v7315_v31 = vadd.f32 %v7314_v59, %v7301_v5 }
 0x38b   : > { %v7328_v62 = vpop.f32.mrf.mxu2  ;;  %v7302_v4 = vpop.f32.mrf.mxu0 }
 0x38c   : > { %v7342_v0 = vpop.f32.mrf.mxu3  ;;  %v7316_v9 = vpop.f32.mrf.mxu1  ;;  %v7303_v22 = vadd.f32 %v7302_v4, %v7289_v29  ;;  %v7329_v32 = vadd.f32 %v7328_v62, %v7315_v31 }
 0x38e   : > { %v7317_v50 = vadd.f32 %v7316_v9, %v7303_v22  ;;  %v7343_v19 = vadd.f32 %v7342_v0, %v7329_v32 }
 0x393   : > { %v7330_v13 = vpop.f32.mrf.mxu2 }
 0x394   : > { %v7344_v14 = vpop.f32.mrf.mxu3  ;;  %v7331_v54 = vadd.f32 %v7330_v13, %v7317_v50 }
 0x396   : > { %v7345_v63 = vadd.f32 %v7344_v14, %v7331_v54 }
 0x39c   : > { %v7526_v58 = vpop.permute.xlu0 %7525 }
 0x39d   : > { %vm7528_vm15 = vcmp.eq.s32.totalorder %v7526_v58, 1 }
 0x3a3   : > { %v7356_v15 = vpop.f32.mrf.mxu0 }
 0x3a4   : > { %v7370_v20 = vpop.f32.mrf.mxu1  ;;  %v7357_v38 = vadd.f32 %v7356_v15, %v7343_v19  ;;  %v7523_v8 = vpop.permute.xlu0 %7522 }
 0x3a5   : > { %vm7527_vm13 = vcmp.eq.s32.totalorder %v7523_v8, 1 }
 0x3a6   : > { %v7371_v40 = vadd.f32 %v7370_v20, %v7357_v38 }
 0x3ab   : > { %v7384_v26 = vpop.f32.mrf.mxu2  ;;  %v7358_v30 = vpop.f32.mrf.mxu0 }
 0x3ac   : > { %v7398_v27 = vpop.f32.mrf.mxu3  ;;  %v7372_v33 = vpop.f32.mrf.mxu1  ;;  %v7359_v39 = vadd.f32 %v7358_v30, %v7345_v63  ;;  %v7385_v41 = vadd.f32 %v7384_v26, %v7371_v40 }
 0x3ae   : > { %v7373_v44 = vadd.f32 %v7372_v33, %v7359_v39  ;;  %v7399_v35 = vadd.f32 %v7398_v27, %v7385_v41 }
 0x3b3   : > { %v7386_v34 = vpop.f32.mrf.mxu2 }
 0x3b4   : > { %v7400_v36 = vpop.f32.mrf.mxu3  ;;  %v7387_v24 = vadd.f32 %v7386_v34, %v7373_v44 }
 0x3b6   : > { %v7401_v47 = vadd.f32 %v7400_v36, %v7387_v24 }
 0x3c3   : > { %v7412_v37 = vpop.f32.mrf.mxu0 }
 0x3c4   : > { %v7426_v7 = vpop.f32.mrf.mxu1  ;;  %v7413_v45 = vadd.f32 %v7412_v37, %v7399_v35 }
 0x3c6   : > { %v7427_v49 = vadd.f32 %v7426_v7, %v7413_v45 }
 0x3cb   : > { %v7440_v42 = vpop.f32.mrf.mxu2  ;;  %v7414_v23 = vpop.f32.mrf.mxu0 }
 0x3cc   : > { %v7454_v43 = vpop.f32.mrf.mxu3  ;;  %v7428_v46 = vpop.f32.mrf.mxu1  ;;  %v7415_v48 = vadd.f32 %v7414_v23, %v7401_v47  ;;  %v7441_v6 = vadd.f32 %v7440_v42, %v7427_v49 }
 0x3ce   : > { %v7429_v55 = vadd.f32 %v7428_v46, %v7415_v48  ;;  %v7455_v10 = vadd.f32 %v7454_v43, %v7441_v6 }
 0x3d3   : > { %v7442_v51 = vpop.f32.mrf.mxu2 }
 0x3d4   : > { %v7456_v52 = vpop.f32.mrf.mxu3  ;;  %v7443_v57 = vadd.f32 %v7442_v51, %v7429_v55 }
 0x3d6   : > { %v7457_v28 = vadd.f32 %v7456_v52, %v7443_v57  ;;  %v7581_v52 = vld [vmem:[%s10518_s15 + $0x4] sm:$0xf] }
 0x3e3   : > { %v7468_v53 = vpop.f32.mrf.mxu0 }
 0x3e4   : > { %v7482_v56 = vpop.f32.mrf.mxu1  ;;  %v7469_v59 = vadd.f32 %v7468_v53, %v7455_v10 }
 0x3e6   : > { %v7483_v1 = vadd.f32 %v7482_v56, %v7469_v59  ;;  %v7622_v59 = vld [vmem:[%s10518_s15 + $0x8] sm:$0xf] (%p9456_p9) }
 0x3e7   : > { %7623 = vst [vmem:[%s7601_s14 + $0x20] sm:$0xf] (%p9456_p9), %v7622_v59 }
 0x3eb   : > { %v7496_v60 = vpop.f32.mrf.mxu2  ;;  %v7470_v62 = vpop.f32.mrf.mxu0 }
 0x3ec   : > { %v7510_v61 = vpop.f32.mrf.mxu3  ;;  %v7471_v0 = vadd.f32 %v7470_v62, %v7457_v28  ;;  %v7497_v2 = vadd.f32 %v7496_v60, %v7483_v1  ;;  %v7484_v4 = vpop.f32.mrf.mxu1 }
 0x3ee   : > { %v7485_v16 = vadd.f32 %v7484_v4, %v7471_v0  ;;  %v7511_v11 = vadd.f32 %v7510_v61, %v7497_v2 }
 0x3f0   : > { %v7529_v15 = vsel %vm7527_vm13, %v7511_v11, 0.0 }
 0x3f3   : > { %v7498_v9 = vpop.f32.mrf.mxu2 }
 0x3f4   : > { %v7499_v3 = vadd.f32 %v7498_v9, %v7485_v16  ;;  %v7512_v12 = vpop.f32.mrf.mxu3 }
 0x3f6   : > { %v7513_v13 = vadd.f32 %v7512_v12, %v7499_v3 }
 0x3f8   : > { %v7530_v14 = vsel %vm7528_vm15, %v7513_v13, 0.0 }
 0x3f9   : > { %v7532_v17 = vsel %vm7531_vm14, %v7530_v14, 0.0 }
 0x3fa   : > { %v7533_v18 = vadd.f32 %v7532_v17, %v7529_v15 }
 0x3fc   : > { %v7534_v20 = vrot.slane %v7533_v18, 4 }
 0x3fe   : > { %v7535_v21 = vadd.f32 %v7534_v20, %v7533_v18 }
 0x400   : > { %v7536_v25 = vrot.slane %v7535_v21, 2 }
 0x402   : > { %v7537_v5 = vadd.f32 %v7536_v25, %v7535_v21 }
 0x404   : > { %v7538_v26 = vrot.slane %v7537_v5, 1 }
 0x406   : > { %v7539_v27 = vadd.f32 %v7538_v26, %v7537_v5 }
 0x408   : > { %v7540_v29 = vmul.f32 0.11111111, %v7539_v27 }
 0x40a   : > { %v7541_v22 = vsub.f32 %v7511_v11, %v7540_v29  ;;  %v7542_v30 = vsub.f32 %v7513_v13, %v7540_v29 }
 0x40c   : > { %v7543_v31 = vsel %vm7527_vm13, %v7541_v22, 0.0  ;;  %v7544_v32 = vsel %vm7528_vm15, %v7542_v30, 0.0 }
 0x40d   : > { %v7545_v33 = vmul.f32 %v7543_v31, %v7543_v31  ;;  %v7546_v50 = vmul.f32 %v7544_v32, %v7544_v32 }
 0x40f   : > { %v7547_v54 = vsel %vm7531_vm14, %v7546_v50, 0.0 }
 0x410   : > { %v7548_v19 = vadd.f32 %v7547_v54, %v7545_v33 }
 0x412   : > { %v7549_v34 = vrot.slane %v7548_v19, 4 }
 0x414   : > { %v7550_v36 = vadd.f32 %v7549_v34, %v7548_v19 }
 0x416   : > { %v7551_v37 = vrot.slane %v7550_v36, 2 }
 0x418   : > { %v7552_v38 = vadd.f32 %v7551_v37, %v7550_v36 }
 0x41a   : > { %v7553_v63 = vrot.slane %v7552_v38, 1 }
 0x41c   : > { %v7554_v7 = vadd.f32 %v7553_v63, %v7552_v38 }
 0x41e   : > { %v7555_v39 = vmul.f32 0.11111111, %v7554_v7 }
 0x420   : > { %v7556_v40 = vadd.f32 1e-05, %v7555_v39 }
 0x422   : > { %9289 = vrsqrt.f32 %v7556_v40  ;;  %vm7563_vm1 = vweird.f32 %v7556_v40 }
 0x428   : > { %v9290_v41 = vpop.eup %9289 }
 0x429   : > { %v7558_v42 = vmul.f32 %v9290_v41, %v7556_v40  ;;  %vm7564_vm0 = vweird.f32 %v9290_v41 }
 0x42a   : > { %vm7565_vm2 = vmor %vm7563_vm1, %vm7564_vm0 }
 0x42b   : > { %v7559_v43 = vmul.f32 %v9290_v41, %v7558_v42 }
 0x42d   : > { %v7560_v44 = vmul.f32 0.5, %v7559_v43 }
 0x42f   : > { %v7561_v24 = vsub.f32 1.5, %v7560_v44 }
 0x431   : > { %v7562_v23 = vmul.f32 %v9290_v41, %v7561_v24 }
 0x433   : > { %v7566_v35 = vsel %vm7565_vm2, %v9290_v41, %v7562_v23 }
 0x434   : > { %v7567_v45 = vmul.f32 %v7566_v35, %v7541_v22  ;;  %v7568_v46 = vmul.f32 %v7566_v35, %v7542_v30 }
 0x436   : > { %vm7569_vm5 = vcmp.ge.f32.partialorder %v7567_v45, 0.0  ;;  %vm7570_vm6 = vcmp.ge.f32.partialorder %v7568_v46, 0.0  ;;  %v7571_v47 = vmul.f32 0.2, %v7567_v45  ;;  %v7572_v48 = vmul.f32 0.2, %v7568_v46 }
 0x438   : > { %v7573_v49 = vsel %vm7569_vm5, %v7567_v45, %v7571_v47  ;;  %v7574_v51 = vsel %vm7570_vm6, %v7568_v46, %v7572_v48 }
 0x439   : > { %v7575_v53 = vpack.c.bf16 %v7573_v49, %v7573_v49  ;;  %v7576_v6 = vpack.c.bf16 %v7574_v51, %v7574_v51 }
 0x43b   : > { %7577 = vst [vmem:[%s10518_s15] sm:$0xf] %v7575_v53  ;;  %v7582_v55 = vsel %vm7580_vm8, %v7576_v6, %v7581_v52 }
 0x43c   : > { %7583 = vst [vmem:[%s10518_s15 + $0x4] sm:$0xf] %v7582_v55 }
 0x441   : > { %7597 = sbr.rel (!%p9456_p9) target bundleno = 1102 (0x44e), region = 96 }
 0x442   : > { %v7618_v10 = vld [vmem:[%s10518_s15] sm:$0xf] (%p9456_p9) }
 0x443   : > { %v7587_v56 = vld [vmem:[%s10518_s15 + $0x4] sm:$0x8]  ;;  %7619 = vst [vmem:[%s7601_s14] sm:$0xf] (%p9456_p9), %v7618_v10 }
 0x444   : > { %v7588_v57 = vsel %vm7586_vm12, 0, %v7587_v56 }
 0x445   : > { %7589 = vst [vmem:[%s10518_s15 + $0x4] sm:$0x8] %v7588_v57 }
 0x44c   : > { %v7620_v58 = vld [vmem:[%s10518_s15 + $0x4] sm:$0xf] }
 0x44d   : > { %7621 = vst [vmem:[%s7601_s14 + $0x10] sm:$0xf] %v7620_v58 }
 0x44e PF: > { %s14_s23 = sadd.s32 1, %s9361_s23   ;;  %s11061_s15 = smov %s9333_s16 }
 0x44f   : > { %p11_p3 = scmp.ge.s32.totalorder %s14_s23, 10   ;;  %s11062_s16 = smov %s9461_s8 }
 0x450   : > { %s11063_s17 = smov %s9341_s18  ;;  %s11064_s18 = smov %s9450_s30 }
 0x451   : > { %s11065_s19 = smov %s9353_s21  ;;  %s11066_s20 = smov %s9357_s22 }
 0x452   : > { %s11067_s21 = smov %s11070_s25  ;;  %s11068_s22 = smov %s11074_s26 }
 0x453   :  { %13 = sbr.rel (!%p11_p3) target bundleno = 7 (0x7), region = 178 }

</bundles_post_ra>
